<compile_context>
chip_gen: v7x
topology: tpu7x:2x2x1
jax: 0.10.0
libtpu: 0.0.40
codegen_flags: <defaults>
</compile_context>

<pallas_src>
import jax
import jax.numpy as jnp
from jax import lax
from jax.experimental import pallas as pl
from jax.experimental.pallas import tpu as pltpu


def _basic_block_kernel(x_ref, w1_ref, b1_ref, w2_ref, b2_ref, o_ref,
                        xp_ref, mp_ref):
    """Fused BasicBlock (stride=1, no downsample, eval-mode BN).

    x_ref  : (1, H, W, C)   input tile (f32)
    w1_ref : (9*C, C)       conv1 weights, taps packed along K, BN1 scale folded (bf16)
    b1_ref : (1, C)         folded BN1 bias (f32)
    w2_ref : (9*C, C)       conv2 weights, BN2 scale folded (bf16)
    b2_ref : (1, C)         folded BN2 bias (f32)
    o_ref  : (1, H, W, C)   output tile
    xp_ref : (H+2, W+2, C)  VMEM scratch: zero-padded bf16 input
    mp_ref : (H+2, W+2, C)  VMEM scratch: zero-padded bf16 conv1 output
    """
    _, H, W, C = o_ref.shape

    # ---- build the zero-padded bf16 input halo in VMEM (no host jnp.pad) ----
    x = x_ref[0]                                           # (H, W, C) f32
    xp_ref[...] = jnp.zeros_like(xp_ref)
    xp_ref[1:H + 1, 1:W + 1, :] = x.astype(jnp.bfloat16)

    def conv3x3(src_ref, w_ref):
        # Pack the 9 shifted views into one (H*W, 9*C) patch -> single long-K
        # matmul on the MXU (amortizes fill/drain), accumulate in f32.
        patches = [
            src_ref[dy:dy + H, dx:dx + W, :].reshape(H * W, C)
            for dy in range(3) for dx in range(3)
        ]
        p = jnp.concatenate(patches, axis=-1)              # (H*W, 9*C) bf16
        return jnp.dot(p, w_ref[...], preferred_element_type=jnp.float32)

    # ---- conv1 + bn1 + relu  ->  padded VMEM intermediate (stays on-chip) ----
    h1 = jnp.maximum(conv3x3(xp_ref, w1_ref) + b1_ref[...], 0.0)   # (H*W, C) f32
    mp_ref[...] = jnp.zeros_like(mp_ref)
    mp_ref[1:H + 1, 1:W + 1, :] = h1.reshape(H, W, C).astype(jnp.bfloat16)

    # ---- conv2 + bn2 + residual + relu --------------------------------------
    res = x.reshape(H * W, C).astype(jnp.float32)          # residual in f32
    out = jnp.maximum(conv3x3(mp_ref, w2_ref) + b2_ref[...] + res, 0.0)
    o_ref[0] = out.reshape(H, W, C).astype(o_ref.dtype)


def basic_block_nhwc(x, w1p, b1, w2p, b2):
    """x: (N, H, W, C) NHWC f32. w*p: (9*C, C) bf16 packed. b*: (1, C) f32."""
    N, H, W, C = x.shape
    kpack = w1p.shape[0]                                   # 9 * C

    grid_spec = pltpu.PrefetchScalarGridSpec(
        num_scalar_prefetch=0,
        grid=(N,),
        in_specs=[
            pl.BlockSpec((1, H, W, C), lambda n: (n, 0, 0, 0)),
            pl.BlockSpec((kpack, C), lambda n: (0, 0)),
            pl.BlockSpec((1, C), lambda n: (0, 0)),
            pl.BlockSpec((kpack, C), lambda n: (0, 0)),
            pl.BlockSpec((1, C), lambda n: (0, 0)),
        ],
        out_specs=pl.BlockSpec((1, H, W, C), lambda n: (n, 0, 0, 0)),
        scratch_shapes=[
            pltpu.VMEM((H + 2, W + 2, C), jnp.bfloat16),   # padded input
            pltpu.VMEM((H + 2, W + 2, C), jnp.bfloat16),   # padded conv1 out
        ],
    )

    return pl.pallas_call(
        _basic_block_kernel,
        out_shape=jax.ShapeDtypeStruct((N, H, W, C), x.dtype),
        grid_spec=grid_spec,
        compiler_params=pltpu.CompilerParams(
            dimension_semantics=("parallel",)),
    )(x, w1p, b1, w2p, b2)


def fold_bn(gamma, beta, running_mean, running_var, eps=1e-5):
    scale = gamma / jnp.sqrt(running_var + eps)
    bias = beta - running_mean * scale
    return scale, bias


def pack_conv_bn(w_torch, gamma, beta, mean, var, eps=1e-5):
    """PyTorch (Cout, Cin, 3, 3) conv weight -> (9*Cin, Cout) bf16 with BN
    scale folded in; returns (packed_weight_bf16, bias_f32 (1, Cout))."""
    scale, bias = fold_bn(gamma, beta, mean, var, eps)
    cout = w_torch.shape[0]
    w = jnp.transpose(w_torch, (2, 3, 1, 0)).reshape(-1, cout)   # (9*Cin, Cout)
    w = (w * scale[None, :]).astype(jnp.bfloat16)
    return w, bias.reshape(1, cout).astype(jnp.float32)


def basic_block_forward(x_nchw, params):
    """PyTorch-interface wrapper (NCHW in/out). The transposes exist only to
    match the NCHW spec; the Pallas path is NHWC (keep a full model NHWC)."""
    x = jnp.transpose(x_nchw, (0, 2, 3, 1))                # NCHW -> NHWC
    w1, b1 = pack_conv_bn(params["w1"], *params["bn1"])
    w2, b2 = pack_conv_bn(params["w2"], *params["bn2"])
    out = basic_block_nhwc(x, w1, b1, w2, b2)
    return jnp.transpose(out, (0, 3, 1, 2))                # NHWC -> NCHW


def _reference_forward(x_nchw, params):
    """Pure-JAX f32 reference (lax.conv) for correctness checking."""
    x = jnp.transpose(x_nchw, (0, 2, 3, 1))
    dn = ("NHWC", "HWIO", "NHWC")

    def conv(inp, w_torch):
        w_hwio = jnp.transpose(w_torch, (2, 3, 1, 0))      # (3,3,Cin,Cout)
        return lax.conv_general_dilated(inp, w_hwio, (1, 1), "SAME",
                                        dimension_numbers=dn)

    s1, b1 = fold_bn(*params["bn1"])
    out = jnp.maximum(conv(x, params["w1"]) * s1 + b1, 0.0)
    s2, b2 = fold_bn(*params["bn2"])
    out = jnp.maximum(conv(out, params["w2"]) * s2 + b2 + x, 0.0)
    return jnp.transpose(out, (0, 3, 1, 2))


def _make_params(key, planes):
    ks = jax.random.split(key, 8)

    def make_w(k):  # PyTorch conv weight layout (Cout, Cin, 3, 3)
        return jax.random.normal(k, (planes, planes, 3, 3), jnp.float32) * 0.1

    def make_bn(k0, k1, k2, k3):
        gamma = 1.0 + 0.1 * jax.random.normal(k0, (planes,), jnp.float32)
        beta = 0.1 * jax.random.normal(k1, (planes,), jnp.float32)
        mean = 0.1 * jax.random.normal(k2, (planes,), jnp.float32)
        var = jnp.abs(jax.random.normal(k3, (planes,), jnp.float32)) + 0.5
        return (gamma, beta, mean, var)

    return {
        "w1": make_w(ks[0]),
        "w2": make_w(ks[1]),
        "bn1": make_bn(ks[2], ks[3], ks[4], ks[5]),
        "bn2": make_bn(ks[6], ks[7], ks[4], ks[5]),
    }


if __name__ == "__main__":
    key = jax.random.PRNGKey(0)
    k_x, k_p = jax.random.split(key)

    N, C, H, W = 2, 8, 16, 16   # inplanes == planes, stride=1, downsample=None
    x = jax.random.normal(k_x, (N, C, H, W), jnp.float32)
    params = _make_params(k_p, C)

    out = jax.block_until_ready(basic_block_forward(x, params))
    ref = _reference_forward(x, params)

    assert out.shape == (N, C, H, W)
    # bf16 matmuls (f32 accumulation) vs f32 reference -> loosened tolerance.
    assert jnp.allclose(out, ref, atol=3e-2, rtol=3e-2), "mismatch vs reference"

    print("KERNEL_OK")
</pallas_src>

<mosaic_0001>
module attributes {stable_mosaic.version = 11 : i64} {
  func.func @_basic_block_kernel(%arg0: i32, %arg1: memref<1x16x16x8xf32, #tpu.memory_space<vmem>>, %arg2: memref<72x8xbf16, #tpu.memory_space<vmem>>, %arg3: memref<1x8xf32, #tpu.memory_space<vmem>>, %arg4: memref<72x8xbf16, #tpu.memory_space<vmem>>, %arg5: memref<1x8xf32, #tpu.memory_space<vmem>>, %arg6: memref<1x16x16x8xf32, #tpu.memory_space<vmem>>, %arg7: memref<18x18x8xbf16, #tpu.memory_space<vmem>>, %arg8: memref<18x18x8xbf16, #tpu.memory_space<vmem>>) attributes {dimension_semantics = [#tpu.dimension_semantics<parallel>], iteration_bounds = array<i64: 2>, scalar_prefetch = 0 : i64, scratch_operands = 2 : i64, tpu.core_type = #tpu.core_type<tc>, window_params = [{transform_indices = @transform_0, window_bounds = array<i64: 1, 16, 16, 8>}, {pipeline_mode = #tpu.pipeline_mode<synchronous>, transform_indices = @transform_1, window_bounds = array<i64: 72, 8>}, {pipeline_mode = #tpu.pipeline_mode<synchronous>, transform_indices = @transform_2, window_bounds = array<i64: 1, 8>}, {pipeline_mode = #tpu.pipeline_mode<synchronous>, transform_indices = @transform_3, window_bounds = array<i64: 72, 8>}, {pipeline_mode = #tpu.pipeline_mode<synchronous>, transform_indices = @transform_4, window_bounds = array<i64: 1, 8>}, {transform_indices = @transform_5, window_bounds = array<i64: 1, 16, 16, 8>}]} {
    %c0 = arith.constant 0 : index
    %c0_0 = arith.constant 0 : index
    %c0_1 = arith.constant 0 : index
    %c0_2 = arith.constant 0 : index
    %0 = vector.load %arg1[%c0, %c0_0, %c0_1, %c0_2] : memref<1x16x16x8xf32, #tpu.memory_space<vmem>>, vector<1x16x16x8xf32>
    %1 = vector.shape_cast %0 : vector<1x16x16x8xf32> to vector<16x16x8xf32>
    %cst = arith.constant 0.000000e+00 : bf16
    %2 = vector.broadcast %cst : bf16 to vector<18x18x8xbf16>
    %c0_3 = arith.constant 0 : index
    %c0_4 = arith.constant 0 : index
    %c0_5 = arith.constant 0 : index
    %3 = vector.load %arg7[%c0_3, %c0_4, %c0_5] : memref<18x18x8xbf16, #tpu.memory_space<vmem>>, vector<18x18x8xbf16>
    tpu.vector_store %arg7[%c0_3, %c0_4, %c0_5], %2 {strides = array<i32>} : memref<18x18x8xbf16, #tpu.memory_space<vmem>>, vector<18x18x8xbf16>,
    %4 = arith.truncf %1 : vector<16x16x8xf32> to vector<16x16x8xbf16>
    %c1 = arith.constant 1 : index
    %c1_6 = arith.constant 1 : index
    %c0_7 = arith.constant 0 : index
    %5 = vector.load %arg7[%c1, %c1_6, %c0_7] : memref<18x18x8xbf16, #tpu.memory_space<vmem>>, vector<16x16x8xbf16>
    tpu.vector_store %arg7[%c1, %c1_6, %c0_7], %4 {strides = array<i32>} : memref<18x18x8xbf16, #tpu.memory_space<vmem>>, vector<16x16x8xbf16>,
    %c0_8 = arith.constant 0 : index
    %c0_9 = arith.constant 0 : index
    %c0_10 = arith.constant 0 : index
    %6 = vector.load %arg7[%c0_8, %c0_9, %c0_10] : memref<18x18x8xbf16, #tpu.memory_space<vmem>>, vector<16x16x8xbf16>
    %7 = vector.shape_cast %6 : vector<16x16x8xbf16> to vector<256x8xbf16>
    %c0_11 = arith.constant 0 : index
    %c1_12 = arith.constant 1 : index
    %c0_13 = arith.constant 0 : index
    %8 = vector.load %arg7[%c0_11, %c1_12, %c0_13] : memref<18x18x8xbf16, #tpu.memory_space<vmem>>, vector<16x16x8xbf16>
    %9 = vector.shape_cast %8 : vector<16x16x8xbf16> to vector<256x8xbf16>
    %c0_14 = arith.constant 0 : index
    %c2 = arith.constant 2 : index
    %c0_15 = arith.constant 0 : index
    %10 = vector.load %arg7[%c0_14, %c2, %c0_15] : memref<18x18x8xbf16, #tpu.memory_space<vmem>>, vector<16x16x8xbf16>
    %11 = vector.shape_cast %10 : vector<16x16x8xbf16> to vector<256x8xbf16>
    %c1_16 = arith.constant 1 : index
    %c0_17 = arith.constant 0 : index
    %c0_18 = arith.constant 0 : index
    %12 = vector.load %arg7[%c1_16, %c0_17, %c0_18] : memref<18x18x8xbf16, #tpu.memory_space<vmem>>, vector<16x16x8xbf16>
    %13 = vector.shape_cast %12 : vector<16x16x8xbf16> to vector<256x8xbf16>
    %c1_19 = arith.constant 1 : index
    %c1_20 = arith.constant 1 : index
    %c0_21 = arith.constant 0 : index
    %14 = vector.load %arg7[%c1_19, %c1_20, %c0_21] : memref<18x18x8xbf16, #tpu.memory_space<vmem>>, vector<16x16x8xbf16>
    %15 = vector.shape_cast %14 : vector<16x16x8xbf16> to vector<256x8xbf16>
    %c1_22 = arith.constant 1 : index
    %c2_23 = arith.constant 2 : index
    %c0_24 = arith.constant 0 : index
    %16 = vector.load %arg7[%c1_22, %c2_23, %c0_24] : memref<18x18x8xbf16, #tpu.memory_space<vmem>>, vector<16x16x8xbf16>
    %17 = vector.shape_cast %16 : vector<16x16x8xbf16> to vector<256x8xbf16>
    %c2_25 = arith.constant 2 : index
    %c0_26 = arith.constant 0 : index
    %c0_27 = arith.constant 0 : index
    %18 = vector.load %arg7[%c2_25, %c0_26, %c0_27] : memref<18x18x8xbf16, #tpu.memory_space<vmem>>, vector<16x16x8xbf16>
    %19 = vector.shape_cast %18 : vector<16x16x8xbf16> to vector<256x8xbf16>
    %c2_28 = arith.constant 2 : index
    %c1_29 = arith.constant 1 : index
    %c0_30 = arith.constant 0 : index
    %20 = vector.load %arg7[%c2_28, %c1_29, %c0_30] : memref<18x18x8xbf16, #tpu.memory_space<vmem>>, vector<16x16x8xbf16>
    %21 = vector.shape_cast %20 : vector<16x16x8xbf16> to vector<256x8xbf16>
    %c2_31 = arith.constant 2 : index
    %c2_32 = arith.constant 2 : index
    %c0_33 = arith.constant 0 : index
    %22 = vector.load %arg7[%c2_31, %c2_32, %c0_33] : memref<18x18x8xbf16, #tpu.memory_space<vmem>>, vector<16x16x8xbf16>
    %23 = vector.shape_cast %22 : vector<16x16x8xbf16> to vector<256x8xbf16>
    %24 = tpu.concatenate %7, %9, %11, %13, %15, %17, %19, %21, %23 in 1 : vector<256x8xbf16>, vector<256x8xbf16>, vector<256x8xbf16>, vector<256x8xbf16>, vector<256x8xbf16>, vector<256x8xbf16>, vector<256x8xbf16>, vector<256x8xbf16>, vector<256x8xbf16> -> vector<256x72xbf16>
    %c0_34 = arith.constant 0 : index
    %c0_35 = arith.constant 0 : index
    %25 = vector.load %arg2[%c0_34, %c0_35] : memref<72x8xbf16, #tpu.memory_space<vmem>>, vector<72x8xbf16>
    %cst_36 = arith.constant dense<0.000000e+00> : vector<256x8xf32>
    %26 = tpu.matmul %24, %25, %cst_36 {dimension_numbers = #tpu.dot_dimension_numbers<[1], [0], [0], [1], [0, 0, 1, 1], [], []>} : vector<256x72xbf16>, vector<72x8xbf16>, vector<256x8xf32> -> vector<256x8xf32>
    %c0_37 = arith.constant 0 : index
    %c0_38 = arith.constant 0 : index
    %27 = vector.load %arg3[%c0_37, %c0_38] : memref<1x8xf32, #tpu.memory_space<vmem>>, vector<1x8xf32>
    %28 = vector.broadcast %27 : vector<1x8xf32> to vector<256x8xf32>
    %29 = arith.addf %26, %28 : vector<256x8xf32>
    %cst_39 = arith.constant 0.000000e+00 : f32
    %30 = vector.broadcast %cst_39 : f32 to vector<256x8xf32>
    %31 = arith.maximumf %29, %30 : vector<256x8xf32>
    %cst_40 = arith.constant 0.000000e+00 : bf16
    %32 = vector.broadcast %cst_40 : bf16 to vector<18x18x8xbf16>
    %c0_41 = arith.constant 0 : index
    %c0_42 = arith.constant 0 : index
    %c0_43 = arith.constant 0 : index
    %33 = vector.load %arg8[%c0_41, %c0_42, %c0_43] : memref<18x18x8xbf16, #tpu.memory_space<vmem>>, vector<18x18x8xbf16>
    tpu.vector_store %arg8[%c0_41, %c0_42, %c0_43], %32 {strides = array<i32>} : memref<18x18x8xbf16, #tpu.memory_space<vmem>>, vector<18x18x8xbf16>,
    %34 = vector.shape_cast %31 : vector<256x8xf32> to vector<16x16x8xf32>
    %35 = arith.truncf %34 : vector<16x16x8xf32> to vector<16x16x8xbf16>
    %c1_44 = arith.constant 1 : index
    %c1_45 = arith.constant 1 : index
    %c0_46 = arith.constant 0 : index
    %36 = vector.load %arg8[%c1_44, %c1_45, %c0_46] : memref<18x18x8xbf16, #tpu.memory_space<vmem>>, vector<16x16x8xbf16>
    tpu.vector_store %arg8[%c1_44, %c1_45, %c0_46], %35 {strides = array<i32>} : memref<18x18x8xbf16, #tpu.memory_space<vmem>>, vector<16x16x8xbf16>,
    %37 = vector.shape_cast %1 : vector<16x16x8xf32> to vector<256x8xf32>
    %c0_47 = arith.constant 0 : index
    %c0_48 = arith.constant 0 : index
    %c0_49 = arith.constant 0 : index
    %38 = vector.load %arg8[%c0_47, %c0_48, %c0_49] : memref<18x18x8xbf16, #tpu.memory_space<vmem>>, vector<16x16x8xbf16>
    %39 = vector.shape_cast %38 : vector<16x16x8xbf16> to vector<256x8xbf16>
    %c0_50 = arith.constant 0 : index
    %c1_51 = arith.constant 1 : index
    %c0_52 = arith.constant 0 : index
    %40 = vector.load %arg8[%c0_50, %c1_51, %c0_52] : memref<18x18x8xbf16, #tpu.memory_space<vmem>>, vector<16x16x8xbf16>
    %41 = vector.shape_cast %40 : vector<16x16x8xbf16> to vector<256x8xbf16>
    %c0_53 = arith.constant 0 : index
    %c2_54 = arith.constant 2 : index
    %c0_55 = arith.constant 0 : index
    %42 = vector.load %arg8[%c0_53, %c2_54, %c0_55] : memref<18x18x8xbf16, #tpu.memory_space<vmem>>, vector<16x16x8xbf16>
    %43 = vector.shape_cast %42 : vector<16x16x8xbf16> to vector<256x8xbf16>
    %c1_56 = arith.constant 1 : index
    %c0_57 = arith.constant 0 : index
    %c0_58 = arith.constant 0 : index
    %44 = vector.load %arg8[%c1_56, %c0_57, %c0_58] : memref<18x18x8xbf16, #tpu.memory_space<vmem>>, vector<16x16x8xbf16>
    %45 = vector.shape_cast %44 : vector<16x16x8xbf16> to vector<256x8xbf16>
    %c1_59 = arith.constant 1 : index
    %c1_60 = arith.constant 1 : index
    %c0_61 = arith.constant 0 : index
    %46 = vector.load %arg8[%c1_59, %c1_60, %c0_61] : memref<18x18x8xbf16, #tpu.memory_space<vmem>>, vector<16x16x8xbf16>
    %47 = vector.shape_cast %46 : vector<16x16x8xbf16> to vector<256x8xbf16>
    %c1_62 = arith.constant 1 : index
    %c2_63 = arith.constant 2 : index
    %c0_64 = arith.constant 0 : index
    %48 = vector.load %arg8[%c1_62, %c2_63, %c0_64] : memref<18x18x8xbf16, #tpu.memory_space<vmem>>, vector<16x16x8xbf16>
    %49 = vector.shape_cast %48 : vector<16x16x8xbf16> to vector<256x8xbf16>
    %c2_65 = arith.constant 2 : index
    %c0_66 = arith.constant 0 : index
    %c0_67 = arith.constant 0 : index
    %50 = vector.load %arg8[%c2_65, %c0_66, %c0_67] : memref<18x18x8xbf16, #tpu.memory_space<vmem>>, vector<16x16x8xbf16>
    %51 = vector.shape_cast %50 : vector<16x16x8xbf16> to vector<256x8xbf16>
    %c2_68 = arith.constant 2 : index
    %c1_69 = arith.constant 1 : index
    %c0_70 = arith.constant 0 : index
    %52 = vector.load %arg8[%c2_68, %c1_69, %c0_70] : memref<18x18x8xbf16, #tpu.memory_space<vmem>>, vector<16x16x8xbf16>
    %53 = vector.shape_cast %52 : vector<16x16x8xbf16> to vector<256x8xbf16>
    %c2_71 = arith.constant 2 : index
    %c2_72 = arith.constant 2 : index
    %c0_73 = arith.constant 0 : index
    %54 = vector.load %arg8[%c2_71, %c2_72, %c0_73] : memref<18x18x8xbf16, #tpu.memory_space<vmem>>, vector<16x16x8xbf16>
    %55 = vector.shape_cast %54 : vector<16x16x8xbf16> to vector<256x8xbf16>
    %56 = tpu.concatenate %39, %41, %43, %45, %47, %49, %51, %53, %55 in 1 : vector<256x8xbf16>, vector<256x8xbf16>, vector<256x8xbf16>, vector<256x8xbf16>, vector<256x8xbf16>, vector<256x8xbf16>, vector<256x8xbf16>, vector<256x8xbf16>, vector<256x8xbf16> -> vector<256x72xbf16>
    %c0_74 = arith.constant 0 : index
    %c0_75 = arith.constant 0 : index
    %57 = vector.load %arg4[%c0_74, %c0_75] : memref<72x8xbf16, #tpu.memory_space<vmem>>, vector<72x8xbf16>
    %cst_76 = arith.constant dense<0.000000e+00> : vector<256x8xf32>
    %58 = tpu.matmul %56, %57, %cst_76 {dimension_numbers = #tpu.dot_dimension_numbers<[1], [0], [0], [1], [0, 0, 1, 1], [], []>} : vector<256x72xbf16>, vector<72x8xbf16>, vector<256x8xf32> -> vector<256x8xf32>
    %c0_77 = arith.constant 0 : index
    %c0_78 = arith.constant 0 : index
    %59 = vector.load %arg5[%c0_77, %c0_78] : memref<1x8xf32, #tpu.memory_space<vmem>>, vector<1x8xf32>
    %60 = vector.broadcast %59 : vector<1x8xf32> to vector<256x8xf32>
    %61 = arith.addf %58, %60 : vector<256x8xf32>
    %62 = arith.addf %61, %37 : vector<256x8xf32>
    %cst_79 = arith.constant 0.000000e+00 : f32
    %63 = vector.broadcast %cst_79 : f32 to vector<256x8xf32>
    %64 = arith.maximumf %62, %63 : vector<256x8xf32>
    %65 = vector.shape_cast %64 : vector<256x8xf32> to vector<16x16x8xf32>
    %c0_80 = arith.constant 0 : index
    %c0_81 = arith.constant 0 : index
    %c0_82 = arith.constant 0 : index
    %c0_83 = arith.constant 0 : index
    %66 = vector.load %arg6[%c0_80, %c0_81, %c0_82, %c0_83] : memref<1x16x16x8xf32, #tpu.memory_space<vmem>>, vector<1x16x16x8xf32>
    %67 = vector.shape_cast %66 : vector<1x16x16x8xf32> to vector<16x16x8xf32>
    %68 = vector.shape_cast %65 : vector<16x16x8xf32> to vector<1x16x16x8xf32>
    tpu.vector_store %arg6[%c0_80, %c0_81, %c0_82, %c0_83], %68 {strides = array<i32>} : memref<1x16x16x8xf32, #tpu.memory_space<vmem>>, vector<1x16x16x8xf32>,
    return
  }
  func.func @transform_0(%arg0: i32) -> (i32, i32, i32, i32) {
    %c0_i32 = arith.constant 0 : i32
    %c0_i32_0 = arith.constant 0 : i32
    %c0_i32_1 = arith.constant 0 : i32
    %c0_i32_2 = arith.constant 0 : i32
    return %arg0, %c0_i32, %c0_i32_0, %c0_i32_1 : i32, i32, i32, i32
  }
  func.func @transform_1(%arg0: i32) -> (i32, i32) {
    %c0_i32 = arith.constant 0 : i32
    %c0_i32_0 = arith.constant 0 : i32
    %c0_i32_1 = arith.constant 0 : i32
    return %c0_i32, %c0_i32_0 : i32, i32
  }
  func.func @transform_2(%arg0: i32) -> (i32, i32) {
    %c0_i32 = arith.constant 0 : i32
    %c0_i32_0 = arith.constant 0 : i32
    %c0_i32_1 = arith.constant 0 : i32
    return %c0_i32, %c0_i32_0 : i32, i32
  }
  func.func @transform_3(%arg0: i32) -> (i32, i32) {
    %c0_i32 = arith.constant 0 : i32
    %c0_i32_0 = arith.constant 0 : i32
    %c0_i32_1 = arith.constant 0 : i32
    return %c0_i32, %c0_i32_0 : i32, i32
  }
  func.func @transform_4(%arg0: i32) -> (i32, i32) {
    %c0_i32 = arith.constant 0 : i32
    %c0_i32_0 = arith.constant 0 : i32
    %c0_i32_1 = arith.constant 0 : i32
    return %c0_i32, %c0_i32_0 : i32, i32
  }
  func.func @transform_5(%arg0: i32) -> (i32, i32, i32, i32) {
    %c0_i32 = arith.constant 0 : i32
    %c0_i32_0 = arith.constant 0 : i32
    %c0_i32_1 = arith.constant 0 : i32
    %c0_i32_2 = arith.constant 0 : i32
    return %arg0, %c0_i32, %c0_i32_0, %c0_i32_1 : i32, i32, i32, i32
  }
}

</mosaic_0001>

<bundles_post_ra>
// kernel: tpu_custom_call.1
= control target key start
LH: loop header
LB: loop body
LE: loop exit
PB: predicated region body
PF: predicated region fallthrough
CT: control target
= control target key end

     0   :  { %s8697_s18 = smov 0   ;;  %s12701_s0 = inlined_call_operand.vmem [shape: f32[2,16,16,8], index: 0, kind: input, shape index: {}]   ;;  %s12702_s1 = inlined_call_operand.vmem [shape: bf16[72,8], index: 1, kind: input, shape index: {}]   ;;  %s12703_s2 = inlined_call_operand.vmem [shape: f32[1,8], index: 2, kind: input, shape index: {}]   ;;  %s12704_s3 = inlined_call_operand.vmem [shape: bf16[72,8], index: 3, kind: input, shape index: {}]   ;;  %s12705_s4 = inlined_call_operand.vmem [shape: f32[1,8], index: 4, kind: input, shape index: {}]   ;;  %s12706_s5 = inlined_call_operand.vmem [shape: f32[2,16,16,8], index: 5, kind: output, shape index: {}]  }
   0x1 LB: > { %s7777_s19 = sadd.s32 4294967295, %s8656_s18   ;;  %p7781_p0 = scmp.ge.s32.totalorder %s8656_s18, 1  ;;  %s8656_s18 = sphi %s8697_s18, %s15_s18  }
   0x2   : > { %p187_p1 = scmp.lt.s32.totalorder %s8656_s18, 3 }
   0x4   : > { %p188_p2 = pnand %p7781_p0, %p187_p1 }
   0x6   : > { %191 = sbr.rel (%p188_p2) target bundleno = 1249 (0x4e1), region = 40 }
   0xd   : > { %vm258_vm0 = vcmask 60416   ;;  %vm261_vm1 = vcmask 57344   ;;  %v8658_v0 = vmov 0   ;;  %p215_p3 = scmp.lt.s32.totalorder %s7777_s19, 1  ;;  %vm1350_vm2 = vcmask 1042432   ;;  %s8659_s24 = smov 16  }
   0xe   : > { %259 = vst.msk [vmem:[#allocation2] sm:$0xf] %vm258_vm0, %v8658_v0  ;;  %260 = vst.msk [vmem:[#allocation2 + $0x4] sm:$0xf] %vm258_vm0, %v8658_v0  ;;  %vm1351_vm3 = vcmask 1046532   ;;  %s8660_s25 = smov 8  }
   0xf   : > { %262 = vst.msk [vmem:[#allocation2 + $0x8] sm:$0x1] %vm261_vm1, %v8658_v0  ;;  %265 = vst.msk [vmem:[#allocation2 + $0x14] sm:$0x1] %vm261_vm1, %v8658_v0  ;;  %s12767_s19 = smov (!%p215_p3, %s7777_s19), 1  ;;  %s8661_s26 = smov 24  }
  0x10   : > { %263 = vst.msk [vmem:[#allocation2 + $0xc] sm:$0xf] %vm258_vm0, %v8658_v0  ;;  %264 = vst.msk [vmem:[#allocation2 + $0x10] sm:$0xf] %vm258_vm0, %v8658_v0  ;;  %vm899_vm4 = vsmask.f32 3328 }
  0x11   : > { %266 = vst.msk [vmem:[#allocation2 + $0x18] sm:$0xf] %vm258_vm0, %v8658_v0  ;;  %267 = vst.msk [vmem:[#allocation2 + $0x1c] sm:$0xf] %vm258_vm0, %v8658_v0  ;;  %vm900_vm5 = vsmask.f32 7440 }
  0x12   : > { %268 = vst.msk [vmem:[#allocation2 + $0x20] sm:$0x1] %vm261_vm1, %v8658_v0  ;;  %271 = vst.msk [vmem:[#allocation2 + $0x2c] sm:$0x1] %vm261_vm1, %v8658_v0  ;;  %s8280_s20 = sshll.u32 %s12767_s19, 8  ;;  %s8662_s27 = smov 48  }
  0x13   : > { %269 = vst.msk [vmem:[#allocation2 + $0x24] sm:$0xf] %vm258_vm0, %v8658_v0  ;;  %270 = vst.msk [vmem:[#allocation2 + $0x28] sm:$0xf] %vm258_vm0, %v8658_v0  ;;  %vm410_vm6 = vsmask.f32 256  ;;  %s8937_s23 = scalar_lea.vmem %s12701_s0, %s8280_s20 }
  0x14   : > { %272 = vst.msk [vmem:[#allocation2 + $0x30] sm:$0xf] %vm258_vm0, %v8658_v0  ;;  %273 = vst.msk [vmem:[#allocation2 + $0x34] sm:$0xf] %vm258_vm0, %v8658_v0  ;;  %vm411_vm8 = vsmask.f32 4368 }
  0x15   : > { %274 = vst.msk [vmem:[#allocation2 + $0x38] sm:$0x1] %vm261_vm1, %v8658_v0  ;;  %277 = vst.msk [vmem:[#allocation2 + $0x44] sm:$0x1] %vm261_vm1, %v8658_v0  ;;  %v228_v2 = vld [vmem:[%s8937_s23 + $0x10] sm:$0xff]  ;;  %v229_v3 = vld [vmem:[%s8937_s23 + $0x18] sm:$0xff] }
  0x16   : > { %275 = vst.msk [vmem:[#allocation2 + $0x3c] sm:$0xf] %vm258_vm0, %v8658_v0  ;;  %276 = vst.msk [vmem:[#allocation2 + $0x40] sm:$0xf] %vm258_vm0, %v8658_v0  ;;  %vm735_vm9 = vsmask.f32 7938  ;;  %v8284_v8 = vpack.c.bf16 %v228_v2, %v228_v2  ;;  %v8285_v9 = vpack.c.bf16 %v229_v3, %v229_v3 }
  0x17   : > { %278 = vst.msk [vmem:[#allocation2 + $0x48] sm:$0xf] %vm258_vm0, %v8658_v0  ;;  %279 = vst.msk [vmem:[#allocation2 + $0x4c] sm:$0xf] %vm258_vm0, %v8658_v0  ;;  %v226_v4 = vld [vmem:[%s8937_s23] sm:$0xff]  ;;  %v227_v28 = vld [vmem:[%s8937_s23 + $0x8] sm:$0xff] }
  0x18   : > { %280 = vst.msk [vmem:[#allocation2 + $0x50] sm:$0x1] %vm261_vm1, %v8658_v0  ;;  %283 = vst.msk [vmem:[#allocation2 + $0x5c] sm:$0x1] %vm261_vm1, %v8658_v0  ;;  %v8942_v5 = vld [vmem:[#allocation2 + $0x4] sm:$0xf]  ;;  %v8282_v10 = vpack.c.bf16 %v226_v4, %v226_v4  ;;  %v8283_v43 = vpack.c.bf16 %v227_v28, %v227_v28 }
  0x19   : > { %281 = vst.msk [vmem:[#allocation2 + $0x54] sm:$0xf] %vm258_vm0, %v8658_v0  ;;  %282 = vst.msk [vmem:[#allocation2 + $0x58] sm:$0xf] %vm258_vm0, %v8658_v0  ;;  %v883_v6 = vld [vmem:[#allocation2 + $0x8] sm:$0x1] }
  0x1a   : > { %284 = vst.msk [vmem:[#allocation2 + $0x60] sm:$0xf] %vm258_vm0, %v8658_v0  ;;  %285 = vst.msk [vmem:[#allocation2 + $0x64] sm:$0xf] %vm258_vm0, %v8658_v0  ;;  %v1286_v7 = vld [vmem:[#allocation2] sm:$0xe] }
  0x1b   : > { %286 = vst.msk [vmem:[#allocation2 + $0x68] sm:$0x1] %vm261_vm1, %v8658_v0  ;;  %289 = vst.msk [vmem:[#allocation2 + $0x74] sm:$0x1] %vm261_vm1, %v8658_v0  ;;  %v7818_v11 = vrot.slane %v1286_v7, 9  ;;  %v1355_v12 = vrot.slane %v8942_v5, 5 }
  0x1c   : > { %287 = vst.msk [vmem:[#allocation2 + $0x6c] sm:$0xf] %vm258_vm0, %v8658_v0  ;;  %288 = vst.msk [vmem:[#allocation2 + $0x70] sm:$0xf] %vm258_vm0, %v8658_v0  ;;  %v1358_v13 = vrot.slane %v883_v6, 5  ;;  %v912_v15 = vshll.u32 %v8942_v5, 16 }
  0x1d   : > { %290 = vst.msk [vmem:[#allocation2 + $0x78] sm:$0xf] %vm258_vm0, %v8658_v0  ;;  %291 = vst.msk [vmem:[#allocation2 + $0x7c] sm:$0xf] %vm258_vm0, %v8658_v0  ;;  %v8945_v14 = vld [vmem:[#allocation2] sm:$0xf] }
  0x1e   : > { %292 = vst.msk [vmem:[#allocation2 + $0x80] sm:$0x1] %vm261_vm1, %v8658_v0  ;;  %295 = vst.msk [vmem:[#allocation2 + $0x8c] sm:$0x1] %vm261_vm1, %v8658_v0  ;;  %v903_v16 = vshrl.u32 %v8945_v14, 16  ;;  %v906_v17 = vshll.u32 %v8945_v14, 16 }
  0x1f   : > { %293 = vst.msk [vmem:[#allocation2 + $0x84] sm:$0xf] %vm258_vm0, %v8658_v0  ;;  %294 = vst.msk [vmem:[#allocation2 + $0x88] sm:$0xf] %vm258_vm0, %v8658_v0  ;;  %v916_v18 = vshrl.u32 %v8942_v5, 16  ;;  %v922_v19 = vshll.u32 %v883_v6, 16 }
  0x20   : > { %296 = vst.msk [vmem:[#allocation2 + $0x90] sm:$0xf] %vm258_vm0, %v8658_v0  ;;  %297 = vst.msk [vmem:[#allocation2 + $0x94] sm:$0xf] %vm258_vm0, %v8658_v0  ;;  %v1357_v21 = vrot.slane %v1355_v12, 4  ;;  %v914_v22 = vrot.slane %v912_v15, 5 }
  0x21   : > { %298 = vst.msk [vmem:[#allocation2 + $0x98] sm:$0x1] %vm261_vm1, %v8658_v0  ;;  %301 = vst.msk [vmem:[#allocation2 + $0xa4] sm:$0x1] %vm261_vm1, %v8658_v0  ;;  %v431_v23 = vshrl.u32 %v8284_v8, 16  ;;  %v905_v24 = vrot.slane %v903_v16, 4 }
  0x22   : > { %299 = vst.msk [vmem:[#allocation2 + $0x9c] sm:$0xf] %vm258_vm0, %v8658_v0  ;;  %300 = vst.msk [vmem:[#allocation2 + $0xa0] sm:$0xf] %vm258_vm0, %v8658_v0  ;;  %v908_v25 = vrot.slane %v906_v17, 5  ;;  %v918_v26 = vrot.slane %v916_v18, 4 }
  0x23   : > { %302 = vst.msk [vmem:[#allocation2 + $0xa8] sm:$0xf] %vm258_vm0, %v8658_v0  ;;  %303 = vst.msk [vmem:[#allocation2 + $0xac] sm:$0xf] %vm258_vm0, %v8658_v0  ;;  %v924_v27 = vrot.slane %v922_v19, 5  ;;  %v433_v30 = vrot.slane %v431_v23, 7 }
  0x24   : > { %304 = vst.msk [vmem:[#allocation2 + $0xb0] sm:$0x1] %vm261_vm1, %v8658_v0  ;;  %307 = vst.msk [vmem:[#allocation2 + $0xbc] sm:$0x1] %vm261_vm1, %v8658_v0  ;;  %v434_v31 = vshll.u32 %v8284_v8, 16  ;;  %v439_v32 = vshrl.u32 %v8285_v9, 16  ;;  %v909_v34 = vor.u32 %v908_v25, %v905_v24  ;;  %v919_v35 = vor.u32 %v918_v26, %v914_v22 }
  0x25   : > { %305 = vst.msk [vmem:[#allocation2 + $0xb4] sm:$0xf] %vm258_vm0, %v8658_v0  ;;  %306 = vst.msk [vmem:[#allocation2 + $0xb8] sm:$0xf] %vm258_vm0, %v8658_v0  ;;  %v442_v36 = vshll.u32 %v8285_v9, 16  ;;  %v437_v41 = vrot.slane %v433_v30, 4 }
  0x26   : > { %308 = vst.msk [vmem:[#allocation2 + $0xc0] sm:$0xf] %vm258_vm0, %v8658_v0  ;;  %309 = vst.msk [vmem:[#allocation2 + $0xc4] sm:$0xf] %vm258_vm0, %v8658_v0  ;;  %v746_v38 = vld [vmem:[#allocation2 + $0x18] sm:$0xf]  ;;  %v436_v40 = vor.u32 %v434_v31, %v433_v30 }
  0x27   : > { %310 = vst.msk [vmem:[#allocation2 + $0xc8] sm:$0x1] %vm261_vm1, %v8658_v0  ;;  %313 = vst.msk [vmem:[#allocation2 + $0xd4] sm:$0x1] %vm261_vm1, %v8658_v0  ;;  %v441_v42 = vrot.slane %v439_v32, 7  ;;  %v230_v44 = vld [vmem:[%s8937_s23 + $0x20] sm:$0xff] }
  0x28   : > { %311 = vst.msk [vmem:[#allocation2 + $0xcc] sm:$0xf] %vm258_vm0, %v8658_v0  ;;  %312 = vst.msk [vmem:[#allocation2 + $0xd0] sm:$0xf] %vm258_vm0, %v8658_v0  ;;  %v910_v45 = vrot.slane %v909_v34, 4  ;;  %v920_v46 = vrot.slane %v919_v35, 4  ;;  %v8286_v58 = vpack.c.bf16 %v230_v44, %v230_v44 }
  0x29   : > { %3971 = vst.msk [vmem:[#allocation3] sm:$0xf] %vm258_vm0, %v8658_v0  ;;  %3972 = vst.msk [vmem:[#allocation3 + $0x4] sm:$0xf] %vm258_vm0, %v8658_v0  ;;  %v414_v48 = vshrl.u32 %v8282_v10, 16  ;;  %v417_v49 = vshll.u32 %v8282_v10, 16  ;;  %v444_v51 = vor.u32 %v442_v36, %v441_v42 }
  0x2a   : > { %3973 = vst.msk [vmem:[#allocation3 + $0x8] sm:$0x1] %vm261_vm1, %v8658_v0  ;;  %3976 = vst.msk [vmem:[#allocation3 + $0x14] sm:$0x1] %vm261_vm1, %v8658_v0  ;;  %v231_v50 = vld [vmem:[%s8937_s23 + $0x28] sm:$0xff]  ;;  %v422_v53 = vshrl.u32 %v8283_v43, 16 }
  0x2b   : > { %3974 = vst.msk [vmem:[#allocation3 + $0xc] sm:$0xf] %vm258_vm0, %v8658_v0  ;;  %3975 = vst.msk [vmem:[#allocation3 + $0x10] sm:$0xf] %vm258_vm0, %v8658_v0  ;;  %v425_v54 = vshll.u32 %v8283_v43, 16  ;;  %v416_v57 = vrot.slane %v414_v48, 7  ;;  %v8287_v63 = vpack.c.bf16 %v231_v50, %v231_v50 }
  0x2c   : > { %3977 = vst.msk [vmem:[#allocation3 + $0x18] sm:$0xf] %vm258_vm0, %v8658_v0  ;;  %3978 = vst.msk [vmem:[#allocation3 + $0x1c] sm:$0xf] %vm258_vm0, %v8658_v0  ;;  %v424_v61 = vrot.slane %v422_v53, 7  ;;  %v232_v2 = vld [vmem:[%s8937_s23 + $0x30] sm:$0xff] }
  0x2d   : > { %3979 = vst.msk [vmem:[#allocation3 + $0x20] sm:$0x1] %vm261_vm1, %v8658_v0  ;;  %3982 = vst.msk [vmem:[#allocation3 + $0x2c] sm:$0x1] %vm261_vm1, %v8658_v0  ;;  %v737_v62 = vld [vmem:[#allocation2 + $0xc] sm:$0xf]  ;;  %v419_v4 = vor.u32 %v417_v49, %v416_v57 }
  0x2e   : > { %3980 = vst.msk [vmem:[#allocation3 + $0x24] sm:$0xf] %vm258_vm0, %v8658_v0  ;;  %3981 = vst.msk [vmem:[#allocation3 + $0x28] sm:$0xf] %vm258_vm0, %v8658_v0  ;;  %v420_v6 = vrot.slane %v416_v57, 4  ;;  %v448_v7 = vshrl.u32 %v8286_v58, 16  ;;  %v427_v10 = vor.u32 %v425_v54, %v424_v61 }
  0x2f   : > { %3983 = vst.msk [vmem:[#allocation3 + $0x30] sm:$0xf] %vm258_vm0, %v8658_v0  ;;  %3984 = vst.msk [vmem:[#allocation3 + $0x34] sm:$0xf] %vm258_vm0, %v8658_v0  ;;  %v451_v8 = vshll.u32 %v8286_v58, 16  ;;  %v429_v15 = vrot.slane %v424_v61, 4 }
  0x30   : > { %3985 = vst.msk [vmem:[#allocation3 + $0x38] sm:$0x1] %vm261_vm1, %v8658_v0  ;;  %3988 = vst.msk [vmem:[#allocation3 + $0x44] sm:$0x1] %vm261_vm1, %v8658_v0  ;;  %v750_v9 = vld [vmem:[#allocation2 + $0x20] sm:$0x1] }
  0x31   : > { %3986 = vst.msk [vmem:[#allocation3 + $0x3c] sm:$0xf] %vm258_vm0, %v8658_v0  ;;  %3987 = vst.msk [vmem:[#allocation3 + $0x40] sm:$0xf] %vm258_vm0, %v8658_v0  ;;  %v233_v16 = vld [vmem:[%s8937_s23 + $0x38] sm:$0xff]  ;;  %v234_v17 = vld [vmem:[%s8937_s23 + $0x40] sm:$0xff] }
  0x32   : > { %3989 = vst.msk [vmem:[#allocation3 + $0x48] sm:$0xf] %vm258_vm0, %v8658_v0  ;;  %3990 = vst.msk [vmem:[#allocation3 + $0x4c] sm:$0xf] %vm258_vm0, %v8658_v0  ;;  %v450_v19 = vrot.slane %v448_v7, 7  ;;  %v236_v23 = vld [vmem:[%s8937_s23 + $0x50] sm:$0xff]  ;;  %v9018_v36 = vpack.c.bf16 %v233_v16, %v233_v16 }
  0x33   : > { %3991 = vst.msk [vmem:[#allocation3 + $0x50] sm:$0x1] %vm261_vm1, %v8658_v0  ;;  %3994 = vst.msk [vmem:[#allocation3 + $0x5c] sm:$0x1] %vm261_vm1, %v8658_v0  ;;  %v9037_v53 = vpack.c.bf16 %v236_v23, %v236_v23  ;;  %v240_v58 = vld [vmem:[%s8937_s23 + $0x70] sm:$0xff]  ;;  %s8663_s28 = smov 40  }
  0x34   : > { %3992 = vst.msk [vmem:[#allocation3 + $0x54] sm:$0xf] %vm258_vm0, %v8658_v0  ;;  %3993 = vst.msk [vmem:[#allocation3 + $0x58] sm:$0xf] %vm258_vm0, %v8658_v0  ;;  %v453_v28 = vor.u32 %v451_v8, %v450_v19  ;;  %s8664_s29 = smov 64   ;;  %s8665_s30 = smov 32  }
  0x35   : > { %3995 = vst.msk [vmem:[#allocation3 + $0x60] sm:$0xf] %vm258_vm0, %v8658_v0  ;;  %3996 = vst.msk [vmem:[#allocation3 + $0x64] sm:$0xf] %vm258_vm0, %v8658_v0  ;;  %s8666_s6 = smov 56   ;;  %vm3418_vm14 = vcmask 64512  }
  0x36   : > { %3997 = vst.msk [vmem:[#allocation3 + $0x68] sm:$0x1] %vm261_vm1, %v8658_v0  ;;  %4000 = vst.msk [vmem:[#allocation3 + $0x74] sm:$0x1] %vm261_vm1, %v8658_v0  ;;  %vm3467_vm15 = vcmask 130048  }
  0x37   : > { %3998 = vst.msk [vmem:[#allocation3 + $0x6c] sm:$0xf] %vm258_vm0, %v8658_v0  ;;  %3999 = vst.msk [vmem:[#allocation3 + $0x70] sm:$0xf] %vm258_vm0, %v8658_v0 }
  0x38   : > { %4001 = vst.msk [vmem:[#allocation3 + $0x78] sm:$0xf] %vm258_vm0, %v8658_v0  ;;  %4002 = vst.msk [vmem:[#allocation3 + $0x7c] sm:$0xf] %vm258_vm0, %v8658_v0 }
  0x39   : > { %4003 = vst.msk [vmem:[#allocation3 + $0x80] sm:$0x1] %vm261_vm1, %v8658_v0  ;;  %4006 = vst.msk [vmem:[#allocation3 + $0x8c] sm:$0x1] %vm261_vm1, %v8658_v0 }
  0x3a   : > { %4004 = vst.msk [vmem:[#allocation3 + $0x84] sm:$0xf] %vm258_vm0, %v8658_v0  ;;  %4005 = vst.msk [vmem:[#allocation3 + $0x88] sm:$0xf] %vm258_vm0, %v8658_v0 }
  0x3b   : > { %4007 = vst.msk [vmem:[#allocation3 + $0x90] sm:$0xf] %vm258_vm0, %v8658_v0  ;;  %4008 = vst.msk [vmem:[#allocation3 + $0x94] sm:$0xf] %vm258_vm0, %v8658_v0 }
  0x3c   : > { %4009 = vst.msk [vmem:[#allocation3 + $0x98] sm:$0x1] %vm261_vm1, %v8658_v0  ;;  %4012 = vst.msk [vmem:[#allocation3 + $0xa4] sm:$0x1] %vm261_vm1, %v8658_v0 }
  0x3d   : > { %4010 = vst.msk [vmem:[#allocation3 + $0x9c] sm:$0xf] %vm258_vm0, %v8658_v0  ;;  %4011 = vst.msk [vmem:[#allocation3 + $0xa0] sm:$0xf] %vm258_vm0, %v8658_v0 }
  0x3e   : > { %4013 = vst.msk [vmem:[#allocation3 + $0xa8] sm:$0xf] %vm258_vm0, %v8658_v0  ;;  %4014 = vst.msk [vmem:[#allocation3 + $0xac] sm:$0xf] %vm258_vm0, %v8658_v0 }
  0x3f   : > { %4015 = vst.msk [vmem:[#allocation3 + $0xb0] sm:$0x1] %vm261_vm1, %v8658_v0  ;;  %4018 = vst.msk [vmem:[#allocation3 + $0xbc] sm:$0x1] %vm261_vm1, %v8658_v0 }
  0x40   : > { %4016 = vst.msk [vmem:[#allocation3 + $0xb4] sm:$0xf] %vm258_vm0, %v8658_v0  ;;  %4017 = vst.msk [vmem:[#allocation3 + $0xb8] sm:$0xf] %vm258_vm0, %v8658_v0 }
  0x41   : > { %4019 = vst.msk [vmem:[#allocation3 + $0xc0] sm:$0xf] %vm258_vm0, %v8658_v0  ;;  %4020 = vst.msk [vmem:[#allocation3 + $0xc4] sm:$0xf] %vm258_vm0, %v8658_v0 }
  0x42   : > { %4021 = vst.msk [vmem:[#allocation3 + $0xc8] sm:$0x1] %vm261_vm1, %v8658_v0  ;;  %4024 = vst.msk [vmem:[#allocation3 + $0xd4] sm:$0x1] %vm261_vm1, %v8658_v0 }
  0x43   : > { %4022 = vst.msk [vmem:[#allocation3 + $0xcc] sm:$0xf] %vm258_vm0, %v8658_v0  ;;  %4023 = vst.msk [vmem:[#allocation3 + $0xd0] sm:$0xf] %vm258_vm0, %v8658_v0  ;;  %v743_v0 = vld [vmem:[#allocation2 + $0x14] sm:$0x1] }
  0x44   : > { %vm8928_vm7 = vmor %vm1350_vm2, %vm1351_vm3  ;;  %vm3533_vm2 = vcmask 261120   ;;  %vm3566_vm3 = vcmask 326656  }
  0x45   : > { %v1356_v20 = vsel %vm8928_vm7, %v7818_v11, %v1355_v12  ;;  %v1359_v29 = vsel %vm8928_vm7, %v1357_v21, %v1358_v13  ;;  %vm8958_vm10 = vmand %vm258_vm0, %vm735_vm9  ;;  %v456_v11 = vshrl.u32 %v8287_v63, 16  ;;  %v459_v12 = vshll.u32 %v8287_v63, 16  ;;  %v753_v13 = vld [vmem:[#allocation2 + $0x24] sm:$0xf] }
  0x46   : > { %v7898_v33 = vcombine.low %v1356_v20, %v1359_v29  ;;  %vm8964_vm11 = vmor %vm899_vm4, %vm900_vm5  ;;  %v747_v52 = vsel %vm8958_vm10, %v436_v40, %v746_v38  ;;  %v738_v18 = vsel %vm8958_vm10, %v419_v4, %v737_v62  ;;  %v446_v20 = vrot.slane %v441_v42, 4 }
  0x47   : > { %vm8972_vm12 = vmor %vm410_vm6, %vm411_vm8  ;;  %v915_v55 = vsel %vm8964_vm11, %v910_v45, %v914_v22  ;;  %v925_v56 = vsel %vm8964_vm11, %v920_v46, %v924_v27  ;;  %748 = vst [vmem:[#allocation2 + $0x18] sm:$0xf] %v747_v52  ;;  %v8998_v21 = vpack.c.bf16 %v232_v2, %v232_v2  ;;  %v235_v22 = vld [vmem:[%s8937_s23 + $0x48] sm:$0xff]  ;;  %v9004_v25 = vrot.slane %v456_v11, 7  ;;  %v237_v27 = vld [vmem:[%s8937_s23 + $0x58] sm:$0xff] }
  0x48   : > { %2874 = vrot.lane.b32.xlu1 %v7898_v33, %s8659_s24  ;;  %v7882_v59 = vcombine.low %v915_v55, %v925_v56  ;;  %v445_v60 = vsel %vm8972_vm12, %v437_v41, %v444_v51  ;;  %vm8988_vm13 = vmand %vm261_vm1, %vm410_vm6  ;;  %v428_v24 = vsel %vm8972_vm12, %v420_v6, %v427_v10  ;;  %739 = vst [vmem:[#allocation2 + $0xc] sm:$0xf] %v738_v18  ;;  %v454_v29 = vrot.slane %v450_v19, 4  ;;  %v238_v45 = vld [vmem:[%s8937_s23 + $0x60] sm:$0xff]  ;;  %v239_v46 = vld [vmem:[%s8937_s23 + $0x68] sm:$0xff] }
  0x49   : > { %749 = vst.msk [vmem:[#allocation2 + $0x1c] sm:$0xf] %vm258_vm0, %v445_v60  ;;  %v744_v26 = vsel %vm8988_vm13, %v429_v15, %v743_v0  ;;  %740 = vst.msk [vmem:[#allocation2 + $0x10] sm:$0xf] %vm258_vm0, %v428_v24  ;;  %v751_v30 = vsel %vm8988_vm13, %v446_v20, %v750_v9  ;;  %v465_v31 = vshrl.u32 %v8998_v21, 16  ;;  %v461_v33 = vor.u32 %v459_v12, %v9004_v25 }
  0x4a   : > { %2794 = vrot.lane.b32.xlu0 %v7882_v59, %s8660_s25  ;;  %745 = vst [vmem:[#allocation2 + $0x14] sm:$0x1] %v744_v26  ;;  %752 = vst [vmem:[#allocation2 + $0x20] sm:$0x1] %v751_v30  ;;  %v9020_v38 = vpack.c.bf16 %v234_v17, %v234_v17  ;;  %v9022_v40 = vpack.c.bf16 %v235_v22, %v235_v22  ;;  %v754_v43 = vsel %vm8958_vm10, %v453_v28, %v753_v13  ;;  %v241_v22 = vld [vmem:[%s8937_s23 + $0x78] sm:$0xff]  ;;  %vm3500_vm1 = vcmask 195584  }
  0x4b   : > { %v462_v49 = vsel %vm8972_vm12, %v454_v29, %v461_v33  ;;  %755 = vst [vmem:[#allocation2 + $0x24] sm:$0xf] %v754_v43  ;;  %v9045_v57 = vpack.c.bf16 %v237_v27, %v237_v27  ;;  %v9059_v7 = vpack.c.bf16 %v238_v45, %v238_v45  ;;  %v9061_v8 = vpack.c.bf16 %v239_v46, %v239_v46 }
  0x4c   : > { %756 = vst.msk [vmem:[#allocation2 + $0x28] sm:$0xf] %vm258_vm0, %v462_v49  ;;  %v9069_v15 = vpack.c.bf16 %v240_v58, %v240_v58  ;;  %v9095_v49 = vpack.c.bf16 %v241_v22, %v241_v22  ;;  %vm3774_vm4 = vcmask 1043456   ;;  %vm3599_vm5 = vcmask 392192  }
  0x4d   : > { %vm3632_vm6 = vcmask 457728   ;;  %vm3665_vm8 = vcmask 523264   ;;  %vm3741_vm9 = vcmask 588800  }
  0x4e   : > { %v1467_v32 = vld [vmem:[#allocation2 + $0x18] sm:$0xf] }
  0x4f   : > { %v9014_v34 = vld [vmem:[#allocation2 + $0x18] sm:$0xf]  ;;  %v1538_v41 = vshrl.u32 %v1467_v32, 16  ;;  %v1541_v42 = vshll.u32 %v1467_v32, 16  ;;  %v1465_v63 = vld [vmem:[#allocation2 + $0xc] sm:$0xf] }
  0x50   : > { %v9016_v35 = vld [vmem:[#allocation2 + $0x18] sm:$0xe]  ;;  %v2123_v44 = vshrl.u32 %v9014_v34, 16  ;;  %v9029_v48 = vld [vmem:[#allocation2 + $0x1c] sm:$0xf]  ;;  %v2126_v51 = vshll.u32 %v9014_v34, 16 }
  0x51   : > { %v9033_v50 = vld [vmem:[#allocation2 + $0x1c] sm:$0xf]  ;;  %v7850_v52 = vrot.slane %v9016_v35, 9  ;;  %v7915_v54 = vcombine.low %v1467_v32, %v9029_v48  ;;  %v9040_v55 = vrot.slane %v1538_v41, 4  ;;  %v9042_v56 = vrot.slane %v1541_v42, 5 }
  0x52   : > { %v1551_v59 = vshrl.u32 %v9029_v48, 16  ;;  %v9049_v60 = vrot.slane %v2123_v44, 4  ;;  %v9051_v61 = vrot.slane %v2126_v51, 5  ;;  %v2136_v62 = vshrl.u32 %v9033_v50, 16  ;;  %v1897_v2 = vld [vmem:[#allocation2 + $0xc] sm:$0xe] }
  0x53   : > { %2972 = vrot.lane.b32.xlu1 %v7915_v54, %s8661_s26  ;;  %v7962_v0 = vcombine.low %v9014_v34, %v9033_v50  ;;  %v1287_v4 = vld [vmem:[#allocation2 + $0xc] sm:$0xe]  ;;  %v1544_v6 = vor.u32 %v9042_v56, %v9040_v55  ;;  %v9063_v9 = vld [vmem:[#allocation2 + $0x10] sm:$0xf]  ;;  %v1514_v10 = vshrl.u32 %v1465_v63, 16  ;;  %v1517_v11 = vshll.u32 %v1465_v63, 16 }
  0x54   : > { %v9065_v12 = vld [vmem:[#allocation2 + $0x14] sm:$0x1]  ;;  %v2129_v13 = vor.u32 %v9051_v61, %v9049_v60  ;;  %v1527_v16 = vshrl.u32 %v9063_v9, 16  ;;  %v7914_v17 = vcombine.low %v1465_v63, %v9063_v9  ;;  %v7834_v18 = vrot.slane %v1897_v2, 9  ;;  %v9074_v20 = vld [vmem:[#allocation2 + $0x10] sm:$0xf] }
  0x55   : > { %v1963_v19 = vrot.slane %v9063_v9, 5  ;;  %v9077_v23 = vrot.slane %v1514_v10, 4  ;;  %v9079_v24 = vrot.slane %v1517_v11, 5  ;;  %v1966_v26 = vrot.slane %v9065_v12, 5  ;;  %v9082_v27 = vld [vmem:[#allocation2 + $0x14] sm:$0x1] }
  0x56   : > { %v7819_v28 = vrot.slane %v1287_v4, 9  ;;  %v1898_v29 = vld [vmem:[#allocation2 + $0x18] sm:$0xe]  ;;  %2970 = vrot.lane.b32.xlu0 %v7914_v17, %s8661_s26  ;;  %v2076_v30 = vld [vmem:[#allocation2 + $0x24] sm:$0xf]  ;;  %v1362_v34 = vrot.slane %v9074_v20, 5 }
  0x57   : > { %v1964_v32 = vsel %vm8928_vm7, %v7834_v18, %v1963_v19  ;;  %v1965_v33 = vrot.slane %v1963_v19, 4  ;;  %v1365_v41 = vrot.slane %v9082_v27, 5  ;;  %v9089_v42 = vld [vmem:[#allocation2 + $0x28] sm:$0xf]  ;;  %v2147_v43 = vshrl.u32 %v2076_v30, 16 }
  0x58   : > { %v2150_v44 = vshll.u32 %v2076_v30, 16  ;;  %v9091_v45 = vld [vmem:[#allocation2 + $0x20] sm:$0x1]  ;;  %v1520_v46 = vor.u32 %v9079_v24, %v9077_v23  ;;  %v2160_v51 = vshrl.u32 %v9089_v42, 16  ;;  %v7963_v54 = vcombine.low %v2076_v30, %v9089_v42  ;;  %v2507_v63 = vld [vmem:[#allocation2 + $0x24] sm:$0xe] }
  0x59   : > { %v1967_v55 = vsel %vm8928_vm7, %v1965_v33, %v1966_v26  ;;  %v1363_v56 = vsel %vm8928_vm7, %v7819_v28, %v1362_v34  ;;  %v1498_v58 = vld [vmem:[#allocation2 + $0x20] sm:$0x1]  ;;  %v2149_v2 = vrot.slane %v2147_v43, 4  ;;  %v1364_v11 = vrot.slane %v1362_v34, 4  ;;  %v757_v26 = vld [vmem:[#allocation2 + $0x2c] sm:$0x1] }
  0x5a   : > { %v2152_v4 = vrot.slane %v2150_v44, 5  ;;  %v7946_v10 = vcombine.low %v1964_v32, %v1967_v55  ;;  %3228 = vrot.lane.b32.xlu1 %v7963_v54, %s8662_s27  ;;  %3226 = vrot.lane.b32.xlu0 %v7962_v0, %s8662_s27  ;;  %v2572_v17 = vrot.slane %v9033_v50, 5  ;;  %v2575_v18 = vrot.slane %v9091_v45, 5 }
  0x5b   : > { %v7835_v19 = vrot.slane %v1898_v29, 9  ;;  %v1970_v22 = vrot.slane %v9029_v48, 5  ;;  %v1366_v28 = vsel %vm8928_vm7, %v1364_v11, %v1365_v41  ;;  %v1973_v30 = vrot.slane %v1498_v58, 5 }
  0x5c   : > { %v463_v32 = vrot.slane %v9004_v25, 4  ;;  %v7851_v33 = vrot.slane %v2507_v63, 9  ;;  %v7899_v34 = vcombine.low %v1363_v56, %v1366_v28  ;;  %v2573_v0 = vsel %vm8928_vm7, %v7850_v52, %v2572_v17  ;;  %v9127_v63 = vld [vmem:[#allocation2 + $0xc] sm:$0xf]  ;;  %v855_v28 = vld [vmem:[#allocation2 + $0x18] sm:$0xf] }
  0x5d   : > { %v2574_v43 = vrot.slane %v2572_v17, 4  ;;  %v1971_v29 = vsel %vm8928_vm7, %v7835_v19, %v1970_v22  ;;  %v1972_v44 = vrot.slane %v1970_v22, 4  ;;  %v2579_v41 = vrot.slane %v9089_v42, 5 }
  0x5e   : > { %v758_v54 = vsel %vm8988_vm13, %v463_v32, %v757_v26  ;;  %v1545_v55 = vrot.slane %v1544_v6, 4  ;;  %3130 = vrot.lane.b32.xlu0 %v7946_v10, %s8663_s28  ;;  %2876 = vrot.lane.b32.xlu1 %v7899_v34, %s8659_s24  ;;  %v1547_v35 = vshll.u32 %v9029_v48, 16  ;;  %v1553_v52 = vrot.slane %v1551_v59, 4 }
  0x5f   : > { %v2576_v25 = vsel %vm8928_vm7, %v2574_v43, %v2575_v18  ;;  %759 = vst [vmem:[#allocation2 + $0x2c] sm:$0x1] %v758_v54  ;;  %v1557_v56 = vshll.u32 %v1498_v58, 16  ;;  %v1974_v6 = vsel %vm8928_vm7, %v1972_v44, %v1973_v30  ;;  %v2580_v10 = vsel %vm8928_vm7, %v7851_v33, %v2579_v41 }
  0x60   : > { %v7994_v11 = vcombine.low %v2573_v0, %v2576_v25  ;;  %v2581_v17 = vrot.slane %v2579_v41, 4  ;;  %v7947_v19 = vcombine.low %v1971_v29, %v1974_v6  ;;  %v1549_v22 = vrot.slane %v1547_v35, 5 }
  0x61   : > { %v1559_v18 = vrot.slane %v1557_v56, 5  ;;  %v2153_v26 = vor.u32 %v2152_v4, %v2149_v2  ;;  %v2156_v32 = vshll.u32 %v9089_v42, 16  ;;  %v2162_v48 = vrot.slane %v2160_v51, 4 }
  0x62   : > { %v927_v59 = vshrl.u32 %v9127_v63, 16  ;;  %v930_v58 = vshll.u32 %v9127_v63, 16  ;;  %3386 = vrot.lane.b32.xlu0 %v7994_v11, %s8664_s29  ;;  %3132 = vrot.lane.b32.xlu1 %v7947_v19, %s8663_s28  ;;  %v1550_v30 = vsel %vm8964_vm11, %v1545_v55, %v1549_v22  ;;  %v1554_v33 = vor.u32 %v1553_v52, %v1549_v22  ;;  %v9147_v22 = vld [vmem:[#allocation2 + $0x1c] sm:$0xf] }
  0x63   : > { %v2154_v34 = vrot.slane %v2153_v26, 4  ;;  %v936_v2 = vshll.u32 %v9074_v20, 16  ;;  %v2158_v4 = vrot.slane %v2156_v32, 5  ;;  %v940_v51 = vshrl.u32 %v9074_v20, 16 }
  0x64   : > { %v929_v0 = vrot.slane %v927_v59, 4  ;;  %v932_v42 = vrot.slane %v930_v58, 5  ;;  %v1555_v43 = vrot.slane %v1554_v33, 4  ;;  %v946_v44 = vshll.u32 %v9082_v27, 16  ;;  %v9149_v59 = vld [vmem:[#allocation2 + $0x20] sm:$0x1] }
  0x65   : > { %v938_v29 = vrot.slane %v936_v2, 5  ;;  %v951_v54 = vshrl.u32 %v855_v28, 16  ;;  %v2159_v25 = vsel %vm8964_vm11, %v2154_v34, %v2158_v4  ;;  %v2163_v35 = vor.u32 %v2162_v48, %v2158_v4 }
  0x66   : > { %v2107_v41 = vld [vmem:[#allocation2 + $0x2c] sm:$0x1]  ;;  %v933_v55 = vor.u32 %v932_v42, %v929_v0  ;;  %v942_v52 = vrot.slane %v940_v51, 4  ;;  %v1560_v11 = vsel %vm8964_vm11, %v1555_v43, %v1559_v18  ;;  %v948_v19 = vrot.slane %v946_v44, 5  ;;  %v857_v43 = vld [vmem:[#allocation2 + $0x24] sm:$0xf] }
  0x67   : > { %v2582_v56 = vrot.slane %v2107_v41, 5  ;;  %v2166_v6 = vshll.u32 %v2107_v41, 16  ;;  %v7931_v20 = vcombine.low %v1550_v30, %v1560_v11  ;;  %v2164_v26 = vrot.slane %v2163_v35, 4  ;;  %v886_v23 = vld [vmem:[#allocation2 + $0x2c] sm:$0x1] }
  0x68   : > { %v934_v32 = vrot.slane %v933_v55, 4  ;;  %v943_v27 = vor.u32 %v942_v52, %v938_v29  ;;  %v953_v33 = vrot.slane %v951_v54, 4  ;;  %v954_v34 = vshll.u32 %v855_v28, 16  ;;  %v858_v54 = vld [vmem:[#allocation2 + $0x28] sm:$0xf] }
  0x69   : > { %v2583_v58 = vsel %vm8928_vm7, %v2581_v17, %v2582_v56  ;;  %v2168_v48 = vrot.slane %v2166_v6, 5  ;;  %3052 = vrot.lane.b32.xlu1 %v7931_v20, %s8665_s30  ;;  %v960_v30 = vshll.u32 %v9147_v22, 16  ;;  %v964_v51 = vshrl.u32 %v9147_v22, 16 }
  0x6a   : > { %v7995_v2 = vcombine.low %v2580_v10, %v2583_v58  ;;  %v939_v18 = vsel %vm8964_vm11, %v934_v32, %v938_v29  ;;  %v944_v4 = vrot.slane %v943_v27, 4  ;;  %v956_v42 = vrot.slane %v954_v34, 5 }
  0x6b   : > { %v2169_v0 = vsel %vm8964_vm11, %v2164_v26, %v2168_v48  ;;  %v970_v17 = vshll.u32 %v9149_v59, 16  ;;  %v962_v44 = vrot.slane %v960_v30, 5  ;;  %v1521_v29 = vrot.slane %v1520_v46, 4 }
  0x6c   : > { %3388 = vrot.lane.b32.xlu0 %v7995_v2, %s8664_s29  ;;  %v7979_v10 = vcombine.low %v2159_v25, %v2169_v0  ;;  %v949_v28 = vsel %vm8964_vm11, %v944_v4, %v948_v19  ;;  %v957_v35 = vor.u32 %v956_v42, %v953_v33  ;;  %v966_v55 = vrot.slane %v964_v51, 4  ;;  %v1289_v51 = vld [vmem:[#allocation2 + $0x24] sm:$0xe] }
  0x6d   : > { %v7883_v41 = vcombine.low %v939_v18, %v949_v28  ;;  %v972_v52 = vrot.slane %v970_v17, 5  ;;  %v1523_v56 = vshll.u32 %v9063_v9, 16  ;;  %v1529_v25 = vrot.slane %v1527_v16, 4 }
  0x6e   : > { %3308 = vrot.lane.b32.xlu1 %v7979_v10, %s8666_s6  ;;  %v1533_v11 = vshll.u32 %v9065_v12, 16  ;;  %v975_v6 = vshrl.u32 %v857_v43, 16  ;;  %v958_v19 = vrot.slane %v957_v35, 4  ;;  %v967_v20 = vor.u32 %v966_v55, %v962_v44 }
  0x6f   : > { %v978_v24 = vshll.u32 %v857_v43, 16  ;;  %v984_v46 = vshll.u32 %v858_v54, 16  ;;  %v1525_v26 = vrot.slane %v1523_v56, 5  ;;  %v988_v58 = vshrl.u32 %v858_v54, 16 }
  0x70   : > { %2796 = vrot.lane.b32.xlu0 %v7883_v41, %s8660_s25  ;;  %v1535_v32 = vrot.slane %v1533_v11, 5  ;;  %v977_v27 = vrot.slane %v975_v6, 4  ;;  %v963_v48 = vsel %vm8964_vm11, %v958_v19, %v962_v44  ;;  %v968_v33 = vrot.slane %v967_v20, 4 }
  0x71   : > { %v980_v9 = vrot.slane %v978_v24, 5  ;;  %v986_v16 = vrot.slane %v984_v46, 5  ;;  %v1526_v12 = vsel %vm8964_vm11, %v1521_v29, %v1525_v26  ;;  %v1530_v34 = vor.u32 %v1529_v25, %v1525_v26 }
  0x72   : > { %v990_v2 = vrot.slane %v988_v58, 4  ;;  %v994_v18 = vshll.u32 %v886_v23, 16  ;;  %v973_v4 = vsel %vm8964_vm11, %v968_v33, %v972_v52  ;;  %v2130_v0 = vrot.slane %v2129_v13, 4  ;;  %v1288_v52 = vld [vmem:[#allocation2 + $0x18] sm:$0xe] }
  0x73   : > { %v981_v30 = vor.u32 %v980_v9, %v977_v27  ;;  %v2132_v42 = vshll.u32 %v9033_v50, 16  ;;  %v7884_v17 = vcombine.low %v963_v48, %v973_v4  ;;  %v1531_v43 = vrot.slane %v1530_v34, 4  ;;  %v1469_v48 = vld [vmem:[#allocation2 + $0x24] sm:$0xf]  ;;  %v760_v34 = vld [vmem:[#allocation2 + $0x30] sm:$0xf] }
  0x74   : > { %v991_v10 = vor.u32 %v990_v2, %v986_v16  ;;  %v996_v28 = vrot.slane %v994_v18, 5  ;;  %v2138_v41 = vrot.slane %v2136_v62, 4  ;;  %v2142_v35 = vshll.u32 %v9091_v45, 16 }
  0x75   : > { %v982_v44 = vrot.slane %v981_v30, 4  ;;  %v2134_v29 = vrot.slane %v2132_v42, 5  ;;  %2798 = vrot.lane.b32.xlu1 %v7884_v17, %s8660_s25  ;;  %v1536_v60 = vsel %vm8964_vm11, %v1531_v43, %v1535_v32  ;;  %v7821_v13 = vrot.slane %v1289_v51, 9  ;;  %v1499_v17 = vld [vmem:[#allocation2 + $0x2c] sm:$0x1] }
  0x76   : > { %v992_v61 = vrot.slane %v991_v10, 4  ;;  %v1376_v55 = vrot.slane %v858_v54, 5  ;;  %v7930_v56 = vcombine.low %v1526_v12, %v1536_v60  ;;  %v2144_v45 = vrot.slane %v2142_v35, 5  ;;  %v1899_v43 = vld [vmem:[#allocation2 + $0x24] sm:$0xe] }
  0x77   : > { %v987_v25 = vsel %vm8964_vm11, %v982_v44, %v986_v16  ;;  %v2135_v11 = vsel %vm8964_vm11, %v2130_v0, %v2134_v29  ;;  %v2139_v50 = vor.u32 %v2138_v41, %v2134_v29  ;;  %v1379_v24 = vrot.slane %v886_v23, 5  ;;  %v1470_v16 = vld [vmem:[#allocation2 + $0x28] sm:$0xf]  ;;  %v764_v41 = vld [vmem:[#allocation2 + $0x38] sm:$0x1] }
  0x78   : > { %v997_v62 = vsel %vm8964_vm11, %v992_v61, %v996_v28  ;;  %v1377_v6 = vsel %vm8928_vm7, %v7821_v13, %v1376_v55  ;;  %v1378_v19 = vrot.slane %v1376_v55, 4  ;;  %3050 = vrot.lane.b32.xlu0 %v7930_v56, %s8665_s30  ;;  %v7820_v46 = vrot.slane %v1288_v52, 9 }
  0x79   : > { %v7885_v54 = vcombine.low %v987_v25, %v997_v62  ;;  %v2140_v20 = vrot.slane %v2139_v50, 4  ;;  %v1369_v26 = vrot.slane %v9147_v22, 5  ;;  %v1372_v32 = vrot.slane %v9149_v59, 5 }
  0x7a   : > { %v467_v27 = vrot.slane %v465_v31, 7  ;;  %v468_v58 = vshll.u32 %v8998_v21, 16  ;;  %v1380_v9 = vsel %vm8928_vm7, %v1378_v19, %v1379_v24  ;;  %v473_v23 = vshrl.u32 %v9018_v36, 16 }
  0x7b   : > { %2800 = vrot.lane.b32.xlu1 %v7885_v54, %s8660_s25  ;;  %v2145_v33 = vsel %vm8964_vm11, %v2140_v20, %v2144_v45  ;;  %v476_v22 = vshll.u32 %v9018_v36, 16  ;;  %v7901_v12 = vcombine.low %v1377_v6, %v1380_v9  ;;  %v1370_v31 = vsel %vm8928_vm7, %v7820_v46, %v1369_v26 }
  0x7c   : > { %v7978_v59 = vcombine.low %v2135_v11, %v2145_v33  ;;  %v1371_v21 = vrot.slane %v1369_v26, 4  ;;  %v470_v2 = vor.u32 %v468_v58, %v467_v27  ;;  %v471_v18 = vrot.slane %v467_v27, 4  ;;  %v8507_v27 = vld [vmem:[%s12702_s1] sm:$0xff]  }
  0x7d   : > { %v475_v4 = vrot.slane %v473_v23, 7  ;;  %v1562_v30 = vshrl.u32 %v1469_v48, 16  ;;  %v1565_v42 = vshll.u32 %v1469_v48, 16  ;;  %v1575_v51 = vshrl.u32 %v1470_v16, 16  ;;  %8388 = vmatprep.subr.bf16.mxu0 %v8507_v27 }
  0x7e   : > { %3306 = vrot.lane.b32.xlu0 %v7978_v59, %s8666_s6  ;;  %v1373_v0 = vsel %vm8928_vm7, %v1371_v21, %v1372_v32  ;;  %v7916_v36 = vcombine.low %v1469_v48, %v1470_v16  ;;  %v761_v44 = vsel %vm8958_vm10, %v470_v2, %v760_v34  ;;  %v1571_v61 = vshll.u32 %v1470_v16, 16  ;;  %v767_v59 = vld [vmem:[#allocation2 + $0x3c] sm:$0xf]  ;;  %8389 = vmatpush3.bf16.msra.mxu0 %v8507_v27 }
  0x7f   : > { %2880 = vrot.lane.b32.xlu1 %v7901_v12, %s8659_s24  ;;  %v7900_v10 = vcombine.low %v1370_v31, %v1373_v0  ;;  %v478_v28 = vor.u32 %v476_v22, %v475_v4  ;;  %v1564_v29 = vrot.slane %v1562_v30, 4  ;;  %762 = vst [vmem:[#allocation2 + $0x30] sm:$0xf] %v761_v44  ;;  %v1567_v35 = vrot.slane %v1565_v42, 5 }
  0x80   : > { %v480_v60 = vrot.slane %v475_v4, 4  ;;  %v1577_v13 = vrot.slane %v1575_v51, 4  ;;  %v1581_v52 = vshll.u32 %v1499_v17, 16  ;;  %v7836_v56 = vrot.slane %v1899_v43, 9  ;;  %v8508_v51 = vld [vmem:[%s12702_s1 + $0x8] sm:$0xff]  }
  0x81   : > { %v479_v55 = vsel %vm8972_vm12, %v471_v18, %v478_v28  ;;  %v1977_v25 = vrot.slane %v1470_v16, 5  ;;  %v1568_v50 = vor.u32 %v1567_v35, %v1564_v29  ;;  %v1573_v62 = vrot.slane %v1571_v61, 5  ;;  %8390 = vmatprep.subr.bf16.mxu0 %v8508_v51 }
  0x82   : > { %2878 = vrot.lane.b32.xlu0 %v7900_v10, %s8659_s24  ;;  %763 = vst.msk [vmem:[#allocation2 + $0x34] sm:$0xf] %vm258_vm0, %v479_v55  ;;  %v765_v11 = vsel %vm8988_vm13, %v480_v60, %v764_v41  ;;  %v1980_v45 = vrot.slane %v1499_v17, 5  ;;  %v1583_v6 = vrot.slane %v1581_v52, 5  ;;  %v482_v20 = vshrl.u32 %v9020_v38, 16  ;;  %8391 = vmatpush3.bf16.msra.mxu0 %v8508_v51 }
  0x83   : > { %766 = vst [vmem:[#allocation2 + $0x38] sm:$0x1] %v765_v11  ;;  %v9226_v19 = vsel %vm8928_vm7, %v7836_v56, %v1977_v25  ;;  %v1979_v54 = vrot.slane %v1977_v25, 4  ;;  %v1569_v24 = vrot.slane %v1568_v50, 4  ;;  %v1578_v46 = vor.u32 %v1577_v13, %v1573_v62 }
  0x84   : > { %v485_v26 = vshll.u32 %v9020_v38, 16  ;;  %v490_v32 = vshrl.u32 %v9022_v40, 16  ;;  %v484_v48 = vrot.slane %v482_v20, 7  ;;  %v493_v33 = vshll.u32 %v9022_v40, 16  ;;  %v771_v20 = vld [vmem:[#allocation2 + $0x44] sm:$0x1] }
  0x85   : > { %v1981_v58 = vsel %vm8928_vm7, %v1979_v54, %v1980_v45  ;;  %v499_v9 = vshrl.u32 %v9037_v53, 16  ;;  %v1574_v23 = vsel %vm8964_vm11, %v1569_v24, %v1573_v62  ;;  %v1579_v38 = vrot.slane %v1578_v46, 4 }
  0x86   : > { %2974 = vrot.lane.b32.xlu0 %v7916_v36, %s8661_s26  ;;  %v7948_v22 = vcombine.low %v9226_v19, %v1981_v58  ;;  %v9242_v16 = vrot.slane %v490_v32, 7  ;;  %v1471_v12 = vld [vmem:[#allocation2 + $0x30] sm:$0xf]  ;;  %v487_v21 = vor.u32 %v485_v26, %v484_v48  ;;  %v488_v34 = vrot.slane %v484_v48, 4 }
  0x87   : > { %v1900_v31 = vld [vmem:[#allocation2 + $0x30] sm:$0xe]  ;;  %v9244_v2 = vrot.slane %v499_v9, 7  ;;  %v7866_v40 = vcombine.low %v8945_v14, %v8942_v5  ;;  %v1586_v18 = vshrl.u32 %v1471_v12, 16  ;;  %v1589_v4 = vshll.u32 %v1471_v12, 16 }
  0x88   : > { %v1584_v30 = vsel %vm8964_vm11, %v1579_v38, %v1583_v6  ;;  %v7837_v0 = vrot.slane %v1900_v31, 9  ;;  %v2078_v42 = vld [vmem:[#allocation2 + $0x30] sm:$0xf]  ;;  %v495_v43 = vor.u32 %v493_v33, %v9242_v16  ;;  %v768_v10 = vsel %vm8958_vm10, %v487_v21, %v767_v59 }
  0x89   : > { %v1472_v36 = vld [vmem:[#allocation2 + $0x34] sm:$0xf]  ;;  %v7932_v17 = vcombine.low %v1574_v23, %v1584_v30  ;;  %v2171_v28 = vshrl.u32 %v2078_v42, 16  ;;  %v1588_v44 = vrot.slane %v1586_v18, 4  ;;  %v1591_v29 = vrot.slane %v1589_v4, 5 }
  0x8a   : > { %v1599_v41 = vshrl.u32 %v1472_v36, 16  ;;  %v7917_v35 = vcombine.low %v1471_v12, %v1472_v36  ;;  %v1500_v60 = vld [vmem:[#allocation2 + $0x38] sm:$0x1]  ;;  %769 = vst [vmem:[#allocation2 + $0x3c] sm:$0xf] %v768_v10  ;;  %v1595_v61 = vshll.u32 %v1472_v36, 16  ;;  %v496_v50 = vsel %vm8972_vm12, %v488_v34, %v495_v43 }
  0x8b   : > { %v1605_v13 = vshll.u32 %v1500_v60, 16  ;;  %3054 = vrot.lane.b32.xlu0 %v7932_v17, %s8665_s30  ;;  %v1984_v55 = vrot.slane %v1472_v36, 5  ;;  %v1987_v52 = vrot.slane %v1500_v60, 5  ;;  %v9257_v56 = vld [vmem:[#allocation2 + $0x34] sm:$0xf]  ;;  %v1592_v25 = vor.u32 %v1591_v29, %v1588_v44 }
  0x8c   : > { %2976 = vrot.lane.b32.xlu1 %v7917_v35, %s8661_s26  ;;  %v1601_v11 = vrot.slane %v1599_v41, 4  ;;  %v2173_v62 = vrot.slane %v2171_v28, 4  ;;  %v1597_v45 = vrot.slane %v1595_v61, 5  ;;  %770 = vst.msk [vmem:[#allocation2 + $0x40] sm:$0xf] %vm258_vm0, %v496_v50  ;;  %v2174_v46 = vshll.u32 %v2078_v42, 16 }
  0x8d   : > { %v1607_v6 = vrot.slane %v1605_v13, 5  ;;  %v9264_v19 = vsel %vm8928_vm7, %v7837_v0, %v1984_v55  ;;  %v1986_v54 = vrot.slane %v1984_v55, 4  ;;  %v1593_v24 = vrot.slane %v1592_v25, 4  ;;  %v9269_v27 = vld [vmem:[#allocation2 + $0x38] sm:$0x1]  ;;  %v8511_v60 = vld [vmem:[%s12702_s1 + $0x10] sm:$0xff]  }
  0x8e   : > { %v2184_v26 = vshrl.u32 %v9257_v56, 16  ;;  %v7964_v32 = vcombine.low %v2078_v42, %v9257_v56  ;;  %v1602_v58 = vor.u32 %v1601_v11, %v1597_v45  ;;  %v497_v33 = vrot.slane %v9242_v16, 4  ;;  %v859_v23 = vld [vmem:[#allocation2 + $0x30] sm:$0xf]  ;;  %v9289_v43 = vld [vmem:[#allocation2 + $0x34] sm:$0xf]  ;;  %8392 = vmatprep.subr.bf16.mxu0 %v8511_v60 }
  0x8f   : > { %v1988_v48 = vsel %vm8928_vm7, %v1986_v54, %v1987_v52  ;;  %3134 = vrot.lane.b32.xlu0 %v7948_v22, %s8663_s28  ;;  %v2180_v9 = vshll.u32 %v9257_v56, 16  ;;  %v1598_v38 = vsel %vm8964_vm11, %v1593_v24, %v1597_v45  ;;  %v2176_v12 = vrot.slane %v2174_v46, 5  ;;  %v9303_v50 = vld [vmem:[#allocation2 + $0x38] sm:$0x1]  ;;  %8393 = vmatpush3.bf16.msra.mxu0 %v8511_v60 }
  0x90   : > { %v7949_v59 = vcombine.low %v9264_v19, %v1988_v48  ;;  %v2186_v31 = vrot.slane %v2184_v26, 4  ;;  %v1603_v21 = vrot.slane %v1602_v58, 4  ;;  %v772_v18 = vsel %vm8988_vm13, %v497_v33, %v771_v20 }
  0x91   : > { %v9279_v34 = vld [vmem:[#allocation2 + $0x3c] sm:$0xf]  ;;  %v2182_v4 = vrot.slane %v2180_v9, 5  ;;  %v2190_v22 = vshll.u32 %v9269_v27, 16  ;;  %773 = vst [vmem:[#allocation2 + $0x44] sm:$0x1] %v772_v18  ;;  %v2177_v0 = vor.u32 %v2176_v12, %v2173_v62 }
  0x92   : > { %v2195_v16 = vshrl.u32 %v9279_v34, 16  ;;  %v2198_v30 = vshll.u32 %v9279_v34, 16  ;;  %v999_v42 = vshrl.u32 %v859_v23, 16  ;;  %v1608_v51 = vsel %vm8964_vm11, %v1603_v21, %v1607_v6  ;;  %v2508_v6 = vld [vmem:[#allocation2 + $0x30] sm:$0xe] }
  0x93   : > { %3230 = vrot.lane.b32.xlu0 %v7964_v32, %s8662_s27  ;;  %v2187_v36 = vor.u32 %v2186_v31, %v2182_v4  ;;  %v2192_v17 = vrot.slane %v2190_v22, 5  ;;  %v1002_v10 = vshll.u32 %v859_v23, 16  ;;  %v7933_v28 = vcombine.low %v1598_v38, %v1608_v51  ;;  %v9291_v44 = vld [vmem:[#allocation2 + $0x40] sm:$0xf]  ;;  %v861_v48 = vld [vmem:[#allocation2 + $0x3c] sm:$0xf] }
  0x94   : > { %v2197_v29 = vrot.slane %v2195_v16, 4  ;;  %v2200_v41 = vrot.slane %v2198_v30, 5  ;;  %v2178_v35 = vrot.slane %v2177_v0, 4  ;;  %v2208_v61 = vshrl.u32 %v9291_v44, 16 }
  0x95   : > { %v7965_v13 = vcombine.low %v9279_v34, %v9291_v44  ;;  %v2204_v55 = vshll.u32 %v9291_v44, 16  ;;  %v2188_v52 = vrot.slane %v2187_v36, 4  ;;  %3056 = vrot.lane.b32.xlu1 %v7933_v28, %s8665_s30  ;;  %v1001_v62 = vrot.slane %v999_v42, 4 }
  0x96   : > { %v2201_v25 = vor.u32 %v2200_v41, %v2197_v29  ;;  %v2183_v11 = vsel %vm8964_vm11, %v2178_v35, %v2182_v4  ;;  %v1004_v45 = vrot.slane %v1002_v10, 5  ;;  %v2210_v54 = vrot.slane %v2208_v61, 4  ;;  %v862_v4 = vld [vmem:[#allocation2 + $0x40] sm:$0xf]  ;;  %v2509_v61 = vld [vmem:[#allocation2 + $0x3c] sm:$0xe] }
  0x97   : > { %v2206_v19 = vrot.slane %v2204_v55, 5  ;;  %v2193_v20 = vsel %vm8964_vm11, %v2188_v52, %v2192_v17  ;;  %v1008_v24 = vshll.u32 %v9289_v43, 16  ;;  %v1012_v58 = vshrl.u32 %v9289_v43, 16  ;;  %v8512_v55 = vld [vmem:[%s12702_s1 + $0x18] sm:$0xff]  }
  0x98   : > { %v2202_v46 = vrot.slane %v2201_v25, 4  ;;  %v7980_v26 = vcombine.low %v2183_v11, %v2193_v20  ;;  %v1005_v32 = vor.u32 %v1004_v45, %v1001_v62  ;;  %v9309_v33 = vld [vmem:[#allocation2 + $0x44] sm:$0x1]  ;;  %v1018_v38 = vshll.u32 %v9303_v50, 16  ;;  %v1291_v45 = vld [vmem:[#allocation2 + $0x3c] sm:$0xe]  ;;  %8394 = vmatprep.subr.bf16.mxu0 %v8512_v55 }
  0x99   : > { %v2211_v9 = vor.u32 %v2210_v54, %v2206_v19  ;;  %v1010_v23 = vrot.slane %v1008_v24, 5  ;;  %v7852_v12 = vrot.slane %v2508_v6, 9  ;;  %3136 = vrot.lane.b32.xlu1 %v7949_v59, %s8663_s28  ;;  %v2214_v21 = vshll.u32 %v9309_v33, 16  ;;  %v888_v28 = vld [vmem:[#allocation2 + $0x44] sm:$0x1]  ;;  %8395 = vmatpush3.bf16.msra.mxu0 %v8512_v55 }
  0x9a   : > { %v2207_v31 = vsel %vm8964_vm11, %v2202_v46, %v2206_v19  ;;  %3310 = vrot.lane.b32.xlu0 %v7980_v26, %s8666_s6  ;;  %v1006_v34 = vrot.slane %v1005_v32, 4  ;;  %v1014_v18 = vrot.slane %v1012_v58, 4  ;;  %v1020_v16 = vrot.slane %v1018_v38, 5  ;;  %v1290_v32 = vld [vmem:[#allocation2 + $0x30] sm:$0xe] }
  0x9b   : > { %v2212_v22 = vrot.slane %v2211_v9, 4  ;;  %v2586_v30 = vrot.slane %v9257_v56, 5  ;;  %v2589_v0 = vrot.slane %v9269_v27, 5  ;;  %v2216_v42 = vrot.slane %v2214_v21, 5 }
  0x9c   : > { %v1011_v59 = vsel %vm8964_vm11, %v1006_v34, %v1010_v23  ;;  %v1015_v51 = vor.u32 %v1014_v18, %v1010_v23  ;;  %v1023_v36 = vshrl.u32 %v861_v48, 16  ;;  %v1026_v29 = vshll.u32 %v861_v48, 16 }
  0x9d   : > { %v2587_v17 = vsel %vm8928_vm7, %v7852_v12, %v2586_v30  ;;  %v2588_v10 = vrot.slane %v2586_v30, 4  ;;  %v1032_v41 = vshll.u32 %v862_v4, 16  ;;  %3232 = vrot.lane.b32.xlu1 %v7965_v13, %s8662_s27  ;;  %v2217_v56 = vsel %vm8964_vm11, %v2212_v22, %v2216_v42 }
  0x9e   : > { %v1016_v35 = vrot.slane %v1015_v51, 4  ;;  %v1025_v27 = vrot.slane %v1023_v36, 4  ;;  %v1036_v60 = vshrl.u32 %v862_v4, 16  ;;  %v7981_v52 = vcombine.low %v2207_v31, %v2217_v56  ;;  %v1473_v51 = vld [vmem:[#allocation2 + $0x3c] sm:$0xf] }
  0x9f   : > { %v2590_v25 = vsel %vm8928_vm7, %v2588_v10, %v2589_v0  ;;  %v1028_v11 = vrot.slane %v1026_v29, 5  ;;  %v1034_v62 = vrot.slane %v1032_v41, 5  ;;  %v1042_v54 = vshll.u32 %v888_v28, 16  ;;  %v1474_v29 = vld [vmem:[#allocation2 + $0x40] sm:$0xf] }
  0xa0   : > { %v1021_v13 = vsel %vm8964_vm11, %v1016_v35, %v1020_v16  ;;  %v7996_v6 = vcombine.low %v2587_v17, %v2590_v25  ;;  %v1038_v19 = vrot.slane %v1036_v60, 4  ;;  %v7853_v46 = vrot.slane %v2509_v61, 9  ;;  %v774_v60 = vld [vmem:[#allocation2 + $0x48] sm:$0xf]  ;;  %v1501_v25 = vld [vmem:[#allocation2 + $0x44] sm:$0x1] }
  0xa1   : > { %v7886_v20 = vcombine.low %v1011_v59, %v1021_v13  ;;  %v1029_v24 = vor.u32 %v1028_v11, %v1025_v27  ;;  %v2593_v26 = vrot.slane %v9291_v44, 5  ;;  %3312 = vrot.lane.b32.xlu1 %v7981_v52, %s8666_s6  ;;  %v1044_v48 = vrot.slane %v1042_v54, 5  ;;  %v1901_v13 = vld [vmem:[#allocation2 + $0x3c] sm:$0xe]  ;;  %v778_v54 = vld [vmem:[#allocation2 + $0x50] sm:$0x1] }
  0xa2   : > { %3390 = vrot.lane.b32.xlu0 %v7996_v6, %s8664_s29  ;;  %v1039_v58 = vor.u32 %v1038_v19, %v1034_v62  ;;  %v2596_v9 = vrot.slane %v9309_v33, 5  ;;  %v7823_v23 = vrot.slane %v1291_v45, 9  ;;  %v1390_v21 = vrot.slane %v862_v4, 5 }
  0xa3   : > { %v1030_v38 = vrot.slane %v1029_v24, 4  ;;  %v2594_v12 = vsel %vm8928_vm7, %v7853_v46, %v2593_v26  ;;  %v2595_v31 = vrot.slane %v2593_v26, 4  ;;  %v1393_v18 = vrot.slane %v888_v28, 5 }
  0xa4   : > { %v1040_v34 = vrot.slane %v1039_v58, 4  ;;  %v7822_v44 = vrot.slane %v1290_v32, 9  ;;  %v1383_v22 = vrot.slane %v9289_v43, 5  ;;  %v1391_v33 = vsel %vm8928_vm7, %v7823_v23, %v1390_v21 }
  0xa5   : > { %v1035_v16 = vsel %vm8964_vm11, %v1030_v38, %v1034_v62  ;;  %v2597_v30 = vsel %vm8928_vm7, %v2595_v31, %v2596_v9  ;;  %v1392_v0 = vrot.slane %v1390_v21, 4  ;;  %2802 = vrot.lane.b32.xlu1 %v7886_v20, %s8660_s25  ;;  %v1386_v10 = vrot.slane %v9303_v50, 5 }
  0xa6   : > { %v1045_v4 = vsel %vm8964_vm11, %v1040_v34, %v1044_v48  ;;  %v7997_v42 = vcombine.low %v2594_v12, %v2597_v30  ;;  %v1384_v59 = vsel %vm8928_vm7, %v7822_v44, %v1383_v22  ;;  %v1385_v43 = vrot.slane %v1383_v22, 4  ;;  %v242_v22 = vld [vmem:[%s8937_s23 + $0x80] sm:$0xff] }
  0xa7   : > { %v7887_v36 = vcombine.low %v1035_v16, %v1045_v4  ;;  %v1394_v17 = vsel %vm8928_vm7, %v1392_v0, %v1393_v18  ;;  %v502_v28 = vshll.u32 %v9037_v53, 16  ;;  %v505_v56 = vrot.slane %v9244_v2, 4  ;;  %v243_v4 = vld [vmem:[%s8937_s23 + $0x88] sm:$0xff] }
  0xa8   : > { %3392 = vrot.lane.b32.xlu0 %v7997_v42, %s8664_s29  ;;  %v7903_v41 = vcombine.low %v1391_v33, %v1394_v17  ;;  %v507_v35 = vshrl.u32 %v9045_v57, 16  ;;  %v510_v27 = vshll.u32 %v9045_v57, 16  ;;  %v1387_v61 = vsel %vm8928_vm7, %v1385_v43, %v1386_v10  ;;  %v244_v42 = vld [vmem:[%s8937_s23 + $0x90] sm:$0xff] }
  0xa9   : > { %v504_v55 = vor.u32 %v502_v28, %v9244_v2  ;;  %v1610_v52 = vshrl.u32 %v1473_v51, 16  ;;  %v1613_v50 = vshll.u32 %v1473_v51, 16  ;;  %2804 = vrot.lane.b32.xlu1 %v7887_v36, %s8660_s25  ;;  %v7902_v53 = vcombine.low %v1384_v59, %v1387_v61 }
  0xaa   : > { %v509_v11 = vrot.slane %v507_v35, 7  ;;  %v1623_v62 = vshrl.u32 %v1474_v29, 16  ;;  %v7918_v45 = vcombine.low %v1473_v51, %v1474_v29  ;;  %v1619_v20 = vshll.u32 %v1474_v29, 16 }
  0xab   : > { %v775_v6 = vsel %vm8958_vm10, %v504_v55, %v774_v60  ;;  %v1612_v57 = vrot.slane %v1610_v52, 4  ;;  %v1615_v19 = vrot.slane %v1613_v50, 5  ;;  %v1629_v26 = vshll.u32 %v1501_v25, 16 }
  0xac   : > { %2882 = vrot.lane.b32.xlu0 %v7902_v53, %s8659_s24  ;;  %v512_v2 = vor.u32 %v510_v27, %v509_v11  ;;  %776 = vst [vmem:[#allocation2 + $0x48] sm:$0xf] %v775_v6  ;;  %v514_v24 = vrot.slane %v509_v11, 4  ;;  %v1625_v46 = vrot.slane %v1623_v62, 4  ;;  %v1621_v58 = vrot.slane %v1619_v20, 5 }
  0xad   : > { %v1616_v32 = vor.u32 %v1615_v19, %v1612_v57  ;;  %v7838_v48 = vrot.slane %v1901_v13, 9  ;;  %v1991_v9 = vrot.slane %v1474_v29, 5  ;;  %2884 = vrot.lane.b32.xlu1 %v7903_v41, %s8659_s24  ;;  %v1631_v12 = vrot.slane %v1629_v26, 5  ;;  %v245_v29 = vld [vmem:[%s8937_s23 + $0x98] sm:$0xff] }
  0xae   : > { %v513_v23 = vsel %vm8972_vm12, %v505_v56, %v512_v2  ;;  %v779_v38 = vsel %vm8988_vm13, %v514_v24, %v778_v54  ;;  %v1994_v31 = vrot.slane %v1501_v25, 5  ;;  %v1626_v34 = vor.u32 %v1625_v46, %v1621_v58  ;;  %v9403_v2 = vld [vmem:[#allocation2 + $0x10] sm:$0xf] }
  0xaf   : > { %777 = vst.msk [vmem:[#allocation2 + $0x4c] sm:$0xf] %vm258_vm0, %v513_v23  ;;  %780 = vst [vmem:[#allocation2 + $0x50] sm:$0x1] %v779_v38  ;;  %v1617_v21 = vrot.slane %v1616_v32, 4  ;;  %v1992_v18 = vsel %vm8928_vm7, %v7838_v48, %v1991_v9  ;;  %v1993_v44 = vrot.slane %v1991_v9, 4  ;;  %v9393_v27 = vpack.c.bf16 %v242_v22, %v242_v22 }
  0xb0   : > { %2978 = vrot.lane.b32.xlu0 %v7918_v45, %s8661_s26  ;;  %v516_v16 = vshrl.u32 %v9059_v7, 16  ;;  %v519_v30 = vshll.u32 %v9059_v7, 16  ;;  %v524_v33 = vshrl.u32 %v9061_v8, 16  ;;  %v527_v0 = vshll.u32 %v9061_v8, 16  ;;  %v781_v45 = vld [vmem:[#allocation2 + $0x54] sm:$0xf] }
  0xb1   : > { %v1622_v59 = vsel %vm8964_vm11, %v1617_v21, %v1621_v58  ;;  %v1627_v43 = vrot.slane %v1626_v34, 4  ;;  %v1995_v51 = vsel %vm8928_vm7, %v1993_v44, %v1994_v31  ;;  %v533_v36 = vshrl.u32 %v9069_v15, 16 }
  0xb2   : > { %v7950_v17 = vcombine.low %v1992_v18, %v1995_v51  ;;  %v518_v10 = vrot.slane %v516_v16, 7  ;;  %v9387_v28 = vrot.slane %v524_v33, 7  ;;  %v536_v7 = vshll.u32 %v9069_v15, 16  ;;  %v785_v33 = vld [vmem:[#allocation2 + $0x5c] sm:$0x1] }
  0xb3   : > { %v1475_v41 = vld [vmem:[#allocation2 + $0x48] sm:$0xf]  ;;  %v1632_v8 = vsel %vm8964_vm11, %v1627_v43, %v1631_v12  ;;  %v9395_v60 = vpack.c.bf16 %v243_v4, %v243_v4  ;;  %v9397_v61 = vpack.c.bf16 %v244_v42, %v244_v42  ;;  %v9401_v20 = vpack.c.bf16 %v245_v29, %v245_v29 }
  0xb4   : > { %v1902_v56 = vld [vmem:[#allocation2 + $0x48] sm:$0xe]  ;;  %v1634_v55 = vshrl.u32 %v1475_v41, 16  ;;  %v1637_v52 = vshll.u32 %v1475_v41, 16  ;;  %v7934_v50 = vcombine.low %v1622_v59, %v1632_v8  ;;  %v521_v53 = vor.u32 %v519_v30, %v518_v10 }
  0xb5   : > { %v2082_v35 = vld [vmem:[#allocation2 + $0x48] sm:$0xf]  ;;  %v7839_v25 = vrot.slane %v1902_v56, 9  ;;  %v522_v11 = vrot.slane %v518_v10, 4  ;;  %v529_v62 = vor.u32 %v527_v0, %v9387_v28  ;;  %v7867_v24 = vcombine.low %v9127_v63, %v9403_v2 }
  0xb6   : > { %v2219_v13 = vshrl.u32 %v2082_v35, 16  ;;  %v1476_v6 = vld [vmem:[#allocation2 + $0x4c] sm:$0xf]  ;;  %v1636_v57 = vrot.slane %v1634_v55, 4  ;;  %v1639_v19 = vrot.slane %v1637_v52, 5  ;;  %3058 = vrot.lane.b32.xlu0 %v7934_v50, %s8665_s30  ;;  %v782_v18 = vsel %vm8958_vm10, %v521_v53, %v781_v45 }
  0xb7   : > { %v1502_v54 = vld [vmem:[#allocation2 + $0x50] sm:$0x1]  ;;  %v1647_v46 = vshrl.u32 %v1476_v6, 16  ;;  %v7919_v26 = vcombine.low %v1475_v41, %v1476_v6  ;;  %v1643_v32 = vshll.u32 %v1476_v6, 16  ;;  %v1998_v9 = vrot.slane %v1476_v6, 5 }
  0xb8   : > { %v1653_v58 = vshll.u32 %v1502_v54, 16  ;;  %v1640_v48 = vor.u32 %v1639_v19, %v1636_v57  ;;  %v2001_v23 = vrot.slane %v1502_v54, 5  ;;  %v530_v38 = vsel %vm8972_vm12, %v522_v11, %v529_v62  ;;  %v9409_v12 = vld [vmem:[#allocation2 + $0x4c] sm:$0xf]  ;;  %783 = vst [vmem:[#allocation2 + $0x54] sm:$0xf] %v782_v18 }
  0xb9   : > { %2980 = vrot.lane.b32.xlu1 %v7919_v26, %s8661_s26  ;;  %v1645_v31 = vrot.slane %v1643_v32, 5  ;;  %v1649_v21 = vrot.slane %v1647_v46, 4  ;;  %784 = vst.msk [vmem:[#allocation2 + $0x58] sm:$0xf] %vm258_vm0, %v530_v38  ;;  %v1999_v22 = vsel %vm8928_vm7, %v7839_v25, %v1998_v9  ;;  %v2000_v16 = vrot.slane %v1998_v9, 4 }
  0xba   : > { %v1655_v34 = vrot.slane %v1653_v58, 5  ;;  %v1641_v44 = vrot.slane %v1640_v48, 4  ;;  %3138 = vrot.lane.b32.xlu0 %v7950_v17, %s8663_s28  ;;  %v2221_v30 = vrot.slane %v2219_v13, 4  ;;  %v2222_v4 = vshll.u32 %v2082_v35, 16  ;;  %v9420_v43 = vld [vmem:[#allocation2 + $0x50] sm:$0x1] }
  0xbb   : > { %v1650_v0 = vor.u32 %v1649_v21, %v1645_v31  ;;  %v2232_v42 = vshrl.u32 %v9409_v12, 16  ;;  %v7966_v59 = vcombine.low %v2082_v35, %v9409_v12  ;;  %v863_v51 = vld [vmem:[#allocation2 + $0x48] sm:$0xf]  ;;  %v2002_v29 = vsel %vm8928_vm7, %v2000_v16, %v2001_v23  ;;  %v9428_v8 = vld [vmem:[#allocation2 + $0x4c] sm:$0xf] }
  0xbc   : > { %v1646_v10 = vsel %vm8964_vm11, %v1641_v44, %v1645_v31  ;;  %v531_v17 = vrot.slane %v9387_v28, 4  ;;  %v2228_v41 = vshll.u32 %v9409_v12, 16  ;;  %v7951_v55 = vcombine.low %v1999_v22, %v2002_v29  ;;  %v9445_v22 = vld [vmem:[#allocation2 + $0x50] sm:$0x1] }
  0xbd   : > { %v1651_v56 = vrot.slane %v1650_v0, 4  ;;  %v2224_v52 = vrot.slane %v2222_v4, 5  ;;  %v2234_v50 = vrot.slane %v2232_v42, 4  ;;  %v2238_v53 = vshll.u32 %v9420_v43, 16 }
  0xbe   : > { %3234 = vrot.lane.b32.xlu0 %v7966_v59, %s8662_s27  ;;  %v786_v35 = vsel %vm8988_vm13, %v531_v17, %v785_v33  ;;  %v2230_v25 = vrot.slane %v2228_v41, 5  ;;  %v1047_v11 = vshrl.u32 %v863_v51, 16  ;;  %v1050_v45 = vshll.u32 %v863_v51, 16  ;;  %v9447_v33 = vpop.permute.xlu0 %2794 }
  0xbf   : > { %v1656_v28 = vsel %vm8964_vm11, %v1651_v56, %v1655_v34  ;;  %787 = vst [vmem:[#allocation2 + $0x5c] sm:$0x1] %v786_v35  ;;  %v2225_v62 = vor.u32 %v2224_v52, %v2221_v30  ;;  %v1056_v13 = vshll.u32 %v9428_v8, 16  ;;  %v2240_v54 = vrot.slane %v2238_v53, 5  ;;  %v2084_v26 = vld [vmem:[#allocation2 + $0x54] sm:$0xf]  ;;  %v9457_v53 = vpop.permute.xlu1 %2874 }
  0xc0   : > { %v7935_v6 = vcombine.low %v1646_v10, %v1656_v28  ;;  %v9437_v57 = vld [vmem:[#allocation2 + $0x58] sm:$0xf]  ;;  %v2235_v19 = vor.u32 %v2234_v50, %v2230_v25  ;;  %v1049_v46 = vrot.slane %v1047_v11, 4  ;;  %v1052_v9 = vrot.slane %v1050_v45, 5  ;;  %v2510_v30 = vld [vmem:[#allocation2 + $0x48] sm:$0xe] }
  0xc1   : > { %v2256_v32 = vshrl.u32 %v9437_v57, 16  ;;  %v2252_v58 = vshll.u32 %v9437_v57, 16  ;;  %v2226_v48 = vrot.slane %v2225_v62, 4  ;;  %v2243_v23 = vshrl.u32 %v2084_v26, 16  ;;  %v865_v41 = vld [vmem:[#allocation2 + $0x54] sm:$0xf] }
  0xc2   : > { %3060 = vrot.lane.b32.xlu1 %v7935_v6, %s8665_s30  ;;  %v2246_v38 = vshll.u32 %v2084_v26, 16  ;;  %v7967_v31 = vcombine.low %v2084_v26, %v9437_v57  ;;  %v2236_v21 = vrot.slane %v2235_v19, 4  ;;  %v1053_v16 = vor.u32 %v1052_v9, %v1049_v46 }
  0xc3   : > { %v2254_v34 = vrot.slane %v2252_v58, 5  ;;  %v2258_v18 = vrot.slane %v2256_v32, 4  ;;  %v2231_v44 = vsel %vm8964_vm11, %v2226_v48, %v2230_v25  ;;  %v2245_v0 = vrot.slane %v2243_v23, 4  ;;  %v2511_v58 = vld [vmem:[#allocation2 + $0x54] sm:$0xe] }
  0xc4   : > { %v2248_v4 = vrot.slane %v2246_v38, 5  ;;  %v2241_v42 = vsel %vm8964_vm11, %v2236_v21, %v2240_v54  ;;  %v1058_v59 = vrot.slane %v1056_v13, 5  ;;  %v1054_v29 = vrot.slane %v1053_v16, 4 }
  0xc5   : > { %v2259_v51 = vor.u32 %v2258_v18, %v2254_v34  ;;  %v7982_v10 = vcombine.low %v2231_v44, %v2241_v42  ;;  %v1060_v17 = vshrl.u32 %v9428_v8, 16  ;;  %v1066_v50 = vshll.u32 %v9445_v22, 16 }
  0xc6   : > { %3140 = vrot.lane.b32.xlu1 %v7951_v55, %s8663_s28  ;;  %v9453_v56 = vld [vmem:[#allocation2 + $0x5c] sm:$0x1]  ;;  %v2249_v52 = vor.u32 %v2248_v4, %v2245_v0  ;;  %v7854_v35 = vrot.slane %v2510_v30, 9  ;;  %v2600_v25 = vrot.slane %v9409_v12, 5  ;;  %v1059_v62 = vsel %vm8964_vm11, %v1054_v29, %v1058_v59  ;;  %v866_v55 = vld [vmem:[#allocation2 + $0x58] sm:$0xf] }
  0xc7   : > { %v2260_v11 = vrot.slane %v2259_v51, 4  ;;  %v2262_v28 = vshll.u32 %v9453_v56, 16  ;;  %3314 = vrot.lane.b32.xlu0 %v7982_v10, %s8666_s6  ;;  %v1062_v45 = vrot.slane %v1060_v17, 4  ;;  %v1068_v6 = vrot.slane %v1066_v50, 5  ;;  %v890_v23 = vld [vmem:[#allocation2 + $0x5c] sm:$0x1]  ;;  %v9475_v51 = vpop.permute.xlu1 %2972 }
  0xc8   : > { %v2250_v13 = vrot.slane %v2249_v52, 4  ;;  %v2601_v19 = vsel %vm8928_vm7, %v7854_v35, %v2600_v25  ;;  %v2602_v54 = vrot.slane %v2600_v25, 4  ;;  %v2603_v26 = vrot.slane %v9420_v43, 5  ;;  %v9466_v48 = vpop.permute.xlu0 %2970 }
  0xc9   : > { %v2264_v46 = vrot.slane %v2262_v28, 5  ;;  %v1063_v12 = vor.u32 %v1062_v45, %v1058_v59  ;;  %v1071_v32 = vshrl.u32 %v865_v41, 16  ;;  %v1074_v38 = vshll.u32 %v865_v41, 16 }
  0xca   : > { %3236 = vrot.lane.b32.xlu1 %v7967_v31, %s8662_s27  ;;  %v2255_v9 = vsel %vm8964_vm11, %v2250_v13, %v2254_v34  ;;  %v1080_v21 = vshll.u32 %v866_v55, 16  ;;  %v1084_v18 = vshrl.u32 %v866_v55, 16  ;;  %v2604_v43 = vsel %vm8928_vm7, %v2602_v54, %v2603_v26  ;;  %v1293_v31 = vld [vmem:[#allocation2 + $0x54] sm:$0xe] }
  0xcb   : > { %v2265_v44 = vsel %vm8964_vm11, %v2260_v11, %v2264_v46  ;;  %v1064_v16 = vrot.slane %v1063_v12, 4  ;;  %v1073_v30 = vrot.slane %v1071_v32, 4  ;;  %v7998_v4 = vcombine.low %v2601_v19, %v2604_v43  ;;  %v1292_v11 = vld [vmem:[#allocation2 + $0x48] sm:$0xe]  ;;  %v1477_v43 = vld [vmem:[#allocation2 + $0x54] sm:$0xf] }
  0xcc   : > { %v7983_v0 = vcombine.low %v2255_v9, %v2265_v44  ;;  %v1076_v42 = vrot.slane %v1074_v38, 5  ;;  %v1082_v59 = vrot.slane %v1080_v21, 5  ;;  %v1086_v10 = vrot.slane %v1084_v18, 4  ;;  %v9479_v41 = vpop.permute.xlu0 %3226  ;;  %v9496_v38 = vpop.permute.xlu1 %3228 }
  0xcd   : > { %v1069_v34 = vsel %vm8964_vm11, %v1064_v16, %v1068_v6  ;;  %v1090_v29 = vshll.u32 %v890_v23, 16  ;;  %v7855_v17 = vrot.slane %v2511_v58, 9  ;;  %3394 = vrot.lane.b32.xlu0 %v7998_v4, %s8664_s29  ;;  %v2607_v35 = vrot.slane %v9437_v57, 5 }
  0xce   : > { %3316 = vrot.lane.b32.xlu1 %v7983_v0, %s8666_s6  ;;  %v7888_v52 = vcombine.low %v1059_v62, %v1069_v34  ;;  %v1077_v50 = vor.u32 %v1076_v42, %v1073_v30  ;;  %v2610_v25 = vrot.slane %v9453_v56, 5  ;;  %v1087_v28 = vor.u32 %v1086_v10, %v1082_v59  ;;  %v1478_v30 = vld [vmem:[#allocation2 + $0x58] sm:$0xf]  ;;  %v788_v42 = vld [vmem:[#allocation2 + $0x60] sm:$0xf] }
  0xcf   : > { %v1092_v45 = vrot.slane %v1090_v29, 5  ;;  %v7825_v13 = vrot.slane %v1293_v31, 9  ;;  %v1404_v6 = vrot.slane %v866_v55, 5  ;;  %v2608_v54 = vsel %vm8928_vm7, %v7855_v17, %v2607_v35 }
  0xd0   : > { %v1078_v19 = vrot.slane %v1077_v50, 4  ;;  %v2609_v46 = vrot.slane %v2607_v35, 4  ;;  %v1407_v12 = vrot.slane %v890_v23, 5  ;;  %v1088_v26 = vrot.slane %v1087_v28, 4  ;;  %v9498_v23 = vpop.permute.xlu0 %3130  ;;  %v1503_v35 = vld [vmem:[#allocation2 + $0x5c] sm:$0x1] }
  0xd1   : > { %v1405_v62 = vsel %vm8928_vm7, %v7825_v13, %v1404_v6  ;;  %v1406_v32 = vrot.slane %v1404_v6, 4  ;;  %v7824_v58 = vrot.slane %v1292_v11, 9  ;;  %v1397_v55 = vrot.slane %v9428_v8, 5 }
  0xd2   : > { %2806 = vrot.lane.b32.xlu1 %v7888_v52, %s8660_s25  ;;  %v1083_v57 = vsel %vm8964_vm11, %v1078_v19, %v1082_v59  ;;  %v2611_v56 = vsel %vm8928_vm7, %v2609_v46, %v2610_v25  ;;  %v1400_v9 = vrot.slane %v9445_v22, 5  ;;  %v1093_v21 = vsel %vm8964_vm11, %v1088_v26, %v1092_v45  ;;  %v9518_v19 = vpop.permute.xlu1 %2876 }
  0xd3   : > { %v7999_v18 = vcombine.low %v2608_v54, %v2611_v56  ;;  %v1408_v44 = vsel %vm8928_vm7, %v1406_v32, %v1407_v12  ;;  %v535_v16 = vrot.slane %v533_v36, 7  ;;  %v7889_v0 = vcombine.low %v1083_v57, %v1093_v21  ;;  %v1903_v36 = vld [vmem:[#allocation2 + $0x54] sm:$0xe] }
  0xd4   : > { %v7905_v8 = vcombine.low %v1405_v62, %v1408_v44  ;;  %v1398_v22 = vsel %vm8928_vm7, %v7824_v58, %v1397_v55  ;;  %v1399_v4 = vrot.slane %v1397_v55, 4  ;;  %v541_v34 = vshrl.u32 %v9095_v49, 16  ;;  %v9520_v54 = vpop.permute.xlu0 %3386 }
  0xd5   : > { %3396 = vrot.lane.b32.xlu0 %v7999_v18, %s8664_s29  ;;  %v538_v59 = vor.u32 %v536_v7, %v535_v16  ;;  %v539_v31 = vrot.slane %v535_v16, 4  ;;  %v544_v10 = vshll.u32 %v9095_v49, 16  ;;  %v1658_v17 = vshrl.u32 %v1477_v43, 16  ;;  %v792_v49 = vld [vmem:[#allocation2 + $0x68] sm:$0x1] }
  0xd6   : > { %2808 = vrot.lane.b32.xlu1 %v7889_v0, %s8660_s25  ;;  %v1401_v29 = vsel %vm8928_vm7, %v1399_v4, %v1400_v9  ;;  %v1661_v52 = vshll.u32 %v1477_v43, 16  ;;  %v1671_v50 = vshrl.u32 %v1478_v30, 16  ;;  %v543_v11 = vrot.slane %v541_v34, 7  ;;  %v795_v34 = vld [vmem:[#allocation2 + $0x6c] sm:$0xf]  ;;  %v9549_v5 = vpop.permute.xlu1 %3132 }
  0xd7   : > { %v7904_v25 = vcombine.low %v1398_v22, %v1401_v29  ;;  %v789_v15 = vsel %vm8958_vm10, %v538_v59, %v788_v42  ;;  %v7920_v7 = vcombine.low %v1477_v43, %v1478_v30  ;;  %v1660_v28 = vrot.slane %v1658_v17, 4  ;;  %v9556_v29 = vld [vmem:[#allocation2 + $0x18] sm:$0xf]  ;;  %v9558_v17 = vld [vmem:[#allocation2 + $0x1c] sm:$0xf] }
  0xd8   : > { %790 = vst [vmem:[#allocation2 + $0x60] sm:$0xf] %v789_v15  ;;  %v1663_v45 = vrot.slane %v1661_v52, 5  ;;  %v1667_v13 = vshll.u32 %v1478_v30, 16  ;;  %v1673_v6 = vrot.slane %v1671_v50, 4  ;;  %v546_v46 = vor.u32 %v544_v10, %v543_v11 }
  0xd9   : > { %2886 = vrot.lane.b32.xlu0 %v7904_v25, %s8659_s24  ;;  %v548_v12 = vrot.slane %v543_v11, 4  ;;  %v1677_v26 = vshll.u32 %v1503_v35, 16  ;;  %v7840_v62 = vrot.slane %v1903_v36, 9  ;;  %v2005_v57 = vrot.slane %v1478_v30, 5 }
  0xda   : > { %2888 = vrot.lane.b32.xlu1 %v7905_v8, %s8659_s24  ;;  %v1664_v32 = vor.u32 %v1663_v45, %v1660_v28  ;;  %v1669_v58 = vrot.slane %v1667_v13, 5  ;;  %v2008_v56 = vrot.slane %v1503_v35, 5  ;;  %v547_v55 = vsel %vm8972_vm12, %v539_v31, %v546_v46 }
  0xdb   : > { %v793_v9 = vsel %vm8988_vm13, %v548_v12, %v792_v49  ;;  %v1679_v21 = vrot.slane %v1677_v26, 5  ;;  %791 = vst.msk [vmem:[#allocation2 + $0x64] sm:$0xf] %vm258_vm0, %v547_v55  ;;  %v9531_v16 = vsel %vm8928_vm7, %v7840_v62, %v2005_v57  ;;  %v2007_v43 = vrot.slane %v2005_v57, 4  ;;  %v9576_v55 = vld [vmem:[#allocation2 + $0x28] sm:$0xf] }
  0xdc   : > { %794 = vst [vmem:[#allocation2 + $0x68] sm:$0x1] %v793_v9  ;;  %v1665_v18 = vrot.slane %v1664_v32, 4  ;;  %v1674_v44 = vor.u32 %v1673_v6, %v1669_v58  ;;  %v9539_v30 = vsel %vm3418_vm14, %v7866_v40, %v9447_v33  ;;  %v550_v0 = vshrl.u32 %v9393_v27, 16 }
  0xdd   : > { %2982 = vrot.lane.b32.xlu0 %v7920_v7, %s8661_s26  ;;  %v553_v8 = vshll.u32 %v9393_v27, 16  ;;  %v558_v22 = vshrl.u32 %v9395_v60, 16  ;;  %v2009_v59 = vsel %vm8928_vm7, %v2007_v43, %v2008_v56  ;;  %v561_v31 = vshll.u32 %v9395_v60, 16  ;;  %v9574_v56 = vld [vmem:[#allocation2 + $0x24] sm:$0xf] }
  0xde   : > { %v1670_v4 = vsel %vm8964_vm11, %v1665_v18, %v1669_v58  ;;  %v1675_v42 = vrot.slane %v1674_v44, 4  ;;  %v9551_v14 = vpop.permute.xlu0 %3388  ;;  %v7952_v27 = vcombine.low %v9531_v16, %v2009_v59  ;;  %v552_v10 = vrot.slane %v550_v0, 7  ;;  %v9583_v0 = vpop.permute.xlu1 %3052 }
  0xdf   : > { %v1479_v40 = vld [vmem:[#allocation2 + $0x60] sm:$0xf]  ;;  %v9554_v36 = vrot.slane %v558_v22, 7  ;;  %v7868_v52 = vcombine.low %v9556_v29, %v9558_v17  ;;  %v7869_v9 = vcombine.low %v9574_v56, %v9576_v55 }
  0xe0   : > { %v1904_v33 = vld [vmem:[#allocation2 + $0x60] sm:$0xe]  ;;  %v1682_v60 = vshrl.u32 %v1479_v40, 16  ;;  %v1685_v50 = vshll.u32 %v1479_v40, 16  ;;  %v1680_v35 = vsel %vm8964_vm11, %v1675_v42, %v1679_v21  ;;  %v555_v7 = vor.u32 %v553_v8, %v552_v10 }
  0xe1   : > { %v7841_v25 = vrot.slane %v1904_v33, 9  ;;  %v2086_v11 = vld [vmem:[#allocation2 + $0x60] sm:$0xf]  ;;  %v7936_v15 = vcombine.low %v1670_v4, %v1680_v35  ;;  %v556_v28 = vrot.slane %v552_v10, 4  ;;  %v563_v45 = vor.u32 %v561_v31, %v9554_v36  ;;  %v799_v35 = vld [vmem:[#allocation2 + $0x74] sm:$0x1] }
  0xe2   : > { %v1684_v49 = vrot.slane %v1682_v60, 4  ;;  %v1687_v13 = vrot.slane %v1685_v50, 5  ;;  %v2267_v6 = vshrl.u32 %v2086_v11, 16  ;;  %v2270_v46 = vshll.u32 %v2086_v11, 16  ;;  %v2797_v12 = vpop.permute.xlu0 %2796  ;;  %v1480_v26 = vld [vmem:[#allocation2 + $0x64] sm:$0xf] }
  0xe3   : > { %v1504_v62 = vld [vmem:[#allocation2 + $0x68] sm:$0x1]  ;;  %3062 = vrot.lane.b32.xlu0 %v7936_v15, %s8665_s30  ;;  %v564_v32 = vsel %vm8972_vm12, %v556_v28, %v563_v45  ;;  %v796_v58 = vsel %vm8958_vm10, %v555_v7, %v795_v34  ;;  %v3424_v57 = vsel %vm3418_vm14, %v7867_v24, %v2797_v12  ;;  %v1695_v21 = vshrl.u32 %v1480_v26, 16  ;;  %v9581_v43 = vld [vmem:[#allocation2 + $0x64] sm:$0xf] }
  0xe4   : > { %v7921_v18 = vcombine.low %v1479_v40, %v1480_v26  ;;  %v1688_v44 = vor.u32 %v1687_v13, %v1684_v49  ;;  %v1691_v16 = vshll.u32 %v1480_v26, 16  ;;  %797 = vst [vmem:[#allocation2 + $0x6c] sm:$0xf] %v796_v58  ;;  %798 = vst.msk [vmem:[#allocation2 + $0x70] sm:$0xf] %vm258_vm0, %v564_v32  ;;  %v1701_v63 = vshll.u32 %v1504_v62, 16  ;;  %v9606_v13 = vpop.permute.xlu1 %3308 }
  0xe5   : > { %v2012_v2 = vrot.slane %v1480_v26, 5  ;;  %v2015_v24 = vrot.slane %v1504_v62, 5  ;;  %v2269_v8 = vrot.slane %v2267_v6, 4  ;;  %v1697_v42 = vrot.slane %v1695_v21, 4  ;;  %v867_v49 = vld [vmem:[#allocation2 + $0x60] sm:$0xf] }
  0xe6   : > { %2984 = vrot.lane.b32.xlu1 %v7921_v18, %s8661_s26  ;;  %v1689_v22 = vrot.slane %v1688_v44, 4  ;;  %v1693_v4 = vrot.slane %v1691_v16, 5  ;;  %v2272_v59 = vrot.slane %v2270_v46, 5  ;;  %v1703_v31 = vrot.slane %v1701_v63, 5  ;;  %v9627_v21 = vld [vmem:[#allocation2 + $0x68] sm:$0x1] }
  0xe7   : > { %v9588_v34 = vsel %vm8928_vm7, %v7841_v25, %v2012_v2  ;;  %v2014_v40 = vrot.slane %v2012_v2, 4  ;;  %3142 = vrot.lane.b32.xlu0 %v7952_v27, %s8663_s28  ;;  %v2280_v33 = vshrl.u32 %v9581_v43, 16  ;;  %v7968_v50 = vcombine.low %v2086_v11, %v9581_v43  ;;  %v9632_v16 = vld [vmem:[#allocation2 + $0x64] sm:$0xf] }
  0xe8   : > { %v1694_v10 = vsel %vm8964_vm11, %v1689_v22, %v1693_v4  ;;  %v1698_v60 = vor.u32 %v1697_v42, %v1693_v4  ;;  %v3469_v25 = vsel %vm3467_vm15, %v9539_v30, %v9457_v53  ;;  %v565_v27 = vrot.slane %v9554_v36, 4 }
  0xe9   : > { %v2016_v15 = vsel %vm8928_vm7, %v2014_v40, %v2015_v24  ;;  %v9604_v45 = vsel %vm3500_vm1, %v3469_v25, %v9466_v48  ;;  %v2273_v11 = vor.u32 %v2272_v59, %v2269_v8  ;;  %v2276_v30 = vshll.u32 %v9581_v43, 16 }
  0xea   : > { %v1699_v7 = vrot.slane %v1698_v60, 4  ;;  %v7953_v28 = vcombine.low %v9588_v34, %v2016_v15  ;;  %v800_v53 = vsel %vm8988_vm13, %v565_v27, %v799_v35  ;;  %v2282_v36 = vrot.slane %v2280_v33, 4  ;;  %v9620_v12 = vpop.permute.xlu0 %3050  ;;  %v9638_v33 = vld [vmem:[#allocation2 + $0x68] sm:$0x1]  ;;  %v2512_v60 = vld [vmem:[#allocation2 + $0x60] sm:$0xe] }
  0xeb   : > { %v9608_v6 = vld [vmem:[#allocation2 + $0x6c] sm:$0xf]  ;;  %v9610_v46 = vld [vmem:[#allocation2 + $0x70] sm:$0xf]  ;;  %3238 = vrot.lane.b32.xlu0 %v7968_v50, %s8662_s27  ;;  %v9618_v48 = vsel %vm3467_vm15, %v3424_v57, %v9518_v19  ;;  %801 = vst [vmem:[#allocation2 + $0x74] sm:$0x1] %v800_v53  ;;  %v9641_v50 = vpop.permute.xlu1 %2798 }
  0xec   : > { %v1704_v26 = vsel %vm8964_vm11, %v1699_v7, %v1703_v31  ;;  %v2291_v62 = vshrl.u32 %v9608_v6, 16  ;;  %v2294_v32 = vshll.u32 %v9608_v6, 16  ;;  %v2304_v58 = vshrl.u32 %v9610_v46, 16 }
  0xed   : > { %v7937_v18 = vcombine.low %v1694_v10, %v1704_v26  ;;  %v7969_v44 = vcombine.low %v9608_v6, %v9610_v46  ;;  %v2300_v19 = vshll.u32 %v9610_v46, 16  ;;  %v2274_v57 = vrot.slane %v2273_v11, 4 }
  0xee   : > { %v2293_v63 = vrot.slane %v2291_v62, 4  ;;  %v2296_v2 = vrot.slane %v2294_v32, 5  ;;  %v2306_v24 = vrot.slane %v2304_v58, 4  ;;  %v2278_v8 = vrot.slane %v2276_v30, 5  ;;  %v869_v30 = vld [vmem:[#allocation2 + $0x6c] sm:$0xf] }
  0xef   : > { %3064 = vrot.lane.b32.xlu1 %v7937_v18, %s8665_s30  ;;  %v2302_v22 = vrot.slane %v2300_v19, 5  ;;  %v2286_v4 = vshll.u32 %v9627_v21, 16  ;;  %v1095_v42 = vshrl.u32 %v867_v49, 16  ;;  %v1098_v59 = vshll.u32 %v867_v49, 16 }
  0xf0   : > { %v2297_v31 = vor.u32 %v2296_v2, %v2293_v63  ;;  %v2279_v34 = vsel %vm8964_vm11, %v2274_v57, %v2278_v8  ;;  %v2283_v40 = vor.u32 %v2282_v36, %v2278_v8  ;;  %v1104_v10 = vshll.u32 %v9632_v16, 16  ;;  %v9643_v35 = vpop.permute.xlu0 %3306 }
  0xf1   : > { %v2307_v15 = vor.u32 %v2306_v24, %v2302_v22  ;;  %v2288_v25 = vrot.slane %v2286_v4, 5  ;;  %v1097_v27 = vrot.slane %v1095_v42, 4  ;;  %v1100_v7 = vrot.slane %v1098_v59, 5  ;;  %v870_v42 = vld [vmem:[#allocation2 + $0x70] sm:$0xf] }
  0xf2   : > { %v2298_v11 = vrot.slane %v2297_v31, 4  ;;  %v2284_v49 = vrot.slane %v2283_v40, 4  ;;  %v1106_v6 = vrot.slane %v1104_v10, 5  ;;  %v1108_v53 = vshrl.u32 %v9632_v16, 16  ;;  %v9647_v36 = vld [vmem:[#allocation2 + $0x74] sm:$0x1] }
  0xf3   : > { %3144 = vrot.lane.b32.xlu1 %v7953_v28, %s8663_s28  ;;  %v2308_v26 = vrot.slane %v2307_v15, 4  ;;  %v1101_v62 = vor.u32 %v1100_v7, %v1097_v27  ;;  %v1114_v32 = vshll.u32 %v9638_v33, 16  ;;  %v7856_v58 = vrot.slane %v2512_v60, 9 }
  0xf4   : > { %v2303_v18 = vsel %vm8964_vm11, %v2298_v11, %v2302_v22  ;;  %v2310_v19 = vshll.u32 %v9647_v36, 16  ;;  %v2289_v57 = vsel %vm8964_vm11, %v2284_v49, %v2288_v25  ;;  %v1110_v63 = vrot.slane %v1108_v53, 4  ;;  %v9655_v2 = vpop.permute.xlu0 %2878  ;;  %v9659_v22 = vpop.permute.xlu1 %2800  ;;  %v2513_v49 = vld [vmem:[#allocation2 + $0x6c] sm:$0xe] }
  0xf5   : > { %v7984_v24 = vcombine.low %v2279_v34, %v2289_v57  ;;  %v1102_v28 = vrot.slane %v1101_v62, 4  ;;  %v1116_v8 = vrot.slane %v1114_v32, 5  ;;  %v2614_v4 = vrot.slane %v9581_v43, 5  ;;  %v892_v43 = vld [vmem:[#allocation2 + $0x74] sm:$0x1] }
  0xf6   : > { %v2312_v59 = vrot.slane %v2310_v19, 5  ;;  %v1111_v31 = vor.u32 %v1110_v63, %v1106_v6  ;;  %v2617_v40 = vrot.slane %v9627_v21, 5  ;;  %v1119_v10 = vshrl.u32 %v869_v30, 16  ;;  %v1295_v19 = vld [vmem:[#allocation2 + $0x6c] sm:$0xe] }
  0xf7   : > { %3240 = vrot.lane.b32.xlu1 %v7969_v44, %s8662_s27  ;;  %3318 = vrot.lane.b32.xlu0 %v7984_v24, %s8666_s6  ;;  %v1107_v60 = vsel %vm8964_vm11, %v1102_v28, %v1106_v6  ;;  %v2615_v34 = vsel %vm8928_vm7, %v7856_v58, %v2614_v4  ;;  %v2616_v15 = vrot.slane %v2614_v4, 4  ;;  %v1122_v25 = vshll.u32 %v869_v30, 16 }
  0xf8   : > { %v2313_v27 = vsel %vm8964_vm11, %v2308_v26, %v2312_v59  ;;  %v1112_v21 = vrot.slane %v1111_v31, 4  ;;  %v1121_v7 = vrot.slane %v1119_v10, 4  ;;  %v1128_v11 = vshll.u32 %v870_v42, 16  ;;  %v9669_v53 = vpop.permute.xlu0 %2974  ;;  %v1294_v59 = vld [vmem:[#allocation2 + $0x60] sm:$0xe] }
  0xf9   : > { %v7985_v44 = vcombine.low %v2303_v18, %v2313_v27  ;;  %v2618_v62 = vsel %vm8928_vm7, %v2616_v15, %v2617_v40  ;;  %v1124_v6 = vrot.slane %v1122_v25, 5  ;;  %v1132_v32 = vshrl.u32 %v870_v42, 16  ;;  %v9679_v15 = vpop.permute.xlu1 %2880 }
  0xfa   : > { %v1117_v58 = vsel %vm8964_vm11, %v1112_v21, %v1116_v8  ;;  %v8000_v30 = vcombine.low %v2615_v34, %v2618_v62  ;;  %v1130_v57 = vrot.slane %v1128_v11, 5  ;;  %v1138_v63 = vshll.u32 %v892_v43, 16 }
  0xfb   : > { %3320 = vrot.lane.b32.xlu1 %v7985_v44, %s8666_s6  ;;  %v7890_v26 = vcombine.low %v1107_v60, %v1117_v58  ;;  %v1125_v24 = vor.u32 %v1124_v6, %v1121_v7  ;;  %v1134_v28 = vrot.slane %v1132_v32, 4  ;;  %v7857_v4 = vrot.slane %v2513_v49, 9 }
  0xfc   : > { %3398 = vrot.lane.b32.xlu0 %v8000_v30, %s8664_s29  ;;  %v1140_v18 = vrot.slane %v1138_v63, 5  ;;  %v2621_v31 = vrot.slane %v9610_v46, 5  ;;  %v2624_v40 = vrot.slane %v9647_v36, 5  ;;  %v7827_v10 = vrot.slane %v1295_v19, 9  ;;  %v9701_v63 = vld [vmem:[#allocation2 + $0x70] sm:$0xf] }
  0xfd   : > { %v1126_v8 = vrot.slane %v1125_v24, 4  ;;  %v1135_v34 = vor.u32 %v1134_v28, %v1130_v57  ;;  %v1418_v25 = vrot.slane %v870_v42, 5  ;;  %v1421_v27 = vrot.slane %v892_v43, 5  ;;  %v9681_v21 = vpop.permute.xlu0 %3054 }
  0xfe   : > { %v2622_v60 = vsel %vm8928_vm7, %v7857_v4, %v2621_v31  ;;  %v2623_v7 = vrot.slane %v2621_v31, 4  ;;  %v7826_v11 = vrot.slane %v1294_v59, 9  ;;  %v1411_v49 = vrot.slane %v9632_v16, 5 }
  0xff   : > { %2810 = vrot.lane.b32.xlu1 %v7890_v26, %s8660_s25  ;;  %v1131_v46 = vsel %vm8964_vm11, %v1126_v8, %v1130_v57  ;;  %v1136_v36 = vrot.slane %v1135_v34, 4  ;;  %v1419_v44 = vsel %vm8928_vm7, %v7827_v10, %v1418_v25  ;;  %v1420_v42 = vrot.slane %v1418_v25, 4  ;;  %v1481_v57 = vld [vmem:[#allocation2 + $0x6c] sm:$0xf]  ;;  %v802_v8 = vld [vmem:[#allocation2 + $0x78] sm:$0xf] }
 0x100   : > { %v2625_v43 = vsel %vm8928_vm7, %v2623_v7, %v2624_v40  ;;  %v1412_v62 = vsel %vm8928_vm7, %v7826_v11, %v1411_v49  ;;  %v1413_v6 = vrot.slane %v1411_v49, 4  ;;  %v1414_v32 = vrot.slane %v9638_v33, 5  ;;  %v9706_v33 = vpop.permute.xlu1 %2976  ;;  %v1505_v49 = vld [vmem:[#allocation2 + $0x74] sm:$0x1] }
 0x101   : > { %v1141_v16 = vsel %vm8964_vm11, %v1136_v36, %v1140_v18  ;;  %v8001_v19 = vcombine.low %v2622_v60, %v2625_v43  ;;  %v1422_v58 = vsel %vm8928_vm7, %v1420_v42, %v1421_v27  ;;  %v567_v30 = vshrl.u32 %v9397_v61, 16  ;;  %v9708_v59 = vpop.permute.xlu0 %3134 }
 0x102   : > { %v7891_v26 = vcombine.low %v1131_v46, %v1141_v16  ;;  %v7907_v24 = vcombine.low %v1419_v44, %v1422_v58  ;;  %v1415_v28 = vsel %vm8928_vm7, %v1413_v6, %v1414_v32  ;;  %v570_v4 = vshll.u32 %v9397_v61, 16  ;;  %v806_v44 = vld [vmem:[#allocation2 + $0x80] sm:$0x1]  ;;  %v1905_v58 = vld [vmem:[#allocation2 + $0x6c] sm:$0xe] }
 0x103   : > { %3400 = vrot.lane.b32.xlu0 %v8001_v19, %s8664_s29  ;;  %v7906_v18 = vcombine.low %v1412_v62, %v1415_v28  ;;  %v569_v31 = vrot.slane %v567_v30, 7  ;;  %v575_v40 = vshrl.u32 %v9401_v20, 16  ;;  %v578_v10 = vshll.u32 %v9401_v20, 16  ;;  %v8513_v28 = vld [vmem:[%s12702_s1 + $0x20] ss:$0 sps:$4 sm:$0xff]  }
 0x104   : > { %2812 = vrot.lane.b32.xlu1 %v7891_v26, %s8660_s25  ;;  %v1706_v34 = vshrl.u32 %v1481_v57, 16  ;;  %v1709_v25 = vshll.u32 %v1481_v57, 16  ;;  %v1719_v27 = vshrl.u32 %v9701_v63, 16  ;;  %v7922_v61 = vcombine.low %v1481_v57, %v9701_v63  ;;  %8472 = vmatprep.subr.msk.bf16.mxu0 %vm3774_vm4, %v8513_v28 }
 0x105   : > { %v572_v60 = vor.u32 %v570_v4, %v569_v31  ;;  %v573_v7 = vrot.slane %v569_v31, 4  ;;  %v577_v11 = vrot.slane %v575_v40, 7  ;;  %v3504_v20 = vsel %vm3500_vm1, %v9618_v48, %v9475_v51  ;;  %v9730_v57 = vpop.permute.xlu0 %3230 }
 0x106   : > { %v1708_v46 = vrot.slane %v1706_v34, 4  ;;  %v1711_v36 = vrot.slane %v1709_v25, 5  ;;  %v1715_v42 = vshll.u32 %v9701_v63, 16  ;;  %v9725_v6 = vsel %vm3533_vm2, %v3504_v20, %v9583_v0 }
 0x107   : > { %2890 = vrot.lane.b32.xlu0 %v7906_v18, %s8659_s24  ;;  %v580_v43 = vor.u32 %v578_v10, %v577_v11  ;;  %v803_v62 = vsel %vm8958_vm10, %v572_v60, %v802_v8  ;;  %v582_v32 = vrot.slane %v577_v11, 4  ;;  %v1721_v51 = vrot.slane %v1719_v27, 4  ;;  %v9728_v30 = vpop.permute.xlu1 %3056  ;;  %v246_v10 = vld [vmem:[%s8937_s23 + $0xa0] sm:$0xff] }
 0x108   : > { %2892 = vrot.lane.b32.xlu1 %v7907_v24, %s8659_s24  ;;  %804 = vst [vmem:[#allocation2 + $0x78] sm:$0xf] %v803_v62  ;;  %v1712_v16 = vor.u32 %v1711_v36, %v1708_v46  ;;  %v1717_v19 = vrot.slane %v1715_v42, 5  ;;  %v1725_v48 = vshll.u32 %v1505_v49, 16  ;;  %v9741_v24 = vsel %vm3418_vm14, %v7868_v52, %v9641_v50 }
 0x109   : > { %v581_v26 = vsel %vm8972_vm12, %v573_v7, %v580_v43  ;;  %v807_v0 = vsel %vm8988_vm13, %v582_v32, %v806_v44  ;;  %v3535_v40 = vsel %vm3533_vm2, %v9604_v45, %v9620_v12  ;;  %v7842_v17 = vrot.slane %v1905_v58, 9  ;;  %v247_v12 = vld [vmem:[%s8937_s23 + $0xa8] sm:$0xff] }
 0x10a   : > { %805 = vst.msk [vmem:[#allocation2 + $0x7c] sm:$0xf] %vm258_vm0, %v581_v26  ;;  %808 = vst [vmem:[#allocation2 + $0x80] sm:$0x1] %v807_v0  ;;  %v1713_v4 = vrot.slane %v1712_v16, 4  ;;  %v1722_v18 = vor.u32 %v1721_v51, %v1717_v19  ;;  %v1727_v31 = vrot.slane %v1725_v48, 5  ;;  %v3568_v29 = vsel %vm3566_vm3, %v3535_v40, %v9498_v23 }
 0x10b   : > { %2986 = vrot.lane.b32.xlu0 %v7922_v61, %s8661_s26  ;;  %v2019_v52 = vrot.slane %v9701_v63, 5  ;;  %v2022_v50 = vrot.slane %v1505_v49, 5  ;;  %v3430_v45 = vsel %vm3418_vm14, %v7869_v9, %v9659_v22  ;;  %v9763_v25 = vpop.permute.xlu1 %3136  ;;  %v3601_v61 = vsel %vm3599_vm5, %v3568_v29, %v9479_v41 }
 0x10c   : > { %v1718_v8 = vsel %vm8964_vm11, %v1713_v4, %v1717_v19  ;;  %v1723_v34 = vrot.slane %v1722_v18, 4  ;;  %v3776_v56 = vsel %vm3774_vm4, %v8513_v28, 0  ;;  %v8302_v55 = vpack.c.bf16 %v246_v10, %v246_v10  ;;  %v9773_v9 = vpop.permute.xlu0 %3310 }
 0x10d   : > { %v2020_v23 = vsel %vm8928_vm7, %v7842_v17, %v2019_v52  ;;  %v2021_v63 = vrot.slane %v2019_v52, 4  ;;  %v9779_v49 = vsel %vm3632_vm6, %v3601_v61, %v9643_v35  ;;  %8397 = vmatpush3.bf16.msra.mxu0 %v3776_v56  ;;  %v8303_v46 = vpack.c.bf16 %v247_v12, %v247_v12 }
 0x10e   : > { %v1728_v27 = vsel %vm8964_vm11, %v1723_v34, %v1727_v31  ;;  %v584_v32 = vshrl.u32 %v8302_v55, 16  ;;  %v587_v16 = vshll.u32 %v8302_v55, 16  ;;  %v9786_v19 = vsel %vm3467_vm15, %v3430_v45, %v9679_v15 }
 0x10f   : > { %v1483_v22 = vld [vmem:[#allocation2 + $0x78] sm:$0xf]  ;;  %v7938_v60 = vcombine.low %v1718_v8, %v1728_v27  ;;  %v2023_v11 = vsel %vm8928_vm7, %v2021_v63, %v2022_v50  ;;  %v9781_v42 = vpop.permute.xlu1 %3232  ;;  %v3570_v35 = vsel %vm3566_vm3, %v9725_v6, %v9549_v5  ;;  %v592_v17 = vshrl.u32 %v8303_v46, 16  ;;  %v809_v8 = vld [vmem:[#allocation2 + $0x84] sm:$0xf] }
 0x110   : > { %v1906_v7 = vld [vmem:[#allocation2 + $0x78] sm:$0xe]  ;;  %v1730_v36 = vshrl.u32 %v1483_v22, 16  ;;  %v1733_v20 = vshll.u32 %v1483_v22, 16  ;;  %v7954_v44 = vcombine.low %v2020_v23, %v2023_v11  ;;  %v586_v29 = vrot.slane %v584_v32, 7 }
 0x111   : > { %v7843_v41 = vrot.slane %v1906_v7, 9  ;;  %v1484_v43 = vld [vmem:[#allocation2 + $0x7c] sm:$0xf]  ;;  %v1506_v62 = vld [vmem:[#allocation2 + $0x80] sm:$0x1]  ;;  %3066 = vrot.lane.b32.xlu0 %v7938_v60, %s8665_s30  ;;  %v594_v23 = vrot.slane %v592_v17, 7 }
 0x112   : > { %v1732_v51 = vrot.slane %v1730_v36, 4  ;;  %v1735_v48 = vrot.slane %v1733_v20, 5  ;;  %v1743_v58 = vshrl.u32 %v1484_v43, 16  ;;  %v7923_v26 = vcombine.low %v1483_v22, %v1484_v43  ;;  %v2090_v15 = vld [vmem:[#allocation2 + $0x78] sm:$0xf] }
 0x113   : > { %v1739_v0 = vshll.u32 %v1484_v43, 16  ;;  %v1749_v28 = vshll.u32 %v1506_v62, 16  ;;  %v2026_v4 = vrot.slane %v1484_v43, 5  ;;  %v2029_v18 = vrot.slane %v1506_v62, 5  ;;  %v9799_v63 = vld [vmem:[#allocation2 + $0x7c] sm:$0xf]  ;;  %v9801_v27 = vpop.permute.xlu1 %3312 }
 0x114   : > { %2988 = vrot.lane.b32.xlu1 %v7923_v26, %s8661_s26  ;;  %v1736_v31 = vor.u32 %v1735_v48, %v1732_v51  ;;  %v1745_v40 = vrot.slane %v1743_v58, 4  ;;  %v9792_v52 = vpop.permute.xlu0 %3390  ;;  %v589_v45 = vor.u32 %v587_v16, %v586_v29  ;;  %v590_v12 = vrot.slane %v586_v29, 4  ;;  %v813_v26 = vld [vmem:[#allocation2 + $0x8c] sm:$0x1]  ;;  %v9838_v17 = vld [vmem:[#allocation2 + $0x7c] sm:$0xf] }
 0x115   : > { %v1741_v50 = vrot.slane %v1739_v0, 5  ;;  %v1751_v10 = vrot.slane %v1749_v28, 5  ;;  %v9796_v5 = vsel %vm8928_vm7, %v7843_v41, %v2026_v4  ;;  %v2028_v6 = vrot.slane %v2026_v4, 4  ;;  %3146 = vrot.lane.b32.xlu0 %v7954_v44, %s8663_s28  ;;  %v9823_v0 = vld [vmem:[#allocation2 + $0x80] sm:$0x1] }
 0x116   : > { %v1737_v34 = vrot.slane %v1736_v31, 4  ;;  %v595_v55 = vshll.u32 %v8303_v46, 16  ;;  %v2315_v22 = vshrl.u32 %v2090_v15, 16  ;;  %v810_v11 = vsel %vm8958_vm10, %v589_v45, %v809_v8 }
 0x117   : > { %v1746_v61 = vor.u32 %v1745_v40, %v1741_v50  ;;  %v2030_v56 = vsel %vm8928_vm7, %v2028_v6, %v2029_v18  ;;  %v2318_v36 = vshll.u32 %v2090_v15, 16  ;;  %811 = vst [vmem:[#allocation2 + $0x84] sm:$0xf] %v810_v11  ;;  %v2328_v43 = vshrl.u32 %v9799_v63, 16  ;;  %v871_v18 = vld [vmem:[#allocation2 + $0x78] sm:$0xf] }
 0x118   : > { %v1742_v60 = vsel %vm8964_vm11, %v1737_v34, %v1741_v50  ;;  %v7955_v7 = vcombine.low %v9796_v5, %v2030_v56  ;;  %v597_v41 = vor.u32 %v595_v55, %v594_v23  ;;  %v2317_v44 = vrot.slane %v2315_v22, 4 }
 0x119   : > { %v1747_v20 = vrot.slane %v1746_v61, 4  ;;  %v2320_v62 = vrot.slane %v2318_v36, 5  ;;  %v7970_v32 = vcombine.low %v2090_v15, %v9799_v63  ;;  %v3667_v48 = vsel %vm3665_vm8, %v9779_v49, %v9520_v54  ;;  %v9840_v15 = vld [vmem:[#allocation2 + $0x80] sm:$0x1]  ;;  %v2514_v36 = vld [vmem:[#allocation2 + $0x78] sm:$0xe] }
 0x11a   : > { %v9812_v46 = vpop.permute.xlu0 %3392  ;;  %v598_v51 = vsel %vm8972_vm12, %v590_v12, %v597_v41  ;;  %v3603_v58 = vsel %vm3599_vm5, %v3570_v35, %v9496_v38  ;;  %8398 = vmatprep.mubr.msk.bf16.mxu0 %vm3741_vm9, %v3667_v48  ;;  %v3473_v54 = vsel %vm3467_vm15, %v9741_v24, %v9655_v2  ;;  %v599_v49 = vrot.slane %v594_v23, 4  ;;  %v9833_v38 = vpop.permute.xlu1 %2802 }
 0x11b   : > { %v1752_v16 = vsel %vm8964_vm11, %v1747_v20, %v1751_v10  ;;  %812 = vst.msk [vmem:[#allocation2 + $0x88] sm:$0xf] %vm258_vm0, %v598_v51  ;;  %3242 = vrot.lane.b32.xlu0 %v7970_v32, %s8662_s27  ;;  %v3636_v4 = vsel %vm3632_vm6, %v3603_v58, %v9606_v13  ;;  %v2321_v31 = vor.u32 %v2320_v62, %v2317_v44  ;;  %v2324_v40 = vshll.u32 %v9799_v63, 16 }
 0x11c   : > { %v7939_v28 = vcombine.low %v1742_v60, %v1752_v16  ;;  %v3669_v35 = vsel %vm3665_vm8, %v3636_v4, %v9551_v14  ;;  %v2330_v29 = vrot.slane %v2328_v43, 4  ;;  %v814_v13 = vsel %vm8988_vm13, %v599_v49, %v813_v26 }
 0x11d   : > { %8399 = vmatmul.mubr.msk.bf16.vlgmr.msra.gmra.mrb[0].mxu0 %vm3741_vm9, %v3669_v35  ;;  %v2334_v2 = vshll.u32 %v9823_v0, 16  ;;  %v3508_v14 = vsel %vm3500_vm1, %v9786_v19, %v9706_v33  ;;  %v9852_v24 = vsel %vm3500_vm1, %v3473_v54, %v9669_v53  ;;  %815 = vst [vmem:[#allocation2 + $0x8c] sm:$0x1] %v814_v13  ;;  %v2322_v10 = vrot.slane %v2321_v31, 4 }
 0x11e   : > { %3068 = vrot.lane.b32.xlu1 %v7939_v28, %s8665_s30  ;;  %v9854_v50 = vpop.permute.xlu0 %2882  ;;  %v2326_v5 = vrot.slane %v2324_v40, 5  ;;  %v1143_v6 = vshrl.u32 %v871_v18, 16  ;;  %v1146_v8 = vshll.u32 %v871_v18, 16  ;;  %v2092_v34 = vld [vmem:[#allocation2 + $0x84] sm:$0xf]  ;;  %v1152_v12 = vshll.u32 %v9838_v17, 16  ;;  %v9862_v20 = vpop.permute.xlu1 %2804 }
 0x11f   : > { %v2336_v45 = vrot.slane %v2334_v2, 5  ;;  %v1156_v23 = vshrl.u32 %v9838_v17, 16  ;;  %v1162_v61 = vshll.u32 %v9840_v15, 16  ;;  %v2339_v33 = vshrl.u32 %v2092_v34, 16 }
 0x120   : > { %v2342_v19 = vshll.u32 %v2092_v34, 16  ;;  %v2327_v53 = vsel %vm8964_vm11, %v2322_v10, %v2326_v5  ;;  %v2331_v56 = vor.u32 %v2330_v29, %v2326_v5  ;;  %v1145_v55 = vrot.slane %v1143_v6, 4 }
 0x121   : > { %v1148_v22 = vrot.slane %v1146_v8, 5  ;;  %v1154_v60 = vrot.slane %v1152_v12, 5  ;;  %v1158_v11 = vrot.slane %v1156_v23, 4  ;;  %v2341_v44 = vrot.slane %v2339_v33, 4 }
 0x122   : > { %3148 = vrot.lane.b32.xlu1 %v7955_v7, %s8663_s28  ;;  %v9864_v41 = vld [vmem:[#allocation2 + $0x88] sm:$0xf]  ;;  %v2344_v43 = vrot.slane %v2342_v19, 5  ;;  %v2332_v62 = vrot.slane %v2331_v56, 4  ;;  %v1164_v32 = vrot.slane %v1162_v61, 5  ;;  %v9869_v58 = vpop.permute.xlu0 %2978  ;;  %v7858_v54 = vrot.slane %v2514_v36, 9  ;;  %v9884_v23 = vpop.permute.xlu1 %2884 }
 0x123   : > { %v2352_v16 = vshrl.u32 %v9864_v41, 16  ;;  %v7971_v51 = vcombine.low %v2092_v34, %v9864_v41  ;;  %v2348_v48 = vshll.u32 %v9864_v41, 16  ;;  %v1149_v7 = vor.u32 %v1148_v22, %v1145_v55  ;;  %v874_v12 = vld [vmem:[#allocation2 + $0x88] sm:$0xf]  ;;  %v2515_v56 = vld [vmem:[#allocation2 + $0x84] sm:$0xe] }
 0x124   : > { %v2345_v26 = vor.u32 %v2344_v43, %v2341_v44  ;;  %v2337_v28 = vsel %vm8964_vm11, %v2332_v62, %v2336_v45  ;;  %v1159_v4 = vor.u32 %v1158_v11, %v1154_v60  ;;  %v9874_v49 = vld [vmem:[#allocation2 + $0x8c] sm:$0x1]  ;;  %v2628_v10 = vrot.slane %v9799_v63, 5  ;;  %v873_v45 = vld [vmem:[#allocation2 + $0x84] sm:$0xf] }
 0x125   : > { %v2350_v18 = vrot.slane %v2348_v48, 5  ;;  %v2354_v35 = vrot.slane %v2352_v16, 4  ;;  %v7986_v31 = vcombine.low %v2327_v53, %v2337_v28  ;;  %v1150_v40 = vrot.slane %v1149_v7, 4  ;;  %v894_v53 = vld [vmem:[#allocation2 + $0x8c] sm:$0x1] }
 0x126   : > { %3244 = vrot.lane.b32.xlu1 %v7971_v51, %s8662_s27  ;;  %v2346_v29 = vrot.slane %v2345_v26, 4  ;;  %v2358_v13 = vshll.u32 %v9874_v49, 16  ;;  %v1160_v2 = vrot.slane %v1159_v4, 4  ;;  %v2631_v8 = vrot.slane %v9823_v0, 5  ;;  %v1297_v28 = vld [vmem:[#allocation2 + $0x84] sm:$0xe] }
 0x127   : > { %v2355_v5 = vor.u32 %v2354_v35, %v2350_v18  ;;  %3322 = vrot.lane.b32.xlu0 %v7986_v31, %s8666_s6  ;;  %v1155_v6 = vsel %vm8964_vm11, %v1150_v40, %v1154_v60  ;;  %v3541_v34 = vsel %vm3533_vm2, %v3508_v14, %v9728_v30  ;;  %v2629_v19 = vsel %vm8928_vm7, %v7858_v54, %v2628_v10 }
 0x128   : > { %v2351_v61 = vsel %vm8964_vm11, %v2346_v29, %v2350_v18  ;;  %v2360_v33 = vrot.slane %v2358_v13, 5  ;;  %v1165_v63 = vsel %vm8964_vm11, %v1160_v2, %v1164_v32  ;;  %v2630_v22 = vrot.slane %v2628_v10, 4  ;;  %v9895_v14 = vpop.permute.xlu0 %3058  ;;  %v1296_v18 = vld [vmem:[#allocation2 + $0x78] sm:$0xe] }
 0x129   : > { %v2356_v0 = vrot.slane %v2355_v5, 4  ;;  %v7892_v55 = vcombine.low %v1155_v6, %v1165_v63  ;;  %v3539_v30 = vsel %vm3533_vm2, %v9852_v24, %v9681_v21  ;;  %v1167_v60 = vshrl.u32 %v873_v45, 16  ;;  %v248_v63 = vld [vmem:[%s8937_s23 + $0xb0] sm:$0xff] }
 0x12a   : > { %v1170_v11 = vshll.u32 %v873_v45, 16  ;;  %v1176_v36 = vshll.u32 %v874_v12, 16  ;;  %v1180_v44 = vshrl.u32 %v874_v12, 16  ;;  %v2632_v62 = vsel %vm8928_vm7, %v2630_v22, %v2631_v8  ;;  %v1485_v22 = vld [vmem:[#allocation2 + $0x84] sm:$0xf] }
 0x12b   : > { %v2361_v43 = vsel %vm8964_vm11, %v2356_v0, %v2360_v33  ;;  %v1186_v32 = vshll.u32 %v894_v53, 16  ;;  %v7859_v16 = vrot.slane %v2515_v56, 9  ;;  %v8002_v48 = vcombine.low %v2629_v19, %v2632_v62  ;;  %v9902_v35 = vpop.permute.xlu1 %2980  ;;  %v249_v0 = vld [vmem:[%s8937_s23 + $0xb8] sm:$0xff]  ;;  %v9939_v62 = vld [vmem:[#allocation2 + $0x88] sm:$0xf] }
 0x12c   : > { %v7987_v51 = vcombine.low %v2351_v61, %v2361_v43  ;;  %v1169_v7 = vrot.slane %v1167_v60, 4  ;;  %v1172_v26 = vrot.slane %v1170_v11, 5  ;;  %v1178_v21 = vrot.slane %v1176_v36, 5  ;;  %v9913_v6 = vpop.permute.xlu0 %3138 }
 0x12d   : > { %v1182_v24 = vrot.slane %v1180_v44, 4  ;;  %v1188_v4 = vrot.slane %v1186_v32, 5  ;;  %v2635_v54 = vrot.slane %v9864_v41, 5  ;;  %3402 = vrot.lane.b32.xlu0 %v8002_v48, %s8664_s29  ;;  %v2638_v40 = vrot.slane %v9874_v49, 5 }
 0x12e   : > { %3324 = vrot.lane.b32.xlu1 %v7987_v51, %s8666_s6  ;;  %v1173_v31 = vor.u32 %v1172_v26, %v1169_v7  ;;  %v3574_v29 = vsel %vm3566_vm3, %v3541_v34, %v9763_v25  ;;  %v3572_v13 = vsel %vm3566_vm3, %v3539_v30, %v9708_v59  ;;  %v7829_v5 = vrot.slane %v1297_v28, 9 }
 0x12f   : > { %v1183_v2 = vor.u32 %v1182_v24, %v1178_v21  ;;  %v2636_v41 = vsel %vm8928_vm7, %v7859_v16, %v2635_v54  ;;  %v2637_v10 = vrot.slane %v2635_v54, 4  ;;  %v1432_v45 = vrot.slane %v874_v12, 5 }
 0x130   : > { %v1174_v8 = vrot.slane %v1173_v31, 4  ;;  %v1435_v61 = vrot.slane %v894_v53, 5  ;;  %v7828_v49 = vrot.slane %v1296_v18, 9  ;;  %v1425_v34 = vrot.slane %v9838_v17, 5  ;;  %v9943_v48 = vpop.permute.xlu0 %3234  ;;  %v9947_v18 = vld [vmem:[#allocation2 + $0x8c] sm:$0x1] }
 0x131   : > { %v1184_v33 = vrot.slane %v1183_v2, 4  ;;  %v2639_v25 = vsel %vm8928_vm7, %v2637_v10, %v2638_v40  ;;  %v1428_v59 = vrot.slane %v9840_v15, 5  ;;  %v1433_v12 = vsel %vm8928_vm7, %v7829_v5, %v1432_v45 }
 0x132   : > { %2814 = vrot.lane.b32.xlu1 %v7892_v55, %s8660_s25  ;;  %v1179_v19 = vsel %vm8964_vm11, %v1174_v8, %v1178_v21  ;;  %v8003_v56 = vcombine.low %v2636_v41, %v2639_v25  ;;  %v1434_v53 = vrot.slane %v1432_v45, 4  ;;  %v1426_v17 = vsel %vm8928_vm7, %v7828_v49, %v1425_v34  ;;  %v816_v41 = vld [vmem:[#allocation2 + $0x90] sm:$0xf] }
 0x133   : > { %v1189_v30 = vsel %vm8964_vm11, %v1184_v33, %v1188_v4  ;;  %v1427_v15 = vrot.slane %v1425_v34, 4  ;;  %v3607_v55 = vsel %vm3599_vm5, %v3574_v29, %v9781_v42  ;;  %v3605_v44 = vsel %vm3599_vm5, %v3572_v13, %v9730_v57  ;;  %v820_v33 = vld [vmem:[#allocation2 + $0x98] sm:$0x1] }
 0x134   : > { %v9932_v60 = vpop.permute.xlu1 %3060  ;;  %v7893_v11 = vcombine.low %v1179_v19, %v1189_v30  ;;  %3404 = vrot.lane.b32.xlu0 %v8003_v56, %s8664_s29  ;;  %v1436_v36 = vsel %vm8928_vm7, %v1434_v53, %v1435_v61  ;;  %v8304_v43 = vpack.c.bf16 %v248_v63, %v248_v63  ;;  %v8305_v51 = vpack.c.bf16 %v249_v0, %v249_v0  ;;  %v8574_v19 = vld [vmem:[#allocation2 + $0x30] sm:$0xf]  ;;  %v8575_v56 = vld [vmem:[#allocation2 + $0x34] sm:$0xf] }
 0x135   : > { %v7909_v32 = vcombine.low %v1433_v12, %v1436_v36  ;;  %v1429_v16 = vsel %vm8928_vm7, %v1427_v15, %v1428_v59  ;;  %v1754_v42 = vshrl.u32 %v1485_v22, 16  ;;  %v1757_v21 = vshll.u32 %v1485_v22, 16  ;;  %v1907_v12 = vld [vmem:[#allocation2 + $0x84] sm:$0xe] }
 0x136   : > { %2816 = vrot.lane.b32.xlu1 %v7893_v11, %s8660_s25  ;;  %v7908_v7 = vcombine.low %v1426_v17, %v1429_v16  ;;  %v601_v26 = vshrl.u32 %v8304_v43, 16  ;;  %v604_v28 = vshll.u32 %v8304_v43, 16  ;;  %v609_v24 = vshrl.u32 %v8305_v51, 16  ;;  %v250_v15 = vld [vmem:[%s8937_s23 + $0xc0] sm:$0xff]  ;;  %v251_v43 = vld [vmem:[%s8937_s23 + $0xc8] sm:$0xff] }
 0x137   : > { %v612_v4 = vshll.u32 %v8305_v51, 16  ;;  %v1756_v57 = vrot.slane %v1754_v42, 4  ;;  %v1767_v54 = vshrl.u32 %v9939_v62, 16  ;;  %v1759_v40 = vrot.slane %v1757_v21, 5 }
 0x138   : > { %2894 = vrot.lane.b32.xlu0 %v7908_v7, %s8659_s24  ;;  %v603_v31 = vrot.slane %v601_v26, 7  ;;  %v7924_v29 = vcombine.low %v1485_v22, %v9939_v62  ;;  %v3640_v13 = vsel %vm3632_vm6, %v3607_v55, %v9801_v27  ;;  %v611_v2 = vrot.slane %v609_v24, 7  ;;  %v9956_v45 = vpop.permute.xlu1 %3140  ;;  %v8576_v7 = vld [vmem:[#allocation2 + $0x3c] sm:$0xf]  ;;  %v8577_v26 = vld [vmem:[#allocation2 + $0x40] sm:$0xf] }
 0x139   : > { %v3638_v10 = vsel %vm3632_vm6, %v3605_v44, %v9773_v9  ;;  %v1763_v5 = vshll.u32 %v9939_v62, 16  ;;  %v1769_v8 = vrot.slane %v1767_v54, 4  ;;  %v1760_v25 = vor.u32 %v1759_v40, %v1756_v57  ;;  %v9960_v53 = vpop.permute.xlu0 %3314 }
 0x13a   : > { %2896 = vrot.lane.b32.xlu1 %v7909_v32, %s8659_s24  ;;  %v606_v61 = vor.u32 %v604_v28, %v603_v31  ;;  %v607_v49 = vrot.slane %v603_v31, 4  ;;  %v1773_v34 = vshll.u32 %v9947_v18, 16  ;;  %v614_v27 = vor.u32 %v612_v4, %v611_v2 }
 0x13b   : > { %v616_v59 = vrot.slane %v611_v2, 4  ;;  %v1765_v63 = vrot.slane %v1763_v5, 5  ;;  %v7870_v9 = vcombine.low %v8574_v19, %v8575_v56  ;;  %v1761_v22 = vrot.slane %v1760_v25, 4 }
 0x13c   : > { %v817_v0 = vsel %vm8958_vm10, %v606_v61, %v816_v41  ;;  %2990 = vrot.lane.b32.xlu0 %v7924_v29, %s8661_s26  ;;  %v1775_v30 = vrot.slane %v1773_v34, 5  ;;  %v3671_v17 = vsel %vm3665_vm8, %v3638_v10, %v9792_v52  ;;  %v615_v55 = vsel %vm8972_vm12, %v607_v49, %v614_v27  ;;  %v9983_v24 = vpop.permute.xlu1 %3236  ;;  %v252_v10 = vld [vmem:[%s8937_s23 + $0xd0] sm:$0xff] }
 0x13d   : > { %818 = vst [vmem:[#allocation2 + $0x90] sm:$0xf] %v817_v0  ;;  %v821_v11 = vsel %vm8988_vm13, %v616_v59, %v820_v33  ;;  %v1770_v36 = vor.u32 %v1769_v8, %v1765_v63  ;;  %v3433_v44 = vsel %vm3418_vm14, %v7870_v9, %v9833_v38  ;;  %8402 = vmatprep.mubr.msk.bf16.mxu0 %vm3741_vm9, %v3671_v17  ;;  %819 = vst.msk [vmem:[#allocation2 + $0x94] sm:$0xf] %vm258_vm0, %v615_v55  ;;  %v823_v17 = vld [vmem:[#allocation2 + $0x9c] sm:$0xf] }
 0x13e   : > { %822 = vst [vmem:[#allocation2 + $0x98] sm:$0x1] %v821_v11  ;;  %v1766_v52 = vsel %vm8964_vm11, %v1761_v22, %v1765_v63  ;;  %v7844_v32 = vrot.slane %v1907_v12, 9  ;;  %v2033_v16 = vrot.slane %v9939_v62, 5  ;;  %v2036_v51 = vrot.slane %v9947_v18, 5 }
 0x13f   : > { %v1771_v42 = vrot.slane %v1770_v36, 4  ;;  %v7871_v28 = vcombine.low %v8576_v7, %v8577_v26  ;;  %v3673_v38 = vsel %vm3665_vm8, %v3640_v13, %v9812_v46  ;;  %v8306_v21 = vpack.c.bf16 %v250_v15, %v250_v15  ;;  %v9992_v46 = vpop.permute.xlu0 %3394 }
 0x140   : > { %v2034_v4 = vsel %vm8928_vm7, %v7844_v32, %v2033_v16  ;;  %v2035_v57 = vrot.slane %v2033_v16, 4  ;;  %v8307_v54 = vpack.c.bf16 %v251_v43, %v251_v43  ;;  %8403 = vmatmul.mubr.msk.bf16.gmra.mrb[4].mxu0 %vm3741_vm9, %v3673_v38  ;;  %v3477_v41 = vsel %vm3467_vm15, %v3433_v44, %v9854_v50  ;;  %v10014_v9 = vpop.permute.xlu1 %3316 }
 0x141   : > { %v1776_v62 = vsel %vm8964_vm11, %v1771_v42, %v1775_v30  ;;  %v3436_v18 = vsel %vm3418_vm14, %v7871_v28, %v9862_v20  ;;  %v618_v31 = vshrl.u32 %v8306_v21, 16  ;;  %v621_v40 = vshll.u32 %v8306_v21, 16 }
 0x142   : > { %v7940_v29 = vcombine.low %v1766_v52, %v1776_v62  ;;  %v2037_v13 = vsel %vm8928_vm7, %v2035_v57, %v2036_v51  ;;  %v626_v2 = vshrl.u32 %v8307_v54, 16  ;;  %v629_v8 = vshll.u32 %v8307_v54, 16 }
 0x143   : > { %v620_v5 = vrot.slane %v618_v31, 7  ;;  %v3479_v61 = vsel %vm3467_vm15, %v3436_v18, %v9884_v23  ;;  %v3510_v20 = vsel %vm3500_vm1, %v3477_v41, %v9869_v58  ;;  %v7956_v25 = vcombine.low %v2034_v4, %v2037_v13  ;;  %v827_v41 = vld [vmem:[#allocation2 + $0xa4] sm:$0x1] }
 0x144   : > { %v1487_v49 = vld [vmem:[#allocation2 + $0x90] sm:$0xf]  ;;  %3070 = vrot.lane.b32.xlu0 %v7940_v29, %s8665_s30  ;;  %v10004_v34 = vrot.slane %v626_v2, 7  ;;  %v3512_v27 = vsel %vm3500_vm1, %v3479_v61, %v9902_v35  ;;  %v10010_v50 = vsel %vm3533_vm2, %v3510_v20, %v9895_v14  ;;  %v1488_v59 = vld [vmem:[#allocation2 + $0x94] sm:$0xf]  ;;  %v10012_v58 = vpack.c.bf16 %v252_v10, %v252_v10  ;;  %v10034_v31 = vpop.permute.xlu1 %2806 }
 0x145   : > { %v1908_v33 = vld [vmem:[#allocation2 + $0x90] sm:$0xe]  ;;  %v1778_v63 = vshrl.u32 %v1487_v49, 16  ;;  %v1781_v23 = vshll.u32 %v1487_v49, 16  ;;  %v1508_v19 = vld [vmem:[#allocation2 + $0x98] sm:$0x1]  ;;  %v623_v56 = vor.u32 %v621_v40, %v620_v5  ;;  %v7925_v0 = vcombine.low %v1487_v49, %v1488_v59 }
 0x146   : > { %v1791_v12 = vshrl.u32 %v1488_v59, 16  ;;  %v1787_v22 = vshll.u32 %v1488_v59, 16  ;;  %v1797_v30 = vshll.u32 %v1508_v19, 16  ;;  %v7845_v55 = vrot.slane %v1908_v33, 9  ;;  %v2094_v14 = vld [vmem:[#allocation2 + $0x90] sm:$0xf] }
 0x147   : > { %v1780_v15 = vrot.slane %v1778_v63, 4  ;;  %v1783_v35 = vrot.slane %v1781_v23, 5  ;;  %v2040_v11 = vrot.slane %v1488_v59, 5  ;;  %v10016_v36 = vpop.permute.xlu0 %3396  ;;  %2992 = vrot.lane.b32.xlu1 %v7925_v0, %s8661_s26  ;;  %v2043_v52 = vrot.slane %v1508_v19, 5  ;;  %v10020_v32 = vld [vmem:[#allocation2 + $0x94] sm:$0xf] }
 0x148   : > { %v1789_v44 = vrot.slane %v1787_v22, 5  ;;  %v1793_v43 = vrot.slane %v1791_v12, 4  ;;  %3150 = vrot.lane.b32.xlu0 %v7956_v25, %s8663_s28  ;;  %v10024_v16 = vsel %vm3533_vm2, %v3512_v27, %v9932_v60  ;;  %v1799_v42 = vrot.slane %v1797_v30, 5  ;;  %v10032_v18 = vld [vmem:[#allocation2 + $0x98] sm:$0x1] }
 0x149   : > { %v1784_v51 = vor.u32 %v1783_v35, %v1780_v15  ;;  %v2042_v7 = vrot.slane %v2040_v11, 4  ;;  %v624_v26 = vrot.slane %v620_v5, 4  ;;  %v631_v38 = vor.u32 %v629_v8, %v10004_v34  ;;  %v875_v10 = vld [vmem:[#allocation2 + $0x90] sm:$0xf]  ;;  %v10045_v49 = vld [vmem:[#allocation2 + $0x94] sm:$0xf] }
 0x14a   : > { %v1794_v28 = vor.u32 %v1793_v43, %v1789_v44  ;;  %v824_v21 = vsel %vm8958_vm10, %v623_v56, %v823_v17  ;;  %v2363_v4 = vshrl.u32 %v2094_v14, 16  ;;  %v2041_v54 = vsel %vm8928_vm7, %v7845_v55, %v2040_v11  ;;  %v10053_v23 = vld [vmem:[#allocation2 + $0x98] sm:$0x1] }
 0x14b   : > { %v1785_v57 = vrot.slane %v1784_v51, 4  ;;  %825 = vst [vmem:[#allocation2 + $0x9c] sm:$0xf] %v824_v21  ;;  %v2366_v62 = vshll.u32 %v2094_v14, 16  ;;  %v2376_v60 = vshrl.u32 %v10020_v32, 16  ;;  %v2044_v29 = vsel %vm8928_vm7, %v2042_v7, %v2043_v52  ;;  %v10047_v33 = vpop.permute.xlu0 %2886 }
 0x14c   : > { %v1795_v40 = vrot.slane %v1794_v28, 4  ;;  %v632_v13 = vsel %vm8972_vm12, %v624_v26, %v631_v38  ;;  %v2365_v2 = vrot.slane %v2363_v4, 4  ;;  %v7972_v61 = vcombine.low %v2094_v14, %v10020_v32  ;;  %v2516_v14 = vld [vmem:[#allocation2 + $0x90] sm:$0xe] }
 0x14d   : > { %v1790_v5 = vsel %vm8964_vm11, %v1785_v57, %v1789_v44  ;;  %826 = vst.msk [vmem:[#allocation2 + $0xa0] sm:$0xf] %vm258_vm0, %v632_v13  ;;  %v2368_v8 = vrot.slane %v2366_v62, 5  ;;  %v633_v20 = vrot.slane %v10004_v34, 4  ;;  %v2372_v27 = vshll.u32 %v10020_v32, 16  ;;  %v10062_v44 = vpop.permute.xlu1 %2808 }
 0x14e   : > { %v1800_v25 = vsel %vm8964_vm11, %v1795_v40, %v1799_v42  ;;  %v2378_v59 = vrot.slane %v2376_v60, 4  ;;  %v2382_v63 = vshll.u32 %v10032_v18, 16  ;;  %3246 = vrot.lane.b32.xlu0 %v7972_v61, %s8662_s27  ;;  %v1191_v12 = vshrl.u32 %v875_v10, 16 }
 0x14f   : > { %v7941_v19 = vcombine.low %v1790_v5, %v1800_v25  ;;  %v828_v34 = vsel %vm8988_vm13, %v633_v20, %v827_v41  ;;  %v2369_v56 = vor.u32 %v2368_v8, %v2365_v2  ;;  %v7957_v0 = vcombine.low %v2041_v54, %v2044_v29  ;;  %v10066_v4 = vpop.permute.xlu0 %2982 }
 0x150   : > { %829 = vst [vmem:[#allocation2 + $0xa4] sm:$0x1] %v828_v34  ;;  %v2374_v22 = vrot.slane %v2372_v27, 5  ;;  %v1194_v30 = vshll.u32 %v875_v10, 16  ;;  %v1200_v17 = vshll.u32 %v10045_v49, 16  ;;  %v1193_v35 = vrot.slane %v1191_v12, 4 }
 0x151   : > { %3072 = vrot.lane.b32.xlu1 %v7941_v19, %s8665_s30  ;;  %v2370_v15 = vrot.slane %v2369_v56, 4  ;;  %v1204_v55 = vshrl.u32 %v10045_v49, 16  ;;  %v1210_v11 = vshll.u32 %v10053_v23, 16  ;;  %v2384_v51 = vrot.slane %v2382_v63, 5  ;;  %v10077_v34 = vpop.permute.xlu1 %2888 }
 0x152   : > { %v2096_v43 = vld [vmem:[#allocation2 + $0x9c] sm:$0xf]  ;;  %v2379_v52 = vor.u32 %v2378_v59, %v2374_v22  ;;  %v1196_v42 = vrot.slane %v1194_v30, 5  ;;  %v1202_v7 = vrot.slane %v1200_v17, 5  ;;  %v7860_v40 = vrot.slane %v2516_v14, 9 }
 0x153   : > { %v2387_v26 = vshrl.u32 %v2096_v43, 16  ;;  %v2390_v28 = vshll.u32 %v2096_v43, 16  ;;  %v2375_v38 = vsel %vm8964_vm11, %v2370_v15, %v2374_v22  ;;  %v1206_v21 = vrot.slane %v1204_v55, 4  ;;  %v877_v19 = vld [vmem:[#allocation2 + $0x9c] sm:$0xf] }
 0x154   : > { %v10068_v57 = vld [vmem:[#allocation2 + $0xa0] sm:$0xf]  ;;  %v2380_v54 = vrot.slane %v2379_v52, 4  ;;  %v1197_v62 = vor.u32 %v1196_v42, %v1193_v35  ;;  %v1212_v60 = vrot.slane %v1210_v11, 5  ;;  %v2642_v63 = vrot.slane %v10020_v32, 5 }
 0x155   : > { %3152 = vrot.lane.b32.xlu1 %v7957_v0, %s8663_s28  ;;  %v2389_v29 = vrot.slane %v2387_v26, 4  ;;  %v2392_v13 = vrot.slane %v2390_v28, 5  ;;  %v2400_v2 = vshrl.u32 %v10068_v57, 16  ;;  %v7973_v41 = vcombine.low %v2096_v43, %v10068_v57  ;;  %v878_v35 = vld [vmem:[#allocation2 + $0xa0] sm:$0xf]  ;;  %v10086_v55 = vpop.permute.xlu0 %3062 }
 0x156   : > { %v2396_v10 = vshll.u32 %v10068_v57, 16  ;;  %v2385_v5 = vsel %vm8964_vm11, %v2380_v54, %v2384_v51  ;;  %v1198_v8 = vrot.slane %v1197_v62, 4  ;;  %v1207_v61 = vor.u32 %v1206_v21, %v1202_v7  ;;  %v2517_v28 = vld [vmem:[#allocation2 + $0x9c] sm:$0xe] }
 0x157   : > { %v2117_v20 = vld [vmem:[#allocation2 + $0xa4] sm:$0x1]  ;;  %v2393_v25 = vor.u32 %v2392_v13, %v2389_v29  ;;  %v2402_v27 = vrot.slane %v2400_v2, 4  ;;  %v7988_v59 = vcombine.low %v2375_v38, %v2385_v5  ;;  %v2643_v17 = vsel %vm8928_vm7, %v7860_v40, %v2642_v63 }
 0x158   : > { %v2398_v56 = vrot.slane %v2396_v10, 5  ;;  %v2406_v12 = vshll.u32 %v2117_v20, 16  ;;  %v1203_v0 = vsel %vm8964_vm11, %v1198_v8, %v1202_v7  ;;  %v1208_v22 = vrot.slane %v1207_v61, 4  ;;  %v10090_v52 = vld [vmem:[#allocation2 + $0xa4] sm:$0x1]  ;;  %v10098_v2 = vpop.permute.xlu1 %2984 }
 0x159   : > { %3248 = vrot.lane.b32.xlu1 %v7973_v41, %s8662_s27  ;;  %v2394_v30 = vrot.slane %v2393_v25, 4  ;;  %3326 = vrot.lane.b32.xlu0 %v7988_v59, %s8666_s6  ;;  %v2644_v15 = vrot.slane %v2642_v63, 4  ;;  %v2645_v32 = vrot.slane %v10032_v18, 5  ;;  %v1215_v51 = vshrl.u32 %v877_v19, 16  ;;  %v1299_v8 = vld [vmem:[#allocation2 + $0x9c] sm:$0xe] }
 0x15a   : > { %v2403_v11 = vor.u32 %v2402_v27, %v2398_v56  ;;  %v2408_v14 = vrot.slane %v2406_v12, 5  ;;  %v1213_v43 = vsel %vm8964_vm11, %v1208_v22, %v1212_v60  ;;  %v1442_v7 = vrot.slane %v10053_v23, 5  ;;  %v1298_v63 = vld [vmem:[#allocation2 + $0x90] sm:$0xe] }
 0x15b   : > { %v2399_v42 = vsel %vm8964_vm11, %v2394_v30, %v2398_v56  ;;  %v2646_v26 = vsel %vm8928_vm7, %v2644_v15, %v2645_v32  ;;  %v1218_v18 = vshll.u32 %v877_v19, 16  ;;  %v1217_v54 = vrot.slane %v1215_v51, 4  ;;  %v10105_v19 = vpop.permute.xlu0 %3142 }
 0x15c   : > { %v2404_v38 = vrot.slane %v2403_v11, 4  ;;  %v8004_v21 = vcombine.low %v2643_v17, %v2646_v26  ;;  %v1224_v62 = vshll.u32 %v878_v35, 16  ;;  %v7894_v40 = vcombine.low %v1203_v0, %v1213_v43 }
 0x15d   : > { %v1220_v29 = vrot.slane %v1218_v18, 5  ;;  %v1228_v60 = vshrl.u32 %v878_v35, 16  ;;  %v1234_v13 = vshll.u32 %v10090_v52, 16  ;;  %v7861_v10 = vrot.slane %v2517_v28, 9 }
 0x15e   : > { %v2409_v41 = vsel %vm8964_vm11, %v2404_v38, %v2408_v14  ;;  %3406 = vrot.lane.b32.xlu0 %v8004_v21, %s8664_s29  ;;  %v1226_v23 = vrot.slane %v1224_v62, 5  ;;  %v2649_v5 = vrot.slane %v10068_v57, 5  ;;  %v1449_v59 = vrot.slane %v10090_v52, 5  ;;  %v253_v52 = vld [vmem:[%s8937_s23 + $0xd8] sm:$0xff] }
 0x15f   : > { %v7989_v61 = vcombine.low %v2399_v42, %v2409_v41  ;;  %v1221_v25 = vor.u32 %v1220_v29, %v1217_v54  ;;  %v1230_v27 = vrot.slane %v1228_v60, 4  ;;  %v1236_v56 = vrot.slane %v1234_v13, 5  ;;  %v1489_v21 = vld [vmem:[#allocation2 + $0x9c] sm:$0xf]  ;;  %v10135_v54 = vld [vmem:[#allocation2 + $0xa0] sm:$0xf]  ;;  %v10137_v62 = vpop.permute.xlu0 %3238 }
 0x160   : > { %v2650_v12 = vsel %vm8928_vm7, %v7861_v10, %v2649_v5  ;;  %v2651_v0 = vrot.slane %v2649_v5, 4  ;;  %v2652_v22 = vrot.slane %v2117_v20, 5  ;;  %v3578_v17 = vsel %vm3566_vm3, %v10024_v16, %v9956_v45 }
 0x161   : > { %3328 = vrot.lane.b32.xlu1 %v7989_v61, %s8666_s6  ;;  %v1222_v30 = vrot.slane %v1221_v25, 4  ;;  %v1231_v57 = vor.u32 %v1230_v27, %v1226_v23  ;;  %v7831_v15 = vrot.slane %v1299_v8, 9  ;;  %v1446_v11 = vrot.slane %v878_v35, 5  ;;  %v10122_v18 = vpop.permute.xlu1 %3064  ;;  %v830_v8 = vld [vmem:[#allocation2 + $0xa8] sm:$0xf] }
 0x162   : > { %v2653_v32 = vsel %vm8928_vm7, %v2651_v0, %v2652_v22  ;;  %v7830_v14 = vrot.slane %v1298_v63, 9  ;;  %v1439_v43 = vrot.slane %v10045_v49, 5  ;;  %v3576_v26 = vsel %vm3566_vm3, %v10010_v50, %v9913_v6 }
 0x163   : > { %v1227_v20 = vsel %vm8964_vm11, %v1222_v30, %v1226_v23  ;;  %v1232_v51 = vrot.slane %v1231_v57, 4  ;;  %v8005_v42 = vcombine.low %v2650_v12, %v2653_v32  ;;  %v1447_v45 = vsel %vm8928_vm7, %v7831_v15, %v1446_v11  ;;  %v834_v15 = vld [vmem:[#allocation2 + $0xb0] sm:$0x1] }
 0x164   : > { %v1448_v16 = vrot.slane %v1446_v11, 4  ;;  %v1440_v35 = vsel %vm8928_vm7, %v7830_v14, %v1439_v43  ;;  %v1441_v49 = vrot.slane %v1439_v43, 4  ;;  %v3609_v6 = vsel %vm3599_vm5, %v3576_v26, %v9943_v48  ;;  %v8579_v26 = vld [vmem:[#allocation2 + $0x4c] sm:$0xf] }
 0x165   : > { %2818 = vrot.lane.b32.xlu1 %v7894_v40, %s8660_s25  ;;  %v1237_v28 = vsel %vm8964_vm11, %v1232_v51, %v1236_v56  ;;  %3408 = vrot.lane.b32.xlu0 %v8005_v42, %s8664_s29  ;;  %v8309_v50 = vpack.c.bf16 %v253_v52, %v253_v52  ;;  %v635_v38 = vshrl.u32 %v10012_v58, 16  ;;  %v638_v13 = vshll.u32 %v10012_v58, 16  ;;  %v1509_v58 = vld [vmem:[#allocation2 + $0xa4] sm:$0x1]  ;;  %v10148_v12 = vpop.permute.xlu1 %3144  ;;  %v1909_v52 = vld [vmem:[#allocation2 + $0x9c] sm:$0xe] }
 0x166   : > { %v7895_v29 = vcombine.low %v1227_v20, %v1237_v28  ;;  %v1450_v40 = vsel %vm8928_vm7, %v1448_v16, %v1449_v59  ;;  %v1443_v60 = vsel %vm8928_vm7, %v1441_v49, %v1442_v7  ;;  %v1802_v61 = vshrl.u32 %v1489_v21, 16  ;;  %v8578_v42 = vld [vmem:[#allocation2 + $0x48] sm:$0xf]  ;;  %v254_v28 = vld [vmem:[%s8937_s23 + $0xe0] sm:$0xff] }
 0x167   : > { %v7911_v41 = vcombine.low %v1447_v45, %v1450_v40  ;;  %v7910_v23 = vcombine.low %v1440_v35, %v1443_v60  ;;  %v637_v48 = vrot.slane %v635_v38, 7  ;;  %v643_v10 = vshrl.u32 %v8309_v50, 16 }
 0x168   : > { %v646_v5 = vshll.u32 %v8309_v50, 16  ;;  %v1805_v25 = vshll.u32 %v1489_v21, 16  ;;  %v1815_v27 = vshrl.u32 %v10135_v54, 16  ;;  %v7926_v7 = vcombine.low %v1489_v21, %v10135_v54 }
 0x169   : > { %2820 = vrot.lane.b32.xlu1 %v7895_v29, %s8660_s25  ;;  %2898 = vrot.lane.b32.xlu0 %v7910_v23, %s8659_s24  ;;  %v640_v59 = vor.u32 %v638_v13, %v637_v48  ;;  %v641_v63 = vrot.slane %v637_v48, 4  ;;  %v645_v56 = vrot.slane %v643_v10, 7  ;;  %v3611_v0 = vsel %vm3599_vm5, %v3578_v17, %v9983_v24  ;;  %v10157_v20 = vpop.permute.xlu0 %3318  ;;  %v8581_v23 = vld [vmem:[#allocation2 + $0x58] sm:$0xf]  ;;  %v10174_v48 = vpop.permute.xlu1 %3240 }
 0x16a   : > { %v1804_v22 = vrot.slane %v1802_v61, 4  ;;  %v1807_v30 = vrot.slane %v1805_v25, 5  ;;  %v3642_v57 = vsel %vm3632_vm6, %v3609_v6, %v9960_v53  ;;  %v1811_v43 = vshll.u32 %v10135_v54, 16  ;;  %v255_v6 = vld [vmem:[%s8937_s23 + $0xe8] sm:$0xff] }
 0x16b   : > { %v648_v32 = vor.u32 %v646_v5, %v645_v56  ;;  %v831_v11 = vsel %vm8958_vm10, %v640_v59, %v830_v8  ;;  %v650_v14 = vrot.slane %v645_v56, 4  ;;  %v1817_v17 = vrot.slane %v1815_v27, 4 }
 0x16c   : > { %832 = vst [vmem:[#allocation2 + $0xa8] sm:$0xf] %v831_v11  ;;  %v1808_v24 = vor.u32 %v1807_v30, %v1804_v22  ;;  %v1821_v51 = vshll.u32 %v1509_v58, 16  ;;  %v7872_v53 = vcombine.low %v8578_v42, %v8579_v26  ;;  %v1813_v35 = vrot.slane %v1811_v43, 5 }
 0x16d   : > { %2900 = vrot.lane.b32.xlu1 %v7911_v41, %s8659_s24  ;;  %v649_v45 = vsel %vm8972_vm12, %v641_v63, %v648_v32  ;;  %2994 = vrot.lane.b32.xlu0 %v7926_v7, %s8661_s26  ;;  %v835_v16 = vsel %vm8988_vm13, %v650_v14, %v834_v15  ;;  %v3675_v49 = vsel %vm3665_vm8, %v3642_v57, %v9992_v46  ;;  %v7846_v29 = vrot.slane %v1909_v52, 9  ;;  %v8580_v41 = vld [vmem:[#allocation2 + $0x54] sm:$0xf] }
 0x16e   : > { %833 = vst.msk [vmem:[#allocation2 + $0xac] sm:$0xf] %vm258_vm0, %v649_v45  ;;  %v3644_v50 = vsel %vm3632_vm6, %v3611_v0, %v10014_v9  ;;  %836 = vst [vmem:[#allocation2 + $0xb0] sm:$0x1] %v835_v16  ;;  %v1809_v38 = vrot.slane %v1808_v24, 4  ;;  %v1823_v21 = vrot.slane %v1821_v51, 5  ;;  %8406 = vmatprep.mubr.msk.bf16.mxu0 %vm3741_vm9, %v3675_v49  ;;  %v1818_v40 = vor.u32 %v1817_v17, %v1813_v35  ;;  %v10185_v27 = vpop.permute.xlu0 %3398  ;;  %v10199_v51 = vpop.permute.xlu1 %3320 }
 0x16f   : > { %v2047_v60 = vrot.slane %v10135_v54, 5  ;;  %v2050_v13 = vrot.slane %v1509_v58, 5  ;;  %v7873_v46 = vcombine.low %v8580_v41, %v8581_v23  ;;  %v3677_v10 = vsel %vm3665_vm8, %v3644_v50, %v10016_v36  ;;  %v837_v16 = vld [vmem:[#allocation2 + $0xb4] sm:$0xf] }
 0x170   : > { %v8310_v5 = vpack.c.bf16 %v254_v28, %v254_v28  ;;  %v8311_v9 = vpack.c.bf16 %v255_v6, %v255_v6  ;;  %v1814_v8 = vsel %vm8964_vm11, %v1809_v38, %v1813_v35  ;;  %v1819_v61 = vrot.slane %v1818_v40, 4  ;;  %8407 = vmatmul.mubr.msk.bf16.gmra.mrb[8].mxu0 %vm3741_vm9, %v3677_v10 }
 0x171   : > { %v10182_v25 = vsel %vm3418_vm14, %v7872_v53, %v10034_v31  ;;  %v2049_v54 = vrot.slane %v2047_v60, 4  ;;  %v2048_v59 = vsel %vm8928_vm7, %v7846_v29, %v2047_v60  ;;  %v3442_v36 = vsel %vm3418_vm14, %v7873_v46, %v10062_v44 }
 0x172   : > { %v652_v63 = vshrl.u32 %v8310_v5, 16  ;;  %v660_v56 = vshrl.u32 %v8311_v9, 16  ;;  %v1824_v58 = vsel %vm8964_vm11, %v1819_v61, %v1823_v21  ;;  %v655_v22 = vshll.u32 %v8310_v5, 16 }
 0x173   : > { %v1491_v7 = vld [vmem:[#allocation2 + $0xa8] sm:$0xf]  ;;  %v2051_v31 = vsel %vm8928_vm7, %v2049_v54, %v2050_v13  ;;  %v663_v30 = vshll.u32 %v8311_v9, 16  ;;  %v7942_v32 = vcombine.low %v1814_v8, %v1824_v58  ;;  %v10197_v17 = vsel %vm3467_vm15, %v3442_v36, %v10077_v34 }
 0x174   : > { %v1910_v0 = vld [vmem:[#allocation2 + $0xa8] sm:$0xe]  ;;  %v1826_v57 = vshrl.u32 %v1491_v7, 16  ;;  %v1829_v15 = vshll.u32 %v1491_v7, 16  ;;  %v7958_v52 = vcombine.low %v2048_v59, %v2051_v31  ;;  %v654_v44 = vrot.slane %v652_v63, 7 }
 0x175   : > { %v7847_v11 = vrot.slane %v1910_v0, 9  ;;  %v1492_v14 = vld [vmem:[#allocation2 + $0xac] sm:$0xf]  ;;  %v1510_v43 = vld [vmem:[#allocation2 + $0xb0] sm:$0x1]  ;;  %v662_v24 = vrot.slane %v660_v56, 7  ;;  %3074 = vrot.lane.b32.xlu0 %v7942_v32, %s8665_s30  ;;  %v10202_v38 = vpop.permute.xlu0 %3400  ;;  %v10219_v56 = vpop.permute.xlu1 %2810  ;;  %v10228_v31 = vsel %vm3467_vm15, %v10182_v25, %v10047_v33 }
 0x176   : > { %v1828_v42 = vrot.slane %v1826_v57, 4  ;;  %v1831_v26 = vrot.slane %v1829_v15, 5  ;;  %v1839_v53 = vshrl.u32 %v1492_v14, 16  ;;  %v7927_v45 = vcombine.low %v1491_v7, %v1492_v14  ;;  %v2098_v50 = vld [vmem:[#allocation2 + $0xa8] sm:$0xf] }
 0x177   : > { %v1835_v35 = vshll.u32 %v1492_v14, 16  ;;  %v1845_v49 = vshll.u32 %v1510_v43, 16  ;;  %v2054_v28 = vrot.slane %v1492_v14, 5  ;;  %v2057_v6 = vrot.slane %v1510_v43, 5  ;;  %v10205_v60 = vld [vmem:[#allocation2 + $0xac] sm:$0xf] }
 0x178   : > { %2996 = vrot.lane.b32.xlu1 %v7927_v45, %s8661_s26  ;;  %v1832_v34 = vor.u32 %v1831_v26, %v1828_v42  ;;  %v1841_v21 = vrot.slane %v1839_v53, 4  ;;  %v657_v29 = vor.u32 %v655_v22, %v654_v44  ;;  %v658_v40 = vrot.slane %v654_v44, 4  ;;  %v10217_v63 = vld [vmem:[#allocation2 + $0xb0] sm:$0x1]  ;;  %v841_v22 = vld [vmem:[#allocation2 + $0xbc] sm:$0x1] }
 0x179   : > { %v1837_v13 = vrot.slane %v1835_v35, 5  ;;  %v1847_v41 = vrot.slane %v1845_v49, 5  ;;  %v10209_v23 = vsel %vm8928_vm7, %v7847_v11, %v2054_v28  ;;  %v2056_v46 = vrot.slane %v2054_v28, 4  ;;  %3154 = vrot.lane.b32.xlu0 %v7958_v52, %s8663_s28  ;;  %v10234_v14 = vpop.permute.xlu0 %2890  ;;  %v10239_v25 = vld [vmem:[#allocation2 + $0xac] sm:$0xf] }
 0x17a   : > { %v1833_v10 = vrot.slane %v1832_v34, 4  ;;  %v665_v5 = vor.u32 %v663_v30, %v662_v24  ;;  %v838_v9 = vsel %vm8958_vm10, %v657_v29, %v837_v16  ;;  %v2411_v8 = vshrl.u32 %v2098_v50, 16  ;;  %v10230_v30 = vld [vmem:[#allocation2 + $0xa8] sm:$0xf]  ;;  %v10246_v53 = vld [vmem:[#allocation2 + $0xb0] sm:$0x1] }
 0x17b   : > { %v1842_v61 = vor.u32 %v1841_v21, %v1837_v13  ;;  %v2058_v54 = vsel %vm8928_vm7, %v2056_v46, %v2057_v6  ;;  %839 = vst [vmem:[#allocation2 + $0xb4] sm:$0xf] %v838_v9  ;;  %v2414_v59 = vshll.u32 %v2098_v50, 16  ;;  %v2424_v36 = vshrl.u32 %v10205_v60, 16  ;;  %v2518_v16 = vld [vmem:[#allocation2 + $0xa8] sm:$0xe] }
 0x17c   : > { %v1838_v7 = vsel %vm8964_vm11, %v1833_v10, %v1837_v13  ;;  %v666_v58 = vsel %vm8972_vm12, %v658_v40, %v665_v5  ;;  %v2413_v0 = vrot.slane %v2411_v8, 4  ;;  %v7974_v32 = vcombine.low %v2098_v50, %v10205_v60  ;;  %v10252_v40 = vpop.permute.xlu1 %2812 }
 0x17d   : > { %v1843_v57 = vrot.slane %v1842_v61, 4  ;;  %840 = vst.msk [vmem:[#allocation2 + $0xb8] sm:$0xf] %vm258_vm0, %v666_v58  ;;  %v2416_v15 = vrot.slane %v2414_v59, 5  ;;  %v667_v11 = vrot.slane %v662_v24, 4  ;;  %v7959_v43 = vcombine.low %v10209_v23, %v2058_v54  ;;  %v10258_v54 = vpop.permute.xlu0 %2986 }
 0x17e   : > { %v2420_v52 = vshll.u32 %v10205_v60, 16  ;;  %v2426_v44 = vrot.slane %v2424_v36, 4  ;;  %v2430_v33 = vshll.u32 %v10217_v63, 16  ;;  %3250 = vrot.lane.b32.xlu0 %v7974_v32, %s8662_s27  ;;  %v1239_v45 = vshrl.u32 %v10230_v30, 16 }
 0x17f   : > { %v1848_v42 = vsel %vm8964_vm11, %v1843_v57, %v1847_v41  ;;  %v842_v26 = vsel %vm8988_vm13, %v667_v11, %v841_v22  ;;  %v2417_v24 = vor.u32 %v2416_v15, %v2413_v0  ;;  %v1242_v6 = vshll.u32 %v10230_v30, 16 }
 0x180   : > { %v7943_v35 = vcombine.low %v1838_v7, %v1848_v42  ;;  %843 = vst [vmem:[#allocation2 + $0xbc] sm:$0x1] %v842_v26  ;;  %v2422_v49 = vrot.slane %v2420_v52, 5  ;;  %v2432_v28 = vrot.slane %v2430_v33, 5  ;;  %v1241_v34 = vrot.slane %v1239_v45, 4 }
 0x181   : > { %v2418_v50 = vrot.slane %v2417_v24, 4  ;;  %v1248_v21 = vshll.u32 %v10239_v25, 16  ;;  %v1252_v29 = vshrl.u32 %v10239_v25, 16  ;;  %v1244_v23 = vrot.slane %v1242_v6, 5 }
 0x182   : > { %3076 = vrot.lane.b32.xlu1 %v7943_v35, %s8665_s30  ;;  %v2100_v13 = vld [vmem:[#allocation2 + $0xb4] sm:$0xf]  ;;  %v2427_v41 = vor.u32 %v2426_v44, %v2422_v49  ;;  %v1258_v46 = vshll.u32 %v10246_v53, 16  ;;  %v7862_v10 = vrot.slane %v2518_v16, 9  ;;  %v2656_v16 = vrot.slane %v10205_v60, 5  ;;  %v10269_v35 = vpop.permute.xlu1 %2892 }
 0x183   : > { %v2435_v5 = vshrl.u32 %v2100_v13, 16  ;;  %v2438_v9 = vshll.u32 %v2100_v13, 16  ;;  %v2423_v8 = vsel %vm8964_vm11, %v2418_v50, %v2422_v49  ;;  %v1250_v61 = vrot.slane %v1248_v21, 5 }
 0x184   : > { %v10260_v59 = vld [vmem:[#allocation2 + $0xb8] sm:$0xf]  ;;  %v2428_v36 = vrot.slane %v2427_v41, 4  ;;  %v1245_v7 = vor.u32 %v1244_v23, %v1241_v34  ;;  %v1254_v58 = vrot.slane %v1252_v29, 4  ;;  %v1260_v0 = vrot.slane %v1258_v46, 5  ;;  %v10282_v41 = vpop.permute.xlu0 %3066 }
 0x185   : > { %v2437_v22 = vrot.slane %v2435_v5, 4  ;;  %v2440_v57 = vrot.slane %v2438_v9, 5  ;;  %v2448_v15 = vshrl.u32 %v10260_v59, 16  ;;  %v7975_v32 = vcombine.low %v2100_v13, %v10260_v59  ;;  %v10274_v34 = vld [vmem:[#allocation2 + $0xb4] sm:$0xf] }
 0x186   : > { %3156 = vrot.lane.b32.xlu1 %v7959_v43, %s8663_s28  ;;  %v2444_v11 = vshll.u32 %v10260_v59, 16  ;;  %v2433_v52 = vsel %vm8964_vm11, %v2428_v36, %v2432_v28  ;;  %v1246_v44 = vrot.slane %v1245_v7, 4  ;;  %v1255_v33 = vor.u32 %v1254_v58, %v1250_v61  ;;  %v10280_v13 = vld [vmem:[#allocation2 + $0xb8] sm:$0xf] }
 0x187   : > { %v2119_v42 = vld [vmem:[#allocation2 + $0xbc] sm:$0x1]  ;;  %v2441_v26 = vor.u32 %v2440_v57, %v2437_v22  ;;  %v2450_v24 = vrot.slane %v2448_v15, 4  ;;  %v7990_v45 = vcombine.low %v2423_v8, %v2433_v52  ;;  %v3516_v43 = vsel %vm3500_vm1, %v10197_v17, %v10098_v2 }
 0x188   : > { %v2446_v49 = vrot.slane %v2444_v11, 5  ;;  %v2454_v6 = vshll.u32 %v2119_v42, 16  ;;  %v1256_v50 = vrot.slane %v1255_v33, 4  ;;  %v2657_v21 = vsel %vm8928_vm7, %v7862_v10, %v2656_v16  ;;  %v10290_v5 = vld [vmem:[#allocation2 + $0xbc] sm:$0x1] }
 0x189   : > { %v2442_v28 = vrot.slane %v2441_v26, 4  ;;  %3330 = vrot.lane.b32.xlu0 %v7990_v45, %s8666_s6  ;;  %v2658_v29 = vrot.slane %v2656_v16, 4  ;;  %v2659_v60 = vrot.slane %v10217_v63, 5  ;;  %v3514_v17 = vsel %vm3500_vm1, %v10228_v31, %v10066_v4  ;;  %v2519_v10 = vld [vmem:[#allocation2 + $0xb4] sm:$0xe]  ;;  %v10311_v16 = vpop.permute.xlu0 %3146 }
 0x18a   : > { %3252 = vrot.lane.b32.xlu1 %v7975_v32, %s8662_s27  ;;  %v2451_v23 = vor.u32 %v2450_v24, %v2446_v49  ;;  %v2456_v2 = vrot.slane %v2454_v6, 5  ;;  %v1251_v46 = vsel %vm8964_vm11, %v1246_v44, %v1250_v61  ;;  %v1261_v9 = vsel %vm8964_vm11, %v1256_v50, %v1260_v0  ;;  %v10305_v0 = vpop.permute.xlu1 %2988  ;;  %v1301_v44 = vld [vmem:[#allocation2 + $0xb4] sm:$0xe] }
 0x18b   : > { %v2447_v63 = vsel %vm8964_vm11, %v2442_v28, %v2446_v49  ;;  %v2660_v8 = vsel %vm8928_vm7, %v2658_v29, %v2659_v60  ;;  %v3549_v36 = vsel %vm3533_vm2, %v3516_v43, %v10122_v18  ;;  %v1263_v31 = vshrl.u32 %v10274_v34, 16  ;;  %v1300_v28 = vld [vmem:[#allocation2 + $0xa8] sm:$0xe] }
 0x18c   : > { %v2452_v7 = vrot.slane %v2451_v23, 4  ;;  %v8006_v4 = vcombine.low %v2657_v21, %v2660_v8  ;;  %v1266_v61 = vshll.u32 %v10274_v34, 16  ;;  %v1272_v58 = vshll.u32 %v10280_v13, 16 }
 0x18d   : > { %v1276_v22 = vshrl.u32 %v10280_v13, 16  ;;  %v1282_v57 = vshll.u32 %v10290_v5, 16  ;;  %v7863_v15 = vrot.slane %v2519_v10, 9  ;;  %v1265_v18 = vrot.slane %v1263_v31, 4 }
 0x18e   : > { %v2457_v32 = vsel %vm8964_vm11, %v2452_v7, %v2456_v2  ;;  %3410 = vrot.lane.b32.xlu0 %v8006_v4, %s8664_s29  ;;  %v1268_v11 = vrot.slane %v1266_v61, 5  ;;  %v2663_v52 = vrot.slane %v10260_v59, 5  ;;  %v7896_v26 = vcombine.low %v1251_v46, %v1261_v9  ;;  %v256_v7 = vld [vmem:[%s8937_s23 + $0xf0] sm:$0xff] }
 0x18f   : > { %v7991_v33 = vcombine.low %v2447_v63, %v2457_v32  ;;  %v1274_v24 = vrot.slane %v1272_v58, 5  ;;  %v1278_v45 = vrot.slane %v1276_v22, 4  ;;  %v2666_v50 = vrot.slane %v2119_v42, 5  ;;  %v257_v58 = vld [vmem:[%s8937_s23 + $0xf8] sm:$0xff]  ;;  %v1493_v22 = vld [vmem:[#allocation2 + $0xb4] sm:$0xf] }
 0x190   : > { %v1269_v49 = vor.u32 %v1268_v11, %v1265_v18  ;;  %v2664_v6 = vsel %vm8928_vm7, %v7863_v15, %v2663_v52  ;;  %v2665_v43 = vrot.slane %v2663_v52, 4  ;;  %v3547_v59 = vsel %vm3533_vm2, %v3514_v17, %v10086_v55  ;;  %v10324_v4 = vpop.permute.xlu1 %3068  ;;  %v10340_v18 = vpop.permute.xlu0 %3242 }
 0x191   : > { %3332 = vrot.lane.b32.xlu1 %v7991_v33, %s8666_s6  ;;  %v1279_v21 = vor.u32 %v1278_v45, %v1274_v24  ;;  %v1284_v29 = vrot.slane %v1282_v57, 5  ;;  %v7833_v60 = vrot.slane %v1301_v44, 9  ;;  %v1460_v46 = vrot.slane %v10280_v13, 5  ;;  %v10346_v33 = vld [vmem:[#allocation2 + $0xb8] sm:$0xf] }
 0x192   : > { %v1270_v23 = vrot.slane %v1269_v49, 4  ;;  %v2667_v2 = vsel %vm8928_vm7, %v2665_v43, %v2666_v50  ;;  %v1463_v10 = vrot.slane %v10290_v5, 5  ;;  %v7832_v9 = vrot.slane %v1300_v28, 9 }
 0x193   : > { %v1280_v63 = vrot.slane %v1279_v21, 4  ;;  %v8007_v42 = vcombine.low %v2664_v6, %v2667_v2  ;;  %v1453_v8 = vrot.slane %v10239_v25, 5  ;;  %v1461_v17 = vsel %vm8928_vm7, %v7833_v60, %v1460_v46  ;;  %v10352_v21 = vld [vmem:[#allocation2 + $0xbc] sm:$0x1] }
 0x194   : > { %v1275_v55 = vsel %vm8964_vm11, %v1270_v23, %v1274_v24  ;;  %v1462_v31 = vrot.slane %v1460_v46, 4  ;;  %v1456_v61 = vrot.slane %v10246_v53, 5  ;;  %v3582_v57 = vsel %vm3566_vm3, %v3549_v36, %v10148_v12 }
 0x195   : > { %2822 = vrot.lane.b32.xlu1 %v7896_v26, %s8660_s25  ;;  %v1285_v5 = vsel %vm8964_vm11, %v1280_v63, %v1284_v29  ;;  %3412 = vrot.lane.b32.xlu0 %v8007_v42, %s8664_s29  ;;  %v1454_v15 = vsel %vm8928_vm7, %v7832_v9, %v1453_v8  ;;  %v1455_v32 = vrot.slane %v1453_v8, 4  ;;  %v3580_v53 = vsel %vm3566_vm3, %v3547_v59, %v10105_v19  ;;  %v10354_v29 = vpop.permute.xlu1 %3148  ;;  %v844_v42 = vld [vmem:[#allocation2 + $0xc0] sm:$0xf] }
 0x196   : > { %v7897_v11 = vcombine.low %v1275_v55, %v1285_v5  ;;  %v1464_v52 = vsel %vm8928_vm7, %v1462_v31, %v1463_v10  ;;  %v8312_v44 = vpack.c.bf16 %v256_v7, %v256_v7  ;;  %v8313_v36 = vpack.c.bf16 %v257_v58, %v257_v58  ;;  %v848_v31 = vld [vmem:[#allocation2 + $0xc8] sm:$0x1] }
 0x197   : > { %v7913_v26 = vcombine.low %v1461_v17, %v1464_v52  ;;  %v1457_v12 = vsel %vm8928_vm7, %v1455_v32, %v1456_v61  ;;  %v1850_v24 = vshrl.u32 %v1493_v22, 16  ;;  %v1853_v43 = vshll.u32 %v1493_v22, 16  ;;  %v10376_v52 = vld [vmem:[#allocation2 + $0xcc] sm:$0xf] }
 0x198   : > { %v7912_v45 = vcombine.low %v1454_v15, %v1457_v12  ;;  %v669_v49 = vshrl.u32 %v8312_v44, 16  ;;  %v672_v6 = vshll.u32 %v8312_v44, 16  ;;  %v677_v50 = vshrl.u32 %v8313_v36, 16 }
 0x199   : > { %2824 = vrot.lane.b32.xlu1 %v7897_v11, %s8660_s25  ;;  %v680_v19 = vshll.u32 %v8313_v36, 16  ;;  %v1852_v28 = vrot.slane %v1850_v24, 4  ;;  %v1863_v59 = vshrl.u32 %v10346_v33, 16  ;;  %v3615_v60 = vsel %vm3599_vm5, %v3582_v57, %v10174_v48  ;;  %v10363_v7 = vpop.permute.xlu0 %3322  ;;  %v1911_v57 = vld [vmem:[#allocation2 + $0xb4] sm:$0xe] }
 0x19a   : > { %2902 = vrot.lane.b32.xlu0 %v7912_v45, %s8659_s24  ;;  %v671_v23 = vrot.slane %v669_v49, 7  ;;  %v1855_v2 = vrot.slane %v1853_v43, 5  ;;  %v7928_v46 = vcombine.low %v1493_v22, %v10346_v33  ;;  %v3613_v10 = vsel %vm3599_vm5, %v3580_v53, %v10137_v62  ;;  %v10383_v36 = vld [vmem:[#allocation2 + $0xd0] sm:$0xf]  ;;  %v8582_v43 = vld [vmem:[#allocation2 + $0x6c] sm:$0xf] }
 0x19b   : > { %v679_v63 = vrot.slane %v677_v50, 7  ;;  %v1859_v9 = vshll.u32 %v10346_v33, 16  ;;  %v1865_v8 = vrot.slane %v1863_v59, 4  ;;  %v1869_v48 = vshll.u32 %v10352_v21, 16  ;;  %v8583_v50 = vld [vmem:[#allocation2 + $0x70] sm:$0xf] }
 0x19c   : > { %v674_v55 = vor.u32 %v672_v6, %v671_v23  ;;  %v675_v17 = vrot.slane %v671_v23, 4  ;;  %v1856_v61 = vor.u32 %v1855_v2, %v1852_v28  ;;  %v3646_v22 = vsel %vm3632_vm6, %v3613_v10, %v10157_v20  ;;  %v8584_v23 = vld [vmem:[#allocation2 + $0x60] sm:$0xf]  ;;  %v8585_v2 = vld [vmem:[#allocation2 + $0x64] sm:$0xf] }
 0x19d   : > { %2904 = vrot.lane.b32.xlu1 %v7913_v26, %s8659_s24  ;;  %v682_v58 = vor.u32 %v680_v19, %v679_v63  ;;  %v684_v62 = vrot.slane %v679_v63, 4  ;;  %v1861_v5 = vrot.slane %v1859_v9, 5  ;;  %v3648_v32 = vsel %vm3632_vm6, %v3615_v60, %v10199_v51  ;;  %v10385_v51 = vpop.permute.xlu1 %3244 }
 0x19e   : > { %v845_v15 = vsel %vm8958_vm10, %v674_v55, %v844_v42  ;;  %2998 = vrot.lane.b32.xlu0 %v7928_v46, %s8661_s26  ;;  %v1857_v11 = vrot.slane %v1856_v61, 4  ;;  %v3679_v53 = vsel %vm3665_vm8, %v3646_v22, %v10185_v27  ;;  %v1871_v12 = vrot.slane %v1869_v48, 5 }
 0x19f   : > { %v683_v20 = vsel %vm8972_vm12, %v675_v17, %v682_v58  ;;  %846 = vst [vmem:[#allocation2 + $0xc0] sm:$0xf] %v845_v15  ;;  %v849_v44 = vsel %vm8988_vm13, %v684_v62, %v848_v31  ;;  %v1866_v26 = vor.u32 %v1865_v8, %v1861_v5  ;;  %8410 = vmatprep.mubr.msk.bf16.mxu0 %vm3741_vm9, %v3679_v53  ;;  %v7848_v24 = vrot.slane %v1911_v57, 9  ;;  %v10395_v60 = vpop.permute.xlu0 %3402 }
 0x1a0   : > { %847 = vst.msk [vmem:[#allocation2 + $0xc4] sm:$0xf] %vm258_vm0, %v683_v20  ;;  %850 = vst [vmem:[#allocation2 + $0xc8] sm:$0x1] %v849_v44  ;;  %v1862_v27 = vsel %vm8964_vm11, %v1857_v11, %v1861_v5  ;;  %v2061_v45 = vrot.slane %v10346_v33, 5  ;;  %v2064_v49 = vrot.slane %v10352_v21, 5  ;;  %v7875_v19 = vcombine.low %v8582_v43, %v8583_v50 }
 0x1a1   : > { %v1867_v6 = vrot.slane %v1866_v26, 4  ;;  %v3681_v28 = vsel %vm3665_vm8, %v3648_v32, %v10202_v38  ;;  %v2483_v59 = vshrl.u32 %v10376_v52, 16  ;;  %v7874_v46 = vcombine.low %v8584_v23, %v8585_v2  ;;  %v10408_v31 = vpop.permute.xlu1 %3324 }
 0x1a2   : > { %v2063_v10 = vrot.slane %v2061_v45, 4  ;;  %v2486_v63 = vshll.u32 %v10376_v52, 16  ;;  %v2496_v33 = vshrl.u32 %v10383_v36, 16  ;;  %8411 = vmatmul.mubr.msk.bf16.gmra.mrb[12].mxu0 %vm3741_vm9, %v3681_v28  ;;  %v2062_v38 = vsel %vm8928_vm7, %v7848_v24, %v2061_v45 }
 0x1a3   : > { %v1872_v21 = vsel %vm8964_vm11, %v1867_v6, %v1871_v12  ;;  %v3448_v8 = vsel %vm3418_vm14, %v7875_v19, %v10252_v40  ;;  %v2485_v55 = vrot.slane %v2483_v59, 4  ;;  %v3445_v48 = vsel %vm3418_vm14, %v7874_v46, %v10219_v56 }
 0x1a4   : > { %v7944_v42 = vcombine.low %v1862_v27, %v1872_v21  ;;  %v2065_v9 = vsel %vm8928_vm7, %v2063_v10, %v2064_v49  ;;  %v2488_v17 = vrot.slane %v2486_v63, 5  ;;  %v2492_v62 = vshll.u32 %v10383_v36, 16 }
 0x1a5   : > { %v7960_v22 = vcombine.low %v2062_v38, %v2065_v9  ;;  %v2498_v5 = vrot.slane %v2496_v33, 4  ;;  %v7977_v40 = vcombine.low %v10376_v52, %v10383_v36  ;;  %v3487_v53 = vsel %vm3467_vm15, %v3448_v8, %v10269_v35  ;;  %v10424_v10 = vpop.permute.xlu1 %2814 }
 0x1a6   : > { %v1495_v61 = vld [vmem:[#allocation2 + $0xc0] sm:$0xf]  ;;  %3078 = vrot.lane.b32.xlu0 %v7944_v42, %s8665_s30  ;;  %v10418_v20 = vpop.permute.xlu0 %3404  ;;  %v2489_v35 = vor.u32 %v2488_v17, %v2485_v55  ;;  %v10428_v42 = vld [vmem:[#allocation2 + $0xd4] sm:$0x1]  ;;  %v3485_v55 = vsel %vm3467_vm15, %v3445_v48, %v10234_v14  ;;  %v7880_v52 = vcombine.low %v10230_v30, %v10239_v25 }
 0x1a7   : > { %v1912_v58 = vld [vmem:[#allocation2 + $0xc0] sm:$0xe]  ;;  %v1496_v57 = vld [vmem:[#allocation2 + $0xc4] sm:$0xf]  ;;  %v1874_v15 = vshrl.u32 %v1495_v61, 16  ;;  %v1877_v32 = vshll.u32 %v1495_v61, 16 }
 0x1a8   : > { %v1512_v11 = vld [vmem:[#allocation2 + $0xc8] sm:$0x1]  ;;  %v1887_v44 = vshrl.u32 %v1496_v57, 16  ;;  %v7929_v26 = vcombine.low %v1495_v61, %v1496_v57  ;;  %v1883_v56 = vshll.u32 %v1496_v57, 16  ;;  %v2102_v27 = vld [vmem:[#allocation2 + $0xc0] sm:$0xf] }
 0x1a9   : > { %v1893_v12 = vshll.u32 %v1512_v11, 16  ;;  %v1876_v24 = vrot.slane %v1874_v15, 4  ;;  %v1879_v45 = vrot.slane %v1877_v32, 5  ;;  %v7849_v49 = vrot.slane %v1912_v58, 9  ;;  %v10420_v43 = vld [vmem:[#allocation2 + $0xc4] sm:$0xf] }
 0x1aa   : > { %v2068_v6 = vrot.slane %v1496_v57, 5  ;;  %3000 = vrot.lane.b32.xlu1 %v7929_v26, %s8661_s26  ;;  %v1885_v50 = vrot.slane %v1883_v56, 5  ;;  %v1889_v19 = vrot.slane %v1887_v44, 4  ;;  %v2071_v28 = vrot.slane %v1512_v11, 5  ;;  %3158 = vrot.lane.b32.xlu0 %v7960_v22, %s8663_s28  ;;  %v10434_v17 = vpop.permute.xlu0 %2894  ;;  %v2120_v32 = vld [vmem:[#allocation2 + $0xc8] sm:$0x1] }
 0x1ab   : > { %v1880_v59 = vor.u32 %v1879_v45, %v1876_v24  ;;  %v1895_v23 = vrot.slane %v1893_v12, 5  ;;  %v2459_v46 = vshrl.u32 %v2102_v27, 16  ;;  %v2462_v33 = vshll.u32 %v2102_v27, 16  ;;  %v2520_v24 = vld [vmem:[#allocation2 + $0xc0] sm:$0xe] }
 0x1ac   : > { %v2070_v2 = vrot.slane %v2068_v6, 4  ;;  %v1890_v63 = vor.u32 %v1889_v19, %v1885_v50  ;;  %v2472_v21 = vshrl.u32 %v10420_v43, 16  ;;  %v7976_v38 = vcombine.low %v2102_v27, %v10420_v43  ;;  %v10447_v19 = vpop.permute.xlu1 %2816 }
 0x1ad   : > { %v1881_v9 = vrot.slane %v1880_v59, 4  ;;  %v2069_v8 = vsel %vm8928_vm7, %v7849_v49, %v2068_v6  ;;  %v2461_v61 = vrot.slane %v2459_v46, 4  ;;  %v2464_v57 = vrot.slane %v2462_v33, 5  ;;  %v2521_v46 = vld [vmem:[#allocation2 + $0xcc] sm:$0xe] }
 0x1ae   : > { %v1891_v58 = vrot.slane %v1890_v63, 4  ;;  %v2072_v22 = vsel %vm8928_vm7, %v2070_v2, %v2071_v28  ;;  %3254 = vrot.lane.b32.xlu0 %v7976_v38, %s8662_s27  ;;  %v2494_v15 = vrot.slane %v2492_v62, 5  ;;  %v2502_v44 = vshll.u32 %v10428_v42, 16  ;;  %v10452_v33 = vpop.permute.xlu0 %2990 }
 0x1af   : > { %v1886_v11 = vsel %vm8964_vm11, %v1881_v9, %v1885_v50  ;;  %v2468_v26 = vshll.u32 %v10420_v43, 16  ;;  %v2474_v56 = vrot.slane %v2472_v21, 4  ;;  %v2490_v48 = vrot.slane %v2489_v35, 4 }
 0x1b0   : > { %v1896_v14 = vsel %vm8964_vm11, %v1891_v58, %v1895_v23  ;;  %v2499_v12 = vor.u32 %v2498_v5, %v2494_v15  ;;  %v2465_v27 = vor.u32 %v2464_v57, %v2461_v61  ;;  %v2478_v6 = vshll.u32 %v2120_v32, 16 }
 0x1b1   : > { %v7945_v45 = vcombine.low %v1886_v11, %v1896_v14  ;;  %v2470_v49 = vrot.slane %v2468_v26, 5  ;;  %v3520_v62 = vsel %vm3500_vm1, %v3487_v53, %v10305_v0  ;;  %v2504_v28 = vrot.slane %v2502_v44, 5  ;;  %v10482_v26 = vld [vmem:[#allocation3] sm:$0xf] }
 0x1b2   : > { %v2500_v50 = vrot.slane %v2499_v12, 4  ;;  %v2466_v59 = vrot.slane %v2465_v27, 4  ;;  %v3518_v2 = vsel %vm3500_vm1, %v3485_v55, %v10258_v54  ;;  %v7961_v35 = vcombine.low %v2069_v8, %v2072_v22 }
 0x1b3   : > { %3080 = vrot.lane.b32.xlu1 %v7945_v45, %s8665_s30  ;;  %v2475_v5 = vor.u32 %v2474_v56, %v2470_v49  ;;  %v2480_v23 = vrot.slane %v2478_v6, 5  ;;  %v7864_v63 = vrot.slane %v2520_v24, 9  ;;  %v2495_v0 = vsel %vm8964_vm11, %v2490_v48, %v2494_v15 }
 0x1b4   : > { %v2677_v53 = vrot.slane %v10383_v36, 5  ;;  %v3553_v21 = vsel %vm3533_vm2, %v3520_v62, %v10324_v4  ;;  %v3551_v54 = vsel %vm3533_vm2, %v3518_v2, %v10282_v41  ;;  %v2471_v38 = vsel %vm8964_vm11, %v2466_v59, %v2470_v49 }
 0x1b5   : > { %v2476_v9 = vrot.slane %v2475_v5, 4  ;;  %v2670_v8 = vrot.slane %v10420_v43, 5  ;;  %v2673_v61 = vrot.slane %v2120_v32, 5  ;;  %v2505_v55 = vsel %vm8964_vm11, %v2500_v50, %v2504_v28  ;;  %v10476_v32 = vpop.permute.xlu1 %2896  ;;  %v4986_v28 = vld [vmem:[#allocation3] sm:$0xe] }
 0x1b6   : > { %v7865_v58 = vrot.slane %v2521_v46, 9  ;;  %v2680_v22 = vrot.slane %v10428_v42, 5  ;;  %v3586_v57 = vsel %vm3566_vm3, %v3553_v21, %v10354_v29  ;;  %v3584_v43 = vsel %vm3566_vm3, %v3551_v54, %v10311_v16  ;;  %v3071_v48 = vpop.permute.xlu0 %3070 }
 0x1b7   : > { %3160 = vrot.lane.b32.xlu1 %v7961_v35, %s8663_s28  ;;  %v2481_v41 = vsel %vm8964_vm11, %v2476_v9, %v2480_v23  ;;  %v2671_v4 = vsel %vm8928_vm7, %v7864_v63, %v2670_v8  ;;  %v2672_v15 = vrot.slane %v2670_v8, 4  ;;  %v2679_v44 = vrot.slane %v2677_v53, 4 }
 0x1b8   : > { %v7992_v11 = vcombine.low %v2471_v38, %v2481_v41  ;;  %v3619_v42 = vsel %vm3599_vm5, %v3586_v57, %v10385_v51  ;;  %v3617_v29 = vsel %vm3599_vm5, %v3584_v43, %v10340_v18  ;;  %v7993_v27 = vcombine.low %v2495_v0, %v2505_v55  ;;  %v8587_v55 = vld [vmem:[#allocation2 + $0x7c] sm:$0xf] }
 0x1b9   : > { %v2674_v56 = vsel %vm8928_vm7, %v2672_v15, %v2673_v61  ;;  %v3652_v14 = vsel %vm3632_vm6, %v3619_v42, %v10408_v31  ;;  %v3650_v16 = vsel %vm3632_vm6, %v3617_v29, %v10363_v7  ;;  %v10500_v31 = vld [vmem:[#allocation3 + $0x4] sm:$0xf]  ;;  %v4586_v7 = vld [vmem:[#allocation3 + $0x8] sm:$0x1]  ;;  %v4603_v24 = vshrl.u32 %v10482_v26, 16  ;;  %v2993_v36 = vpop.permute.xlu1 %2992 }
 0x1ba   : > { %3334 = vrot.lane.b32.xlu0 %v7992_v11, %s8666_s6  ;;  %v8008_v12 = vcombine.low %v2671_v4, %v2674_v56  ;;  %v3683_v51 = vsel %vm3665_vm8, %v3650_v16, %v10395_v60  ;;  %v3685_v18 = vsel %vm3665_vm8, %v3652_v14, %v10418_v20  ;;  %v2678_v45 = vsel %vm8928_vm7, %v7865_v58, %v2677_v53  ;;  %v3151_v2 = vpop.permute.xlu0 %3150  ;;  %v8586_v61 = vld [vmem:[#allocation2 + $0x78] sm:$0xf]  ;;  %v8588_v29 = vld [vmem:[#allocation2 + $0x84] sm:$0xf]  ;;  %v8589_v56 = vld [vmem:[#allocation2 + $0x88] sm:$0xf] }
 0x1bb   : > { %3256 = vrot.lane.b32.xlu1 %v7977_v40, %s8662_s27  ;;  %8414 = vmatprep.mubr.msk.bf16.mxu0 %vm3741_vm9, %v3683_v51  ;;  %v2681_v60 = vsel %vm8928_vm7, %v2679_v44, %v2680_v22  ;;  %v7881_v40 = vcombine.low %v10274_v34, %v10280_v13  ;;  %v4605_v20 = vrot.slane %v4603_v24, 4  ;;  %v4606_v49 = vshll.u32 %v10482_v26, 16 }
 0x1bc   : > { %8415 = vmatmul.mubr.msk.bf16.gmra.mrb[16].mxu0 %vm3741_vm9, %v3685_v18  ;;  %v4612_v6 = vshll.u32 %v10500_v31, 16  ;;  %v4616_v62 = vshrl.u32 %v10500_v31, 16  ;;  %v4622_v50 = vshll.u32 %v4586_v7, 16  ;;  %v8009_v59 = vcombine.low %v2678_v45, %v2681_v60 }
 0x1bd   : > { %v4608_v35 = vrot.slane %v4606_v49, 5  ;;  %v5052_v5 = vrot.slane %v10500_v31, 5  ;;  %v8064_v0 = vrot.slane %v4986_v28, 9  ;;  %v5055_v38 = vrot.slane %v4586_v7, 5 }
 0x1be   : > { %3414 = vrot.lane.b32.xlu0 %v8008_v12, %s8664_s29  ;;  %v4614_v23 = vrot.slane %v4612_v6, 5  ;;  %v4618_v46 = vrot.slane %v4616_v62, 4  ;;  %v4624_v21 = vrot.slane %v4622_v50, 5  ;;  %v7876_v58 = vcombine.low %v8586_v61, %v8587_v55  ;;  %v8592_v61 = vld [vmem:[#allocation2 + $0x9c] sm:$0xf] }
 0x1bf   : > { %3336 = vrot.lane.b32.xlu1 %v7993_v27, %s8666_s6  ;;  %v4609_v63 = vor.u32 %v4608_v35, %v4605_v20  ;;  %v5054_v54 = vrot.slane %v5052_v5, 4  ;;  %v5053_v15 = vsel %vm8928_vm7, %v8064_v0, %v5052_v5  ;;  %v7877_v14 = vcombine.low %v8588_v29, %v8589_v56  ;;  %v8593_v55 = vld [vmem:[#allocation2 + $0xa0] sm:$0xf] }
 0x1c0   : > { %v4619_v53 = vor.u32 %v4618_v46, %v4614_v23  ;;  %v3247_v57 = vpop.permute.xlu0 %3246  ;;  %v3451_v44 = vsel %vm3418_vm14, %v7876_v58, %v10424_v10  ;;  %v7879_v58 = vcombine.low %v8592_v61, %v8593_v55 }
 0x1c1   : > { %v4610_v8 = vrot.slane %v4609_v63, 4  ;;  %v5056_v43 = vsel %vm8928_vm7, %v5054_v54, %v5055_v38  ;;  %v3489_v12 = vsel %vm3467_vm15, %v3451_v44, %v10434_v17  ;;  %v3454_v27 = vsel %vm3418_vm14, %v7877_v14, %v10447_v19  ;;  %v10557_v63 = vld [vmem:[%s12703_s2] ss:$0 sm:$0xff] }
 0x1c2   : > { %v4620_v22 = vrot.slane %v4619_v53, 4  ;;  %v8144_v16 = vcombine.low %v5053_v15, %v5056_v43  ;;  %v3522_v18 = vsel %vm3500_vm1, %v3489_v12, %v10452_v33  ;;  %v3491_v60 = vsel %vm3467_vm15, %v3454_v27, %v10476_v32  ;;  %v8590_v53 = vld [vmem:[#allocation2 + $0x90] sm:$0xf] }
 0x1c3   : > { %3416 = vrot.lane.b32.xlu1 %v8009_v59, %s8664_s29  ;;  %v3073_v9 = vpop.permute.xlu1 %3072  ;;  %v4615_v41 = vsel %vm8964_vm11, %v4610_v8, %v4614_v23  ;;  %v3555_v7 = vsel %vm3533_vm2, %v3522_v18, %v3071_v48  ;;  %v3524_v19 = vsel %vm3500_vm1, %v3491_v60, %v2993_v36 }
 0x1c4   : > { %v4625_v4 = vsel %vm8964_vm11, %v4620_v22, %v4624_v21  ;;  %v3588_v10 = vsel %vm3566_vm3, %v3555_v7, %v3151_v2  ;;  %v3557_v48 = vsel %vm3533_vm2, %v3524_v19, %v3073_v9  ;;  %v8591_v21 = vld [vmem:[#allocation2 + $0x94] sm:$0xf] }
 0x1c5   : > { %v8128_v11 = vcombine.low %v4615_v41, %v4625_v4  ;;  %v3621_v45 = vsel %vm3599_vm5, %v3588_v10, %v3247_v57  ;;  %v7878_v54 = vcombine.low %v8590_v53, %v8591_v21 }
 0x1c7   : > { %v3153_v42 = vpop.permute.xlu1 %3152  ;;  %6491 = vrot.lane.b32.xlu0 %v8128_v11, %s8660_s25 }
 0x1c8   : > { %v3590_v6 = vsel %vm3566_vm3, %v3557_v48, %v3153_v42  ;;  %v4449_v48 = vld [vmem:[#allocation3 + $0x18] sm:$0xf] }
 0x1cb   : > { %v3327_v51 = vpop.permute.xlu0 %3326  ;;  %6571 = vrot.lane.b32.xlu0 %v8144_v16, %s8659_s24  ;;  %v3249_v24 = vpop.permute.xlu1 %3248 }
 0x1cc   : > { %v3654_v17 = vsel %vm3632_vm6, %v3621_v45, %v3327_v51  ;;  %v3623_v62 = vsel %vm3599_vm5, %v3590_v6, %v3249_v24 }
 0x1d0   : > { %v3407_v20 = vpop.permute.xlu0 %3406 }
 0x1d1   : > { %v3687_v33 = vsel %vm3665_vm8, %v3654_v17, %v3407_v20 }
 0x1d2   : > { %8418 = vmatprep.mubr.msk.bf16.mxu0 %vm3741_vm9, %v3687_v33 }
 0x1d3   : > { %v3329_v49 = vpop.permute.xlu1 %3328 }
 0x1d4   : > { %v3656_v50 = vsel %vm3632_vm6, %v3623_v62, %v3329_v49 }
 0x1d7   : > { %v3409_v28 = vpop.permute.xlu0 %3408  ;;  %v2819_v59 = vpop.permute.xlu1 %2818 }
 0x1d8   : > { %v3689_v32 = vsel %vm3665_vm8, %v3656_v50, %v3409_v28  ;;  %v3457_v43 = vsel %vm3418_vm14, %v7878_v54, %v2819_v59  ;;  %v4442_v59 = vld [vmem:[#allocation3 + $0xc] sm:$0xf] }
 0x1d9   : > { %8419 = vmatmul.mubr.msk.bf16.gmra.mrb[20].mxu0 %vm3741_vm9, %v3689_v32 }
 0x1db   : > { %v2899_v2 = vpop.permute.xlu0 %2898  ;;  %v2821_v35 = vpop.permute.xlu1 %2820 }
 0x1dc   : > { %v3460_v16 = vsel %vm3418_vm14, %v7879_v58, %v2821_v35  ;;  %v3493_v18 = vsel %vm3467_vm15, %v3457_v43, %v2899_v2  ;;  %v4446_v58 = vld [vmem:[#allocation3 + $0x14] sm:$0x1] }
 0x1df   : > { %v2995_v5 = vpop.permute.xlu0 %2994  ;;  %v2901_v23 = vpop.permute.xlu1 %2900 }
 0x1e0   : > { %v3495_v60 = vsel %vm3467_vm15, %v3460_v16, %v2901_v23  ;;  %v3526_v19 = vsel %vm3500_vm1, %v3493_v18, %v2995_v5  ;;  %v4453_v23 = vld [vmem:[#allocation3 + $0x20] sm:$0x1] }
 0x1e7   : > { %v3075_v36 = vpop.permute.xlu0 %3074 }
 0x1e8   : > { %v3559_v50 = vsel %vm3533_vm2, %v3526_v19, %v3075_v36 }
 0x1ea   : > { %v10552_v46 = vpop.permute.xlu1 %2996 }
 0x1eb   : > { %v3155_v0 = vpop.permute.xlu0 %3154  ;;  %v3528_v43 = vsel %vm3500_vm1, %v3495_v60, %v10552_v46 }
 0x1ec   : > { %v3592_v53 = vsel %vm3566_vm3, %v3559_v50, %v3155_v0 }
 0x1f0   : > { %v8400_v38 = vpop.f32.mrb[0].mxu0  ;;  %v3251_v29 = vpop.permute.xlu0 %3250 }
 0x1f1   : > { %v3821_v9 = vadd.f32 %v8400_v38, %v10557_v63  ;;  %v3812_v8 = vpop.f32.mrb[1].mxu0  ;;  %v3625_v0 = vsel %vm3599_vm5, %v3592_v53, %v3251_v29 }
 0x1f2   : > { %v3813_v22 = vadd.f32 %v10557_v63, %v3812_v8  ;;  %v8401_v57 = vpop.f32.mrb[2].mxu0 }
 0x1f3   : > { %v3941_v41 = vmax.f32 %v3821_v9, 0.0  ;;  %v3824_v4 = vadd.f32 %v8401_v57, %v10557_v63  ;;  %v3815_v15 = vpop.f32.mrb[3].mxu0 }
 0x1f4   : > { %v3077_v11 = vpop.permute.xlu1 %3076  ;;  %v3939_v44 = vmax.f32 %v3813_v22, 0.0  ;;  %v3816_v42 = vadd.f32 %v10557_v63, %v3815_v15 }
 0x1f5   : > { %v8316_v56 = vpack.c.bf16 %v3941_v41, %v3941_v41  ;;  %v3942_v14 = vmax.f32 %v3824_v4, 0.0  ;;  %v3561_v46 = vsel %vm3533_vm2, %v3528_v43, %v3077_v11 }
 0x1f6   : > { %v8314_v12 = vpack.c.bf16 %v3939_v44, %v3939_v44  ;;  %v3940_v51 = vmax.f32 %v3816_v42, 0.0 }
 0x1f7   : > { %v4139_v27 = vshrl.u32 %v8316_v56, 16  ;;  %v8317_v7 = vpack.c.bf16 %v3942_v14, %v3942_v14  ;;  %v4142_v20 = vshll.u32 %v8316_v56, 16 }
 0x1f8   : > { %v3157_v10 = vpop.permute.xlu1 %3156  ;;  %v4122_v24 = vshrl.u32 %v8314_v12, 16  ;;  %v8315_v45 = vpack.c.bf16 %v3940_v51, %v3940_v51  ;;  %v4125_v6 = vshll.u32 %v8314_v12, 16 }
 0x1f9   : > { %v4141_v17 = vrot.slane %v4139_v27, 7  ;;  %v4147_v33 = vshrl.u32 %v8317_v7, 16  ;;  %v4150_v35 = vshll.u32 %v8317_v7, 16  ;;  %v3594_v12 = vsel %vm3566_vm3, %v3561_v46, %v3157_v10 }
 0x1fa   : > { %v4124_v49 = vrot.slane %v4122_v24, 7  ;;  %v4130_v62 = vshrl.u32 %v8315_v45, 16  ;;  %v4133_v38 = vshll.u32 %v8315_v45, 16 }
 0x1fb   : > { %v3331_v28 = vpop.permute.xlu0 %3330  ;;  %v4144_v32 = vor.u32 %v4142_v20, %v4141_v17  ;;  %v4149_v2 = vrot.slane %v4147_v33, 7  ;;  %v4145_v8 = vrot.slane %v4141_v17, 4 }
 0x1fc   : > { %v4127_v21 = vor.u32 %v4125_v6, %v4124_v49  ;;  %v4132_v54 = vrot.slane %v4130_v62, 7  ;;  %v3253_v9 = vpop.permute.xlu1 %3252  ;;  %v4128_v36 = vrot.slane %v4124_v49, 4  ;;  %v3658_v44 = vsel %vm3632_vm6, %v3625_v0, %v3331_v28 }
 0x1fd   : > { %v4450_v5 = vsel %vm8958_vm10, %v4144_v32, %v4449_v48  ;;  %v4152_v61 = vor.u32 %v4150_v35, %v4149_v2  ;;  %v4154_v55 = vrot.slane %v4149_v2, 4  ;;  %v3627_v51 = vsel %vm3599_vm5, %v3594_v12, %v3253_v9 }
 0x1fe   : > { %4451 = vst [vmem:[#allocation3 + $0x18] sm:$0xf] %v4450_v5  ;;  %v4443_v22 = vsel %vm8958_vm10, %v4127_v21, %v4442_v59  ;;  %v4135_v57 = vor.u32 %v4133_v38, %v4132_v54  ;;  %v4137_v41 = vrot.slane %v4132_v54, 4 }
 0x1ff   : > { %4444 = vst [vmem:[#allocation3 + $0xc] sm:$0xf] %v4443_v22  ;;  %v4153_v4 = vsel %vm8972_vm12, %v4145_v8, %v4152_v61  ;;  %v4454_v15 = vsel %vm8988_vm13, %v4154_v55, %v4453_v23 }
 0x200   : > { %v3411_v42 = vpop.permute.xlu0 %3410  ;;  %4452 = vst.msk [vmem:[#allocation3 + $0x1c] sm:$0xf] %vm258_vm0, %v4153_v4  ;;  %4455 = vst [vmem:[#allocation3 + $0x20] sm:$0x1] %v4454_v15  ;;  %v4136_v56 = vsel %vm8972_vm12, %v4128_v36, %v4135_v57  ;;  %v4447_v29 = vsel %vm8988_vm13, %v4137_v41, %v4446_v58 }
 0x201   : > { %v3691_v14 = vsel %vm3665_vm8, %v3658_v44, %v3411_v42  ;;  %4445 = vst.msk [vmem:[#allocation3 + $0x10] sm:$0xf] %vm258_vm0, %v4136_v56  ;;  %4448 = vst [vmem:[#allocation3 + $0x14] sm:$0x1] %v4447_v29 }
 0x202   : > { %8422 = vmatprep.mubr.msk.bf16.mxu0 %vm3741_vm9, %v3691_v14 }
 0x203   : > { %v3333_v16 = vpop.permute.xlu1 %3332 }
 0x204   : > { %v3660_v20 = vsel %vm3632_vm6, %v3627_v51, %v3333_v16 }
 0x205   : > { %v5164_v18 = vld [vmem:[#allocation3 + $0x18] sm:$0xf] }
 0x206   : > { %v5771_v27 = vld [vmem:[#allocation3 + $0x18] sm:$0xf]  ;;  %v5235_v7 = vshrl.u32 %v5164_v18, 16  ;;  %v5238_v24 = vshll.u32 %v5164_v18, 16  ;;  %v5162_v17 = vld [vmem:[#allocation3 + $0xc] sm:$0xf] }
 0x207   : > { %v5820_v45 = vshrl.u32 %v5771_v27, 16  ;;  %v5823_v60 = vshll.u32 %v5771_v27, 16  ;;  %v2823_v33 = vpop.permute.xlu1 %2822  ;;  %v3413_v19 = vpop.permute.xlu0 %3412  ;;  %v10594_v48 = vld [vmem:[#allocation3 + $0x1c] sm:$0xf]  ;;  %v5211_v11 = vshrl.u32 %v5162_v17, 16  ;;  %v5214_v6 = vshll.u32 %v5162_v17, 16 }
 0x208   : > { %v10596_v49 = vld [vmem:[#allocation3 + $0x1c] sm:$0xf]  ;;  %v3693_v10 = vsel %vm3665_vm8, %v3660_v20, %v3413_v19  ;;  %v10599_v62 = vrot.slane %v5235_v7, 4  ;;  %v5595_v50 = vld [vmem:[#allocation3 + $0x18] sm:$0xe]  ;;  %v10602_v28 = vrot.slane %v5238_v24, 5  ;;  %v8161_v32 = vcombine.low %v5164_v18, %v10594_v48 }
 0x209   : > { %8423 = vmatmul.mubr.msk.bf16.gmra.mrb[24].mxu0 %vm3741_vm9, %v3693_v10  ;;  %v5248_v59 = vshrl.u32 %v10594_v48, 16  ;;  %v10606_v2 = vld [vmem:[#allocation3 + $0x10] sm:$0xf]  ;;  %v10608_v35 = vld [vmem:[#allocation3 + $0x20] sm:$0x1]  ;;  %v3463_v53 = vsel %vm3418_vm14, %v7880_v52, %v2823_v33  ;;  %v10614_v21 = vrot.slane %v5820_v45, 4  ;;  %v8208_v54 = vcombine.low %v5771_v27, %v10596_v49 }
 0x20a   : > { %v10616_v23 = vrot.slane %v5823_v60, 5  ;;  %v10619_v38 = vld [vmem:[#allocation3 + $0x20] sm:$0x1]  ;;  %v6203_v9 = vld [vmem:[#allocation3 + $0x18] sm:$0xe]  ;;  %6669 = vrot.lane.b32.xlu1 %v8161_v32, %s8661_s26  ;;  %v5833_v5 = vshrl.u32 %v10596_v49, 16  ;;  %v8160_v58 = vcombine.low %v5162_v17, %v10606_v2 }
 0x20b   : > { %v2825_v8 = vpop.permute.xlu1 %2824  ;;  %v10623_v61 = vrot.slane %v5211_v11, 4  ;;  %v10625_v55 = vrot.slane %v5214_v6, 5  ;;  %v5667_v30 = vrot.slane %v10594_v48, 5  ;;  %v10628_v25 = vld [vmem:[#allocation3 + $0x10] sm:$0xf]  ;;  %6923 = vrot.lane.b32.xlu0 %v8208_v54, %s8662_s27  ;;  %v8081_v36 = vrot.slane %v5595_v50, 9 }
 0x20c   : > { %v2903_v52 = vpop.permute.xlu0 %2902  ;;  %v5670_v22 = vrot.slane %v10608_v35, 5  ;;  %v6269_v57 = vrot.slane %v10596_v49, 5  ;;  %v10634_v41 = vld [vmem:[#allocation3 + $0x14] sm:$0x1]  ;;  %v3466_v0 = vsel %vm3418_vm14, %v7881_v40, %v2825_v8  ;;  %v8096_v43 = vrot.slane %v6203_v9, 9 }
 0x20d   : > { %v3497_v4 = vsel %vm3467_vm15, %v3463_v53, %v2903_v52  ;;  %v5669_v15 = vrot.slane %v5667_v30, 4  ;;  %v4987_v44 = vld [vmem:[#allocation3 + $0xc] sm:$0xe]  ;;  %v10641_v42 = vld [vmem:[#allocation3 + $0x1c] sm:$0xf]  ;;  %v5668_v56 = vsel %vm8928_vm7, %v8081_v36, %v5667_v30  ;;  %v6272_v14 = vrot.slane %v10619_v38, 5 }
 0x20e   : > { %v6271_v29 = vrot.slane %v6269_v57, 4  ;;  %v5059_v46 = vrot.slane %v10628_v25, 5  ;;  %v10647_v16 = vld [vmem:[#allocation3 + $0x20] sm:$0x1]  ;;  %v6270_v13 = vsel %vm8928_vm7, %v8096_v43, %v6269_v57  ;;  %v8065_v40 = vrot.slane %v4987_v44, 9 }
 0x20f   : > { %v5671_v34 = vsel %vm8928_vm7, %v5669_v15, %v5670_v22  ;;  %v4988_v12 = vld [vmem:[#allocation3 + $0x18] sm:$0xe]  ;;  %v5066_v51 = vrot.slane %v10641_v42, 5  ;;  %v2905_v18 = vpop.permute.xlu1 %2904  ;;  %6667 = vrot.lane.b32.xlu0 %v8160_v58, %s8661_s26  ;;  %v5062_v24 = vrot.slane %v10634_v41, 5  ;;  %v5069_v45 = vrot.slane %v10647_v16, 5 }
 0x210   : > { %v8193_v27 = vcombine.low %v5668_v56, %v5671_v34  ;;  %v6273_v7 = vsel %vm8928_vm7, %v6271_v29, %v6272_v14  ;;  %v10659_v60 = vld [vmem:[#allocation3 + $0x14] sm:$0x1]  ;;  %v5594_v17 = vld [vmem:[#allocation3 + $0xc] sm:$0xe]  ;;  %v10662_v20 = vsel %vm3467_vm15, %v3466_v0, %v2905_v18  ;;  %v5060_v19 = vsel %vm8928_vm7, %v8065_v40, %v5059_v46  ;;  %v2999_v6 = vpop.permute.xlu0 %2998 }
 0x211   : > { %v8240_v33 = vcombine.low %v6270_v13, %v6273_v7  ;;  %v5061_v11 = vrot.slane %v5059_v46, 4  ;;  %v8066_v10 = vrot.slane %v4988_v12, 9  ;;  %v5068_v50 = vrot.slane %v5066_v51, 4 }
 0x212   : > { %6829 = vrot.lane.b32.xlu1 %v8193_v27, %s8663_s28  ;;  %v8080_v32 = vrot.slane %v5594_v17, 9  ;;  %v5660_v53 = vrot.slane %v10606_v2, 5  ;;  %v5663_v8 = vrot.slane %v10659_v60, 5  ;;  %v5241_v30 = vor.u32 %v10602_v28, %v10599_v62 }
 0x213   : > { %v8404_v54 = vpop.f32.mrb[4].mxu0  ;;  %v5063_v9 = vsel %vm8928_vm7, %v5061_v11, %v5062_v24  ;;  %v5244_v52 = vshll.u32 %v10594_v48, 16  ;;  %7083 = vrot.lane.b32.xlu0 %v8240_v33, %s8664_s29  ;;  %v5067_v57 = vsel %vm8928_vm7, %v8066_v10, %v5066_v51  ;;  %v5070_v0 = vsel %vm8928_vm7, %v5068_v50, %v5069_v45 }
 0x214   : > { %v3837_v58 = vadd.f32 %v8404_v54, %v10557_v63  ;;  %v3828_v36 = vpop.f32.mrb[5].mxu0  ;;  %v8145_v22 = vcombine.low %v5060_v19, %v5063_v9  ;;  %v8146_v44 = vcombine.low %v5067_v57, %v5070_v0  ;;  %v5662_v56 = vrot.slane %v5660_v53, 4 }
 0x215   : > { %v3829_v15 = vadd.f32 %v10557_v63, %v3828_v36  ;;  %v8405_v43 = vpop.f32.mrb[6].mxu0  ;;  %v10681_v62 = vrot.slane %v5241_v30, 4  ;;  %v10685_v46 = vrot.slane %v5244_v52, 5  ;;  %v5250_v34 = vrot.slane %v5248_v59, 4 }
 0x216   : > { %v3945_v28 = vmax.f32 %v3837_v58, 0.0  ;;  %v3840_v29 = vadd.f32 %v8405_v43, %v10557_v63  ;;  %v3831_v14 = vpop.f32.mrb[7].mxu0  ;;  %6573 = vrot.lane.b32.xlu1 %v8145_v22, %s8659_s24  ;;  %v5664_v12 = vsel %vm8928_vm7, %v5662_v56, %v5663_v8  ;;  %v5254_v51 = vshll.u32 %v10608_v35, 16  ;;  %v4463_v58 = vld [vmem:[#allocation3 + $0x30] sm:$0xf] }
 0x217   : > { %v3943_v13 = vmax.f32 %v3829_v15, 0.0  ;;  %v3832_v40 = vadd.f32 %v10557_v63, %v3831_v14  ;;  %v3530_v18 = vsel %vm3500_vm1, %v3497_v4, %v2999_v6  ;;  %6575 = vrot.lane.b32.xlu0 %v8146_v44, %s8659_s24  ;;  %v5661_v45 = vsel %vm8928_vm7, %v8080_v32, %v5660_v53  ;;  %v4456_v56 = vld [vmem:[#allocation3 + $0x24] sm:$0xf]  ;;  %v4467_v14 = vld [vmem:[#allocation3 + $0x38] sm:$0x1] }
 0x218   : > { %v3079_v27 = vpop.permute.xlu0 %3078  ;;  %v8320_v7 = vpack.c.bf16 %v3945_v28, %v3945_v28  ;;  %v3946_v24 = vmax.f32 %v3840_v29, 0.0  ;;  %v8192_v17 = vcombine.low %v5661_v45, %v5664_v12  ;;  %v5251_v33 = vor.u32 %v5250_v34, %v10685_v46 }
 0x219   : > { %v8318_v48 = vpack.c.bf16 %v3943_v13, %v3943_v13  ;;  %v3944_v59 = vmax.f32 %v3832_v40, 0.0  ;;  %v3563_v19 = vsel %vm3533_vm2, %v3530_v18, %v3079_v27  ;;  %v5247_v35 = vsel %vm8964_vm11, %v10681_v62, %v10685_v46 }
 0x21a   : > { %v4173_v11 = vshrl.u32 %v8320_v7, 16  ;;  %v8321_v10 = vpack.c.bf16 %v3946_v24, %v3946_v24  ;;  %v4176_v4 = vshll.u32 %v8320_v7, 16  ;;  %v5256_v54 = vrot.slane %v5254_v51, 5  ;;  %v10715_v7 = vld [vmem:[#allocation3 + $0x18] sm:$0xf] }
 0x21b   : > { %v4156_v6 = vshrl.u32 %v8318_v48, 16  ;;  %v8319_v50 = vpack.c.bf16 %v3944_v59, %v3944_v59  ;;  %v4159_v53 = vshll.u32 %v8318_v48, 16  ;;  %6827 = vrot.lane.b32.xlu0 %v8192_v17, %s8663_s28  ;;  %v5252_v30 = vrot.slane %v5251_v33, 4 }
 0x21c   : > { %v3159_v9 = vpop.permute.xlu0 %3158  ;;  %v4175_v32 = vrot.slane %v4173_v11, 7  ;;  %v4181_v8 = vshrl.u32 %v8321_v10, 16  ;;  %v3001_v52 = vpop.permute.xlu1 %3000  ;;  %v4184_v22 = vshll.u32 %v8321_v10, 16  ;;  %v5826_v0 = vor.u32 %v10616_v23, %v10614_v21  ;;  %v4460_v21 = vld [vmem:[#allocation3 + $0x2c] sm:$0x1] }
 0x21d   : > { %v4158_v36 = vrot.slane %v4156_v6, 7  ;;  %v4164_v57 = vshrl.u32 %v8319_v50, 16  ;;  %v3532_v15 = vsel %vm3500_vm1, %v10662_v20, %v3001_v52  ;;  %v3596_v43 = vsel %vm3566_vm3, %v3563_v19, %v3159_v9 }
 0x21e   : > { %v4178_v44 = vor.u32 %v4176_v4, %v4175_v32  ;;  %v4183_v62 = vrot.slane %v4181_v8, 7  ;;  %v4179_v28 = vrot.slane %v4175_v32, 4  ;;  %v4167_v34 = vshll.u32 %v8319_v50, 16 }
 0x21f   : > { %v4161_v29 = vor.u32 %v4159_v53, %v4158_v36  ;;  %v4166_v46 = vrot.slane %v4164_v57, 7  ;;  %v4162_v40 = vrot.slane %v4158_v36, 4  ;;  %v5257_v27 = vsel %vm8964_vm11, %v5252_v30, %v5256_v54 }
 0x220   : > { %v4464_v13 = vsel %vm8958_vm10, %v4178_v44, %v4463_v58  ;;  %v4186_v12 = vor.u32 %v4184_v22, %v4183_v62  ;;  %v4188_v51 = vrot.slane %v4183_v62, 4  ;;  %v3255_v24 = vpop.permute.xlu0 %3254  ;;  %v10721_v59 = vrot.slane %v5826_v0, 4 }
 0x221   : > { %4465 = vst [vmem:[#allocation3 + $0x30] sm:$0xf] %v4464_v13  ;;  %v4457_v23 = vsel %vm8958_vm10, %v4161_v29, %v4456_v56  ;;  %v4169_v20 = vor.u32 %v4167_v34, %v4166_v46  ;;  %v4171_v18 = vrot.slane %v4166_v46, 4  ;;  %v5829_v17 = vshll.u32 %v10596_v49, 16 }
 0x222   : > { %4458 = vst [vmem:[#allocation3 + $0x24] sm:$0xf] %v4457_v23  ;;  %v4187_v45 = vsel %vm8972_vm12, %v4179_v28, %v4186_v12  ;;  %v4468_v48 = vsel %vm8988_vm13, %v4188_v51, %v4467_v14  ;;  %v5835_v11 = vrot.slane %v5833_v5, 4  ;;  %v5839_v10 = vshll.u32 %v10619_v38, 16 }
 0x223   : > { %4466 = vst.msk [vmem:[#allocation3 + $0x34] sm:$0xf] %vm258_vm0, %v4187_v45  ;;  %4469 = vst [vmem:[#allocation3 + $0x38] sm:$0x1] %v4468_v48  ;;  %v4170_v33 = vsel %vm8972_vm12, %v4162_v40, %v4169_v20  ;;  %v4461_v19 = vsel %vm8988_vm13, %v4171_v18, %v4460_v21  ;;  %v5831_v4 = vrot.slane %v5829_v17, 5  ;;  %v4651_v6 = vshrl.u32 %v10715_v7, 16 }
 0x224   : > { %4459 = vst.msk [vmem:[#allocation3 + $0x28] sm:$0xf] %vm258_vm0, %v4170_v33  ;;  %4462 = vst [vmem:[#allocation3 + $0x2c] sm:$0x1] %v4461_v19  ;;  %v4654_v50 = vshll.u32 %v10715_v7, 16  ;;  %v4660_v54 = vshll.u32 %v10641_v42, 16  ;;  %v3629_v32 = vsel %vm3599_vm5, %v3596_v43, %v3255_v24  ;;  %v10738_v8 = vcombine.low %v5247_v35, %v5257_v27 }
 0x225   : > { %v3081_v9 = vpop.permute.xlu1 %3080  ;;  %v5224_v53 = vshrl.u32 %v10606_v2, 16  ;;  %v4664_v49 = vshrl.u32 %v10641_v42, 16  ;;  %v5836_v38 = vor.u32 %v5835_v11, %v5831_v4  ;;  %v5841_v5 = vrot.slane %v5839_v10, 5 }
 0x226   : > { %v4670_v30 = vshll.u32 %v10647_v16, 16  ;;  %v5217_v52 = vor.u32 %v10625_v55, %v10623_v61  ;;  %v3565_v58 = vsel %vm3533_vm2, %v3532_v15, %v3081_v9  ;;  %v4653_v36 = vrot.slane %v4651_v6, 4 }
 0x227   : > { %v4656_v22 = vrot.slane %v4654_v50, 5  ;;  %v10745_v57 = vrot.slane %v4660_v54, 5  ;;  %v5832_v35 = vsel %vm8964_vm11, %v10721_v59, %v5831_v4  ;;  %v5837_v44 = vrot.slane %v5836_v38, 4 }
 0x228   : > { %v5168_v0 = vld [vmem:[#allocation3 + $0x30] sm:$0xf]  ;;  %v4666_v56 = vrot.slane %v4664_v49, 4  ;;  %v10757_v13 = vrot.slane %v4670_v30, 5  ;;  %v10759_v40 = vrot.slane %v5217_v52, 4  ;;  %v8112_v12 = vcombine.low %v10482_v26, %v10500_v31 }
 0x229   : > { %v5775_v43 = vld [vmem:[#allocation3 + $0x30] sm:$0xf]  ;;  %v3161_v62 = vpop.permute.xlu1 %3160  ;;  %v5283_v28 = vshrl.u32 %v5168_v0, 16  ;;  %v5286_v61 = vshll.u32 %v5168_v0, 16  ;;  %v5773_v29 = vld [vmem:[#allocation3 + $0x24] sm:$0xf]  ;;  %v5842_v21 = vsel %vm8964_vm11, %v5837_v44, %v5841_v5  ;;  %v4657_v30 = vor.u32 %v4656_v22, %v4653_v36 }
 0x22a   : > { %v5868_v55 = vshrl.u32 %v5775_v43, 16  ;;  %v5871_v15 = vshll.u32 %v5775_v43, 16  ;;  %v3598_v14 = vsel %vm3566_vm3, %v3565_v58, %v3161_v62  ;;  %v10753_v46 = vld [vmem:[#allocation3 + $0x34] sm:$0xf]  ;;  %v5844_v20 = vshrl.u32 %v5773_v29, 16 }
 0x22b   : > { %v10755_v34 = vld [vmem:[#allocation3 + $0x34] sm:$0xf]  ;;  %v8163_v51 = vcombine.low %v5168_v0, %v10753_v46  ;;  %v10766_v23 = vld [vmem:[#allocation3 + $0x28] sm:$0xf]  ;;  %v5847_v18 = vshll.u32 %v5773_v29, 16  ;;  %v10768_v24 = vrot.slane %v5283_v28, 4  ;;  %v8224_v50 = vcombine.low %v5832_v35, %v5842_v21 }
 0x22c   : > { %v3335_v27 = vpop.permute.xlu0 %3334  ;;  %v10770_v45 = vrot.slane %v5286_v61, 5  ;;  %v5296_v48 = vshrl.u32 %v10753_v46, 16  ;;  %v8210_v59 = vcombine.low %v5775_v43, %v10755_v34  ;;  %v10774_v17 = vld [vmem:[#allocation3 + $0x24] sm:$0xf]  ;;  %v10778_v11 = vrot.slane %v5868_v55, 4 }
 0x22d   : > { %v3257_v33 = vpop.permute.xlu1 %3256  ;;  %v3662_v19 = vsel %vm3632_vm6, %v3629_v32, %v3335_v27  ;;  %6673 = vrot.lane.b32.xlu1 %v8163_v51, %s8661_s26  ;;  %v10780_v10 = vrot.slane %v5871_v15, 5  ;;  %v5881_v4 = vshrl.u32 %v10755_v34, 16  ;;  %v5857_v54 = vshrl.u32 %v10766_v23, 16  ;;  %v10787_v49 = vld [vmem:[#allocation3 + $0x28] sm:$0xf] }
 0x22e   : > { %v3631_v6 = vsel %vm3599_vm5, %v3598_v14, %v3257_v33  ;;  %6927 = vrot.lane.b32.xlu0 %v8210_v59, %s8662_s27  ;;  %v8209_v9 = vcombine.low %v5773_v29, %v10766_v23  ;;  %v10789_v32 = vrot.slane %v5844_v20, 4  ;;  %v10791_v38 = vrot.slane %v5847_v18, 5  ;;  %v4556_v52 = vld [vmem:[#allocation3 + $0xc] sm:$0xf]  ;;  %v10816_v18 = vld [vmem:[#allocation3 + $0x38] sm:$0x1] }
 0x22f   : > { %v5259_v5 = vshrl.u32 %v10774_v17, 16  ;;  %v5262_v0 = vshll.u32 %v10774_v17, 16  ;;  %v4667_v43 = vor.u32 %v4666_v56, %v10745_v57  ;;  %v5220_v35 = vshll.u32 %v10606_v2, 16 }
 0x230   : > { %v3415_v58 = vpop.permute.xlu0 %3414  ;;  %v5226_v44 = vrot.slane %v5224_v53, 4  ;;  %v5272_v61 = vshrl.u32 %v10787_v49, 16  ;;  %v4658_v55 = vrot.slane %v4657_v30, 4  ;;  %v5230_v36 = vshll.u32 %v10659_v60, 16 }
 0x231   : > { %v3337_v62 = vpop.permute.xlu1 %3336  ;;  %v3695_v28 = vsel %vm3665_vm8, %v3662_v19, %v3415_v58  ;;  %6749 = vrot.lane.b32.xlu1 %v10738_v8, %s8665_s30  ;;  %v8162_v22 = vcombine.low %v10774_v17, %v10787_v49  ;;  %v4668_v2 = vrot.slane %v4667_v43, 4  ;;  %v5222_v53 = vrot.slane %v5220_v35, 5  ;;  %v10828_v35 = vld [vmem:[#allocation3 + $0x38] sm:$0x1] }
 0x232   : > { %8426 = vmatprep.mubr.msk.bf16.mxu0 %vm3741_vm9, %v3695_v28  ;;  %7003 = vrot.lane.b32.xlu0 %v8224_v50, %s8666_s6  ;;  %v4627_v56 = vshrl.u32 %v4556_v52, 16  ;;  %v3664_v15 = vsel %vm3632_vm6, %v3631_v6, %v3337_v62  ;;  %v10807_v29 = vrot.slane %v5259_v5, 4  ;;  %v4630_v8 = vshll.u32 %v4556_v52, 16  ;;  %v6205_v50 = vld [vmem:[#allocation3 + $0x30] sm:$0xe] }
 0x233   : > { %v4636_v14 = vshll.u32 %v10628_v25, 16  ;;  %v4663_v60 = vsel %vm8964_vm11, %v4658_v55, %v10745_v57  ;;  %v4673_v51 = vsel %vm8964_vm11, %v4668_v2, %v10757_v13  ;;  %v5227_v21 = vor.u32 %v5226_v44, %v5222_v53  ;;  %v5597_v52 = vld [vmem:[#allocation3 + $0x30] sm:$0xe]  ;;  %v10834_v55 = vld [vmem:[#allocation3 + $0x34] sm:$0xf] }
 0x234   : > { %v4629_v20 = vrot.slane %v4627_v56, 4  ;;  %v5232_v59 = vrot.slane %v5230_v36, 5  ;;  %v4632_v33 = vrot.slane %v4630_v8, 5  ;;  %v4640_v6 = vshrl.u32 %v10628_v25, 16  ;;  %v4990_v56 = vld [vmem:[#allocation3 + $0x30] sm:$0xe] }
 0x235   : > { %v3417_v27 = vpop.permute.xlu1 %3416  ;;  %6925 = vrot.lane.b32.xlu1 %v8209_v9, %s8662_s27  ;;  %v4638_v19 = vrot.slane %v4636_v14, 5  ;;  %v5223_v57 = vsel %vm8964_vm11, %v10759_v40, %v5222_v53  ;;  %v5228_v13 = vrot.slane %v5227_v21, 4  ;;  %v4646_v30 = vshll.u32 %v10634_v41, 16  ;;  %v10837_v53 = vld [vmem:[#allocation3 + $0x38] sm:$0x1] }
 0x236   : > { %v3697_v5 = vsel %vm3665_vm8, %v3664_v15, %v3417_v27  ;;  %6671 = vrot.lane.b32.xlu0 %v8162_v22, %s8661_s26  ;;  %v8130_v9 = vcombine.low %v4663_v60, %v4673_v51  ;;  %v4633_v58 = vor.u32 %v4632_v33, %v4629_v20  ;;  %v4642_v43 = vrot.slane %v4640_v6, 4  ;;  %v4989_v51 = vld [vmem:[#allocation3 + $0x24] sm:$0xe]  ;;  %v10846_v33 = vld [vmem:[#allocation3 + $0x28] sm:$0xf] }
 0x237   : > { %8427 = vmatmul.mubr.msk.bf16.gmra.mrb[28].mxu0 %vm3741_vm9, %v3697_v5  ;;  %v6283_v25 = vrot.slane %v10755_v34, 5  ;;  %v5233_v44 = vsel %vm8964_vm11, %v5228_v13, %v5232_v59  ;;  %v8098_v62 = vrot.slane %v6205_v50, 9  ;;  %v6286_v28 = vrot.slane %v10816_v18, 5  ;;  %v10854_v13 = vld [vmem:[#allocation3 + $0x2c] sm:$0x1] }
 0x238   : > { %v5681_v40 = vrot.slane %v10753_v46, 5  ;;  %v8176_v41 = vcombine.low %v5223_v57, %v5233_v44  ;;  %v4634_v36 = vrot.slane %v4633_v58, 4  ;;  %v4643_v22 = vor.u32 %v4642_v43, %v4638_v19 }
 0x239   : > { %6495 = vrot.lane.b32.xlu1 %v8130_v9, %s8660_s25  ;;  %v8083_v2 = vrot.slane %v5597_v52, 9  ;;  %v4648_v15 = vrot.slane %v4646_v30, 5  ;;  %v6285_v8 = vrot.slane %v6283_v25, 4  ;;  %v5684_v60 = vrot.slane %v10828_v35, 5  ;;  %v6204_v30 = vld [vmem:[#allocation3 + $0x24] sm:$0xe] }
 0x23a   : > { %v5683_v14 = vrot.slane %v5681_v40, 4  ;;  %6747 = vrot.lane.b32.xlu0 %v8176_v41, %s8665_s30  ;;  %v4644_v21 = vrot.slane %v4643_v22, 4  ;;  %v6284_v20 = vsel %vm8928_vm7, %v8098_v62, %v6283_v25  ;;  %v5080_v59 = vrot.slane %v10834_v55, 5  ;;  %v10859_v25 = vld [vmem:[#allocation3 + $0x2c] sm:$0x1] }
 0x23b   : > { %v5682_v27 = vsel %vm8928_vm7, %v8083_v2, %v5681_v40  ;;  %v4639_v6 = vsel %vm8964_vm11, %v4634_v36, %v4638_v19  ;;  %v6287_v50 = vsel %vm8928_vm7, %v6285_v8, %v6286_v28  ;;  %v8068_v57 = vrot.slane %v4990_v56, 9  ;;  %v5596_v40 = vld [vmem:[#allocation3 + $0x24] sm:$0xe]  ;;  %v10867_v56 = vld [vmem:[#allocation3 + $0x2c] sm:$0x1] }
 0x23c   : > { %v5685_v5 = vsel %vm8928_vm7, %v5683_v14, %v5684_v60  ;;  %v4649_v52 = vsel %vm8964_vm11, %v4644_v21, %v4648_v15  ;;  %v8242_v9 = vcombine.low %v6284_v20, %v6287_v50  ;;  %v5083_v58 = vrot.slane %v10837_v53, 5 }
 0x23d   : > { %v8067_v43 = vrot.slane %v4989_v51, 9  ;;  %v8129_v19 = vcombine.low %v4639_v6, %v4649_v52  ;;  %v8195_v44 = vcombine.low %v5682_v27, %v5685_v5  ;;  %v5082_v62 = vrot.slane %v5080_v59, 4 }
 0x23e   : > { %v5073_v28 = vrot.slane %v10846_v33, 5  ;;  %7087 = vrot.lane.b32.xlu0 %v8242_v9, %s8664_s29  ;;  %v5081_v41 = vsel %vm8928_vm7, %v8068_v57, %v5080_v59  ;;  %v5076_v36 = vrot.slane %v10854_v13, 5  ;;  %v8097_v22 = vrot.slane %v6204_v30, 9 }
 0x23f   : > { %v6276_v2 = vrot.slane %v10766_v23, 5  ;;  %6493 = vrot.lane.b32.xlu1 %v8129_v19, %s8660_s25  ;;  %v5084_v15 = vsel %vm8928_vm7, %v5082_v62, %v5083_v58  ;;  %v6279_v14 = vrot.slane %v10859_v25, 5  ;;  %v5674_v60 = vrot.slane %v10787_v49, 5 }
 0x240   : > { %v5075_v8 = vrot.slane %v5073_v28, 4  ;;  %v8148_v51 = vcombine.low %v5081_v41, %v5084_v15  ;;  %v5074_v21 = vsel %vm8928_vm7, %v8067_v43, %v5073_v28  ;;  %v8082_v27 = vrot.slane %v5596_v40, 9 }
 0x241   : > { %v6278_v20 = vrot.slane %v6276_v2, 4  ;;  %v6277_v6 = vsel %vm8928_vm7, %v8097_v22, %v6276_v2  ;;  %v5676_v50 = vrot.slane %v5674_v60, 4  ;;  %v5677_v5 = vrot.slane %v10867_v56, 5 }
 0x242   : > { %v5077_v59 = vsel %vm8928_vm7, %v5075_v8, %v5076_v36  ;;  %6579 = vrot.lane.b32.xlu0 %v8148_v51, %s8659_s24  ;;  %v5289_v30 = vor.u32 %v10770_v45, %v10768_v24  ;;  %v5292_v52 = vshll.u32 %v10753_v46, 16  ;;  %v5298_v9 = vrot.slane %v5296_v48, 4 }
 0x243   : > { %v6280_v57 = vsel %vm8928_vm7, %v6278_v20, %v6279_v14  ;;  %v8408_v58 = vpop.f32.mrb[8].mxu0  ;;  %v10891_v43 = vrot.slane %v5262_v0, 5  ;;  %6833 = vrot.lane.b32.xlu1 %v8195_v44, %s8663_s28  ;;  %v8147_v19 = vcombine.low %v5074_v21, %v5077_v59  ;;  %v5675_v28 = vsel %vm8928_vm7, %v8082_v27, %v5674_v60 }
 0x244   : > { %v8241_v62 = vcombine.low %v6277_v6, %v6280_v57  ;;  %v3853_v40 = vadd.f32 %v8408_v58, %v10557_v63  ;;  %v3844_v24 = vpop.f32.mrb[9].mxu0  ;;  %v5678_v45 = vsel %vm8928_vm7, %v5676_v50, %v5677_v5  ;;  %v10899_v46 = vrot.slane %v5292_v52, 5 }
 0x245   : > { %v5874_v48 = vor.u32 %v10780_v10, %v10778_v11  ;;  %v3845_v17 = vadd.f32 %v10557_v63, %v3844_v24  ;;  %v8409_v0 = vpop.f32.mrb[10].mxu0  ;;  %v5302_v44 = vshll.u32 %v10828_v35, 16  ;;  %v5877_v41 = vshll.u32 %v10755_v34, 16 }
 0x246   : > { %v5883_v36 = vrot.slane %v5881_v4, 4  ;;  %v3949_v22 = vmax.f32 %v3853_v40, 0.0  ;;  %v3856_v2 = vadd.f32 %v8409_v0, %v10557_v63  ;;  %v3847_v15 = vpop.f32.mrb[11].mxu0  ;;  %7085 = vrot.lane.b32.xlu0 %v8241_v62, %s8664_s29  ;;  %v10910_v8 = vrot.slane %v5289_v30, 4 }
 0x247   : > { %v5299_v11 = vor.u32 %v5298_v9, %v10899_v46  ;;  %v3947_v10 = vmax.f32 %v3845_v17, 0.0  ;;  %v3848_v14 = vadd.f32 %v10557_v63, %v3847_v15  ;;  %6577 = vrot.lane.b32.xlu1 %v8147_v19, %s8659_s24  ;;  %v10915_v35 = vrot.slane %v5874_v48, 4  ;;  %v4562_v19 = vld [vmem:[#allocation3 + $0x30] sm:$0xf] }
 0x248   : > { %v10917_v60 = vrot.slane %v5877_v41, 5  ;;  %v8324_v34 = vpack.c.bf16 %v3949_v22, %v3949_v22  ;;  %v3950_v4 = vmax.f32 %v3856_v2, 0.0  ;;  %v8194_v51 = vcombine.low %v5675_v28, %v5678_v45  ;;  %v4477_v45 = vld [vmem:[#allocation3 + $0x48] sm:$0xf] }
 0x249   : > { %v10919_v21 = vrot.slane %v5299_v11, 4  ;;  %v8322_v20 = vpack.c.bf16 %v3947_v10, %v3947_v10  ;;  %v3948_v27 = vmax.f32 %v3848_v14, 0.0  ;;  %v10921_v59 = vrot.slane %v5302_v44, 5  ;;  %v4470_v44 = vld [vmem:[#allocation3 + $0x3c] sm:$0xf] }
 0x24a   : > { %v5884_v6 = vor.u32 %v5883_v36, %v10917_v60  ;;  %v4207_v50 = vshrl.u32 %v8324_v34, 16  ;;  %v8325_v5 = vpack.c.bf16 %v3950_v4, %v3950_v4  ;;  %6831 = vrot.lane.b32.xlu0 %v8194_v51, %s8663_s28  ;;  %v5295_v63 = vsel %vm8964_vm11, %v10910_v8, %v10899_v46  ;;  %v4481_v8 = vld [vmem:[#allocation3 + $0x50] sm:$0x1]  ;;  %v4474_v4 = vld [vmem:[#allocation3 + $0x44] sm:$0x1] }
 0x24b   : > { %v5887_v57 = vshll.u32 %v10816_v18, 16  ;;  %v4210_v30 = vshll.u32 %v8324_v34, 16  ;;  %v4190_v52 = vshrl.u32 %v8322_v20, 16  ;;  %v8323_v9 = vpack.c.bf16 %v3948_v27, %v3948_v27 }
 0x24c   : > { %v5880_v58 = vsel %vm8964_vm11, %v10915_v35, %v10917_v60  ;;  %v4209_v62 = vrot.slane %v4207_v50, 7  ;;  %v4193_v28 = vshll.u32 %v8322_v20, 16  ;;  %v4215_v40 = vshrl.u32 %v8325_v5, 16 }
 0x24d   : > { %v5305_v24 = vsel %vm8964_vm11, %v10919_v21, %v10921_v59  ;;  %v4192_v46 = vrot.slane %v4190_v52, 7  ;;  %v4218_v18 = vshll.u32 %v8325_v5, 16  ;;  %v4198_v48 = vshrl.u32 %v8323_v9, 16 }
 0x24e   : > { %v5885_v17 = vrot.slane %v5884_v6, 4  ;;  %v4212_v0 = vor.u32 %v4210_v30, %v4209_v62  ;;  %v4217_v41 = vrot.slane %v4215_v40, 7  ;;  %v4201_v36 = vshll.u32 %v8323_v9, 16 }
 0x24f   : > { %v4699_v22 = vshrl.u32 %v4562_v19, 16  ;;  %v4213_v2 = vrot.slane %v4209_v62, 4  ;;  %v4195_v15 = vor.u32 %v4193_v28, %v4192_v46  ;;  %v4200_v11 = vrot.slane %v4198_v48, 7 }
 0x250   : > { %v5889_v10 = vrot.slane %v5887_v57, 5  ;;  %v4478_v14 = vsel %vm8958_vm10, %v4212_v0, %v4477_v45  ;;  %v4196_v35 = vrot.slane %v4192_v46, 4  ;;  %v4220_v60 = vor.u32 %v4218_v18, %v4217_v41 }
 0x251   : > { %v4222_v34 = vrot.slane %v4217_v41, 4  ;;  %4479 = vst [vmem:[#allocation3 + $0x48] sm:$0xf] %v4478_v14  ;;  %v4471_v51 = vsel %vm8958_vm10, %v4195_v15, %v4470_v44  ;;  %v4203_v21 = vor.u32 %v4201_v36, %v4200_v11  ;;  %v4205_v20 = vrot.slane %v4200_v11, 4 }
 0x252   : > { %v4701_v27 = vrot.slane %v4699_v22, 4  ;;  %4472 = vst [vmem:[#allocation3 + $0x3c] sm:$0xf] %v4471_v51  ;;  %v4221_v59 = vsel %vm8972_vm12, %v4213_v2, %v4220_v60  ;;  %v4702_v50 = vshll.u32 %v4562_v19, 16  ;;  %v4708_v5 = vshll.u32 %v10834_v55, 16 }
 0x253   : > { %v4482_v6 = vsel %vm8988_vm13, %v4222_v34, %v4481_v8  ;;  %4480 = vst.msk [vmem:[#allocation3 + $0x4c] sm:$0xf] %vm258_vm0, %v4221_v59  ;;  %v4204_v57 = vsel %vm8972_vm12, %v4196_v35, %v4203_v21  ;;  %v4475_v30 = vsel %vm8988_vm13, %v4205_v20, %v4474_v4  ;;  %v4712_v52 = vshrl.u32 %v10834_v55, 16 }
 0x254   : > { %4483 = vst [vmem:[#allocation3 + $0x50] sm:$0x1] %v4482_v6  ;;  %v4718_v9 = vshll.u32 %v10837_v53, 16  ;;  %4473 = vst.msk [vmem:[#allocation3 + $0x40] sm:$0xf] %vm258_vm0, %v4204_v57  ;;  %v4704_v62 = vrot.slane %v4702_v50, 5  ;;  %v5265_v28 = vor.u32 %v10891_v43, %v10807_v29  ;;  %v5890_v45 = vsel %vm8964_vm11, %v5885_v17, %v5889_v10 }
 0x255   : > { %4476 = vst [vmem:[#allocation3 + $0x44] sm:$0x1] %v4475_v30  ;;  %v10955_v19 = vrot.slane %v4708_v5, 5  ;;  %v5268_v40 = vshll.u32 %v10787_v49, 16  ;;  %v4714_v46 = vrot.slane %v4712_v52, 4  ;;  %v5274_v55 = vrot.slane %v5272_v61, 4 }
 0x256   : > { %v5278_v53 = vshll.u32 %v10867_v56, 16  ;;  %v4705_v18 = vor.u32 %v4704_v62, %v4701_v27  ;;  %v10965_v48 = vrot.slane %v5265_v28, 4  ;;  %v5850_v44 = vor.u32 %v10791_v38, %v10789_v32  ;;  %v4560_v62 = vld [vmem:[#allocation3 + $0x24] sm:$0xf] }
 0x257   : > { %v10967_v0 = vrot.slane %v5268_v40, 5  ;;  %v8179_v29 = vcombine.low %v5295_v63, %v5305_v24  ;;  %v10971_v43 = vrot.slane %v4718_v9, 5  ;;  %v5853_v17 = vshll.u32 %v10766_v23, 16  ;;  %v6492_v23 = vpop.permute.xlu0 %6491 }
 0x258   : > { %v10973_v41 = vrot.slane %v5278_v53, 5  ;;  %v5172_v36 = vld [vmem:[#allocation3 + $0x48] sm:$0xf]  ;;  %v8226_v61 = vcombine.low %v5880_v58, %v5890_v45  ;;  %v10976_v22 = vrot.slane %v4705_v18, 4  ;;  %v4715_v56 = vor.u32 %v4714_v46, %v10955_v19 }
 0x259   : > { %v5779_v49 = vld [vmem:[#allocation3 + $0x48] sm:$0xf]  ;;  %v5859_v2 = vrot.slane %v5857_v54, 4  ;;  %v5331_v15 = vshrl.u32 %v5172_v36, 16  ;;  %v5334_v8 = vshll.u32 %v5172_v36, 16  ;;  %v5271_v58 = vsel %vm8964_vm11, %v10965_v48, %v10967_v0 }
 0x25a   : > { %v5916_v32 = vshrl.u32 %v5779_v49, 16  ;;  %v5919_v38 = vshll.u32 %v5779_v49, 16  ;;  %v5777_v63 = vld [vmem:[#allocation3 + $0x3c] sm:$0xf]  ;;  %v10981_v24 = vld [vmem:[#allocation3 + $0x4c] sm:$0xf]  ;;  %v5275_v14 = vor.u32 %v5274_v55, %v10967_v0  ;;  %v4711_v4 = vsel %vm8964_vm11, %v10976_v22, %v10955_v19 }
 0x25b   : > { %v10983_v11 = vld [vmem:[#allocation3 + $0x4c] sm:$0xf]  ;;  %v5892_v10 = vshrl.u32 %v5777_v63, 16  ;;  %v10990_v35 = vrot.slane %v5850_v44, 4  ;;  %v8165_v54 = vcombine.low %v5172_v36, %v10981_v24  ;;  %v10993_v60 = vld [vmem:[#allocation3 + $0x40] sm:$0xf]  ;;  %v11003_v51 = vsel %vm3418_vm14, %v8112_v12, %v6492_v23 }
 0x25c   : > { %v5895_v34 = vshll.u32 %v5777_v63, 16  ;;  %v11005_v21 = vrot.slane %v5331_v15, 4  ;;  %v11007_v20 = vrot.slane %v5334_v8, 5  ;;  %v5344_v27 = vshrl.u32 %v10981_v24, 16  ;;  %v5170_v6 = vld [vmem:[#allocation3 + $0x3c] sm:$0xf] }
 0x25d   : > { %v8212_v59 = vcombine.low %v5779_v49, %v10983_v11  ;;  %6677 = vrot.lane.b32.xlu1 %v8165_v54, %s8661_s26  ;;  %v11012_v50 = vrot.slane %v5916_v32, 4  ;;  %v11014_v5 = vrot.slane %v5919_v38, 5  ;;  %v5929_v26 = vshrl.u32 %v10983_v11, 16  ;;  %v11018_v12 = vld [vmem:[#allocation3 + $0x40] sm:$0xf] }
 0x25e   : > { %v5905_v31 = vshrl.u32 %v10993_v60, 16  ;;  %v8211_v57 = vcombine.low %v5777_v63, %v10993_v60  ;;  %v11022_v30 = vrot.slane %v5892_v10, 4  ;;  %v5307_v52 = vshrl.u32 %v5170_v6, 16  ;;  %v6207_v46 = vld [vmem:[#allocation3 + $0x48] sm:$0xe] }
 0x25f   : > { %6931 = vrot.lane.b32.xlu0 %v8212_v59, %s8662_s27  ;;  %v5310_v9 = vshll.u32 %v5170_v6, 16  ;;  %v4716_v19 = vrot.slane %v4715_v56, 4  ;;  %v5276_v28 = vrot.slane %v5275_v14, 4  ;;  %v5855_v40 = vrot.slane %v5853_v17, 5  ;;  %v11029_v48 = vld [vmem:[#allocation3 + $0x50] sm:$0x1] }
 0x260   : > { %v5863_v45 = vshll.u32 %v10859_v25, 16  ;;  %v11025_v55 = vrot.slane %v5895_v34, 5  ;;  %v5320_v53 = vshrl.u32 %v11018_v12, 16  ;;  %v8164_v18 = vcombine.low %v5170_v6, %v11018_v12  ;;  %v11048_v38 = vld [vmem:[#allocation3 + $0x4c] sm:$0xf] }
 0x261   : > { %v6297_v0 = vrot.slane %v10983_v11, 5  ;;  %6753 = vrot.lane.b32.xlu1 %v8179_v29, %s8665_s30  ;;  %v11033_v44 = vrot.slane %v5307_v52, 4  ;;  %v11035_v36 = vrot.slane %v5310_v9, 5  ;;  %v5860_v17 = vor.u32 %v5859_v2, %v5855_v40  ;;  %v5599_v52 = vld [vmem:[#allocation3 + $0x48] sm:$0xe] }
 0x262   : > { %v8100_v49 = vrot.slane %v6207_v46, 9  ;;  %v4721_v25 = vsel %vm8964_vm11, %v4716_v19, %v10971_v43  ;;  %v5281_v22 = vsel %vm8964_vm11, %v5276_v28, %v10973_v41  ;;  %v5856_v29 = vsel %vm8964_vm11, %v10990_v35, %v5855_v40  ;;  %v4992_v41 = vld [vmem:[#allocation3 + $0x48] sm:$0xe]  ;;  %v11064_v19 = vld [vmem:[#allocation3 + $0x50] sm:$0x1] }
 0x263   : > { %7007 = vrot.lane.b32.xlu0 %v8226_v61, %s8666_s6  ;;  %v5865_v56 = vrot.slane %v5863_v45, 5  ;;  %v5861_v15 = vrot.slane %v5860_v17, 4  ;;  %v6299_v8 = vrot.slane %v6297_v0, 4  ;;  %v6300_v2 = vrot.slane %v11029_v48, 5  ;;  %v11067_v46 = vld [vmem:[#allocation3 + $0x44] sm:$0x1] }
 0x264   : > { %v4675_v32 = vshrl.u32 %v4560_v62, 16  ;;  %v4678_v61 = vshll.u32 %v4560_v62, 16  ;;  %v4684_v63 = vshll.u32 %v10846_v33, 16  ;;  %v4688_v43 = vshrl.u32 %v10846_v33, 16 }
 0x265   : > { %v4694_v10 = vshll.u32 %v10854_v13, 16  ;;  %6929 = vrot.lane.b32.xlu1 %v8211_v57, %s8662_s27  ;;  %v8132_v14 = vcombine.low %v4711_v4, %v4721_v25  ;;  %v5866_v35 = vsel %vm8964_vm11, %v5861_v15, %v5865_v56  ;;  %v6301_v23 = vsel %vm8928_vm7, %v6299_v8, %v6300_v2  ;;  %v11061_v13 = vld [vmem:[#allocation3 + $0x50] sm:$0x1]  ;;  %v11074_v2 = vld [vmem:[#allocation3 + $0x40] sm:$0xf] }
 0x266   : > { %v4677_v54 = vrot.slane %v4675_v32, 4  ;;  %v8178_v34 = vcombine.low %v5271_v58, %v5281_v22  ;;  %v6298_v59 = vsel %vm8928_vm7, %v8100_v49, %v6297_v0  ;;  %v4680_v33 = vrot.slane %v4678_v61, 5  ;;  %v4991_v22 = vld [vmem:[#allocation3 + $0x3c] sm:$0xe] }
 0x267   : > { %6675 = vrot.lane.b32.xlu0 %v8164_v18, %s8661_s26  ;;  %v4686_v6 = vrot.slane %v4684_v63, 5  ;;  %v8225_v57 = vcombine.low %v5856_v29, %v5866_v35  ;;  %v4690_v4 = vrot.slane %v4688_v43, 4  ;;  %v8070_v9 = vrot.slane %v4992_v41, 9  ;;  %v6206_v18 = vld [vmem:[#allocation3 + $0x3c] sm:$0xe] }
 0x268   : > { %v5094_v62 = vrot.slane %v11048_v38, 5  ;;  %v8244_v28 = vcombine.low %v6298_v59, %v6301_v23  ;;  %v4681_v40 = vor.u32 %v4680_v33, %v4677_v54  ;;  %v4696_v45 = vrot.slane %v4694_v10, 5  ;;  %v11085_v35 = vld [vmem:[#allocation3 + $0x44] sm:$0x1] }
 0x269   : > { %v5695_v58 = vrot.slane %v10981_v24, 5  ;;  %6499 = vrot.lane.b32.xlu1 %v8132_v14, %s8660_s25  ;;  %v4691_v0 = vor.u32 %v4690_v4, %v4686_v6  ;;  %v5097_v49 = vrot.slane %v11061_v13, 5  ;;  %v8085_v25 = vrot.slane %v5599_v52, 9  ;;  %v11093_v52 = vld [vmem:[#allocation3 + $0x44] sm:$0x1] }
 0x26a   : > { %v5096_v17 = vrot.slane %v5094_v62, 4  ;;  %v4682_v29 = vrot.slane %v4681_v40, 4  ;;  %v5698_v15 = vrot.slane %v11064_v19, 5  ;;  %v6290_v8 = vrot.slane %v10993_v60, 5  ;;  %v5598_v4 = vld [vmem:[#allocation3 + $0x3c] sm:$0xe] }
 0x26b   : > { %6751 = vrot.lane.b32.xlu0 %v8178_v34, %s8665_s30  ;;  %v5697_v56 = vrot.slane %v5695_v58, 4  ;;  %v4692_v32 = vrot.slane %v4691_v0, 4  ;;  %v5095_v61 = vsel %vm8928_vm7, %v8070_v9, %v5094_v62  ;;  %v8099_v43 = vrot.slane %v6206_v18, 9 }
 0x26c   : > { %v5098_v63 = vsel %vm8928_vm7, %v5096_v17, %v5097_v49  ;;  %v5696_v10 = vsel %vm8928_vm7, %v8085_v25, %v5695_v58  ;;  %v6293_v14 = vrot.slane %v11067_v46, 5  ;;  %v8069_v23 = vrot.slane %v4991_v22, 9 }
 0x26d   : > { %v5699_v41 = vsel %vm8928_vm7, %v5697_v56, %v5698_v15  ;;  %7005 = vrot.lane.b32.xlu1 %v8225_v57, %s8666_s6  ;;  %v4687_v54 = vsel %vm8964_vm11, %v4682_v29, %v4686_v6  ;;  %v4697_v34 = vsel %vm8964_vm11, %v4692_v32, %v4696_v45  ;;  %v6292_v59 = vrot.slane %v6290_v8, 4  ;;  %v4566_v15 = vld [vmem:[#allocation3 + $0x48] sm:$0xf] }
 0x26e   : > { %v5087_v33 = vrot.slane %v11074_v2, 5  ;;  %v8150_v9 = vcombine.low %v5095_v61, %v5098_v63  ;;  %v8197_v62 = vcombine.low %v5696_v10, %v5699_v41  ;;  %v6291_v40 = vsel %vm8928_vm7, %v8099_v43, %v6290_v8 }
 0x26f   : > { %7091 = vrot.lane.b32.xlu0 %v8244_v28, %s8664_s29  ;;  %v5688_v57 = vrot.slane %v11018_v12, 5  ;;  %v8131_v58 = vcombine.low %v4687_v54, %v4697_v34  ;;  %v6294_v6 = vsel %vm8928_vm7, %v6292_v59, %v6293_v14  ;;  %v5090_v18 = vrot.slane %v11085_v35, 5 }
 0x270   : > { %v5089_v45 = vrot.slane %v5087_v33, 4  ;;  %v8084_v0 = vrot.slane %v5598_v4, 9  ;;  %v5691_v49 = vrot.slane %v11093_v52, 5  ;;  %v5337_v28 = vor.u32 %v11007_v20, %v11005_v21 }
 0x271   : > { %v5690_v17 = vrot.slane %v5688_v57, 4  ;;  %6497 = vrot.lane.b32.xlu1 %v8131_v58, %s8660_s25  ;;  %v5088_v25 = vsel %vm8928_vm7, %v8069_v23, %v5087_v33  ;;  %v5340_v29 = vshll.u32 %v10981_v24, 16  ;;  %v5346_v56 = vrot.slane %v5344_v27, 4 }
 0x272   : > { %v5091_v22 = vsel %vm8928_vm7, %v5089_v45, %v5090_v18  ;;  %v8243_v8 = vcombine.low %v6291_v40, %v6294_v6  ;;  %v5350_v20 = vshll.u32 %v11064_v19, 16  ;;  %v5922_v32 = vor.u32 %v11014_v5, %v11012_v50  ;;  %v11131_v50 = vld [vmem:[%s12703_s2] ss:$0 sm:$0xff] }
 0x273   : > { %6583 = vrot.lane.b32.xlu0 %v8150_v9, %s8659_s24  ;;  %v5692_v21 = vsel %vm8928_vm7, %v5690_v17, %v5691_v49  ;;  %v8149_v61 = vcombine.low %v5088_v25, %v5091_v22  ;;  %v5689_v63 = vsel %vm8928_vm7, %v8084_v0, %v5688_v57  ;;  %v11121_v43 = vrot.slane %v5340_v29, 5 }
 0x274   : > { %v5925_v24 = vshll.u32 %v10983_v11, 16  ;;  %v8196_v10 = vcombine.low %v5689_v63, %v5692_v21  ;;  %v11124_v41 = vrot.slane %v5337_v28, 4  ;;  %v5931_v14 = vrot.slane %v5929_v26, 4 }
 0x275   : > { %v8412_v27 = vpop.f32.mrb[12].mxu0  ;;  %v4747_v23 = vshrl.u32 %v4566_v15, 16  ;;  %6837 = vrot.lane.b32.xlu1 %v8197_v62, %s8663_s28  ;;  %v5347_v54 = vor.u32 %v5346_v56, %v11121_v43  ;;  %v5935_v59 = vshll.u32 %v11029_v48, 16  ;;  %v11141_v33 = vrot.slane %v5350_v20, 5 }
 0x276   : > { %v3869_v5 = vadd.f32 %v11131_v50, %v8412_v27  ;;  %v3860_v19 = vpop.f32.mrb[13].mxu0  ;;  %v11136_v34 = vrot.slane %v5925_v24, 5  ;;  %v11143_v4 = vrot.slane %v5922_v32, 4  ;;  %v4750_v9 = vshll.u32 %v4566_v15, 16 }
 0x277   : > { %v3861_v11 = vadd.f32 %v11131_v50, %v3860_v19  ;;  %v8413_v26 = vpop.f32.mrb[14].mxu0  ;;  %7089 = vrot.lane.b32.xlu0 %v8243_v8, %s8664_s29  ;;  %v11146_v58 = vrot.slane %v5347_v54, 4  ;;  %v4749_v6 = vrot.slane %v4747_v23, 4  ;;  %v5343_v28 = vsel %vm8964_vm11, %v11124_v41, %v11121_v43  ;;  %v11167_v23 = vpop.permute.xlu0 %6571 }
 0x278   : > { %v3953_v40 = vmax.f32 %v3869_v5, 0.0  ;;  %v3872_v57 = vadd.f32 %v11131_v50, %v8413_v26  ;;  %v3863_v62 = vpop.f32.mrb[15].mxu0  ;;  %v5932_v18 = vor.u32 %v5931_v14, %v11136_v34  ;;  %v4752_v0 = vrot.slane %v4750_v9, 5  ;;  %v4491_v5 = vld [vmem:[#allocation3 + $0x60] sm:$0xf] }
 0x279   : > { %v3951_v45 = vmax.f32 %v3861_v11, 0.0  ;;  %v3864_v48 = vadd.f32 %v11131_v50, %v3863_v62  ;;  %6581 = vrot.lane.b32.xlu1 %v8149_v61, %s8659_s24  ;;  %v5937_v25 = vrot.slane %v5935_v59, 5  ;;  %v5928_v56 = vsel %vm8964_vm11, %v11143_v4, %v11136_v34 }
 0x27a   : > { %v8328_v17 = vpack.c.bf16 %v3953_v40, %v3953_v40  ;;  %v3954_v49 = vmax.f32 %v3872_v57, 0.0  ;;  %v5933_v15 = vrot.slane %v5932_v18, 4  ;;  %v5353_v20 = vsel %vm8964_vm11, %v11146_v58, %v11141_v33  ;;  %v4484_v33 = vld [vmem:[#allocation3 + $0x54] sm:$0xf]  ;;  %v4495_v57 = vld [vmem:[#allocation3 + $0x68] sm:$0x1] }
 0x27b   : > { %v8326_v22 = vpack.c.bf16 %v3951_v45, %v3951_v45  ;;  %v3952_v29 = vmax.f32 %v3864_v48, 0.0  ;;  %6835 = vrot.lane.b32.xlu0 %v8196_v10, %s8663_s28  ;;  %v4753_v32 = vor.u32 %v4752_v0, %v4749_v6  ;;  %v4756_v24 = vshll.u32 %v11048_v38, 16 }
 0x27c   : > { %v4241_v8 = vshrl.u32 %v8328_v17, 16  ;;  %v8329_v21 = vpack.c.bf16 %v3954_v49, %v3954_v49  ;;  %v4244_v61 = vshll.u32 %v8328_v17, 16  ;;  %v5938_v14 = vsel %vm8964_vm11, %v5933_v15, %v5937_v25  ;;  %v4488_v17 = vld [vmem:[#allocation3 + $0x5c] sm:$0x1] }
 0x27d   : > { %v4224_v63 = vshrl.u32 %v8326_v22, 16  ;;  %v8327_v43 = vpack.c.bf16 %v3952_v29, %v3952_v29  ;;  %v4227_v10 = vshll.u32 %v8326_v22, 16  ;;  %v11169_v9 = vrot.slane %v4753_v32, 4  ;;  %v11185_v32 = vpop.permute.xlu0 %6923 }
 0x27e   : > { %v4243_v27 = vrot.slane %v4241_v8, 7  ;;  %v4249_v41 = vshrl.u32 %v8329_v21, 16  ;;  %v4252_v54 = vshll.u32 %v8329_v21, 16  ;;  %v11171_v58 = vrot.slane %v4756_v24, 5 }
 0x27f   : > { %v4226_v19 = vrot.slane %v4224_v63, 7  ;;  %v4232_v34 = vshrl.u32 %v8327_v43, 16  ;;  %v4235_v59 = vshll.u32 %v8327_v43, 16  ;;  %v4760_v6 = vshrl.u32 %v11048_v38, 16 }
 0x280   : > { %v4246_v11 = vor.u32 %v4244_v61, %v4243_v27  ;;  %v4247_v26 = vrot.slane %v4243_v27, 4  ;;  %v4251_v4 = vrot.slane %v4249_v41, 7  ;;  %v4766_v8 = vshll.u32 %v11061_v13, 16  ;;  %v8551_v61 = vld [vmem:[%s12704_s3] sm:$0xff]  }
 0x281   : > { %v4229_v40 = vor.u32 %v4227_v10, %v4226_v19  ;;  %v4234_v62 = vrot.slane %v4232_v34, 7  ;;  %v4230_v48 = vrot.slane %v4226_v19, 4  ;;  %v4762_v29 = vrot.slane %v4760_v6, 4  ;;  %8430 = vmatprep.subr.bf16.mxu1 %v8551_v61 }
 0x282   : > { %v4492_v45 = vsel %vm8958_vm10, %v4246_v11, %v4491_v5  ;;  %v4254_v18 = vor.u32 %v4252_v54, %v4251_v4  ;;  %v4256_v0 = vrot.slane %v4251_v4, 4  ;;  %v5313_v21 = vor.u32 %v11035_v36, %v11033_v44  ;;  %8431 = vmatpush3.bf16.msra.mxu1 %v8551_v61  ;;  %v6668_v4 = vpop.permute.xlu0 %6667 }
 0x283   : > { %4493 = vst [vmem:[#allocation3 + $0x60] sm:$0xf] %v4492_v45  ;;  %v4485_v49 = vsel %vm8958_vm10, %v4229_v40, %v4484_v33  ;;  %v4237_v25 = vor.u32 %v4235_v59, %v4234_v62  ;;  %v4239_v22 = vrot.slane %v4234_v62, 4  ;;  %v4763_v13 = vor.u32 %v4762_v29, %v11171_v58 }
 0x284   : > { %4486 = vst [vmem:[#allocation3 + $0x54] sm:$0xf] %v4485_v49  ;;  %v4255_v15 = vsel %vm8972_vm12, %v4247_v26, %v4254_v18  ;;  %v4496_v38 = vsel %vm8988_vm13, %v4256_v0, %v4495_v57  ;;  %v5316_v24 = vshll.u32 %v11018_v12, 16  ;;  %v11198_v44 = vcombine.low %v5343_v28, %v5353_v20 }
 0x285   : > { %4494 = vst.msk [vmem:[#allocation3 + $0x64] sm:$0xf] %vm258_vm0, %v4255_v15  ;;  %4497 = vst [vmem:[#allocation3 + $0x68] sm:$0x1] %v4496_v38  ;;  %v4238_v63 = vsel %vm8972_vm12, %v4230_v48, %v4237_v25  ;;  %v4489_v43 = vsel %vm8988_vm13, %v4239_v22, %v4488_v17  ;;  %v11200_v36 = vcombine.low %v5928_v56, %v5938_v14  ;;  %v11202_v27 = vrot.slane %v5313_v21, 4  ;;  %v8552_v14 = vld [vmem:[%s12704_s3 + $0x8] sm:$0xff]  }
 0x286   : > { %4487 = vst.msk [vmem:[#allocation3 + $0x58] sm:$0xf] %vm258_vm0, %v4238_v63  ;;  %4490 = vst [vmem:[#allocation3 + $0x5c] sm:$0x1] %v4489_v43  ;;  %v5326_v10 = vshll.u32 %v11093_v52, 16  ;;  %v4764_v41 = vrot.slane %v4763_v13, 4  ;;  %v5898_v19 = vor.u32 %v11025_v55, %v11022_v30  ;;  %v4759_v28 = vsel %vm8964_vm11, %v11169_v9, %v11171_v58  ;;  %8432 = vmatprep.subr.bf16.mxu1 %v8552_v14 }
 0x287   : > { %v4768_v5 = vrot.slane %v4766_v8, 5  ;;  %v5901_v54 = vshll.u32 %v10993_v60, 16  ;;  %v11212_v56 = vrot.slane %v5316_v24, 5  ;;  %v5322_v20 = vrot.slane %v5320_v53, 4  ;;  %8433 = vmatpush3.bf16.msra.mxu1 %v8552_v14  ;;  %v8553_v25 = vld [vmem:[%s12704_s3 + $0x10] sm:$0xff]  }
 0x288   : > { %v5911_v52 = vshll.u32 %v11067_v46, 16  ;;  %v11222_v55 = vrot.slane %v5326_v10, 5  ;;  %v11224_v34 = vrot.slane %v5898_v19, 4  ;;  %v5907_v59 = vrot.slane %v5905_v31, 4  ;;  %8434 = vmatprep.subr.bf16.mxu1 %v8553_v25 }
 0x289   : > { %v4769_v30 = vsel %vm8964_vm11, %v4764_v41, %v4768_v5  ;;  %v5319_v12 = vsel %vm8964_vm11, %v11202_v27, %v11212_v56  ;;  %v11232_v53 = vrot.slane %v5901_v54, 5  ;;  %v7164_v33 = vsel %vm3467_vm15, %v11003_v51, %v11167_v23 }
 0x28a   : > { %v5176_v11 = vld [vmem:[#allocation3 + $0x60] sm:$0xf]  ;;  %v11234_v46 = vrot.slane %v5911_v52, 5  ;;  %v11247_v48 = vcombine.low %v4759_v28, %v4769_v30  ;;  %v5323_v51 = vor.u32 %v5322_v20, %v11212_v56  ;;  %v11257_v49 = vsel %vm3500_vm1, %v7164_v33, %v6668_v4 }
 0x28b   : > { %v5783_v26 = vld [vmem:[#allocation3 + $0x60] sm:$0xf]  ;;  %v5379_v9 = vshrl.u32 %v5176_v11, 16  ;;  %v5382_v60 = vshll.u32 %v5176_v11, 16  ;;  %v11239_v57 = vld [vmem:[#allocation3 + $0x54] sm:$0xf]  ;;  %v5908_v17 = vor.u32 %v5907_v59, %v11232_v53  ;;  %v5904_v24 = vsel %vm8964_vm11, %v11224_v34, %v11232_v53  ;;  %8435 = vmatpush3.bf16.msra.mxu1 %v8553_v25 }
 0x28c   : > { %v5964_v31 = vshrl.u32 %v5783_v26, 16  ;;  %v5967_v40 = vshll.u32 %v5783_v26, 16  ;;  %v11241_v62 = vld [vmem:[#allocation3 + $0x64] sm:$0xf]  ;;  %v5940_v6 = vshrl.u32 %v11239_v57, 16  ;;  %v5943_v45 = vshll.u32 %v11239_v57, 16 }
 0x28d   : > { %v11243_v58 = vld [vmem:[#allocation3 + $0x64] sm:$0xf]  ;;  %v11250_v23 = vrot.slane %v5379_v9, 4  ;;  %v8167_v18 = vcombine.low %v5176_v11, %v11241_v62  ;;  %v11253_v0 = vld [vmem:[#allocation3 + $0x58] sm:$0xf]  ;;  %v11262_v22 = vrot.slane %v5382_v60, 5 }
 0x28e   : > { %v5392_v29 = vshrl.u32 %v11241_v62, 16  ;;  %v11265_v15 = vrot.slane %v5964_v31, 4  ;;  %v8214_v38 = vcombine.low %v5783_v26, %v11243_v58  ;;  %v11268_v8 = vld [vmem:[#allocation3 + $0x54] sm:$0xf]  ;;  %v11271_v21 = vrot.slane %v5967_v40, 5 }
 0x28f   : > { %6681 = vrot.lane.b32.xlu1 %v8167_v18, %s8661_s26  ;;  %v5977_v61 = vshrl.u32 %v11243_v58, 16  ;;  %v8416_v63 = vpop.f32.mrb[16].mxu0  ;;  %v11275_v13 = vld [vmem:[#allocation3 + $0x58] sm:$0xf]  ;;  %v8213_v5 = vcombine.low %v11239_v57, %v11253_v0  ;;  %v11285_v19 = vrot.slane %v5940_v6, 4  ;;  %v11287_v54 = vrot.slane %v5943_v45, 5 }
 0x290   : > { %6935 = vrot.lane.b32.xlu0 %v8214_v38, %s8662_s27  ;;  %v3885_v10 = vadd.f32 %v11131_v50, %v8416_v63  ;;  %v3876_v41 = vpop.f32.mrb[17].mxu0  ;;  %v5355_v52 = vshrl.u32 %v11268_v8, 16  ;;  %v5324_v14 = vrot.slane %v5323_v51, 4  ;;  %v5909_v30 = vrot.slane %v5908_v17, 4  ;;  %v6209_v33 = vld [vmem:[#allocation3 + $0x60] sm:$0xe] }
 0x291   : > { %v3877_v28 = vadd.f32 %v11131_v50, %v3876_v41  ;;  %v8417_v20 = vpop.f32.mrb[18].mxu0  ;;  %v5358_v11 = vshll.u32 %v11268_v8, 16  ;;  %v8166_v26 = vcombine.low %v11268_v8, %v11275_v13  ;;  %v11304_v40 = vld [vmem:[#allocation3 + $0x68] sm:$0x1]  ;;  %v8554_v57 = vld [vmem:[%s12704_s3 + $0x18] sm:$0xff]   ;;  %v8102_v18 = vrot.slane %v6209_v33, 9 }
 0x292   : > { %v3957_v34 = vmax.f32 %v3885_v10, 0.0  ;;  %v3888_v59 = vadd.f32 %v11131_v50, %v8417_v20  ;;  %v3879_v53 = vpop.f32.mrb[19].mxu0  ;;  %v5329_v60 = vsel %vm8964_vm11, %v5324_v14, %v11222_v55  ;;  %v5914_v31 = vsel %vm8964_vm11, %v5909_v30, %v11234_v46  ;;  %8436 = vmatprep.subr.bf16.mxu1 %v8554_v57  ;;  %v4564_v10 = vld [vmem:[#allocation3 + $0x3c] sm:$0xf] }
 0x293   : > { %6757 = vrot.lane.b32.xlu1 %v11198_v44, %s8665_s30  ;;  %v3955_v4 = vmax.f32 %v3877_v28, 0.0  ;;  %v3880_v9 = vadd.f32 %v11131_v50, %v3879_v53  ;;  %v8180_v55 = vcombine.low %v5319_v12, %v5329_v60  ;;  %v11316_v45 = vcombine.low %v5904_v24, %v5914_v31  ;;  %8437 = vmatpush3.bf16.msra.mxu1 %v8554_v57  ;;  %v11323_v12 = vpop.permute.xlu0 %7083 }
 0x294   : > { %7011 = vrot.lane.b32.xlu0 %v11200_v36, %s8666_s6  ;;  %v8332_v44 = vpack.c.bf16 %v3957_v34, %v3957_v34  ;;  %v3958_v6 = vmax.f32 %v3888_v59, 0.0  ;;  %v6311_v17 = vrot.slane %v11243_v58, 5  ;;  %v6314_v36 = vrot.slane %v11304_v40, 5  ;;  %v4505_v34 = vld [vmem:[#allocation3 + $0x78] sm:$0xf] }
 0x295   : > { %v8330_v46 = vpack.c.bf16 %v3955_v4, %v3955_v4  ;;  %v3956_v51 = vmax.f32 %v3880_v9, 0.0  ;;  %v4723_v4 = vshrl.u32 %v4564_v10, 16  ;;  %v6304_v8 = vrot.slane %v11253_v0, 5 }
 0x296   : > { %v4275_v25 = vshrl.u32 %v8332_v44, 16  ;;  %v4278_v38 = vshll.u32 %v8332_v44, 16  ;;  %v8333_v63 = vpack.c.bf16 %v3958_v6, %v3958_v6  ;;  %v6312_v56 = vsel %vm8928_vm7, %v8102_v18, %v6311_v17  ;;  %v8555_v18 = vld [vmem:[%s12704_s3 + $0x20] ss:$0 sps:$4 sm:$0xff]  }
 0x297   : > { %v4258_v41 = vshrl.u32 %v8330_v46, 16  ;;  %v4261_v28 = vshll.u32 %v8330_v46, 16  ;;  %6933 = vrot.lane.b32.xlu1 %v8213_v5, %s8662_s27  ;;  %v8331_v27 = vpack.c.bf16 %v3956_v51, %v3956_v51  ;;  %v6313_v30 = vrot.slane %v6311_v17, 4  ;;  %v4498_v5 = vld [vmem:[#allocation3 + $0x6c] sm:$0xf]  ;;  %8473 = vmatprep.subr.msk.bf16.mxu1 %vm3774_vm4, %v8555_v18 }
 0x298   : > { %v4277_v24 = vrot.slane %v4275_v25, 7  ;;  %v4283_v20 = vshrl.u32 %v8333_v63, 16  ;;  %v4286_v14 = vshll.u32 %v8333_v63, 16  ;;  %6679 = vrot.lane.b32.xlu0 %v8166_v26, %s8661_s26  ;;  %v4509_v46 = vld [vmem:[#allocation3 + $0x80] sm:$0x1] }
 0x299   : > { %v4260_v59 = vrot.slane %v4258_v41, 7  ;;  %v4266_v53 = vshrl.u32 %v8331_v27, 16  ;;  %v4269_v33 = vshll.u32 %v8331_v27, 16  ;;  %v6315_v57 = vsel %vm8928_vm7, %v6313_v30, %v6314_v36  ;;  %v4502_v63 = vld [vmem:[#allocation3 + $0x74] sm:$0x1]  ;;  %v11336_v36 = vpop.permute.xlu1 %6669 }
 0x29a   : > { %v4280_v9 = vor.u32 %v4278_v38, %v4277_v24  ;;  %v4281_v60 = vrot.slane %v4277_v24, 4  ;;  %v4285_v31 = vrot.slane %v4283_v20, 7  ;;  %v8246_v26 = vcombine.low %v6312_v56, %v6315_v57  ;;  %v11340_v24 = vld [vmem:[#allocation3 + $0x64] sm:$0xf]  ;;  %v11342_v20 = vpop.permute.xlu0 %6575  ;;  %v5601_v57 = vld [vmem:[#allocation3 + $0x60] sm:$0xe] }
 0x29b   : > { %v4263_v44 = vor.u32 %v4261_v28, %v4260_v59  ;;  %v4264_v6 = vrot.slane %v4260_v59, 4  ;;  %v4268_v51 = vrot.slane %v4266_v53, 7  ;;  %6503 = vrot.lane.b32.xlu1 %v11247_v48, %s8660_s25  ;;  %v4725_v41 = vrot.slane %v4723_v4, 4  ;;  %v4994_v59 = vld [vmem:[#allocation3 + $0x60] sm:$0xe] }
 0x29c   : > { %v4506_v17 = vsel %vm8958_vm10, %v4280_v9, %v4505_v34  ;;  %v4288_v25 = vor.u32 %v4286_v14, %v4285_v31  ;;  %v4290_v38 = vrot.slane %v4285_v31, 4  ;;  %6755 = vrot.lane.b32.xlu0 %v8180_v55, %s8665_s30  ;;  %v4726_v56 = vshll.u32 %v4564_v10, 16  ;;  %v11359_v9 = vld [vmem:[#allocation3 + $0x68] sm:$0x1] }
 0x29d   : > { %4507 = vst [vmem:[#allocation3 + $0x78] sm:$0xf] %v4506_v17  ;;  %v4499_v48 = vsel %vm8958_vm10, %v4263_v44, %v4498_v5  ;;  %v4271_v28 = vor.u32 %v4269_v33, %v4268_v51  ;;  %v4273_v27 = vrot.slane %v4268_v51, 4  ;;  %v4732_v30 = vshll.u32 %v11074_v2, 16 }
 0x29e   : > { %4500 = vst [vmem:[#allocation3 + $0x6c] sm:$0xf] %v4499_v48  ;;  %v4289_v55 = vsel %vm8972_vm12, %v4281_v60, %v4288_v25  ;;  %v4510_v14 = vsel %vm8988_vm13, %v4290_v38, %v4509_v46  ;;  %v4736_v34 = vshrl.u32 %v11074_v2, 16  ;;  %v4728_v33 = vrot.slane %v4726_v56, 5  ;;  %v11373_v46 = vld [vmem:[#allocation3 + $0x68] sm:$0x1]  ;;  %v11377_v38 = vpop.permute.xlu1 %6829 }
 0x29f   : > { %4508 = vst.msk [vmem:[#allocation3 + $0x7c] sm:$0xf] %vm258_vm0, %v4289_v55  ;;  %4511 = vst [vmem:[#allocation3 + $0x80] sm:$0x1] %v4510_v14  ;;  %v4272_v10 = vsel %vm8972_vm12, %v4264_v6, %v4271_v28  ;;  %v4503_v53 = vsel %vm8988_vm13, %v4273_v27, %v4502_v63  ;;  %7009 = vrot.lane.b32.xlu1 %v11316_v45, %s8666_s6  ;;  %v4742_v4 = vshll.u32 %v11085_v35, 16  ;;  %v4734_v60 = vrot.slane %v4732_v30, 5 }
 0x2a0   : > { %4501 = vst.msk [vmem:[#allocation3 + $0x70] sm:$0xf] %vm258_vm0, %v4272_v10  ;;  %4504 = vst [vmem:[#allocation3 + $0x74] sm:$0x1] %v4503_v53  ;;  %7095 = vrot.lane.b32.xlu0 %v8246_v26, %s8664_s29  ;;  %v4738_v5 = vrot.slane %v4736_v34, 4  ;;  %v5108_v31 = vrot.slane %v11340_v24, 5  ;;  %v4729_v44 = vor.u32 %v4728_v33, %v4725_v41 }
 0x2a1   : > { %v11367_v45 = vrot.slane %v5355_v52, 4  ;;  %v11371_v35 = vrot.slane %v5358_v11, 5  ;;  %v8072_v6 = vrot.slane %v4994_v59, 9  ;;  %v5111_v26 = vrot.slane %v11359_v9, 5  ;;  %v6208_v25 = vld [vmem:[#allocation3 + $0x54] sm:$0xe]  ;;  %v11382_v11 = vpop.permute.xlu0 %6827 }
 0x2a2   : > { %v4739_v51 = vor.u32 %v4738_v5, %v4734_v60  ;;  %v5110_v18 = vrot.slane %v5108_v31, 4  ;;  %v5709_v17 = vrot.slane %v11241_v62, 5  ;;  %12719 = vst [vmem:[#allocation4_spill] sm:$0xff] %v11377_v38  ;;  %v4730_v63 = vrot.slane %v4729_v44, 4  ;;  %v11379_v28 = vld [vmem:[#allocation3 + $0x5c] sm:$0x1] }
 0x2a3   : > { %v4744_v52 = vrot.slane %v4742_v4, 5  ;;  %v8087_v48 = vrot.slane %v5601_v57, 9  ;;  %v5109_v27 = vsel %vm8928_vm7, %v8072_v6, %v5108_v31  ;;  %v11388_v14 = vld [vmem:[#allocation3 + $0x58] sm:$0xf]  ;;  %v11390_v30 = vld [vmem:[#allocation3 + $0x5c] sm:$0x1] }
 0x2a4   : > { %v4740_v41 = vrot.slane %v4739_v51, 4  ;;  %v5112_v56 = vsel %vm8928_vm7, %v5110_v18, %v5111_v26  ;;  %v5711_v55 = vrot.slane %v5709_v17, 4  ;;  %v5712_v59 = vrot.slane %v11373_v46, 5  ;;  %v4993_v33 = vld [vmem:[#allocation3 + $0x54] sm:$0xe] }
 0x2a5   : > { %v8152_v34 = vcombine.low %v5109_v27, %v5112_v56  ;;  %v8101_v10 = vrot.slane %v6208_v25, 9  ;;  %v6306_v53 = vrot.slane %v6304_v8, 4  ;;  %v4735_v4 = vsel %vm8964_vm11, %v4730_v63, %v4734_v60  ;;  %v5600_v44 = vld [vmem:[#allocation3 + $0x54] sm:$0xe]  ;;  %v11400_v6 = vld [vmem:[#allocation3 + $0x78] sm:$0xf]  ;;  %v11410_v63 = vpop.permute.xlu0 %6927  ;;  %v11416_v27 = vpop.permute.xlu1 %6573 }
 0x2a6   : > { %v4745_v5 = vsel %vm8964_vm11, %v4740_v41, %v4744_v52  ;;  %v5710_v31 = vsel %vm8928_vm7, %v8087_v48, %v5709_v17  ;;  %v6307_v57 = vrot.slane %v11379_v28, 5  ;;  %v5713_v18 = vsel %vm8928_vm7, %v5711_v55, %v5712_v59  ;;  %v11408_v25 = vld [vmem:[#allocation3 + $0x5c] sm:$0x1]  ;;  %v8612_v1 = vld [vmem:[#allocation3 + $0x78] sm:$0xf] }
 0x2a7   : > { %v8133_v51 = vcombine.low %v4735_v4, %v4745_v5  ;;  %6587 = vrot.lane.b32.xlu0 %v8152_v34, %s8659_s24  ;;  %v6305_v60 = vsel %vm8928_vm7, %v8101_v10, %v6304_v8  ;;  %v5101_v26 = vrot.slane %v11388_v14, 5  ;;  %v8071_v52 = vrot.slane %v4993_v33, 9  ;;  %v11418_v56 = vld [vmem:[#allocation3 + $0x7c] sm:$0xf]  ;;  %v5787_v10 = vld [vmem:[#allocation3 + $0x78] sm:$0xf] }
 0x2a8   : > { %v6308_v17 = vsel %vm8928_vm7, %v6306_v53, %v6307_v57  ;;  %v5104_v48 = vrot.slane %v11390_v30, 5  ;;  %v5702_v41 = vrot.slane %v11275_v13, 5  ;;  %v8086_v34 = vrot.slane %v5600_v44, 9 }
 0x2a9   : > { %6501 = vrot.lane.b32.xlu1 %v8133_v51, %s8660_s25  ;;  %v8245_v8 = vcombine.low %v6305_v60, %v6308_v17  ;;  %v5103_v55 = vrot.slane %v5101_v26, 4  ;;  %v5427_v59 = vshrl.u32 %v11400_v6, 16  ;;  %v8199_v4 = vcombine.low %v5710_v31, %v5713_v18  ;;  %v11433_v31 = vld [vmem:[#allocation3 + $0x7c] sm:$0xf]  ;;  %v11445_v43 = vpop.permute.xlu0 %7003 }
 0x2aa   : > { %v5704_v5 = vrot.slane %v5702_v41, 4  ;;  %v5705_v53 = vrot.slane %v11408_v25, 5  ;;  %v5430_v33 = vshll.u32 %v11400_v6, 16  ;;  %v5102_v57 = vsel %vm8928_vm7, %v8071_v52, %v5101_v26  ;;  %v11440_v52 = vpop.permute.xlu1 %6673 }
 0x2ab   : > { %7093 = vrot.lane.b32.xlu0 %v8245_v8, %s8664_s29  ;;  %v5105_v51 = vsel %vm8928_vm7, %v5103_v55, %v5104_v48  ;;  %v5703_v44 = vsel %vm8928_vm7, %v8086_v34, %v5702_v41  ;;  %v8169_v60 = vcombine.low %v11400_v6, %v11418_v56  ;;  %v11437_v17 = vrot.slane %v5427_v59, 4  ;;  %12720 = vst [vmem:[#allocation5_spill] sm:$0xff] %v11440_v52 }
 0x2ac   : > { %v5706_v18 = vsel %vm8928_vm7, %v5704_v5, %v5705_v53  ;;  %v6012_v16 = vshrl.u32 %v5787_v10, 16  ;;  %v8420_v26 = vpop.f32.mrb[20].mxu0  ;;  %v8151_v48 = vcombine.low %v5102_v57, %v5105_v51  ;;  %v11443_v55 = vrot.slane %v5430_v33, 5 }
 0x2ad   : > { %6841 = vrot.lane.b32.xlu1 %v8199_v4, %s8663_s28  ;;  %v8198_v41 = vcombine.low %v5703_v44, %v5706_v18  ;;  %v6015_v6 = vshll.u32 %v5787_v10, 16  ;;  %v3892_v34 = vpop.f32.mrb[21].mxu0  ;;  %v8216_v5 = vcombine.low %v5787_v10, %v11433_v31  ;;  %v5385_v59 = vor.u32 %v11262_v22, %v11250_v23  ;;  %v5785_v18 = vld [vmem:[#allocation3 + $0x6c] sm:$0xf] }
 0x2ae   : > { %v5388_v53 = vshll.u32 %v11241_v62, 16  ;;  %v5394_v8 = vrot.slane %v5392_v29, 4  ;;  %v8421_v2 = vpop.f32.mrb[22].mxu0  ;;  %v5398_v4 = vshll.u32 %v11373_v46, 16  ;;  %v5970_v33 = vor.u32 %v11271_v21, %v11265_v15  ;;  %v11476_v46 = vpop.permute.xlu1 %6749 }
 0x2af   : > { %6839 = vrot.lane.b32.xlu0 %v8198_v41, %s8663_s28  ;;  %v5973_v57 = vshll.u32 %v11243_v58, 16  ;;  %v5979_v10 = vrot.slane %v5977_v61, 4  ;;  %v11460_v51 = vpop.f32.mrb[23].mxu0  ;;  %v5386_v23 = vrot.slane %v5385_v59, 4  ;;  %v5983_v62 = vshll.u32 %v11304_v40, 16  ;;  %12721 = vst [vmem:[#allocation6_spill] sm:$0xff] %v11476_v46 }
 0x2b0   : > { %v5390_v22 = vrot.slane %v5388_v53, 5  ;;  %v3901_v29 = vadd.f32 %v11131_v50, %v8420_v26  ;;  %v11465_v44 = vrot.slane %v6012_v16, 4  ;;  %v3893_v21 = vadd.f32 %v11131_v50, %v3892_v34  ;;  %v11474_v53 = vld [vmem:[#allocation3 + $0x70] sm:$0xf] }
 0x2b1   : > { %6585 = vrot.lane.b32.xlu1 %v8151_v48, %s8659_s24  ;;  %v5975_v15 = vrot.slane %v5973_v57, 5  ;;  %v11469_v58 = vrot.slane %v6015_v6, 5  ;;  %v5971_v41 = vrot.slane %v5970_v33, 4  ;;  %v5400_v26 = vrot.slane %v5398_v4, 5  ;;  %v11478_v57 = vpop.permute.xlu0 %6671 }
 0x2b2   : > { %v5395_v61 = vor.u32 %v5394_v8, %v5390_v22  ;;  %v3961_v59 = vmax.f32 %v3901_v29, 0.0  ;;  %v5391_v40 = vsel %vm8964_vm11, %v5386_v23, %v5390_v22  ;;  %v3959_v16 = vmax.f32 %v3893_v21, 0.0 }
 0x2b3   : > { %6939 = vrot.lane.b32.xlu0 %v8216_v5, %s8662_s27  ;;  %v5980_v48 = vor.u32 %v5979_v10, %v5975_v15  ;;  %v5985_v6 = vrot.slane %v5983_v62, 5  ;;  %v5988_v8 = vshrl.u32 %v5785_v18, 16  ;;  %v5991_v29 = vshll.u32 %v5785_v18, 16 }
 0x2b4   : > { %v5396_v34 = vrot.slane %v5395_v61, 4  ;;  %v8336_v52 = vpack.c.bf16 %v3961_v59, %v3961_v59  ;;  %v8334_v5 = vpack.c.bf16 %v3959_v16, %v3959_v16  ;;  %v3904_v23 = vadd.f32 %v11131_v50, %v8421_v2 }
 0x2b5   : > { %6685 = vrot.lane.b32.xlu1 %v8169_v60, %s8661_s26  ;;  %v5981_v33 = vrot.slane %v5980_v48, 4  ;;  %v5976_v10 = vsel %vm8964_vm11, %v5971_v41, %v5975_v15  ;;  %v8215_v60 = vcombine.low %v5785_v18, %v11474_v53  ;;  %v11490_v48 = vld [vmem:[#allocation3 + $0x6c] sm:$0xf]  ;;  %v4519_v15 = vld [vmem:[#allocation3 + $0x90] sm:$0xf]  ;;  %v11503_v18 = vpop.permute.xlu0 %6747 }
 0x2b6   : > { %v5401_v4 = vsel %vm8964_vm11, %v5396_v34, %v5400_v26  ;;  %v4309_v22 = vshrl.u32 %v8336_v52, 16  ;;  %v4292_v59 = vshrl.u32 %v8334_v5, 16  ;;  %v4312_v38 = vshll.u32 %v8336_v52, 16  ;;  %v11492_v26 = vld [vmem:[#allocation3 + $0x70] sm:$0xf] }
 0x2b7   : > { %v8183_v61 = vcombine.low %v5391_v40, %v5401_v4  ;;  %v5986_v62 = vsel %vm8964_vm11, %v5981_v33, %v5985_v6  ;;  %v3962_v46 = vmax.f32 %v3904_v23, 0.0  ;;  %v4295_v40 = vshll.u32 %v8334_v5, 16  ;;  %v11501_v33 = vpop.permute.xlu1 %6925  ;;  %v4512_v23 = vld [vmem:[#allocation3 + $0x84] sm:$0xf] }
 0x2b8   : > { %v8230_v16 = vcombine.low %v5976_v10, %v5986_v62  ;;  %v4311_v2 = vrot.slane %v4309_v22, 7  ;;  %v11495_v41 = vrot.slane %v4292_v59, 7  ;;  %v11497_v34 = vrot.slane %v5988_v8, 4  ;;  %12722 = vst [vmem:[#allocation7_spill] sm:$0xff] %v11501_v33 }
 0x2b9   : > { %6761 = vrot.lane.b32.xlu1 %v8183_v61, %s8665_s30  ;;  %v11499_v6 = vrot.slane %v5991_v29, 5  ;;  %v8337_v4 = vpack.c.bf16 %v3962_v46, %v3962_v46  ;;  %v4570_v61 = vld [vmem:[#allocation3 + $0x60] sm:$0xf]  ;;  %v8168_v29 = vcombine.low %v11490_v48, %v11492_v26  ;;  %v3896_v46 = vadd.f32 %v11131_v50, %v11460_v51  ;;  %v4523_v51 = vld [vmem:[#allocation3 + $0x98] sm:$0x1] }
 0x2ba   : > { %7015 = vrot.lane.b32.xlu0 %v8230_v16, %s8666_s6  ;;  %v4314_v52 = vor.u32 %v4312_v38, %v4311_v2  ;;  %v4315_v62 = vrot.slane %v4311_v2, 4  ;;  %v4297_v8 = vor.u32 %v4295_v40, %v11495_v41  ;;  %v4795_v2 = vshrl.u32 %v4570_v61, 16 }
 0x2bb   : > { %v4317_v16 = vshrl.u32 %v8337_v4, 16  ;;  %v4320_v38 = vshll.u32 %v8337_v4, 16  ;;  %v4798_v40 = vshll.u32 %v4570_v61, 16  ;;  %v4804_v5 = vshll.u32 %v11340_v24, 16  ;;  %v11526_v61 = vpop.permute.xlu0 %7087 }
 0x2bc   : > { %v4520_v59 = vsel %vm8958_vm10, %v4314_v52, %v4519_v15  ;;  %v4513_v21 = vsel %vm8958_vm10, %v4297_v8, %v4512_v23  ;;  %v3960_v15 = vmax.f32 %v3896_v46, 0.0  ;;  %v4808_v52 = vshrl.u32 %v11340_v24, 16  ;;  %12723 = vst [vmem:[#allocation8_spill] sm:$0xff] %v11526_v61  ;;  %v5602_v61 = vld [vmem:[#allocation3 + $0x6c] sm:$0xe] }
 0x2bd   : > { %4521 = vst [vmem:[#allocation3 + $0x90] sm:$0xf] %v4520_v59  ;;  %6937 = vrot.lane.b32.xlu1 %v8215_v60, %s8662_s27  ;;  %4514 = vst [vmem:[#allocation3 + $0x84] sm:$0xf] %v4513_v21  ;;  %v4319_v22 = vrot.slane %v4317_v16, 7  ;;  %v4814_v4 = vshll.u32 %v11359_v9, 16  ;;  %v11524_v60 = vpop.permute.xlu1 %6495  ;;  %v5361_v24 = vor.u32 %v11371_v35, %v11367_v45 }
 0x2be   : > { %6683 = vrot.lane.b32.xlu0 %v8168_v29, %s8661_s26  ;;  %v4298_v50 = vrot.slane %v11495_v41, 4  ;;  %v4797_v59 = vrot.slane %v4795_v2, 4  ;;  %v4800_v23 = vrot.slane %v4798_v40, 5  ;;  %v4806_v8 = vrot.slane %v4804_v5, 5 }
 0x2bf   : > { %v4322_v10 = vor.u32 %v4320_v38, %v4319_v22  ;;  %v4324_v21 = vrot.slane %v4319_v22, 4  ;;  %v8335_v16 = vpack.c.bf16 %v3960_v15, %v3960_v15  ;;  %v4810_v33 = vrot.slane %v4808_v52, 4 }
 0x2c0   : > { %v4801_v29 = vor.u32 %v4800_v23, %v4797_v59  ;;  %v4816_v46 = vrot.slane %v4814_v4, 5  ;;  %v5364_v9 = vshll.u32 %v11275_v13, 16  ;;  %v12724_v52 = vshrl.u32 %v11275_v13, 16 }
 0x2c1   : > { %v4323_v41 = vsel %vm8972_vm12, %v4315_v62, %v4322_v10  ;;  %v4524_v5 = vsel %vm8988_vm13, %v4324_v21, %v4523_v51  ;;  %v4300_v2 = vshrl.u32 %v8335_v16, 16  ;;  %v4303_v40 = vshll.u32 %v8335_v16, 16  ;;  %v4516_v51 = vld [vmem:[#allocation3 + $0x8c] sm:$0x1] }
 0x2c2   : > { %4522 = vst.msk [vmem:[#allocation3 + $0x94] sm:$0xf] %vm258_vm0, %v4323_v41  ;;  %4525 = vst [vmem:[#allocation3 + $0x98] sm:$0x1] %v4524_v5  ;;  %v4802_v22 = vrot.slane %v4801_v29, 4  ;;  %v4811_v38 = vor.u32 %v4810_v33, %v4806_v8  ;;  %v5366_v15 = vrot.slane %v5364_v9, 5  ;;  %v5946_v10 = vor.u32 %v11287_v54, %v11285_v19  ;;  %v11544_v33 = vpop.permute.xlu1 %6493  ;;  %v11546_v29 = vpop.permute.xlu0 %6579 }
 0x2c3   : > { %v5370_v4 = vrot.slane %v12724_v52, 4  ;;  %v4302_v45 = vrot.slane %v4300_v2, 7  ;;  %v5374_v35 = vshll.u32 %v11408_v25, 16  ;;  %v5949_v62 = vshll.u32 %v11253_v0, 16 }
 0x2c4   : > { %v4807_v59 = vsel %vm8964_vm11, %v4802_v22, %v4806_v8  ;;  %v4812_v23 = vrot.slane %v4811_v38, 4  ;;  %v5362_v21 = vrot.slane %v5361_v24, 4  ;;  %v5947_v25 = vrot.slane %v5946_v10, 4  ;;  %v6211_v8 = vld [vmem:[#allocation3 + $0x78] sm:$0xe] }
 0x2c5   : > { %v5371_v16 = vor.u32 %v5370_v4, %v5366_v15  ;;  %v4305_v13 = vor.u32 %v4303_v40, %v4302_v45  ;;  %v4307_v9 = vrot.slane %v4302_v45, 4  ;;  %v5376_v41 = vrot.slane %v5374_v35, 5  ;;  %v4568_v4 = vld [vmem:[#allocation3 + $0x54] sm:$0xf]  ;;  %v11564_v35 = vld [vmem:[#allocation3 + $0x80] sm:$0x1] }
 0x2c6   : > { %v4817_v19 = vsel %vm8964_vm11, %v4812_v23, %v4816_v46  ;;  %v5951_v5 = vrot.slane %v5949_v62, 5  ;;  %v12725_v2 = vshrl.u32 %v11253_v0, 16  ;;  %v5959_v40 = vshll.u32 %v11379_v28, 16 }
 0x2c7   : > { %v5372_v54 = vrot.slane %v5371_v16, 4  ;;  %v4306_v24 = vsel %vm8972_vm12, %v4298_v50, %v4305_v13  ;;  %v4517_v22 = vsel %vm8988_vm13, %v4307_v9, %v4516_v51  ;;  %v8136_v38 = vcombine.low %v4807_v59, %v4817_v19  ;;  %v11571_v13 = vpop.permute.xlu0 %7085 }
 0x2c8   : > { %v5955_v52 = vrot.slane %v12725_v2, 4  ;;  %4515 = vst.msk [vmem:[#allocation3 + $0x88] sm:$0xf] %vm258_vm0, %v4306_v24  ;;  %4518 = vst [vmem:[#allocation3 + $0x8c] sm:$0x1] %v4517_v22  ;;  %v5367_v46 = vsel %vm8964_vm11, %v5362_v21, %v5366_v15  ;;  %v5952_v45 = vsel %vm8964_vm11, %v5947_v25, %v5951_v5  ;;  %v5961_v28 = vrot.slane %v5959_v40, 5  ;;  %v11569_v21 = vpop.permute.xlu1 %6833 }
 0x2c9   : > { %v5377_v0 = vsel %vm8964_vm11, %v5372_v54, %v5376_v41  ;;  %6507 = vrot.lane.b32.xlu1 %v8136_v38, %s8660_s25  ;;  %v8104_v62 = vrot.slane %v6211_v8, 9  ;;  %v6325_v51 = vrot.slane %v11433_v31, 5  ;;  %v4771_v23 = vshrl.u32 %v4568_v4, 16  ;;  %12726 = vst [vmem:[#allocation9_spill] sm:$0xff] %v11569_v21  ;;  %12727 = vst [vmem:[#allocation10_spill] sm:$0xff] %v11571_v13 }
 0x2ca   : > { %v5956_v50 = vor.u32 %v5955_v52, %v5951_v5  ;;  %v8182_v10 = vcombine.low %v5367_v46, %v5377_v0  ;;  %v4774_v16 = vshll.u32 %v4568_v4, 16  ;;  %v4780_v15 = vshll.u32 %v11388_v14, 16  ;;  %v11578_v54 = vld [vmem:[#allocation3 + $0x7c] sm:$0xf]  ;;  %v4996_v24 = vld [vmem:[#allocation3 + $0x78] sm:$0xe] }
 0x2cb   : > { %v6326_v9 = vsel %vm8928_vm7, %v8104_v62, %v6325_v51  ;;  %v6327_v41 = vrot.slane %v6325_v51, 4  ;;  %v6328_v25 = vrot.slane %v11564_v35, 5  ;;  %v4784_v19 = vshrl.u32 %v11388_v14, 16  ;;  %v11585_v46 = vld [vmem:[#allocation3 + $0x80] sm:$0x1] }
 0x2cc   : > { %v5957_v59 = vrot.slane %v5956_v50, 4  ;;  %6759 = vrot.lane.b32.xlu0 %v8182_v10, %s8665_s30  ;;  %v4773_v2 = vrot.slane %v4771_v23, 4  ;;  %v4776_v52 = vrot.slane %v4774_v16, 5  ;;  %v4782_v8 = vrot.slane %v4780_v15, 5  ;;  %v5603_v0 = vld [vmem:[#allocation3 + $0x78] sm:$0xe] }
 0x2cd   : > { %v6329_v38 = vsel %vm8928_vm7, %v6327_v41, %v6328_v25  ;;  %v4786_v40 = vrot.slane %v4784_v19, 4  ;;  %v4790_v4 = vshll.u32 %v11390_v30, 16  ;;  %v12728_v14 = vshrl.u32 %v11490_v48, 16  ;;  %v11592_v51 = vld [vmem:[#allocation3 + $0x80] sm:$0x1] }
 0x2ce   : > { %v5962_v5 = vsel %vm8964_vm11, %v5957_v59, %v5961_v28  ;;  %v8248_v10 = vcombine.low %v6326_v9, %v6329_v38  ;;  %v4777_v28 = vor.u32 %v4776_v52, %v4773_v2  ;;  %v5122_v62 = vrot.slane %v11578_v54, 5  ;;  %v11602_v19 = vld [vmem:[#allocation3 + $0x74] sm:$0x1]  ;;  %v6210_v38 = vld [vmem:[#allocation3 + $0x6c] sm:$0xe] }
 0x2cf   : > { %v8229_v22 = vcombine.low %v5952_v45, %v5962_v5  ;;  %v11589_v50 = vrot.slane %v12728_v14, 4  ;;  %v12729_v45 = vshll.u32 %v11490_v48, 16  ;;  %v4787_v30 = vor.u32 %v4786_v40, %v4782_v8  ;;  %v11604_v5 = vpop.permute.xlu1 %6577  ;;  %v11606_v48 = vpop.permute.xlu0 %6831 }
 0x2d0   : > { %v8074_v23 = vrot.slane %v4996_v24, 9  ;;  %v5723_v16 = vrot.slane %v11418_v56, 5  ;;  %7099 = vrot.lane.b32.xlu0 %v8248_v10, %s8664_s29  ;;  %v4778_v15 = vrot.slane %v4777_v28, 4  ;;  %v5124_v41 = vrot.slane %v5122_v62, 4  ;;  %12730 = vst [vmem:[#allocation11_spill] sm:$0xff] %v11604_v5 }
 0x2d1   : > { %v11596_v59 = vrot.slane %v12729_v45, 5  ;;  %7013 = vrot.lane.b32.xlu1 %v8229_v22, %s8666_s6  ;;  %v5125_v9 = vrot.slane %v11585_v46, 5  ;;  %v8089_v25 = vrot.slane %v5603_v0, 9  ;;  %v4788_v2 = vrot.slane %v4787_v30, 4  ;;  %v11616_v28 = vld [vmem:[#allocation3 + $0x70] sm:$0xf] }
 0x2d2   : > { %v4792_v52 = vrot.slane %v4790_v4, 5  ;;  %v5725_v22 = vrot.slane %v5723_v16, 4  ;;  %v5726_v24 = vrot.slane %v11592_v51, 5  ;;  %v5123_v40 = vsel %vm8928_vm7, %v8074_v23, %v5122_v62  ;;  %v4995_v45 = vld [vmem:[#allocation3 + $0x6c] sm:$0xe] }
 0x2d3   : > { %v5126_v14 = vsel %vm8928_vm7, %v5124_v41, %v5125_v9  ;;  %v5724_v0 = vsel %vm8928_vm7, %v8089_v25, %v5723_v16  ;;  %v6318_v10 = vrot.slane %v11474_v53, 5  ;;  %v4783_v4 = vsel %vm8964_vm11, %v4778_v15, %v4782_v8  ;;  %v11624_v23 = vld [vmem:[#allocation3 + $0x74] sm:$0x1]  ;;  %v11629_v13 = vpop.permute.xlu1 %6677 }
 0x2d4   : > { %v4793_v30 = vsel %vm8964_vm11, %v4788_v2, %v4792_v52  ;;  %v8154_v21 = vcombine.low %v5123_v40, %v5126_v14  ;;  %v5727_v62 = vsel %vm8928_vm7, %v5725_v22, %v5726_v24  ;;  %v11626_v41 = vld [vmem:[#allocation3 + $0x74] sm:$0x1]  ;;  %v8103_v9 = vrot.slane %v6210_v38, 9  ;;  %12731 = vst [vmem:[#allocation12_spill] sm:$0xff] %v11629_v13  ;;  %v11634_v22 = vld [vmem:[#allocation3 + $0x90] sm:$0xf] }
 0x2d5   : > { %v8135_v16 = vcombine.low %v4783_v4, %v4793_v30  ;;  %v6320_v25 = vrot.slane %v6318_v10, 4  ;;  %v6321_v5 = vrot.slane %v11602_v19, 5  ;;  %v8201_v8 = vcombine.low %v5724_v0, %v5727_v62  ;;  %v11647_v0 = vpop.permute.xlu0 %6931  ;;  %v11652_v62 = vld [vmem:[#allocation3 + $0x94] sm:$0xf] }
 0x2d6   : > { %6591 = vrot.lane.b32.xlu0 %v8154_v21, %s8659_s24  ;;  %v8073_v15 = vrot.slane %v4995_v45, 9  ;;  %v5115_v2 = vrot.slane %v11616_v28, 5  ;;  %v5716_v52 = vrot.slane %v11492_v26, 5  ;;  %v6319_v24 = vsel %vm8928_vm7, %v8103_v9, %v6318_v10  ;;  %12733 = vst [vmem:[#allocation13_spill] sm:$0xff] %v11647_v0  ;;  %v4537_v0 = vld [vmem:[#allocation3 + $0xb0] sm:$0x1] }
 0x2d7   : > { %6505 = vrot.lane.b32.xlu1 %v8135_v16, %s8660_s25  ;;  %v6322_v38 = vsel %vm8928_vm7, %v6320_v25, %v6321_v5  ;;  %v5118_v40 = vrot.slane %v11624_v23, 5  ;;  %v12732_v21 = vcombine.low %v10715_v7, %v10641_v42  ;;  %v8088_v30 = vrot.slane %v5602_v61, 9  ;;  %v5791_v7 = vld [vmem:[#allocation3 + $0x90] sm:$0xf] }
 0x2d8   : > { %v8247_v45 = vcombine.low %v6319_v24, %v6322_v38  ;;  %v5117_v4 = vrot.slane %v5115_v2, 4  ;;  %v7228_v10 = vsel %vm3533_vm2, %v11257_v49, %v11503_v18  ;;  %v5116_v5 = vsel %vm8928_vm7, %v8073_v15, %v5115_v2  ;;  %v11678_v38 = vpop.permute.xlu1 %6753 }
 0x2d9   : > { %v7123_v14 = vsel %vm3418_vm14, %v12732_v21, %v11524_v60  ;;  %v5718_v16 = vrot.slane %v5716_v52, 4  ;;  %v5719_v9 = vrot.slane %v11626_v41, 5  ;;  %v5475_v42 = vshrl.u32 %v11634_v22, 16  ;;  %12734 = vst [vmem:[#allocation14_spill] sm:$0xff] %v11678_v38 }
 0x2da   : > { %7097 = vrot.lane.b32.xlu0 %v8247_v45, %s8664_s29  ;;  %v5119_v60 = vsel %vm8928_vm7, %v5117_v4, %v5118_v40  ;;  %v5717_v61 = vsel %vm8928_vm7, %v8088_v30, %v5716_v52  ;;  %v11665_v49 = vsel %vm3467_vm15, %v7123_v14, %v11342_v20  ;;  %v5478_v18 = vshll.u32 %v11634_v22, 16  ;;  %v11676_v52 = vld [vmem:[#allocation3 + $0x94] sm:$0xf]  ;;  %v8595_v30 = vld [vmem:[#allocation3 + $0x10] sm:$0xf] }
 0x2db   : > { %6845 = vrot.lane.b32.xlu1 %v8201_v8, %s8663_s28  ;;  %v5720_v25 = vsel %vm8928_vm7, %v5718_v16, %v5719_v9  ;;  %v7260_v15 = vsel %vm3566_vm3, %v7228_v10, %v11382_v11  ;;  %v8171_v2 = vcombine.low %v11634_v22, %v11652_v62  ;;  %v8153_v20 = vcombine.low %v5116_v5, %v5119_v60  ;;  %v8596_v11 = vld [vmem:[#allocation3 + $0xc] sm:$0xf]  ;;  %v11686_v9 = vpop.permute.xlu0 %7007 }
 0x2dc   : > { %v8200_v40 = vcombine.low %v5717_v61, %v5720_v25  ;;  %v11680_v21 = vrot.slane %v5475_v42, 4  ;;  %v6060_v8 = vshrl.u32 %v5791_v7, 16  ;;  %v8424_v14 = vpop.f32.mrb[24].mxu0  ;;  %v11682_v45 = vrot.slane %v5478_v18, 5 }
 0x2dd   : > { %v6063_v4 = vshll.u32 %v5791_v7, 16  ;;  %v8113_v10 = vcombine.low %v8596_v11, %v8595_v30  ;;  %v5433_v22 = vor.u32 %v11443_v55, %v11437_v17  ;;  %v3908_v16 = vpop.f32.mrb[25].mxu0  ;;  %v8218_v5 = vcombine.low %v5791_v7, %v11676_v52 }
 0x2de   : > { %6843 = vrot.lane.b32.xlu0 %v8200_v40, %s8663_s28  ;;  %v5436_v42 = vshll.u32 %v11418_v56, 16  ;;  %v12735_v60 = vshrl.u32 %v11418_v56, 16  ;;  %v5446_v18 = vshll.u32 %v11592_v51, 16  ;;  %v8425_v25 = vpop.f32.mrb[26].mxu0  ;;  %v6018_v55 = vor.u32 %v11469_v58, %v11465_v44  ;;  %v11712_v44 = vpop.permute.xlu1 %6929 }
 0x2df   : > { %6589 = vrot.lane.b32.xlu1 %v8153_v20, %s8659_s24  ;;  %v7120_v17 = vsel %vm3418_vm14, %v8113_v10, %v11544_v33  ;;  %v6021_v7 = vshll.u32 %v11433_v31, 16  ;;  %v11701_v40 = vpop.f32.mrb[27].mxu0  ;;  %v11703_v11 = vrot.slane %v6060_v8, 4  ;;  %v12736_v20 = vshrl.u32 %v11433_v31, 16  ;;  %12737 = vst [vmem:[#allocation15_spill] sm:$0xff] %v11712_v44 }
 0x2e0   : > { %v5442_v61 = vrot.slane %v12735_v60, 4  ;;  %v7166_v56 = vsel %vm3467_vm15, %v7120_v17, %v11416_v27  ;;  %v5438_v51 = vrot.slane %v5436_v42, 5  ;;  %v11709_v24 = vrot.slane %v6063_v4, 5  ;;  %v11720_v27 = vld [vmem:[%s12703_s2] ss:$0 sm:$0xff] }
 0x2e1   : > { %v6027_v60 = vrot.slane %v12736_v20, 4  ;;  %v5434_v30 = vrot.slane %v5433_v22, 4  ;;  %v6023_v33 = vrot.slane %v6021_v7, 5  ;;  %v6031_v10 = vshll.u32 %v11564_v35, 16  ;;  %v5789_v4 = vld [vmem:[#allocation3 + $0x84] sm:$0xf] }
 0x2e2   : > { %6943 = vrot.lane.b32.xlu0 %v8218_v5, %s8662_s27  ;;  %v5443_v58 = vor.u32 %v5442_v61, %v5438_v51  ;;  %v5448_v8 = vrot.slane %v5446_v18, 5  ;;  %v7292_v13 = vsel %vm3599_vm5, %v7260_v15, %v11185_v32  ;;  %v3917_v31 = vadd.f32 %v11720_v27, %v8424_v14  ;;  %v11730_v32 = vpop.permute.xlu0 %6675 }
 0x2e3   : > { %6689 = vrot.lane.b32.xlu1 %v8171_v2, %s8661_s26  ;;  %v11726_v35 = vsel %vm3500_vm1, %v7166_v56, %v11336_v36  ;;  %v6019_v22 = vrot.slane %v6018_v55, 4  ;;  %v6028_v5 = vor.u32 %v6027_v60, %v6023_v33  ;;  %v7324_v42 = vsel %vm3632_vm6, %v7292_v13, %v11445_v43  ;;  %12738 = vst [vmem:[#allocation16_spill] sm:$0xff] %v11730_v32  ;;  %v11738_v55 = vld [vmem:[#allocation3 + $0x88] sm:$0xf] }
 0x2e4   : > { %v5444_v15 = vrot.slane %v5443_v58, 4  ;;  %v7356_v61 = vsel %vm3665_vm8, %v7324_v42, %v11323_v12  ;;  %v3965_v18 = vmax.f32 %v3917_v31, 0.0  ;;  %v3909_v14 = vadd.f32 %v11720_v27, %v3908_v16  ;;  %v11742_v12 = vld [vmem:[#allocation3 + $0x84] sm:$0xf] }
 0x2e5   : > { %v5439_v2 = vsel %vm8964_vm11, %v5434_v30, %v5438_v51  ;;  %v6029_v17 = vrot.slane %v6028_v5, 4  ;;  %v6033_v36 = vrot.slane %v6031_v10, 5  ;;  %8440 = vmatprep.mubr.msk.bf16.mxu1 %vm3741_vm9, %v7356_v61  ;;  %v6036_v7 = vshrl.u32 %v5789_v4, 16  ;;  %v11749_v10 = vpop.permute.xlu1 %6499 }
 0x2e6   : > { %v5449_v43 = vsel %vm8964_vm11, %v5444_v15, %v5448_v8  ;;  %v8340_v13 = vpack.c.bf16 %v3965_v18, %v3965_v18  ;;  %v3963_v56 = vmax.f32 %v3909_v14, 0.0  ;;  %v6039_v20 = vshll.u32 %v5789_v4, 16  ;;  %v11759_v18 = vpop.permute.xlu0 %6751 }
 0x2e7   : > { %v8185_v60 = vcombine.low %v5439_v2, %v5449_v43  ;;  %v6024_v16 = vsel %vm8964_vm11, %v6019_v22, %v6023_v33  ;;  %v6034_v30 = vsel %vm8964_vm11, %v6029_v17, %v6033_v36  ;;  %v3920_v51 = vadd.f32 %v11720_v27, %v8425_v25  ;;  %v11756_v33 = vld [vmem:[#allocation3 + $0x88] sm:$0xf]  ;;  %v4574_v36 = vld [vmem:[#allocation3 + $0x78] sm:$0xf] }
 0x2e8   : > { %v8232_v58 = vcombine.low %v6024_v16, %v6034_v30  ;;  %v4343_v31 = vshrl.u32 %v8340_v13, 16  ;;  %v8338_v5 = vpack.c.bf16 %v3963_v56, %v3963_v56  ;;  %v8217_v42 = vcombine.low %v5789_v4, %v11738_v55  ;;  %v4533_v43 = vld [vmem:[#allocation3 + $0xa8] sm:$0xf] }
 0x2e9   : > { %6765 = vrot.lane.b32.xlu1 %v8185_v60, %s8665_s30  ;;  %v11754_v15 = vrot.slane %v6036_v7, 4  ;;  %v3966_v61 = vmax.f32 %v3920_v51, 0.0  ;;  %v5451_v22 = vshrl.u32 %v11742_v12, 16  ;;  %v4346_v14 = vshll.u32 %v8340_v13, 16 }
 0x2ea   : > { %7019 = vrot.lane.b32.xlu0 %v8232_v58, %s8666_s6  ;;  %v4345_v25 = vrot.slane %v4343_v31, 7  ;;  %v4326_v2 = vshrl.u32 %v8338_v5, 16  ;;  %v11762_v17 = vrot.slane %v6039_v20, 5  ;;  %v4329_v56 = vshll.u32 %v8338_v5, 16  ;;  %v4526_v20 = vld [vmem:[#allocation3 + $0x9c] sm:$0xf]  ;;  %v11781_v38 = vpop.permute.xlu0 %7091 }
 0x2eb   : > { %v8341_v4 = vpack.c.bf16 %v3966_v61, %v3966_v61  ;;  %v11764_v7 = vrot.slane %v5451_v22, 4  ;;  %v8170_v51 = vcombine.low %v11742_v12, %v11756_v33  ;;  %v3912_v13 = vadd.f32 %v11720_v27, %v11701_v40  ;;  %v11774_v22 = vpop.permute.xlu1 %7005  ;;  %12739 = vst [vmem:[#allocation17_spill] sm:$0xff] %v11781_v38 }
 0x2ec   : > { %v4348_v16 = vor.u32 %v4346_v14, %v4345_v25  ;;  %v11767_v30 = vrot.slane %v4326_v2, 7  ;;  %v4349_v58 = vrot.slane %v4345_v25, 4  ;;  %v4843_v5 = vshrl.u32 %v4574_v36, 16 }
 0x2ed   : > { %6941 = vrot.lane.b32.xlu1 %v8217_v42, %s8662_s27  ;;  %v4351_v31 = vshrl.u32 %v8341_v4, 16  ;;  %v4846_v61 = vshll.u32 %v4574_v36, 16  ;;  %v4354_v8 = vshll.u32 %v8341_v4, 16  ;;  %v3964_v60 = vmax.f32 %v3912_v13, 0.0 }
 0x2ee   : > { %v4534_v14 = vsel %vm8958_vm10, %v4348_v16, %v4533_v43  ;;  %v4331_v2 = vor.u32 %v4329_v56, %v11767_v30  ;;  %6687 = vrot.lane.b32.xlu0 %v8170_v51, %s8661_s26  ;;  %v4845_v25 = vrot.slane %v4843_v5, 4  ;;  %v4852_v42 = vshll.u32 %v11578_v54, 16 }
 0x2ef   : > { %4535 = vst [vmem:[#allocation3 + $0xa8] sm:$0xf] %v4534_v14  ;;  %v4353_v40 = vrot.slane %v4351_v31, 7  ;;  %v4848_v44 = vrot.slane %v4846_v61, 5  ;;  %v8339_v32 = vpack.c.bf16 %v3964_v60, %v3964_v60  ;;  %v4856_v43 = vshrl.u32 %v11578_v54, 16 }
 0x2f0   : > { %v4527_v36 = vsel %vm8958_vm10, %v4331_v2, %v4526_v20  ;;  %v4862_v56 = vshll.u32 %v11585_v46, 16  ;;  %v4854_v13 = vrot.slane %v4852_v42, 5  ;;  %v4332_v31 = vrot.slane %v11767_v30, 4  ;;  %v11794_v46 = vpop.permute.xlu1 %6497  ;;  %v4530_v2 = vld [vmem:[#allocation3 + $0xa4] sm:$0x1] }
 0x2f1   : > { %4528 = vst [vmem:[#allocation3 + $0x9c] sm:$0xf] %v4527_v36  ;;  %v4356_v4 = vor.u32 %v4354_v8, %v4353_v40  ;;  %v4358_v16 = vrot.slane %v4353_v40, 4  ;;  %v4849_v51 = vor.u32 %v4848_v44, %v4845_v25  ;;  %v4334_v5 = vshrl.u32 %v8339_v32, 16 }
 0x2f2   : > { %v4337_v61 = vshll.u32 %v8339_v32, 16  ;;  %v4858_v14 = vrot.slane %v4856_v43, 4  ;;  %v5409_v54 = vor.u32 %v11596_v59, %v11589_v50  ;;  %v4864_v30 = vrot.slane %v4862_v56, 5  ;;  %v11803_v59 = vpop.permute.xlu0 %6583 }
 0x2f3   : > { %v4357_v38 = vsel %vm8972_vm12, %v4349_v58, %v4356_v4  ;;  %v4538_v60 = vsel %vm8988_vm13, %v4358_v16, %v4537_v0  ;;  %v4850_v20 = vrot.slane %v4849_v51, 4  ;;  %v4336_v44 = vrot.slane %v4334_v5, 7  ;;  %v4572_v4 = vld [vmem:[#allocation3 + $0x6c] sm:$0xf] }
 0x2f4   : > { %4536 = vst.msk [vmem:[#allocation3 + $0xac] sm:$0xf] %vm258_vm0, %v4357_v38  ;;  %4539 = vst [vmem:[#allocation3 + $0xb0] sm:$0x1] %v4538_v60  ;;  %v4859_v8 = vor.u32 %v4858_v14, %v4854_v13  ;;  %v5412_v32 = vshll.u32 %v11492_v26, 16  ;;  %v5410_v40 = vrot.slane %v5409_v54, 4  ;;  %v5994_v50 = vor.u32 %v11499_v6, %v11497_v34 }
 0x2f5   : > { %v12740_v58 = vshrl.u32 %v11492_v26, 16  ;;  %v5422_v0 = vshll.u32 %v11626_v41, 16  ;;  %v4339_v42 = vor.u32 %v4337_v61, %v4336_v44  ;;  %v4341_v38 = vrot.slane %v4336_v44, 4  ;;  %v6213_v41 = vld [vmem:[#allocation3 + $0x90] sm:$0xe]  ;;  %v11820_v44 = vpop.permute.xlu1 %6837 }
 0x2f6   : > { %v4860_v36 = vrot.slane %v4859_v8, 4  ;;  %v5414_v43 = vrot.slane %v5412_v32, 5  ;;  %v4855_v56 = vsel %vm8964_vm11, %v4850_v20, %v4854_v13  ;;  %v5995_v16 = vrot.slane %v5994_v50, 4  ;;  %v11816_v60 = vld [vmem:[#allocation3 + $0x98] sm:$0x1]  ;;  %v11829_v50 = vpop.permute.xlu0 %7089 }
 0x2f7   : > { %v5418_v25 = vrot.slane %v12740_v58, 4  ;;  %v5997_v51 = vshll.u32 %v11474_v53, 16  ;;  %v12741_v26 = vshrl.u32 %v11474_v53, 16  ;;  %v4340_v34 = vsel %vm8972_vm12, %v4332_v31, %v4339_v42 }
 0x2f8   : > { %v4531_v6 = vsel %vm8988_vm13, %v4341_v38, %v4530_v2  ;;  %v4865_v61 = vsel %vm8964_vm11, %v4860_v36, %v4864_v30  ;;  %v5424_v14 = vrot.slane %v5422_v0, 5  ;;  %4529 = vst.msk [vmem:[#allocation3 + $0xa0] sm:$0xf] %vm258_vm0, %v4340_v34  ;;  %v6007_v54 = vshll.u32 %v11602_v19, 16  ;;  %v6212_v34 = vld [vmem:[#allocation3 + $0x84] sm:$0xe] }
 0x2f9   : > { %v6003_v5 = vrot.slane %v12741_v26, 4  ;;  %4532 = vst [vmem:[#allocation3 + $0xa4] sm:$0x1] %v4531_v6  ;;  %v8138_v13 = vcombine.low %v4855_v56, %v4865_v61  ;;  %v5419_v20 = vor.u32 %v5418_v25, %v5414_v43  ;;  %v5999_v53 = vrot.slane %v5997_v51, 5 }
 0x2fa   : > { %v5415_v31 = vsel %vm8964_vm11, %v5410_v40, %v5414_v43  ;;  %v8106_v8 = vrot.slane %v6213_v41, 9  ;;  %v6339_v32 = vrot.slane %v11676_v52, 5  ;;  %v4819_v30 = vshrl.u32 %v4572_v4, 16 }
 0x2fb   : > { %6511 = vrot.lane.b32.xlu1 %v8138_v13, %s8660_s25  ;;  %v5420_v2 = vrot.slane %v5419_v20, 4  ;;  %v6000_v58 = vsel %vm8964_vm11, %v5995_v16, %v5999_v53  ;;  %v6004_v0 = vor.u32 %v6003_v5, %v5999_v53  ;;  %v6342_v25 = vrot.slane %v11816_v60, 5  ;;  %v11842_v13 = vld [vmem:[#allocation3 + $0x8c] sm:$0x1]  ;;  %v5605_v20 = vld [vmem:[#allocation3 + $0x90] sm:$0xe] }
 0x2fc   : > { %v6009_v19 = vrot.slane %v6007_v54, 5  ;;  %v6341_v42 = vrot.slane %v6339_v32, 4  ;;  %v4821_v38 = vrot.slane %v4819_v30, 4  ;;  %v4822_v36 = vshll.u32 %v4572_v4, 16 }
 0x2fd   : > { %v5425_v40 = vsel %vm8964_vm11, %v5420_v2, %v5424_v14  ;;  %v6005_v43 = vrot.slane %v6004_v0, 4  ;;  %v4828_v56 = vshll.u32 %v11616_v28, 16  ;;  %v4832_v51 = vshrl.u32 %v11616_v28, 16  ;;  %v11844_v28 = vpop.permute.xlu1 %6581  ;;  %v11851_v2 = vld [vmem:[#allocation3 + $0x98] sm:$0x1] }
 0x2fe   : > { %v8184_v26 = vcombine.low %v5415_v31, %v5425_v40  ;;  %v6343_v16 = vsel %vm8928_vm7, %v6341_v42, %v6342_v25  ;;  %v4824_v5 = vrot.slane %v4822_v36, 5  ;;  %v4838_v41 = vshll.u32 %v11624_v23, 16  ;;  %v11854_v42 = vpop.permute.xlu0 %6835 }
 0x2ff   : > { %v6010_v6 = vsel %vm8964_vm11, %v6005_v43, %v6009_v19  ;;  %v6340_v4 = vsel %vm8928_vm7, %v8106_v8, %v6339_v32  ;;  %v4830_v61 = vrot.slane %v4828_v56, 5  ;;  %v4834_v14 = vrot.slane %v4832_v51, 4  ;;  %v5604_v19 = vld [vmem:[#allocation3 + $0x84] sm:$0xe]  ;;  %v11859_v43 = vld [vmem:[#allocation3 + $0x8c] sm:$0x1] }
 0x300   : > { %v12742_v53 = vshll.u32 %v11742_v12, 16  ;;  %6763 = vrot.lane.b32.xlu0 %v8184_v26, %s8665_s30  ;;  %v8231_v23 = vcombine.low %v6000_v58, %v6010_v6  ;;  %v8250_v31 = vcombine.low %v6340_v4, %v6343_v16  ;;  %v4825_v30 = vor.u32 %v4824_v5, %v4821_v38  ;;  %v11868_v6 = vld [vmem:[#allocation3 + $0x88] sm:$0xf]  ;;  %v4997_v4 = vld [vmem:[#allocation3 + $0x84] sm:$0xe] }
 0x301   : > { %v4835_v0 = vor.u32 %v4834_v14, %v4830_v61  ;;  %v4840_v8 = vrot.slane %v4838_v41, 5  ;;  %v8105_v32 = vrot.slane %v6212_v34, 9  ;;  %v6332_v25 = vrot.slane %v11738_v55, 5 }
 0x302   : > { %v11848_v54 = vrot.slane %v12742_v53, 5  ;;  %7017 = vrot.lane.b32.xlu1 %v8231_v23, %s8666_s6  ;;  %v4826_v12 = vrot.slane %v4825_v30, 4  ;;  %v6335_v36 = vrot.slane %v11842_v13, 5  ;;  %v8091_v40 = vrot.slane %v5605_v20, 9 }
 0x303   : > { %v5737_v58 = vrot.slane %v11652_v62, 5  ;;  %v4836_v38 = vrot.slane %v4835_v0, 4  ;;  %v6334_v56 = vrot.slane %v6332_v25, 4  ;;  %v5740_v51 = vrot.slane %v11851_v2, 5 }
 0x304   : > { %v5730_v26 = vrot.slane %v11756_v33, 5  ;;  %7103 = vrot.lane.b32.xlu0 %v8250_v31, %s8664_s29  ;;  %v4831_v16 = vsel %vm8964_vm11, %v4826_v12, %v4830_v61  ;;  %v6333_v5 = vsel %vm8928_vm7, %v8105_v32, %v6332_v25  ;;  %v8090_v34 = vrot.slane %v5604_v19, 9  ;;  %v11875_v31 = vpop.permute.xlu1 %6681  ;;  %v11881_v25 = vld [vmem:[#allocation3 + $0x8c] sm:$0x1] }
 0x305   : > { %v5739_v41 = vrot.slane %v5737_v58, 4  ;;  %v4841_v14 = vsel %vm8964_vm11, %v4836_v38, %v4840_v8  ;;  %v6336_v20 = vsel %vm8928_vm7, %v6334_v56, %v6335_v36  ;;  %v5733_v23 = vrot.slane %v11859_v43, 5  ;;  %v11888_v38 = vpop.permute.xlu0 %6935 }
 0x306   : > { %v5732_v53 = vrot.slane %v5730_v26, 4  ;;  %v8137_v61 = vcombine.low %v4831_v16, %v4841_v14  ;;  %v8249_v30 = vcombine.low %v6333_v5, %v6336_v20  ;;  %v5738_v0 = vsel %vm8928_vm7, %v8091_v40, %v5737_v58  ;;  %v8598_v20 = vld [vmem:[#allocation3 + $0x34] sm:$0xf] }
 0x307   : > { %v5741_v32 = vsel %vm8928_vm7, %v5739_v41, %v5740_v51  ;;  %v5731_v8 = vsel %vm8928_vm7, %v8090_v34, %v5730_v26  ;;  %v8075_v12 = vrot.slane %v4997_v4, 9  ;;  %v5129_v36 = vrot.slane %v11868_v6, 5 }
 0x308   : > { %v5734_v19 = vsel %vm8928_vm7, %v5732_v53, %v5733_v23  ;;  %6509 = vrot.lane.b32.xlu1 %v8137_v61, %s8660_s25  ;;  %7101 = vrot.lane.b32.xlu0 %v8249_v30, %s8664_s29  ;;  %v8203_v40 = vcombine.low %v5738_v0, %v5741_v32  ;;  %v6066_v58 = vor.u32 %v11709_v24, %v11703_v11  ;;  %v6069_v56 = vshll.u32 %v11676_v52, 16  ;;  %v8599_v53 = vld [vmem:[#allocation3 + $0x30] sm:$0xf]  ;;  %v11909_v32 = vpop.permute.xlu1 %6757 }
 0x309   : > { %v12743_v51 = vshrl.u32 %v11676_v52, 16  ;;  %v8202_v16 = vcombine.low %v5731_v8, %v5734_v19  ;;  %v5131_v5 = vrot.slane %v5129_v36, 4  ;;  %v5132_v41 = vrot.slane %v11881_v25, 5 }
 0x30a   : > { %v6079_v34 = vshll.u32 %v11816_v60, 16  ;;  %v6067_v4 = vrot.slane %v6066_v58, 4  ;;  %v6071_v14 = vrot.slane %v6069_v56, 5  ;;  %v8116_v23 = vcombine.low %v8599_v53, %v8598_v20  ;;  %v8428_v11 = vpop.f32.mrb[28].mxu0 }
 0x30b   : > { %v6075_v26 = vrot.slane %v12743_v51, 4  ;;  %v7200_v24 = vsel %vm3500_vm1, %v11665_v49, %v11478_v57  ;;  %v5464_v61 = vshrl.u32 %v11756_v33, 16  ;;  %v5133_v52 = vsel %vm8928_vm7, %v5131_v5, %v5132_v41  ;;  %v3924_v0 = vpop.f32.mrb[29].mxu0 }
 0x30c   : > { %v7232_v30 = vsel %vm3533_vm2, %v7200_v24, %v11759_v18  ;;  %v5481_v60 = vor.u32 %v11682_v45, %v11680_v21  ;;  %6849 = vrot.lane.b32.xlu1 %v8203_v40, %s8663_s28  ;;  %6847 = vrot.lane.b32.xlu0 %v8202_v16, %s8663_s28  ;;  %v5130_v57 = vsel %vm8928_vm7, %v8075_v12, %v5129_v36  ;;  %v6081_v8 = vrot.slane %v6079_v34, 5  ;;  %v8429_v58 = vpop.f32.mrb[30].mxu0  ;;  %v11922_v16 = vpop.permute.xlu0 %7011 }
 0x30d   : > { %v6076_v49 = vor.u32 %v6075_v26, %v6071_v14  ;;  %v7129_v19 = vsel %vm3418_vm14, %v8116_v23, %v11749_v10  ;;  %v8155_v18 = vcombine.low %v5130_v57, %v5133_v52  ;;  %v6072_v21 = vsel %vm8964_vm11, %v6067_v4, %v6071_v14  ;;  %v3927_v51 = vpop.f32.mrb[31].mxu0  ;;  %v11946_v23 = vld [vmem:[#allocation3 + $0xa0] sm:$0xf] }
 0x30e   : > { %v5484_v45 = vshll.u32 %v11652_v62, 16  ;;  %v12744_v56 = vshrl.u32 %v11652_v62, 16  ;;  %v7264_v12 = vsel %vm3566_vm3, %v7232_v30, %v11606_v48  ;;  %v5494_v36 = vshll.u32 %v11851_v2, 16 }
 0x30f   : > { %v6077_v5 = vrot.slane %v6076_v49, 4  ;;  %v5457_v10 = vor.u32 %v11848_v54, %v11764_v7  ;;  %v5482_v26 = vrot.slane %v5481_v60, 4  ;;  %v5460_v34 = vshll.u32 %v11756_v33, 16  ;;  %v8600_v7 = vld [vmem:[%s12704_s3 + $0x20] ss:$0 sps:$4 sm:$0xff]  }
 0x310   : > { %v5490_v40 = vrot.slane %v12744_v56, 4  ;;  %v5486_v41 = vrot.slane %v5484_v45, 5  ;;  %v5466_v4 = vrot.slane %v5464_v61, 4  ;;  %6593 = vrot.lane.b32.xlu1 %v8155_v18, %s8659_s24  ;;  %v11935_v14 = vsel %vm3467_vm15, %v7129_v19, %v11546_v29  ;;  %v11948_v29 = vpop.permute.xlu1 %6933  ;;  %v12745_v61 = vld [vmem:[#allocation6_spill] sm:$0xff]  ;;  %v11954_v60 = vld [vmem:[#allocation3 + $0x9c] sm:$0xf]  ;;  %v11961_v18 = vpop.permute.xlu0 %6679 }
 0x311   : > { %v6082_v62 = vsel %vm8964_vm11, %v6077_v5, %v6081_v8  ;;  %v5470_v48 = vshll.u32 %v11859_v43, 16  ;;  %v7463_v54 = vsel %vm3774_vm4, %v8600_v7, 0  ;;  %v11944_v33 = vsel %vm3599_vm5, %v7264_v12, %v11410_v63  ;;  %v12746_v8 = vld [vmem:[#allocation4_spill] sm:$0xff]  ;;  %v12747_v45 = vld [vmem:[#allocation7_spill] sm:$0xff]  ;;  %v12748_v7 = vld [vmem:[#allocation10_spill] sm:$0xff] }
 0x312   : > { %v8234_v2 = vcombine.low %v6072_v21, %v6082_v62  ;;  %v5491_v20 = vor.u32 %v5490_v40, %v5486_v41  ;;  %v5462_v53 = vrot.slane %v5460_v34, 5  ;;  %8439 = vmatpush3.bf16.msra.mxu1 %v7463_v54  ;;  %v5496_v24 = vrot.slane %v5494_v36, 5  ;;  %v6214_v54 = vld [vmem:[#allocation3 + $0x9c] sm:$0xe] }
 0x313   : > { %v5458_v43 = vrot.slane %v5457_v10, 4  ;;  %v7230_v52 = vsel %vm3533_vm2, %v11726_v35, %v12745_v61  ;;  %v3933_v30 = vadd.f32 %v11720_v27, %v8428_v11  ;;  %v5487_v63 = vsel %vm8964_vm11, %v5482_v26, %v5486_v41 }
 0x314   : > { %7023 = vrot.lane.b32.xlu0 %v8234_v2, %s8666_s6  ;;  %v5492_v57 = vrot.slane %v5491_v20, 4  ;;  %v5467_v49 = vor.u32 %v5466_v4, %v5462_v53  ;;  %v7262_v19 = vsel %vm3566_vm3, %v7230_v52, %v12746_v8  ;;  %v5472_v21 = vrot.slane %v5470_v48, 5  ;;  %v11981_v2 = vpop.permute.xlu1 %6503  ;;  %v8601_v8 = vld [vmem:[#allocation3 + $0x28] sm:$0xf] }
 0x315   : > { %v7294_v35 = vsel %vm3599_vm5, %v7262_v19, %v12747_v45  ;;  %v3969_v56 = vmax.f32 %v3933_v30, 0.0  ;;  %v6097_v11 = vshrl.u32 %v11946_v23, 16  ;;  %v6084_v36 = vshrl.u32 %v11954_v60, 16  ;;  %v8602_v19 = vld [vmem:[#allocation3 + $0x24] sm:$0xf] }
 0x316   : > { %v5497_v40 = vsel %vm8964_vm11, %v5492_v57, %v5496_v24  ;;  %v5468_v5 = vrot.slane %v5467_v49, 4  ;;  %v7326_v12 = vsel %vm3632_vm6, %v7294_v35, %v11774_v22  ;;  %v5463_v26 = vsel %vm8964_vm11, %v5458_v43, %v5462_v53  ;;  %v11986_v43 = vld [vmem:[#allocation3 + $0xa4] sm:$0x1]  ;;  %v4547_v35 = vld [vmem:[#allocation3 + $0xc0] sm:$0xf] }
 0x317   : > { %v8187_v10 = vcombine.low %v5487_v63, %v5497_v40  ;;  %v8344_v41 = vpack.c.bf16 %v3969_v56, %v3969_v56  ;;  %v3925_v34 = vadd.f32 %v11720_v27, %v3924_v0  ;;  %v8219_v62 = vcombine.low %v11954_v60, %v11946_v23  ;;  %v11991_v63 = vpop.permute.xlu0 %6755 }
 0x318   : > { %v5473_v4 = vsel %vm8964_vm11, %v5468_v5, %v5472_v21  ;;  %v3936_v48 = vadd.f32 %v11720_v27, %v8429_v58  ;;  %v7358_v22 = vsel %vm3665_vm8, %v7326_v12, %v12748_v7  ;;  %v6087_v0 = vshll.u32 %v11954_v60, 16  ;;  %v12002_v7 = vpop.permute.xlu1 %7009 }
 0x319   : > { %6769 = vrot.lane.b32.xlu1 %v8187_v10, %s8665_s30  ;;  %v8186_v20 = vcombine.low %v5463_v26, %v5473_v4  ;;  %v4377_v53 = vshrl.u32 %v8344_v41, 16  ;;  %v3967_v24 = vmax.f32 %v3925_v34, 0.0  ;;  %8441 = vmatmul.mubr.msk.bf16.vlgmr.msra.gmra.mrb[0].mxu1 %vm3741_vm9, %v7358_v22  ;;  %v4380_v61 = vshll.u32 %v8344_v41, 16 }
 0x31a   : > { %v11988_v52 = vrot.slane %v6084_v36, 4  ;;  %v3970_v58 = vmax.f32 %v3936_v48, 0.0  ;;  %v3928_v30 = vadd.f32 %v11720_v27, %v3927_v51  ;;  %v8115_v21 = vcombine.low %v8602_v19, %v8601_v8  ;;  %v4578_v48 = vld [vmem:[#allocation3 + $0x90] sm:$0xf] }
 0x31b   : > { %6767 = vrot.lane.b32.xlu0 %v8186_v20, %s8665_s30  ;;  %v4379_v57 = vrot.slane %v4377_v53, 7  ;;  %v8342_v49 = vpack.c.bf16 %v3967_v24, %v3967_v24  ;;  %v6346_v45 = vrot.slane %v11946_v23, 5  ;;  %v8107_v5 = vrot.slane %v6214_v54, 9 }
 0x31c   : > { %v8345_v56 = vpack.c.bf16 %v3970_v58, %v3970_v58  ;;  %v3968_v40 = vmax.f32 %v3928_v30, 0.0  ;;  %v6349_v12 = vrot.slane %v11986_v43, 5  ;;  %v7126_v51 = vsel %vm3418_vm14, %v8115_v21, %v11794_v46  ;;  %v4540_v46 = vld [vmem:[#allocation3 + $0xb4] sm:$0xf] }
 0x31d   : > { %v4382_v36 = vor.u32 %v4380_v61, %v4379_v57  ;;  %6945 = vrot.lane.b32.xlu1 %v8219_v62, %s8662_s27  ;;  %v4360_v27 = vshrl.u32 %v8342_v49, 16  ;;  %v7328_v10 = vsel %vm3632_vm6, %v11944_v33, %v11686_v9  ;;  %v4383_v26 = vrot.slane %v4379_v57, 4  ;;  %v12008_v61 = vpop.permute.xlu0 %7095  ;;  %v4551_v57 = vld [vmem:[#allocation3 + $0xc8] sm:$0x1] }
 0x31e   : > { %v4363_v41 = vshll.u32 %v8342_v49, 16  ;;  %v4385_v34 = vshrl.u32 %v8345_v56, 16  ;;  %v8343_v4 = vpack.c.bf16 %v3968_v40, %v3968_v40  ;;  %v4388_v62 = vshll.u32 %v8345_v56, 16  ;;  %v12749_v49 = vld [vmem:[#allocation8_spill] sm:$0xff] }
 0x31f   : > { %v4548_v22 = vsel %vm8958_vm10, %v4382_v36, %v4547_v35  ;;  %v4362_v54 = vrot.slane %v4360_v27, 7  ;;  %v6347_v20 = vsel %vm8928_vm7, %v8107_v5, %v6346_v45  ;;  %v6348_v33 = vrot.slane %v6346_v45, 4  ;;  %v4579_v5 = vld [vmem:[#allocation3 + $0x94] sm:$0xf]  ;;  %v4598_v36 = vld [vmem:[#allocation3 + $0x98] sm:$0x1] }
 0x320   : > { %4549 = vst [vmem:[#allocation3 + $0xc0] sm:$0xf] %v4548_v22  ;;  %v4387_v53 = vrot.slane %v4385_v34, 7  ;;  %v4368_v24 = vshrl.u32 %v8343_v4, 16  ;;  %v4371_v9 = vshll.u32 %v8343_v4, 16  ;;  %v7360_v8 = vsel %vm3665_vm8, %v7328_v10, %v12749_v49 }
 0x321   : > { %v4365_v58 = vor.u32 %v4363_v41, %v4362_v54  ;;  %v4366_v30 = vrot.slane %v4362_v54, 4  ;;  %v4891_v19 = vshrl.u32 %v4578_v48, 16  ;;  %v6350_v40 = vsel %vm8928_vm7, %v6348_v33, %v6349_v12  ;;  %8444 = vmatprep.mubr.msk.bf16.mxu1 %vm3741_vm9, %v7360_v8  ;;  %v4544_v27 = vld [vmem:[#allocation3 + $0xbc] sm:$0x1] }
 0x322   : > { %v4390_v21 = vor.u32 %v4388_v62, %v4387_v53  ;;  %v4392_v35 = vrot.slane %v4387_v53, 4  ;;  %v4370_v56 = vrot.slane %v4368_v24, 7  ;;  %v8251_v41 = vcombine.low %v6347_v20, %v6350_v40  ;;  %v4998_v62 = vld [vmem:[#allocation3 + $0x90] sm:$0xe]  ;;  %v12021_v53 = vpop.permute.xlu1 %6501 }
 0x323   : > { %v4541_v45 = vsel %vm8958_vm10, %v4365_v58, %v4540_v46  ;;  %v4893_v34 = vrot.slane %v4891_v19, 4  ;;  %v4894_v4 = vshll.u32 %v4578_v48, 16  ;;  %v4900_v20 = vshll.u32 %v4579_v5, 16  ;;  %v12750_v24 = vld [vmem:[#allocation11_spill] sm:$0xff] }
 0x324   : > { %4542 = vst [vmem:[#allocation3 + $0xb4] sm:$0xf] %v4541_v45  ;;  %v4391_v10 = vsel %vm8972_vm12, %v4383_v26, %v4390_v21  ;;  %v4552_v22 = vsel %vm8988_vm13, %v4392_v35, %v4551_v57  ;;  %v4373_v54 = vor.u32 %v4371_v9, %v4370_v56  ;;  %v4375_v12 = vrot.slane %v4370_v56, 4  ;;  %7105 = vrot.lane.b32.xlu0 %v8251_v41, %s8664_s29  ;;  %v12033_v57 = vpop.permute.xlu0 %6587  ;;  %v5186_v35 = vld [vmem:[#allocation3 + $0x9c] sm:$0xf] }
 0x325   : > { %4550 = vst.msk [vmem:[#allocation3 + $0xc4] sm:$0xf] %vm258_vm0, %v4391_v10  ;;  %4553 = vst [vmem:[#allocation3 + $0xc8] sm:$0x1] %v4552_v22  ;;  %v4896_v37 = vrot.slane %v4894_v4, 5  ;;  %v4904_v48 = vshrl.u32 %v4579_v5, 16  ;;  %v12027_v26 = vsel %vm3467_vm15, %v7126_v51, %v12750_v24  ;;  %v6042_v47 = vor.u32 %v11762_v17, %v11754_v15 }
 0x326   : > { %v4910_v46 = vshll.u32 %v4598_v36, 16  ;;  %v4374_v9 = vsel %vm8972_vm12, %v4366_v30, %v4373_v54  ;;  %v4545_v33 = vsel %vm8988_vm13, %v4375_v12, %v4544_v27  ;;  %v5136_v58 = vrot.slane %v4579_v5, 5  ;;  %v12046_v10 = vld [vmem:[#allocation3 + $0xa0] sm:$0xf]  ;;  %v12048_v22 = vpop.permute.xlu1 %6841 }
 0x327   : > { %4543 = vst.msk [vmem:[#allocation3 + $0xb8] sm:$0xf] %vm258_vm0, %v4374_v9  ;;  %4546 = vst [vmem:[#allocation3 + $0xbc] sm:$0x1] %v4545_v33  ;;  %v4897_v49 = vor.u32 %v4896_v37, %v4893_v34  ;;  %v4902_v8 = vrot.slane %v4900_v20, 5  ;;  %v4906_v19 = vrot.slane %v4904_v48, 4  ;;  %v8172_v33 = vcombine.low %v5186_v35, %v12046_v10 }
 0x328   : > { %v8076_v21 = vrot.slane %v4998_v62, 9  ;;  %v4912_v56 = vrot.slane %v4910_v46, 5  ;;  %v5138_v51 = vrot.slane %v5136_v58, 4  ;;  %v5139_v40 = vrot.slane %v4598_v36, 5  ;;  %v12050_v62 = vld [vmem:[#allocation3 + $0x84] sm:$0xf]  ;;  %v12054_v46 = vpop.permute.xlu0 %7093 }
 0x329   : > { %v4898_v30 = vrot.slane %v4897_v49, 4  ;;  %v4907_v3 = vor.u32 %v4906_v19, %v4902_v8  ;;  %v6045_v5 = vshll.u32 %v11738_v55, 16  ;;  %v12751_v45 = vshrl.u32 %v11738_v55, 16 }
 0x32a   : > { %v5137_v41 = vsel %vm8928_vm7, %v8076_v21, %v5136_v58  ;;  %v5140_v34 = vsel %vm8928_vm7, %v5138_v51, %v5139_v40  ;;  %v6055_v4 = vshll.u32 %v11842_v13, 16  ;;  %v5499_v36 = vshrl.u32 %v5186_v35, 16 }
 0x32b   : > { %v6051_v27 = vrot.slane %v12751_v45, 4  ;;  %v4908_v15 = vrot.slane %v4907_v3, 4  ;;  %v8156_v17 = vcombine.low %v5137_v41, %v5140_v34  ;;  %v6043_v54 = vrot.slane %v6042_v47, 4  ;;  %v5206_v3 = vld [vmem:[#allocation3 + $0xa4] sm:$0x1]  ;;  %v12068_v45 = vpop.permute.xlu1 %6585 }
 0x32c   : > { %v6047_v12 = vrot.slane %v6045_v5, 5  ;;  %v4903_v55 = vsel %vm8964_vm11, %v4898_v30, %v4902_v8  ;;  %v6057_v37 = vrot.slane %v6055_v4, 5  ;;  %v5501_v20 = vrot.slane %v5499_v36, 4  ;;  %v12075_v34 = vld [vmem:[#allocation3 + $0xa0] sm:$0xf] }
 0x32d   : > { %v5502_v48 = vshll.u32 %v5186_v35, 16  ;;  %v4913_v13 = vsel %vm8964_vm11, %v4908_v15, %v4912_v56  ;;  %6595 = vrot.lane.b32.xlu0 %v8156_v17, %s8659_s24  ;;  %v5512_v9 = vshrl.u32 %v12046_v10, 16  ;;  %v4867_v19 = vshrl.u32 %v12050_v62, 16  ;;  %12752 = vst [vmem:[#allocation6_spill] sm:$0xff] %v12075_v34 }
 0x32e   : > { %v6052_v24 = vor.u32 %v6051_v27, %v6047_v12  ;;  %v8140_v58 = vcombine.low %v4903_v55, %v4913_v13  ;;  %v4870_v8 = vshll.u32 %v12050_v62, 16  ;;  %v4876_v51 = vshll.u32 %v11868_v6, 16  ;;  %v4999_v55 = vld [vmem:[#allocation3 + $0x9c] sm:$0xe] }
 0x32f   : > { %v5504_v49 = vrot.slane %v5502_v48, 5  ;;  %v4880_v40 = vshrl.u32 %v11868_v6, 16  ;;  %v4886_v56 = vshll.u32 %v11881_v25, 16  ;;  %v4869_v47 = vrot.slane %v4867_v19, 4 }
 0x330   : > { %v6053_v21 = vrot.slane %v6052_v24, 4  ;;  %6515 = vrot.lane.b32.xlu1 %v8140_v58, %s8660_s25  ;;  %v4872_v30 = vrot.slane %v4870_v8, 5  ;;  %v5508_v35 = vshll.u32 %v12046_v10, 16  ;;  %v6048_v27 = vsel %vm8964_vm11, %v6043_v54, %v6047_v12  ;;  %v12753_v24 = vld [vmem:[#allocation5_spill] sm:$0xff]  ;;  %v5606_v8 = vld [vmem:[#allocation3 + $0x9c] sm:$0xe] }
 0x331   : > { %v5505_v5 = vor.u32 %v5504_v49, %v5501_v20  ;;  %6691 = vrot.lane.b32.xlu0 %v8172_v33, %s8661_s26  ;;  %v4878_v6 = vrot.slane %v4876_v51, 5  ;;  %v4882_v25 = vrot.slane %v4880_v40, 4  ;;  %v12077_v20 = vpop.permute.xlu0 %6839  ;;  %v6089_v48 = vrot.slane %v6087_v0, 5 }
 0x332   : > { %v6058_v41 = vsel %vm8964_vm11, %v6053_v21, %v6057_v37  ;;  %v4873_v36 = vor.u32 %v4872_v30, %v4869_v47  ;;  %v5510_v17 = vrot.slane %v5508_v35, 5  ;;  %v5514_v12 = vrot.slane %v5512_v9, 4  ;;  %v12081_v37 = vld [vmem:[#allocation3 + $0xa4] sm:$0x1]  ;;  %v12094_v30 = vpop.permute.xlu1 %6685 }
 0x333   : > { %v8233_v4 = vcombine.low %v6048_v27, %v6058_v41  ;;  %v5506_v15 = vrot.slane %v5505_v5, 4  ;;  %v4883_v54 = vor.u32 %v4882_v25, %v4878_v6  ;;  %v5518_v13 = vshll.u32 %v5206_v3, 16 }
 0x334   : > { %v12086_v33 = vsel %vm3500_vm1, %v12027_v26, %v12753_v24  ;;  %v4874_v58 = vrot.slane %v4873_v36, 4  ;;  %v4888_v49 = vrot.slane %v4886_v56, 5  ;;  %v5143_v19 = vrot.slane %v12075_v34, 5 }
 0x335   : > { %7021 = vrot.lane.b32.xlu1 %v8233_v4, %s8666_s6  ;;  %v4884_v21 = vrot.slane %v4883_v54, 4  ;;  %v5511_v60 = vsel %vm8964_vm11, %v5506_v15, %v5510_v17  ;;  %v5515_v0 = vor.u32 %v5514_v12, %v5510_v17  ;;  %v8077_v9 = vrot.slane %v4999_v55, 9  ;;  %v5795_v15 = vld [vmem:[#allocation3 + $0xa8] sm:$0xf]  ;;  %v12101_v17 = vpop.permute.xlu0 %6939  ;;  %v12110_v12 = vld [vmem:[#allocation3 + $0x9c] sm:$0xf] }
 0x336   : > { %v5520_v51 = vrot.slane %v5518_v13, 5  ;;  %v5145_v40 = vrot.slane %v5143_v19, 4  ;;  %v5146_v47 = vrot.slane %v12081_v37, 5  ;;  %v5744_v26 = vrot.slane %v12046_v10, 5  ;;  %12754 = vst [vmem:[#allocation4_spill] sm:$0xff] %v12110_v12 }
 0x337   : > { %v4879_v56 = vsel %vm8964_vm11, %v4874_v58, %v4878_v6  ;;  %v4889_v5 = vsel %vm8964_vm11, %v4884_v21, %v4888_v49  ;;  %v5516_v35 = vrot.slane %v5515_v0, 4  ;;  %v8092_v27 = vrot.slane %v5606_v8, 9 }
 0x338   : > { %v8139_v41 = vcombine.low %v4879_v56, %v4889_v5  ;;  %v5746_v25 = vrot.slane %v5744_v26, 4  ;;  %v5747_v4 = vrot.slane %v5206_v3, 5  ;;  %v6090_v36 = vor.u32 %v6089_v48, %v11988_v52 }
 0x339   : > { %v5521_v10 = vsel %vm8964_vm11, %v5516_v35, %v5520_v51  ;;  %v5144_v55 = vsel %vm8928_vm7, %v8077_v9, %v5143_v19  ;;  %v5147_v6 = vsel %vm8928_vm7, %v5145_v40, %v5146_v47  ;;  %v6093_v54 = vshll.u32 %v11946_v23, 16  ;;  %v12124_v51 = vpop.permute.xlu1 %6761  ;;  %v12130_v35 = vpop.permute.xlu0 %7015 }
 0x33a   : > { %6513 = vrot.lane.b32.xlu1 %v8139_v41, %s8660_s25  ;;  %v8188_v3 = vcombine.low %v5511_v60, %v5521_v10  ;;  %v5748_v52 = vsel %vm8928_vm7, %v5746_v25, %v5747_v4  ;;  %v6099_v48 = vrot.slane %v6097_v11, 4  ;;  %v6103_v13 = vshll.u32 %v11986_v43, 16  ;;  %v12121_v60 = vld [vmem:[#allocation3 + $0xac] sm:$0xf] }
 0x33b   : > { %v5745_v24 = vsel %vm8928_vm7, %v8092_v27, %v5744_v26  ;;  %v6095_v58 = vrot.slane %v6093_v54, 5  ;;  %v6108_v49 = vshrl.u32 %v5795_v15, 16  ;;  %v6111_v19 = vshll.u32 %v5795_v15, 16 }
 0x33c   : > { %6771 = vrot.lane.b32.xlu0 %v8188_v3, %s8665_s30  ;;  %v8157_v8 = vcombine.low %v5144_v55, %v5147_v6  ;;  %v8204_v21 = vcombine.low %v5745_v24, %v5748_v52  ;;  %v6091_v0 = vrot.slane %v6090_v36, 4  ;;  %v4915_v9 = vshrl.u32 %v12110_v12, 16  ;;  %v12135_v6 = vld [vmem:[#allocation3 + $0xb0] sm:$0x1] }
 0x33d   : > { %v6100_v23 = vor.u32 %v6099_v48, %v6095_v58  ;;  %v6105_v11 = vrot.slane %v6103_v13, 5  ;;  %v6110_v43 = vrot.slane %v6108_v49, 4  ;;  %v6113_v40 = vrot.slane %v6111_v19, 5 }
 0x33e   : > { %6597 = vrot.lane.b32.xlu1 %v8157_v8, %s8659_s24  ;;  %v4917_v47 = vrot.slane %v4915_v9, 4  ;;  %v4918_v26 = vshll.u32 %v12110_v12, 16  ;;  %v4924_v56 = vshll.u32 %v12075_v34, 16  ;;  %v4928_v5 = vshrl.u32 %v12075_v34, 16 }
 0x33f   : > { %v6101_v27 = vrot.slane %v6100_v23, 4  ;;  %v6121_v41 = vshrl.u32 %v12121_v60, 16  ;;  %v4934_v25 = vshll.u32 %v12081_v37, 16  ;;  %v6114_v4 = vor.u32 %v6113_v40, %v6110_v43  ;;  %v12143_v37 = vld [vmem:[#allocation3 + $0xa8] sm:$0xf]  ;;  %v12755_v40 = vld [vmem:[#allocation16_spill] sm:$0xff] }
 0x340   : > { %6851 = vrot.lane.b32.xlu0 %v8204_v21, %s8663_s28  ;;  %v4920_v36 = vrot.slane %v4918_v26, 5  ;;  %v4926_v10 = vrot.slane %v4924_v56, 5  ;;  %v4930_v55 = vrot.slane %v4928_v5, 4  ;;  %v6117_v54 = vshll.u32 %v12121_v60, 16  ;;  %v12145_v21 = vpop.permute.xlu1 %6937  ;;  %v12158_v56 = vpop.permute.xlu0 %6683  ;;  %v8603_v5 = vld [vmem:[#allocation3 + $0x4c] sm:$0xf] }
 0x341   : > { %v6096_v3 = vsel %vm8964_vm11, %v6091_v0, %v6095_v58  ;;  %v6106_v52 = vsel %vm8964_vm11, %v6101_v27, %v6105_v11  ;;  %v8220_v48 = vcombine.low %v5795_v15, %v12121_v60  ;;  %v6115_v13 = vrot.slane %v6114_v4, 4  ;;  %v8604_v27 = vld [vmem:[#allocation3 + $0x48] sm:$0xf] }
 0x342   : > { %v8235_v24 = vcombine.low %v6096_v3, %v6106_v52  ;;  %v4921_v49 = vor.u32 %v4920_v36, %v4917_v47  ;;  %v4931_v19 = vor.u32 %v4930_v55, %v4926_v10  ;;  %v4936_v8 = vrot.slane %v4934_v25, 5  ;;  %v12155_v47 = vld [vmem:[#allocation3 + $0xac] sm:$0xf]  ;;  %v6215_v3 = vld [vmem:[#allocation3 + $0xa8] sm:$0xe] }
 0x343   : > { %v6119_v9 = vrot.slane %v6117_v54, 5  ;;  %v6123_v23 = vrot.slane %v6121_v41, 4  ;;  %v6127_v43 = vshll.u32 %v12135_v6, 16  ;;  %v7204_v58 = vsel %vm3500_vm1, %v11935_v14, %v12755_v40 }
 0x344   : > { %7025 = vrot.lane.b32.xlu1 %v8235_v24, %s8666_s6  ;;  %6947 = vrot.lane.b32.xlu0 %v8220_v48, %s8662_s27  ;;  %v4922_v15 = vrot.slane %v4921_v49, 4  ;;  %v4932_v0 = vrot.slane %v4931_v19, 4  ;;  %v7236_v11 = vsel %vm3533_vm2, %v7204_v58, %v11991_v63  ;;  %v5523_v26 = vshrl.u32 %v12143_v37, 16  ;;  %v12758_v58 = vld [vmem:[#allocation9_spill] sm:$0xff] }
 0x345   : > { %v8118_v41 = vcombine.low %v8604_v27, %v8603_v5  ;;  %v6120_v14 = vsel %vm8964_vm11, %v6115_v13, %v6119_v9  ;;  %v6124_v25 = vor.u32 %v6123_v23, %v6119_v9  ;;  %v7268_v4 = vsel %vm3566_vm3, %v7236_v11, %v11854_v42  ;;  %v12756_v13 = vld [vmem:[#allocation13_spill] sm:$0xff]  ;;  %v12757_v9 = vld [vmem:[#allocation14_spill] sm:$0xff]  ;;  %v12178_v23 = vpop.permute.xlu1 %6507  ;;  %v12185_v11 = vld [vmem:[#allocation3 + $0xb0] sm:$0x1]  ;;  %v12190_v27 = vpop.permute.xlu0 %6759 }
 0x346   : > { %v4927_v36 = vsel %vm8964_vm11, %v4922_v15, %v4926_v10  ;;  %v4937_v63 = vsel %vm8964_vm11, %v4932_v0, %v4936_v8  ;;  %v6129_v55 = vrot.slane %v6127_v43, 5  ;;  %v5525_v54 = vrot.slane %v5523_v26, 4  ;;  %v12759_v26 = vld [vmem:[#allocation15_spill] sm:$0xff] }
 0x347   : > { %v8141_v52 = vcombine.low %v4927_v36, %v4937_v63  ;;  %v6125_v48 = vrot.slane %v6124_v25, 4  ;;  %v5526_v24 = vshll.u32 %v12143_v37, 16  ;;  %v5536_v49 = vshrl.u32 %v12155_v47, 16 }
 0x348   : > { %v7300_v19 = vsel %vm3599_vm5, %v7268_v4, %v12756_v13  ;;  %v8173_v42 = vcombine.low %v12143_v37, %v12155_v47  ;;  %v7234_v10 = vsel %vm3533_vm2, %v12086_v33, %v12757_v9  ;;  %v6353_v8 = vrot.slane %v12121_v60, 5 }
 0x349   : > { %6517 = vrot.lane.b32.xlu1 %v8141_v52, %s8660_s25  ;;  %v6130_v43 = vsel %vm8964_vm11, %v6125_v48, %v6129_v55  ;;  %v5528_v40 = vrot.slane %v5526_v24, 5  ;;  %v7266_v15 = vsel %vm3566_vm3, %v7234_v10, %v12758_v58  ;;  %v8108_v0 = vrot.slane %v6215_v3, 9  ;;  %v12195_v55 = vld [vmem:[#allocation3 + $0xb8] sm:$0xf]  ;;  %v6216_v3 = vld [vmem:[#allocation3 + $0xb4] sm:$0xe] }
 0x34a   : > { %v8236_v37 = vcombine.low %v6120_v14, %v6130_v43  ;;  %v7298_v33 = vsel %vm3599_vm5, %v7266_v15, %v12759_v26  ;;  %v6355_v5 = vrot.slane %v6353_v8, 4  ;;  %v6356_v60 = vrot.slane %v12135_v6, 5  ;;  %v8605_v48 = vld [vmem:[#allocation3 + $0x40] sm:$0xf]  ;;  %v8606_v24 = vld [vmem:[#allocation3 + $0x3c] sm:$0xf] }
 0x34b   : > { %v7330_v25 = vsel %vm3632_vm6, %v7298_v33, %v12002_v7  ;;  %v5529_v4 = vor.u32 %v5528_v40, %v5525_v54  ;;  %v5532_v36 = vshll.u32 %v12155_v47, 16  ;;  %v5538_v63 = vrot.slane %v5536_v49, 4  ;;  %v12203_v54 = vld [vmem:[#allocation3 + $0xbc] sm:$0x1]  ;;  %v5607_v15 = vld [vmem:[#allocation3 + $0xa8] sm:$0xe] }
 0x34c   : > { %7027 = vrot.lane.b32.xlu0 %v8236_v37, %s8666_s6  ;;  %v6357_v14 = vsel %vm8928_vm7, %v6355_v5, %v6356_v60  ;;  %v5542_v52 = vshll.u32 %v12185_v11, 16  ;;  %v7362_v6 = vsel %vm3665_vm8, %v7330_v25, %v11829_v50  ;;  %v8117_v7 = vcombine.low %v8606_v24, %v8605_v48  ;;  %v12216_v37 = vpop.permute.xlu1 %7013  ;;  %v5000_v26 = vld [vmem:[#allocation3 + $0xa8] sm:$0xe]  ;;  %v12760_v60 = vld [vmem:[#allocation17_spill] sm:$0xff]  ;;  %v5190_v24 = vld [vmem:[#allocation3 + $0xb4] sm:$0xf] }
 0x34d   : > { %v12207_v49 = vsel %vm3418_vm14, %v8118_v41, %v11981_v2  ;;  %6693 = vrot.lane.b32.xlu1 %v8173_v42, %s8661_s26  ;;  %v6354_v13 = vsel %vm8928_vm7, %v8108_v0, %v6353_v8  ;;  %v5530_v9 = vrot.slane %v5529_v4, 4  ;;  %v5534_v10 = vrot.slane %v5532_v36, 5  ;;  %8445 = vmatmul.mubr.msk.bf16.gmra.mrb[4].mxu1 %vm3741_vm9, %v7362_v6  ;;  %v12221_v0 = vld [vmem:[#allocation3 + $0xac] sm:$0xf]  ;;  %v12232_v4 = vld [vmem:[#allocation3 + $0xb0] sm:$0x1]  ;;  %v12234_v36 = vpop.permute.xlu0 %7099 }
 0x34e   : > { %v8252_v43 = vcombine.low %v6354_v13, %v6357_v14  ;;  %v7132_v50 = vsel %vm3418_vm14, %v8117_v7, %v12021_v53  ;;  %v8109_v40 = vrot.slane %v6216_v3, 9  ;;  %v6360_v58 = vrot.slane %v12195_v55, 5  ;;  %v5797_v14 = vld [vmem:[#allocation3 + $0xb4] sm:$0xf] }
 0x34f   : > { %v5539_v2 = vor.u32 %v5538_v63, %v5534_v10  ;;  %v5544_v41 = vrot.slane %v5542_v52, 5  ;;  %v6363_v42 = vrot.slane %v12203_v54, 5  ;;  %v7332_v8 = vsel %vm3632_vm6, %v7300_v19, %v11922_v16 }
 0x350   : > { %7107 = vrot.lane.b32.xlu0 %v8252_v43, %s8664_s29  ;;  %v5535_v53 = vsel %vm8964_vm11, %v5530_v9, %v5534_v10  ;;  %v12228_v33 = vsel %vm3467_vm15, %v7132_v50, %v11844_v28  ;;  %v6362_v5 = vrot.slane %v6360_v58, 4  ;;  %v7364_v25 = vsel %vm3665_vm8, %v7332_v8, %v12760_v60  ;;  %v12247_v43 = vld [vmem:[#allocation3 + $0xb8] sm:$0xf] }
 0x351   : > { %v5540_v16 = vrot.slane %v5539_v2, 4  ;;  %v6361_v19 = vsel %vm8928_vm7, %v8109_v40, %v6360_v58  ;;  %8448 = vmatprep.mubr.msk.bf16.mxu1 %vm3741_vm9, %v7364_v25  ;;  %v8093_v63 = vrot.slane %v5607_v15, 9  ;;  %v5751_v3 = vrot.slane %v12155_v47, 5  ;;  %v12253_v58 = vpop.permute.xlu1 %6505  ;;  %v12263_v60 = vpop.permute.xlu0 %6591 }
 0x352   : > { %v6364_v28 = vsel %vm8928_vm7, %v6362_v5, %v6363_v42  ;;  %v5754_v52 = vrot.slane %v12185_v11, 5  ;;  %v8078_v6 = vrot.slane %v5000_v26, 9  ;;  %v5150_v48 = vrot.slane %v12221_v0, 5 }
 0x353   : > { %v5545_v7 = vsel %vm8964_vm11, %v5540_v16, %v5544_v41  ;;  %v8253_v13 = vcombine.low %v6361_v19, %v6364_v28  ;;  %v5753_v9 = vrot.slane %v5751_v3, 4  ;;  %v5153_v10 = vrot.slane %v12232_v4, 5 }
 0x354   : > { %v8189_v47 = vcombine.low %v5535_v53, %v5545_v7  ;;  %v5752_v50 = vsel %vm8928_vm7, %v8093_v63, %v5751_v3  ;;  %v5151_v11 = vsel %vm8928_vm7, %v8078_v6, %v5150_v48  ;;  %v5152_v40 = vrot.slane %v5150_v48, 4  ;;  %v12265_v3 = vld [vmem:[#allocation3 + $0xbc] sm:$0x1]  ;;  %v12269_v7 = vld [vmem:[#allocation3 + $0xa8] sm:$0xf] }
 0x355   : > { %7109 = vrot.lane.b32.xlu0 %v8253_v13, %s8664_s29  ;;  %v5755_v15 = vsel %vm8928_vm7, %v5753_v9, %v5754_v52  ;;  %v6132_v2 = vshrl.u32 %v5797_v14, 16  ;;  %v6135_v41 = vshll.u32 %v5797_v14, 16  ;;  %v5547_v42 = vshrl.u32 %v5190_v24, 16 }
 0x356   : > { %6773 = vrot.lane.b32.xlu1 %v8189_v47, %s8665_s30  ;;  %v5154_v8 = vsel %vm8928_vm7, %v5152_v40, %v5153_v10  ;;  %v8221_v26 = vcombine.low %v5797_v14, %v12195_v55  ;;  %v5550_v53 = vshll.u32 %v5190_v24, 16  ;;  %v5560_v5 = vshrl.u32 %v12247_v43, 16 }
 0x357   : > { %v8158_v25 = vcombine.low %v5151_v11, %v5154_v8  ;;  %v6134_v16 = vrot.slane %v6132_v2, 4  ;;  %v6137_v19 = vrot.slane %v6135_v41, 5  ;;  %v5549_v63 = vrot.slane %v5547_v42, 4 }
 0x358   : > { %v8205_v28 = vcombine.low %v5752_v50, %v5755_v15  ;;  %v5552_v52 = vrot.slane %v5550_v53, 5  ;;  %v6141_v6 = vshll.u32 %v12195_v55, 16  ;;  %v6145_v48 = vshrl.u32 %v12195_v55, 16  ;;  %v12276_v15 = vpop.permute.xlu1 %6845 }
 0x359   : > { %6599 = vrot.lane.b32.xlu0 %v8158_v25, %s8659_s24  ;;  %v6138_v14 = vor.u32 %v6137_v19, %v6134_v16  ;;  %v6151_v13 = vshll.u32 %v12203_v54, 16  ;;  %v5556_v9 = vshll.u32 %v12247_v43, 16  ;;  %v5562_v10 = vrot.slane %v5560_v5, 4  ;;  %v12281_v25 = vpop.permute.xlu0 %7097 }
 0x35a   : > { %6853 = vrot.lane.b32.xlu1 %v8205_v28, %s8663_s28  ;;  %v6143_v47 = vrot.slane %v6141_v6, 5  ;;  %v6147_v11 = vrot.slane %v6145_v48, 4  ;;  %v5553_v50 = vor.u32 %v5552_v52, %v5549_v63  ;;  %v5566_v40 = vshll.u32 %v12265_v3, 16 }
 0x35b   : > { %v8174_v55 = vcombine.low %v5190_v24, %v12247_v43  ;;  %v6139_v2 = vrot.slane %v6138_v14, 4  ;;  %v5558_v41 = vrot.slane %v5556_v9, 5  ;;  %v4939_v42 = vshrl.u32 %v12269_v7, 16  ;;  %v5608_v14 = vld [vmem:[#allocation3 + $0xb4] sm:$0xe] }
 0x35c   : > { %v6148_v8 = vor.u32 %v6147_v11, %v6143_v47  ;;  %v6153_v54 = vrot.slane %v6151_v13, 5  ;;  %v5554_v53 = vrot.slane %v5553_v50, 4  ;;  %v4942_v5 = vshll.u32 %v12269_v7, 16 }
 0x35d   : > { %6695 = vrot.lane.b32.xlu0 %v8174_v55, %s8661_s26  ;;  %v5563_v16 = vor.u32 %v5562_v10, %v5558_v41  ;;  %v5568_v19 = vrot.slane %v5566_v40, 5  ;;  %v4941_v63 = vrot.slane %v4939_v42, 4  ;;  %v4948_v28 = vshll.u32 %v12221_v0, 16  ;;  %v12299_v42 = vpop.permute.xlu1 %6589 }
 0x35e   : > { %6949 = vrot.lane.b32.xlu1 %v8221_v26, %s8662_s27  ;;  %v6144_v24 = vsel %vm8964_vm11, %v6139_v2, %v6143_v47  ;;  %v6149_v52 = vrot.slane %v6148_v8, 4  ;;  %v4944_v6 = vrot.slane %v4942_v5, 5  ;;  %v4952_v48 = vshrl.u32 %v12221_v0, 16  ;;  %v12295_v47 = vld [vmem:[#allocation3 + $0xb4] sm:$0xf] }
 0x35f   : > { %v5559_v13 = vsel %vm8964_vm11, %v5554_v53, %v5558_v41  ;;  %v5564_v9 = vrot.slane %v5563_v16, 4  ;;  %v4950_v11 = vrot.slane %v4948_v28, 5  ;;  %v4958_v10 = vshll.u32 %v12232_v4, 16  ;;  %v12297_v2 = vld [vmem:[#allocation3 + $0xb8] sm:$0xf] }
 0x360   : > { %v6154_v50 = vsel %vm8964_vm11, %v6149_v52, %v6153_v54  ;;  %v4945_v40 = vor.u32 %v4944_v6, %v4941_v63  ;;  %v4954_v26 = vrot.slane %v4952_v48, 4  ;;  %v5758_v55 = vrot.slane %v12247_v43, 5  ;;  %v12304_v63 = vpop.permute.xlu0 %6843  ;;  %v4601_v52 = vld [vmem:[#allocation3 + $0xbc] sm:$0x1] }
 0x361   : > { %v8237_v8 = vcombine.low %v6144_v24, %v6154_v50  ;;  %v5569_v41 = vsel %vm8964_vm11, %v5564_v9, %v5568_v19  ;;  %v4960_v53 = vrot.slane %v4958_v10, 5  ;;  %v8094_v5 = vrot.slane %v5608_v14, 9  ;;  %v5799_v9 = vld [vmem:[#allocation3 + $0xc0] sm:$0xf] }
 0x362   : > { %v8190_v4 = vcombine.low %v5559_v13, %v5569_v41  ;;  %v4946_v16 = vrot.slane %v4945_v40, 4  ;;  %v4955_v28 = vor.u32 %v4954_v26, %v4950_v11  ;;  %v5761_v54 = vrot.slane %v12265_v3, 5 }
 0x363   : > { %7029 = vrot.lane.b32.xlu1 %v8237_v8, %s8666_s6  ;;  %v5760_v43 = vrot.slane %v5758_v55, 4  ;;  %v4963_v6 = vshrl.u32 %v12295_v47, 16  ;;  %v4966_v24 = vshll.u32 %v12295_v47, 16  ;;  %v4972_v48 = vshll.u32 %v12297_v2, 16  ;;  %v12318_v8 = vld [vmem:[#allocation3 + $0xc4] sm:$0xf] }
 0x364   : > { %6775 = vrot.lane.b32.xlu0 %v8190_v4, %s8665_s30  ;;  %v4951_v19 = vsel %vm8964_vm11, %v4946_v16, %v4950_v11  ;;  %v4956_v14 = vrot.slane %v4955_v28, 4  ;;  %v5759_v3 = vsel %vm8928_vm7, %v8094_v5, %v5758_v55  ;;  %v4976_v13 = vshrl.u32 %v12297_v2, 16  ;;  %v12322_v28 = vpop.permute.xlu1 %6689 }
 0x365   : > { %v5762_v10 = vsel %vm8928_vm7, %v5760_v43, %v5761_v54  ;;  %v4965_v50 = vrot.slane %v4963_v6, 4  ;;  %v4968_v40 = vrot.slane %v4966_v24, 5  ;;  %v4974_v26 = vrot.slane %v4972_v48, 5  ;;  %12761 = vst [vmem:[#allocation7_spill] sm:$0xff] %v12322_v28  ;;  %v12762_v43 = vld [vmem:[#allocation12_spill] sm:$0xff] }
 0x366   : > { %v4961_v41 = vsel %vm8964_vm11, %v4956_v14, %v4960_v53  ;;  %v8206_v4 = vcombine.low %v5759_v3, %v5762_v10  ;;  %v4978_v11 = vrot.slane %v4976_v13, 4  ;;  %v4982_v16 = vshll.u32 %v4601_v52, 16  ;;  %v5001_v48 = vld [vmem:[#allocation3 + $0xb4] sm:$0xe]  ;;  %v12332_v14 = vpop.permute.xlu0 %6943 }
 0x367   : > { %v8142_v55 = vcombine.low %v4951_v19, %v4961_v41  ;;  %v4969_v5 = vor.u32 %v4968_v40, %v4965_v50  ;;  %v6156_v12 = vshrl.u32 %v5799_v9, 16  ;;  %v6159_v34 = vshll.u32 %v5799_v9, 16 }
 0x368   : > { %v7176_v54 = vsel %vm3467_vm15, %v12207_v49, %v11803_v59  ;;  %v7206_v6 = vsel %vm3500_vm1, %v12228_v33, %v12762_v43  ;;  %6855 = vrot.lane.b32.xlu0 %v8206_v4, %s8663_s28  ;;  %v4979_v53 = vor.u32 %v4978_v11, %v4974_v26  ;;  %v6169_v24 = vshrl.u32 %v12318_v8, 16  ;;  %v5817_v11 = vld [vmem:[#allocation3 + $0xc8] sm:$0x1] }
 0x369   : > { %6519 = vrot.lane.b32.xlu1 %v8142_v55, %s8660_s25  ;;  %v4970_v19 = vrot.slane %v4969_v5, 4  ;;  %v6158_v3 = vrot.slane %v6156_v12, 4  ;;  %v6161_v13 = vrot.slane %v6159_v34, 5  ;;  %v5157_v10 = vrot.slane %v12297_v2, 5  ;;  %v12343_v5 = vpop.permute.xlu1 %6765 }
 0x36a   : > { %v4980_v59 = vrot.slane %v4979_v53, 4  ;;  %v4984_v49 = vrot.slane %v4982_v16, 5  ;;  %v8222_v50 = vcombine.low %v5799_v9, %v12318_v8  ;;  %v6165_v33 = vshll.u32 %v12318_v8, 16  ;;  %v5192_v16 = vld [vmem:[#allocation3 + $0xc0] sm:$0xf] }
 0x36b   : > { %v8079_v40 = vrot.slane %v5001_v48, 9  ;;  %v5159_v41 = vrot.slane %v5157_v10, 4  ;;  %v5160_v4 = vrot.slane %v4601_v52, 5  ;;  %v6162_v43 = vor.u32 %v6161_v13, %v6158_v3  ;;  %v12349_v3 = vld [vmem:[#allocation3 + $0xc4] sm:$0xf] }
 0x36c   : > { %v4975_v28 = vsel %vm8964_vm11, %v4970_v19, %v4974_v26  ;;  %v4985_v12 = vsel %vm8964_vm11, %v4980_v59, %v4984_v49  ;;  %6951 = vrot.lane.b32.xlu0 %v8222_v50, %s8662_s27  ;;  %v6167_v34 = vrot.slane %v6165_v33, 5  ;;  %v6171_v55 = vrot.slane %v6169_v24, 4  ;;  %v12353_v24 = vpop.permute.xlu0 %7019  ;;  %v6217_v33 = vld [vmem:[#allocation3 + $0xc0] sm:$0xe] }
 0x36d   : > { %v8143_v9 = vcombine.low %v4975_v28, %v4985_v12  ;;  %v5158_v53 = vsel %vm8928_vm7, %v8079_v40, %v5157_v10  ;;  %v5161_v52 = vsel %vm8928_vm7, %v5159_v41, %v5160_v4  ;;  %v6163_v48 = vrot.slane %v6162_v43, 4 }
 0x36e   : > { %v8159_v26 = vcombine.low %v5158_v53, %v5161_v52  ;;  %v6172_v19 = vor.u32 %v6171_v55, %v6167_v34  ;;  %v6175_v13 = vshll.u32 %v5817_v11, 16  ;;  %v7208_v59 = vsel %vm3500_vm1, %v7176_v54, %v11961_v18  ;;  %v12371_v52 = vld [vmem:[#allocation3 + $0xc8] sm:$0x1] }
 0x36f   : > { %6521 = vrot.lane.b32.xlu1 %v8143_v9, %s8660_s25  ;;  %v6168_v28 = vsel %vm8964_vm11, %v6163_v48, %v6167_v34  ;;  %v7240_v10 = vsel %vm3533_vm2, %v7208_v59, %v12190_v27  ;;  %v5571_v49 = vshrl.u32 %v5192_v16, 16  ;;  %v5574_v50 = vshll.u32 %v5192_v16, 16 }
 0x370   : > { %v6173_v40 = vrot.slane %v6172_v19, 4  ;;  %v6177_v41 = vrot.slane %v6175_v13, 5  ;;  %v7272_v4 = vsel %vm3566_vm3, %v7240_v10, %v12077_v20  ;;  %v5584_v18 = vshrl.u32 %v12349_v3, 16  ;;  %v12373_v20 = vpop.permute.xlu1 %6941  ;;  %v12383_v59 = vpop.permute.xlu0 %6687 }
 0x371   : > { %v7304_v54 = vsel %vm3599_vm5, %v7272_v4, %v11888_v38  ;;  %v5573_v43 = vrot.slane %v5571_v49, 4  ;;  %v5576_v12 = vrot.slane %v5574_v50, 5  ;;  %v8175_v34 = vcombine.low %v5192_v16, %v12349_v3  ;;  %v8607_v50 = vld [vmem:[#allocation3 + $0x58] sm:$0xf]  ;;  %v8609_v4 = vld [vmem:[#allocation3 + $0x64] sm:$0xf] }
 0x372   : > { %v6178_v27 = vsel %vm8964_vm11, %v6173_v40, %v6177_v41  ;;  %v7238_v55 = vsel %vm3533_vm2, %v7206_v6, %v11909_v32  ;;  %v8110_v9 = vrot.slane %v6217_v33, 9  ;;  %v6367_v53 = vrot.slane %v12318_v8, 5  ;;  %v8608_v33 = vld [vmem:[#allocation3 + $0x54] sm:$0xf]  ;;  %v12393_v41 = vld [vmem:[#allocation3 + $0xcc] sm:$0xf] }
 0x373   : > { %6601 = vrot.lane.b32.xlu1 %v8159_v26, %s8659_s24  ;;  %v8238_v38 = vcombine.low %v6168_v28, %v6178_v27  ;;  %v7270_v48 = vsel %vm3566_vm3, %v7238_v55, %v11820_v44  ;;  %v6370_v16 = vrot.slane %v5817_v11, 5  ;;  %v5577_v19 = vor.u32 %v5576_v12, %v5573_v43  ;;  %v8610_v43 = vld [vmem:[#allocation3 + $0x60] sm:$0xf]  ;;  %v12399_v27 = vld [vmem:[#allocation3 + $0xd0] sm:$0xf] }
 0x374   : > { %v7302_v13 = vsel %vm3599_vm5, %v7270_v48, %v11948_v29  ;;  %v6368_v32 = vsel %vm8928_vm7, %v8110_v9, %v6367_v53  ;;  %v6369_v6 = vrot.slane %v6367_v53, 4  ;;  %v5580_v8 = vshll.u32 %v12349_v3, 16  ;;  %v12405_v53 = vpop.permute.xlu1 %6511  ;;  %v5818_v48 = vld [vmem:[#allocation3 + $0xd4] sm:$0x1] }
 0x375   : > { %7031 = vrot.lane.b32.xlu0 %v8238_v38, %s8666_s6  ;;  %v7334_v26 = vsel %vm3632_vm6, %v7302_v13, %v12216_v37  ;;  %v5578_v28 = vrot.slane %v5577_v19, 4  ;;  %v5586_v44 = vrot.slane %v5584_v18, 4  ;;  %v5590_v11 = vshll.u32 %v12371_v52, 16 }
 0x376   : > { %v6371_v29 = vsel %vm8928_vm7, %v6369_v6, %v6370_v16  ;;  %v5582_v10 = vrot.slane %v5580_v8, 5  ;;  %v7366_v49 = vsel %vm3665_vm8, %v7334_v26, %v12054_v46  ;;  %v8119_v40 = vcombine.low %v8608_v33, %v8607_v50 }
 0x377   : > { %v8120_v12 = vcombine.low %v8610_v43, %v8609_v4  ;;  %6697 = vrot.lane.b32.xlu1 %v8175_v34, %s8661_s26  ;;  %v8254_v37 = vcombine.low %v6368_v32, %v6371_v29  ;;  %8449 = vmatmul.mubr.msk.bf16.gmra.mrb[8].mxu1 %vm3741_vm9, %v7366_v49  ;;  %v7336_v18 = vsel %vm3632_vm6, %v7304_v54, %v12130_v35  ;;  %v5592_v38 = vrot.slane %v5590_v11, 5 }
 0x378   : > { %v5587_v55 = vor.u32 %v5586_v44, %v5582_v10  ;;  %v7138_v46 = vsel %vm3418_vm14, %v8119_v40, %v12253_v58  ;;  %v7368_v9 = vsel %vm3665_vm8, %v7336_v18, %v12008_v61  ;;  %v5765_v35 = vrot.slane %v12349_v3, 5  ;;  %v5609_v61 = vld [vmem:[#allocation3 + $0xc0] sm:$0xe]  ;;  %v7018_v4 = vpop.permute.xlu1 %7017 }
 0x379   : > { %v7141_v34 = vsel %vm3418_vm14, %v8120_v12, %v12178_v23  ;;  %7111 = vrot.lane.b32.xlu0 %v8254_v37, %s8664_s29  ;;  %8452 = vmatprep.mubr.msk.bf16.mxu1 %vm3741_vm9, %v7368_v9  ;;  %v6180_v54 = vshrl.u32 %v12393_v41, 16  ;;  %v5583_v58 = vsel %vm8964_vm11, %v5578_v28, %v5582_v10  ;;  %v6183_v19 = vshll.u32 %v12393_v41, 16  ;;  %v6764_v23 = vpop.permute.xlu0 %6763  ;;  %v6218_v12 = vld [vmem:[#allocation3 + $0xcc] sm:$0xe] }
 0x37a   : > { %v5588_v16 = vrot.slane %v5587_v55, 4  ;;  %v6193_v13 = vshrl.u32 %v12399_v27, 16  ;;  %v7178_v32 = vsel %vm3467_vm15, %v7138_v46, %v12068_v45  ;;  %v5767_v6 = vrot.slane %v5765_v35, 4 }
 0x37b   : > { %v5768_v8 = vrot.slane %v12371_v52, 5  ;;  %v6182_v3 = vrot.slane %v6180_v54, 4  ;;  %v6185_v44 = vrot.slane %v6183_v19, 5  ;;  %v6189_v28 = vshll.u32 %v12399_v27, 16 }
 0x37c   : > { %v5593_v26 = vsel %vm8964_vm11, %v5588_v16, %v5592_v38  ;;  %v6195_v11 = vrot.slane %v6193_v13, 4  ;;  %v7180_v29 = vsel %vm3467_vm15, %v7141_v34, %v12033_v57  ;;  %v8095_v49 = vrot.slane %v5609_v61, 9 }
 0x37d   : > { %v8191_v10 = vcombine.low %v5583_v58, %v5593_v26  ;;  %v6199_v50 = vshll.u32 %v5818_v48, 16  ;;  %v7210_v45 = vsel %vm3500_vm1, %v7178_v32, %v11875_v31  ;;  %v5769_v52 = vsel %vm8928_vm7, %v5767_v6, %v5768_v8  ;;  %v12435_v46 = vpop.permute.xlu0 %7103 }
 0x37e   : > { %v6186_v33 = vor.u32 %v6185_v44, %v6182_v3  ;;  %v6191_v40 = vrot.slane %v6189_v28, 5  ;;  %v5766_v43 = vsel %vm8928_vm7, %v8095_v49, %v5765_v35  ;;  %v6374_v57 = vrot.slane %v12399_v27, 5  ;;  %v8611_v28 = vld [vmem:[#allocation3 + $0x7c] sm:$0xf] }
 0x37f   : > { %6777 = vrot.lane.b32.xlu1 %v8191_v10, %s8665_s30  ;;  %v6201_v55 = vrot.slane %v6199_v50, 5  ;;  %v7212_v31 = vsel %vm3500_vm1, %v7180_v29, %v12158_v56  ;;  %v8207_v9 = vcombine.low %v5766_v43, %v5769_v52  ;;  %v7242_v38 = vsel %vm3533_vm2, %v7210_v45, %v12124_v51  ;;  %v8613_v29 = vld [vmem:[#allocation3 + $0x70] sm:$0xf]  ;;  %v8614_v10 = vld [vmem:[#allocation3 + $0x6c] sm:$0xf] }
 0x380   : > { %v6187_v37 = vrot.slane %v6186_v33, 4  ;;  %v6196_v18 = vor.u32 %v6195_v11, %v6191_v40  ;;  %v7244_v34 = vsel %vm3533_vm2, %v7212_v31, %v6764_v23  ;;  %v8223_v35 = vcombine.low %v12393_v41, %v12399_v27  ;;  %v6510_v23 = vpop.permute.xlu1 %6509 }
 0x381   : > { %v8111_v58 = vrot.slane %v6218_v12, 9  ;;  %v6376_v16 = vrot.slane %v6374_v57, 4  ;;  %v6377_v61 = vrot.slane %v5818_v48, 5  ;;  %v7276_v56 = vsel %vm3566_vm3, %v7244_v34, %v12304_v63  ;;  %v7102_v32 = vpop.permute.xlu0 %7101 }
 0x382   : > { %v6197_v54 = vrot.slane %v6196_v18, 4  ;;  %v7274_v19 = vsel %vm3566_vm3, %v7242_v38, %v12048_v22  ;;  %v6192_v13 = vsel %vm8964_vm11, %v6187_v37, %v6191_v40  ;;  %v7308_v41 = vsel %vm3599_vm5, %v7276_v56, %v12101_v17  ;;  %v12763_v56 = vld [vmem:[#allocation7_spill] sm:$0xff] }
 0x383   : > { %6857 = vrot.lane.b32.xlu1 %v8207_v9, %s8663_s28  ;;  %v7306_v27 = vsel %vm3599_vm5, %v7274_v19, %v12145_v21  ;;  %v7340_v63 = vsel %vm3632_vm6, %v7308_v41, %v12353_v24  ;;  %v6375_v21 = vsel %vm8928_vm7, %v8111_v58, %v6374_v57  ;;  %v6378_v6 = vsel %vm8928_vm7, %v6376_v16, %v6377_v61  ;;  %s12560_s28 = scalar_lea.vmem %s12706_s5, %s8280_s20 }
 0x384   : > { %v6202_v51 = vsel %vm8964_vm11, %v6197_v54, %v6201_v55  ;;  %v7338_v48 = vsel %vm3632_vm6, %v7306_v27, %v7018_v4  ;;  %v7372_v17 = vsel %vm3665_vm8, %v7340_v63, %v12234_v36  ;;  %v8127_v24 = vcombine.low %v12295_v47, %v12297_v2  ;;  %v6850_v8 = vpop.permute.xlu1 %6849  ;;  %v8617_v63 = vld [vmem:[#allocation3 + $0x94] sm:$0xf] }
 0x385   : > { %v7370_v22 = vsel %vm3665_vm8, %v7338_v48, %v12281_v25  ;;  %v8239_v39 = vcombine.low %v6192_v13, %v6202_v51  ;;  %v8126_v25 = vcombine.low %v12269_v7, %v12221_v0  ;;  %v8255_v3 = vcombine.low %v6375_v21, %v6378_v6  ;;  %v6848_v26 = vpop.permute.xlu0 %6847  ;;  %v8616_v48 = vld [vmem:[#allocation3 + $0x90] sm:$0xf]  ;;  %v12546_v0 = vld [vmem:[%s12705_s4] ss:$0 sm:$0xff] }
 0x386   : > { %8453 = vmatmul.mubr.msk.bf16.gmra.mrb[12].mxu1 %vm3741_vm9, %v7370_v22  ;;  %v8122_v11 = vcombine.low %v8612_v1, %v8611_v28  ;;  %v8121_v49 = vcombine.low %v8614_v10, %v8613_v29  ;;  %v8124_v22 = vcombine.low %v8616_v48, %v8617_v63  ;;  %v8619_v63 = vld [vmem:[%s8937_s23] sm:$0xff] }
 0x387   : > { %6953 = vrot.lane.b32.xlu1 %v8223_v35, %s8662_s27  ;;  %8456 = vmatprep.mubr.msk.bf16.mxu1 %vm3741_vm9, %v7372_v17 }
 0x388   : > { %v6594_v36 = vpop.permute.xlu1 %6593  ;;  %v7147_v50 = vsel %vm3418_vm14, %v8122_v11, %v12405_v53  ;;  %v7144_v52 = vsel %vm3418_vm14, %v8121_v49, %v6510_v23 }
 0x389   : > { %v7024_v44 = vpop.permute.xlu0 %7023  ;;  %v7184_v40 = vsel %vm3467_vm15, %v7147_v50, %v12263_v60  ;;  %v7182_v4 = vsel %vm3467_vm15, %v7144_v52, %v12299_v42  ;;  %v12765_v52 = vld [vmem:[#allocation4_spill] sm:$0xff] }
 0x38a   : > { %v7216_v43 = vsel %vm3500_vm1, %v7184_v40, %v12383_v59  ;;  %v7214_v37 = vsel %vm3500_vm1, %v7182_v4, %v12094_v30 }
 0x38b   : > { %7033 = vrot.lane.b32.xlu1 %v8239_v39, %s8666_s6  ;;  %v7246_v55 = vsel %vm3533_vm2, %v7214_v37, %v12343_v5 }
 0x38c   : > { %v6770_v45 = vpop.permute.xlu1 %6769  ;;  %v7278_v59 = vsel %vm3566_vm3, %v7246_v55, %v12276_v15 }
 0x38d   : > { %v6768_v33 = vpop.permute.xlu0 %6767  ;;  %v7310_v9 = vsel %vm3599_vm5, %v7278_v59, %v12373_v20 }
 0x38e   : > { %v7248_v53 = vsel %vm3533_vm2, %v7216_v43, %v6768_v33 }
 0x38f   : > { %7113 = vrot.lane.b32.xlu1 %v8255_v3, %s8664_s29  ;;  %v7280_v18 = vsel %vm3566_vm3, %v7248_v53, %v6848_v26 }
 0x390   : > { %v6946_v12 = vpop.permute.xlu1 %6945  ;;  %v7312_v42 = vsel %vm3599_vm5, %v7280_v18, %v12332_v14  ;;  %v8615_v14 = vld [vmem:[#allocation3 + $0x88] sm:$0xf] }
 0x391   : > { %v7344_v30 = vsel %vm3632_vm6, %v7312_v42, %v7024_v44  ;;  %v8123_v15 = vcombine.low %v12050_v62, %v8615_v14 }
 0x392   : > { %v7376_v5 = vsel %vm3665_vm8, %v7344_v30, %v12435_v46 }
 0x396   : > { %v7106_v57 = vpop.permute.xlu0 %7105 }
 0x39f   : > { %v6596_v60 = vpop.permute.xlu0 %6595 }
 0x3a2   : > { %v6516_v31 = vpop.permute.xlu1 %6515 }
 0x3a3   : > { %v6692_v35 = vpop.permute.xlu0 %6691  ;;  %v7153_v17 = vsel %vm3418_vm14, %v8124_v22, %v6516_v31 }
 0x3a4   : > { %v7188_v6 = vsel %vm3467_vm15, %v7153_v17, %v6596_v60 }
 0x3a7   : > { %v7022_v34 = vpop.permute.xlu1 %7021 }
 0x3a8   : > { %v7342_v38 = vsel %vm3632_vm6, %v7310_v9, %v7022_v34 }
 0x3a9   : > { %v7374_v54 = vsel %vm3665_vm8, %v7342_v38, %v7102_v32 }
 0x3aa   : > { %8457 = vmatmul.mubr.msk.bf16.gmra.mrb[16].mxu1 %vm3741_vm9, %v7374_v54 }
 0x3ab   : > { %8460 = vmatprep.mubr.msk.bf16.mxu1 %vm3741_vm9, %v7376_v5 }
 0x3ac   : > { %v6514_v58 = vpop.permute.xlu1 %6513 }
 0x3ad   : > { %v7150_v20 = vsel %vm3418_vm14, %v8123_v15, %v6514_v58 }
 0x3ae   : > { %v7186_v16 = vsel %vm3467_vm15, %v7150_v20, %v6594_v36  ;;  %v6772_v61 = vpop.permute.xlu0 %6771 }
 0x3af   : > { %v7218_v19 = vsel %vm3500_vm1, %v7186_v16, %v12763_v56 }
 0x3b0   : > { %v6598_v13 = vpop.permute.xlu1 %6597  ;;  %v7250_v51 = vsel %vm3533_vm2, %v7218_v19, %v6770_v45  ;;  %v12764_v45 = vld [vmem:[#allocation6_spill] sm:$0xff] }
 0x3b1   : > { %v7282_v46 = vsel %vm3566_vm3, %v7250_v51, %v6850_v8  ;;  %v7220_v8 = vsel %vm3500_vm1, %v7188_v6, %v6692_v35  ;;  %v8125_v33 = vcombine.low %v12765_v52, %v12764_v45 }
 0x3b2   : > { %v6852_v41 = vpop.permute.xlu0 %6851  ;;  %v7314_v27 = vsel %vm3599_vm5, %v7282_v46, %v6946_v12  ;;  %v7252_v26 = vsel %vm3533_vm2, %v7220_v8, %v6772_v61 }
 0x3b3   : > { %v7284_v36 = vsel %vm3566_vm3, %v7252_v26, %v6852_v41 }
 0x3b6   : > { %v7026_v23 = vpop.permute.xlu1 %7025  ;;  %v6948_v32 = vpop.permute.xlu0 %6947 }
 0x3b7   : > { %v7346_v62 = vsel %vm3632_vm6, %v7314_v27, %v7026_v23  ;;  %v7316_v44 = vsel %vm3599_vm5, %v7284_v36, %v6948_v32  ;;  %v8618_v27 = vld [vmem:[%s8937_s23 + $0x10] sm:$0xff] }
 0x3b8   : > { %v7378_v39 = vsel %vm3665_vm8, %v7346_v62, %v7106_v57 }
 0x3b9   : > { %8461 = vmatmul.mubr.msk.bf16.gmra.mrb[20].mxu1 %vm3741_vm9, %v7378_v39 }
 0x3bb   : > { %v6518_v21 = vpop.permute.xlu1 %6517 }
 0x3bc   : > { %v7156_v4 = vsel %vm3418_vm14, %v8125_v33, %v6518_v21  ;;  %v8620_v21 = vld [vmem:[%s8937_s23 + $0x18] sm:$0xff] }
 0x3bd   : > { %v7190_v57 = vsel %vm3467_vm15, %v7156_v4, %v6598_v13 }
 0x3be   : > { %v7028_v3 = vpop.permute.xlu0 %7027 }
 0x3bf   : > { %v7348_v28 = vsel %vm3632_vm6, %v7316_v44, %v7028_v3  ;;  %v6694_v1 = vpop.permute.xlu1 %6693  ;;  %v8621_v3 = vld [vmem:[%s8937_s23 + $0x8] sm:$0xff] }
 0x3c0   : > { %v7222_v37 = vsel %vm3500_vm1, %v7190_v57, %v6694_v1  ;;  %v8622_v57 = vld [vmem:[%s8937_s23 + $0x30] sm:$0xff] }
 0x3c2   : > { %v7108_v11 = vpop.permute.xlu0 %7107 }
 0x3c3   : > { %v7380_v29 = vsel %vm3665_vm8, %v7348_v28, %v7108_v11 }
 0x3c4   : > { %8464 = vmatprep.mubr.msk.bf16.mxu1 %vm3741_vm9, %v7380_v29 }
 0x3c7   : > { %v7110_v10 = vpop.permute.xlu0 %7109 }
 0x3c8   : > { %v6774_v49 = vpop.permute.xlu1 %6773 }
 0x3c9   : > { %v7254_v53 = vsel %vm3533_vm2, %v7222_v37, %v6774_v49 }
 0x3cb   : > { %v6600_v50 = vpop.permute.xlu0 %6599 }
 0x3cc   : > { %v6854_v40 = vpop.permute.xlu1 %6853 }
 0x3cd   : > { %v7286_v18 = vsel %vm3566_vm3, %v7254_v53, %v6854_v40 }
 0x3cf   : > { %v6696_v12 = vpop.permute.xlu0 %6695 }
 0x3d0   : > { %v6950_v43 = vpop.permute.xlu1 %6949 }
 0x3d1   : > { %v7318_v55 = vsel %vm3599_vm5, %v7286_v18, %v6950_v43 }
 0x3d5   : > { %v7030_v31 = vpop.permute.xlu1 %7029 }
 0x3d6   : > { %v7350_v60 = vsel %vm3632_vm6, %v7318_v55, %v7030_v31  ;;  %v6776_v42 = vpop.permute.xlu0 %6775  ;;  %v8623_v55 = vld [vmem:[%s8937_s23 + $0x20] sm:$0xff] }
 0x3d7   : > { %v7382_v59 = vsel %vm3665_vm8, %v7350_v60, %v7110_v10 }
 0x3d8   : > { %8465 = vmatmul.mubr.msk.bf16.gmra.mrb[24].mxu1 %vm3741_vm9, %v7382_v59  ;;  %v8624_v59 = vld [vmem:[%s8937_s23 + $0x38] sm:$0xff] }
 0x3da   : > { %v6856_v34 = vpop.permute.xlu0 %6855 }
 0x3db   : > { %v6520_v9 = vpop.permute.xlu1 %6519 }
 0x3dc   : > { %v7159_v30 = vsel %vm3418_vm14, %v8126_v25, %v6520_v9 }
 0x3dd   : > { %v7192_v38 = vsel %vm3467_vm15, %v7159_v30, %v6600_v50  ;;  %v8625_v30 = vld [vmem:[%s8937_s23 + $0x28] sm:$0xff] }
 0x3de   : > { %v7224_v35 = vsel %vm3500_vm1, %v7192_v38, %v6696_v12  ;;  %v6952_v5 = vpop.permute.xlu0 %6951 }
 0x3df   : > { %v7256_v14 = vsel %vm3533_vm2, %v7224_v35, %v6776_v42 }
 0x3e0   : > { %v7288_v58 = vsel %vm3566_vm3, %v7256_v14, %v6856_v34 }
 0x3e1   : > { %v6522_v54 = vpop.permute.xlu1 %6521  ;;  %v7320_v16 = vsel %vm3599_vm5, %v7288_v58, %v6952_v5 }
 0x3e2   : > { %v7162_v11 = vsel %vm3418_vm14, %v8127_v24, %v6522_v54 }
 0x3e5   : > { %v6602_v15 = vpop.permute.xlu1 %6601 }
 0x3e6   : > { %v7194_v29 = vsel %vm3467_vm15, %v7162_v11, %v6602_v15  ;;  %v8632_v11 = vld [vmem:[%s8937_s23 + $0x78] sm:$0xff] }
 0x3e7   : > { %v7032_v20 = vpop.permute.xlu0 %7031 }
 0x3e8   : > { %v7352_v7 = vsel %vm3632_vm6, %v7320_v16, %v7032_v20  ;;  %v8626_v16 = vld [vmem:[%s8937_s23 + $0x50] sm:$0xff] }
 0x3e9   : > { %v6698_v25 = vpop.permute.xlu1 %6697 }
 0x3ea   : > { %v7226_v10 = vsel %vm3500_vm1, %v7194_v29, %v6698_v25 }
 0x3eb   : > { %v7112_v61 = vpop.permute.xlu0 %7111 }
 0x3ec   : > { %v7384_v56 = vsel %vm3665_vm8, %v7352_v7, %v7112_v61  ;;  %v8442_v19 = vpop.f32.mrb[0].mxu1 }
 0x3ed   : > { %8468 = vmatprep.mubr.msk.bf16.mxu1 %vm3741_vm9, %v7384_v56  ;;  %v7508_v13 = vadd.f32 %v8442_v19, %v12546_v0  ;;  %v7499_v51 = vpop.f32.mrb[1].mxu1  ;;  %v8627_v56 = vld [vmem:[%s8937_s23 + $0x40] sm:$0xff] }
 0x3ee   : > { %v7500_v41 = vadd.f32 %v12546_v0, %v7499_v51  ;;  %v8443_v46 = vpop.f32.mrb[2].mxu1 }
 0x3ef   : > { %v7628_v23 = vadd.f32 %v8618_v27, %v7508_v13  ;;  %v7511_v62 = vadd.f32 %v8443_v46, %v12546_v0  ;;  %v7502_v48 = vpop.f32.mrb[3].mxu1 }
 0x3f0   : > { %v7626_v22 = vadd.f32 %v8619_v63, %v7500_v41  ;;  %v7503_v32 = vadd.f32 %v12546_v0, %v7502_v48  ;;  %v8628_v41 = vld [vmem:[%s8937_s23 + $0x58] sm:$0xff] }
 0x3f1   : > { %v6778_v39 = vpop.permute.xlu1 %6777  ;;  %v7660_v17 = vmax.f32 %v7628_v23, 0.0  ;;  %v7629_v6 = vadd.f32 %v8620_v21, %v7511_v62  ;;  %v8629_v23 = vld [vmem:[%s8937_s23 + $0x48] sm:$0xff] }
 0x3f2   : > { %v7658_v8 = vmax.f32 %v7626_v22, 0.0  ;;  %v7627_v26 = vadd.f32 %v8621_v3, %v7503_v32  ;;  %v7258_v50 = vsel %vm3533_vm2, %v7226_v10, %v6778_v39 }
 0x3f3   : > { %7692 = vst.msk [vmem:[%s12560_s28 + $0x10] sm:$0xff] %vm3418_vm14, %v7660_v17  ;;  %v7661_v36 = vmax.f32 %v7629_v6, 0.0  ;;  %v8630_v6 = vld [vmem:[%s8937_s23 + $0x70] sm:$0xff] }
 0x3f4   : > { %7690 = vst.msk [vmem:[%s12560_s28] sm:$0xff] %vm3418_vm14, %v7658_v8  ;;  %v7659_v44 = vmax.f32 %v7627_v26, 0.0 }
 0x3f5   : > { %v6858_v28 = vpop.permute.xlu1 %6857  ;;  %7693 = vst.msk [vmem:[%s12560_s28 + $0x18] sm:$0xff] %vm3418_vm14, %v7661_v36  ;;  %v8631_v36 = vld [vmem:[%s8937_s23 + $0x60] sm:$0xff] }
 0x3f6   : > { %7691 = vst.msk [vmem:[%s12560_s28 + $0x8] sm:$0xff] %vm3418_vm14, %v7659_v44  ;;  %v7290_v45 = vsel %vm3566_vm3, %v7258_v50, %v6858_v28 }
 0x3f9   : > { %v6954_v1 = vpop.permute.xlu1 %6953 }
 0x3fa   : > { %v7322_v52 = vsel %vm3599_vm5, %v7290_v45, %v6954_v1 }
 0x3fd   : > { %v7034_v49 = vpop.permute.xlu1 %7033 }
 0x3fe   : > { %v7354_v33 = vsel %vm3632_vm6, %v7322_v52, %v7034_v49  ;;  %v8633_v49 = vld [vmem:[%s8937_s23 + $0x68] sm:$0xff] }
 0x401   : > { %v7114_v40 = vpop.permute.xlu1 %7113 }
 0x402   : > { %v7386_v47 = vsel %vm3665_vm8, %v7354_v33, %v7114_v40 }
 0x403   : > { %8469 = vmatmul.mubr.msk.bf16.gmra.mrb[28].mxu1 %vm3741_vm9, %v7386_v47 }
 0x420   : > { %v8446_v2 = vpop.f32.mrb[4].mxu1 }
 0x421   : > { %v7524_v24 = vadd.f32 %v8446_v2, %v12546_v0  ;;  %v7515_v4 = vpop.f32.mrb[5].mxu1 }
 0x422   : > { %v7516_v43 = vadd.f32 %v12546_v0, %v7515_v4  ;;  %v8447_v12 = vpop.f32.mrb[6].mxu1  ;;  %v8634_v4 = vld [vmem:[%s8937_s23 + $0x90] sm:$0xff] }
 0x423   : > { %v7632_v37 = vadd.f32 %v8622_v57, %v7524_v24  ;;  %v7527_v53 = vadd.f32 %v8447_v12, %v12546_v0  ;;  %v7518_v18 = vpop.f32.mrb[7].mxu1 }
 0x424   : > { %v7630_v31 = vadd.f32 %v8623_v55, %v7516_v43  ;;  %v7519_v60 = vadd.f32 %v12546_v0, %v7518_v18 }
 0x425   : > { %v7664_v42 = vmax.f32 %v7632_v37, 0.0  ;;  %v7633_v9 = vadd.f32 %v8624_v59, %v7527_v53  ;;  %v8635_v37 = vld [vmem:[%s8937_s23 + $0x80] sm:$0xff]  ;;  %v8637_v59 = vld [vmem:[%s8937_s23 + $0x88] sm:$0xff] }
 0x426   : > { %v7662_v34 = vmax.f32 %v7630_v31, 0.0  ;;  %v7631_v38 = vadd.f32 %v8625_v30, %v7519_v60  ;;  %v8636_v31 = vld [vmem:[%s8937_s23 + $0x98] sm:$0xff] }
 0x427   : > { %7696 = vst.msk [vmem:[%s12560_s28 + $0x30] sm:$0xff] %vm3418_vm14, %v7664_v42  ;;  %v7665_v35 = vmax.f32 %v7633_v9, 0.0 }
 0x428   : > { %7694 = vst.msk [vmem:[%s12560_s28 + $0x20] sm:$0xff] %vm3418_vm14, %v7662_v34  ;;  %v7663_v54 = vmax.f32 %v7631_v38, 0.0 }
 0x429   : > { %7697 = vst.msk [vmem:[%s12560_s28 + $0x38] sm:$0xff] %vm3418_vm14, %v7665_v35 }
 0x42a   : > { %7695 = vst.msk [vmem:[%s12560_s28 + $0x28] sm:$0xff] %vm3418_vm14, %v7663_v54 }
 0x44a   : > { %v8450_v5 = vpop.f32.mrb[8].mxu1 }
 0x44b   : > { %v7540_v14 = vadd.f32 %v8450_v5, %v12546_v0  ;;  %v7531_v15 = vpop.f32.mrb[9].mxu1 }
 0x44c   : > { %v7532_v58 = vadd.f32 %v12546_v0, %v7531_v15  ;;  %v8451_v20 = vpop.f32.mrb[10].mxu1  ;;  %v8638_v15 = vld [vmem:[%s8937_s23 + $0xb0] sm:$0xff] }
 0x44d   : > { %v7636_v7 = vadd.f32 %v8626_v16, %v7540_v14  ;;  %v7543_v25 = vadd.f32 %v8451_v20, %v12546_v0  ;;  %v7534_v61 = vpop.f32.mrb[11].mxu1 }
 0x44e   : > { %v7634_v19 = vadd.f32 %v8627_v56, %v7532_v58  ;;  %v7535_v13 = vadd.f32 %v12546_v0, %v7534_v61 }
 0x44f   : > { %v7668_v51 = vmax.f32 %v7636_v7, 0.0  ;;  %v7637_v46 = vadd.f32 %v8628_v41, %v7543_v25  ;;  %v8639_v7 = vld [vmem:[%s8937_s23 + $0xa0] sm:$0xff]  ;;  %v8641_v41 = vld [vmem:[%s8937_s23 + $0xa8] sm:$0xff] }
 0x450   : > { %v7666_v27 = vmax.f32 %v7634_v19, 0.0  ;;  %v7635_v62 = vadd.f32 %v8629_v23, %v7535_v13  ;;  %v8640_v19 = vld [vmem:[%s8937_s23 + $0xb8] sm:$0xff] }
 0x451   : > { %7700 = vst.msk [vmem:[%s12560_s28 + $0x50] sm:$0xff] %vm3418_vm14, %v7668_v51  ;;  %v7669_v48 = vmax.f32 %v7637_v46, 0.0 }
 0x452   : > { %7698 = vst.msk [vmem:[%s12560_s28 + $0x40] sm:$0xff] %vm3418_vm14, %v7666_v27  ;;  %v7667_v63 = vmax.f32 %v7635_v62, 0.0 }
 0x453   : > { %7701 = vst.msk [vmem:[%s12560_s28 + $0x58] sm:$0xff] %vm3418_vm14, %v7669_v48 }
 0x454   : > { %7699 = vst.msk [vmem:[%s12560_s28 + $0x48] sm:$0xff] %vm3418_vm14, %v7667_v63 }
 0x459   : > { %v8454_v22 = vpop.f32.mrb[12].mxu1 }
 0x45a   : > { %v7556_v32 = vadd.f32 %v8454_v22, %v12546_v0  ;;  %v7547_v39 = vpop.f32.mrb[13].mxu1 }
 0x45b   : > { %v7548_v17 = vadd.f32 %v12546_v0, %v7547_v39  ;;  %v8455_v21 = vpop.f32.mrb[14].mxu1  ;;  %v8642_v39 = vld [vmem:[%s8937_s23 + $0xd0] sm:$0xff] }
 0x45c   : > { %v7640_v8 = vadd.f32 %v8630_v6, %v7556_v32  ;;  %v7559_v3 = vadd.f32 %v8455_v21, %v12546_v0  ;;  %v7550_v26 = vpop.f32.mrb[15].mxu1 }
 0x45d   : > { %v7638_v44 = vadd.f32 %v8631_v36, %v7548_v17  ;;  %v7551_v28 = vadd.f32 %v12546_v0, %v7550_v26 }
 0x45e   : > { %v7672_v1 = vmax.f32 %v7640_v8, 0.0  ;;  %v7641_v29 = vadd.f32 %v8632_v11, %v7559_v3  ;;  %v8643_v8 = vld [vmem:[%s8937_s23 + $0xc0] sm:$0xff]  ;;  %v8645_v11 = vld [vmem:[%s8937_s23 + $0xc8] sm:$0xff] }
 0x45f   : > { %v7670_v10 = vmax.f32 %v7638_v44, 0.0  ;;  %v7639_v50 = vadd.f32 %v8633_v49, %v7551_v28  ;;  %v8644_v44 = vld [vmem:[%s8937_s23 + $0xd8] sm:$0xff] }
 0x460   : > { %7704 = vst.msk [vmem:[%s12560_s28 + $0x70] sm:$0xff] %vm3418_vm14, %v7672_v1  ;;  %v7673_v45 = vmax.f32 %v7641_v29, 0.0 }
 0x461   : > { %7702 = vst.msk [vmem:[%s12560_s28 + $0x60] sm:$0xff] %vm3418_vm14, %v7670_v10  ;;  %v7671_v52 = vmax.f32 %v7639_v50, 0.0 }
 0x462   : > { %7705 = vst.msk [vmem:[%s12560_s28 + $0x78] sm:$0xff] %vm3418_vm14, %v7673_v45 }
 0x463   : > { %7703 = vst.msk [vmem:[%s12560_s28 + $0x68] sm:$0xff] %vm3418_vm14, %v7671_v52 }
 0x47d   : > { %v8458_v33 = vpop.f32.mrb[16].mxu1 }
 0x47e   : > { %v7572_v40 = vadd.f32 %v8458_v33, %v12546_v0  ;;  %v7563_v47 = vpop.f32.mrb[17].mxu1 }
 0x47f   : > { %v7564_v2 = vadd.f32 %v12546_v0, %v7563_v47  ;;  %v8459_v24 = vpop.f32.mrb[18].mxu1  ;;  %v8646_v47 = vld [vmem:[%s8937_s23 + $0xf0] sm:$0xff] }
 0x480   : > { %v7644_v43 = vadd.f32 %v8634_v4, %v7572_v40  ;;  %v7575_v12 = vadd.f32 %v8459_v24, %v12546_v0  ;;  %v7566_v57 = vpop.f32.mrb[19].mxu1 }
 0x481   : > { %v7642_v53 = vadd.f32 %v8635_v37, %v7564_v2  ;;  %v7567_v18 = vadd.f32 %v12546_v0, %v7566_v57 }
 0x482   : > { %v7676_v55 = vmax.f32 %v7644_v43, 0.0  ;;  %v7645_v60 = vadd.f32 %v8636_v31, %v7575_v12  ;;  %v8647_v43 = vld [vmem:[%s8937_s23 + $0xe0] sm:$0xff]  ;;  %v8649_v31 = vld [vmem:[%s8937_s23 + $0xe8] sm:$0xff] }
 0x483   : > { %v7674_v42 = vmax.f32 %v7642_v53, 0.0  ;;  %v7643_v9 = vadd.f32 %v8637_v59, %v7567_v18  ;;  %v8648_v53 = vld [vmem:[%s8937_s23 + $0xf8] sm:$0xff] }
 0x484   : > { %7708 = vst.msk [vmem:[%s12560_s28 + $0x90] sm:$0xff] %vm3418_vm14, %v7676_v55  ;;  %v7677_v34 = vmax.f32 %v7645_v60, 0.0 }
 0x485   : > { %7706 = vst.msk [vmem:[%s12560_s28 + $0x80] sm:$0xff] %vm3418_vm14, %v7674_v42  ;;  %v7675_v30 = vmax.f32 %v7643_v9, 0.0 }
 0x486   : > { %7709 = vst.msk [vmem:[%s12560_s28 + $0x98] sm:$0xff] %vm3418_vm14, %v7677_v34 }
 0x487   : > { %7707 = vst.msk [vmem:[%s12560_s28 + $0x88] sm:$0xff] %vm3418_vm14, %v7675_v30 }
 0x48c   : > { %v8462_v38 = vpop.f32.mrb[20].mxu1 }
 0x48d   : > { %v7588_v35 = vadd.f32 %v8462_v38, %v12546_v0  ;;  %v7579_v54 = vpop.f32.mrb[21].mxu1 }
 0x48e   : > { %v7580_v5 = vadd.f32 %v12546_v0, %v7579_v54  ;;  %v8463_v14 = vpop.f32.mrb[22].mxu1 }
 0x48f   : > { %v7648_v58 = vadd.f32 %v8638_v15, %v7588_v35  ;;  %v7591_v20 = vadd.f32 %v8463_v14, %v12546_v0  ;;  %v7582_v16 = vpop.f32.mrb[23].mxu1 }
 0x490   : > { %v7646_v25 = vadd.f32 %v8639_v7, %v7580_v5  ;;  %v7583_v61 = vadd.f32 %v12546_v0, %v7582_v16 }
 0x491   : > { %v7680_v56 = vmax.f32 %v7648_v58, 0.0  ;;  %v7649_v13 = vadd.f32 %v8640_v19, %v7591_v20 }
 0x492   : > { %v7678_v51 = vmax.f32 %v7646_v25, 0.0  ;;  %v7647_v46 = vadd.f32 %v8641_v41, %v7583_v61 }
 0x493   : > { %7712 = vst.msk [vmem:[%s12560_s28 + $0xb0] sm:$0xff] %vm3418_vm14, %v7680_v56  ;;  %v7681_v27 = vmax.f32 %v7649_v13, 0.0 }
 0x494   : > { %7710 = vst.msk [vmem:[%s12560_s28 + $0xa0] sm:$0xff] %vm3418_vm14, %v7678_v51  ;;  %v7679_v23 = vmax.f32 %v7647_v46, 0.0 }
 0x495   : > { %7713 = vst.msk [vmem:[%s12560_s28 + $0xb8] sm:$0xff] %vm3418_vm14, %v7681_v27 }
 0x496   : > { %7711 = vst.msk [vmem:[%s12560_s28 + $0xa8] sm:$0xff] %vm3418_vm14, %v7679_v23 }
 0x4ab   : > { %v8466_v62 = vpop.f32.mrb[24].mxu1 }
 0x4ac   : > { %v7604_v48 = vadd.f32 %v8466_v62, %v12546_v0  ;;  %v7595_v63 = vpop.f32.mrb[25].mxu1 }
 0x4ad   : > { %v7596_v22 = vadd.f32 %v12546_v0, %v7595_v63  ;;  %v8467_v32 = vpop.f32.mrb[26].mxu1 }
 0x4ae   : > { %v7652_v17 = vadd.f32 %v8642_v39, %v7604_v48  ;;  %v7607_v21 = vadd.f32 %v8467_v32, %v12546_v0  ;;  %v7598_v6 = vpop.f32.mrb[27].mxu1 }
 0x4af   : > { %v7650_v3 = vadd.f32 %v8643_v8, %v7596_v22  ;;  %v7599_v26 = vadd.f32 %v12546_v0, %v7598_v6 }
 0x4b0   : > { %v7684_v36 = vmax.f32 %v7652_v17, 0.0  ;;  %v7653_v28 = vadd.f32 %v8644_v44, %v7607_v21 }
 0x4b1   : > { %v7682_v1 = vmax.f32 %v7650_v3, 0.0  ;;  %v7651_v29 = vadd.f32 %v8645_v11, %v7599_v26 }
 0x4b2   : > { %7716 = vst.msk [vmem:[%s12560_s28 + $0xd0] sm:$0xff] %vm3418_vm14, %v7684_v36  ;;  %v7685_v10 = vmax.f32 %v7653_v28, 0.0 }
 0x4b3   : > { %7714 = vst.msk [vmem:[%s12560_s28 + $0xc0] sm:$0xff] %vm3418_vm14, %v7682_v1  ;;  %v7683_v49 = vmax.f32 %v7651_v29, 0.0 }
 0x4b4   : > { %7717 = vst.msk [vmem:[%s12560_s28 + $0xd8] sm:$0xff] %vm3418_vm14, %v7685_v10 }
 0x4b5   : > { %7715 = vst.msk [vmem:[%s12560_s28 + $0xc8] sm:$0xff] %vm3418_vm14, %v7683_v49 }
 0x4d6   : > { %v8470_v50 = vpop.f32.mrb[28].mxu1 }
 0x4d7   : > { %v7620_v45 = vadd.f32 %v8470_v50, %v12546_v0  ;;  %v7611_v52 = vpop.f32.mrb[29].mxu1 }
 0x4d8   : > { %v7612_v33 = vadd.f32 %v12546_v0, %v7611_v52  ;;  %v8471_v40 = vpop.f32.mrb[30].mxu1 }
 0x4d9   : > { %v7656_v2 = vadd.f32 %v8646_v47, %v7620_v45  ;;  %v7623_v24 = vadd.f32 %v8471_v40, %v12546_v0  ;;  %v7614_v4 = vpop.f32.mrb[31].mxu1 }
 0x4da   : > { %v7654_v12 = vadd.f32 %v8647_v43, %v7612_v33  ;;  %v7615_v57 = vadd.f32 %v12546_v0, %v7614_v4 }
 0x4db   : > { %v7688_v37 = vmax.f32 %v7656_v2, 0.0  ;;  %v7657_v18 = vadd.f32 %v8648_v53, %v7623_v24 }
 0x4dc   : > { %v7686_v55 = vmax.f32 %v7654_v12, 0.0  ;;  %v7655_v60 = vadd.f32 %v8649_v31, %v7615_v57 }
 0x4dd   : > { %7720 = vst.msk [vmem:[%s12560_s28 + $0xf0] sm:$0xff] %vm3418_vm14, %v7688_v37  ;;  %v7689_v42 = vmax.f32 %v7657_v18, 0.0 }
 0x4de   : > { %7718 = vst.msk [vmem:[%s12560_s28 + $0xe0] sm:$0xff] %vm3418_vm14, %v7686_v55  ;;  %v7687_v59 = vmax.f32 %v7655_v60, 0.0 }
 0x4df   : > { %7721 = vst.msk [vmem:[%s12560_s28 + $0xf8] sm:$0xff] %vm3418_vm14, %v7689_v42 }
 0x4e0   : > { %7719 = vst.msk [vmem:[%s12560_s28 + $0xe8] sm:$0xff] %vm3418_vm14, %v7687_v59 }
 0x4e1 PF: > { %s15_s18 = sadd.s32 1, %s8656_s18  }
 0x4e2   : > { %p12_p4 = scmp.ge.s32.totalorder %s15_s18, 4  }
 0x4e4   :  { %14 = sbr.rel (!%p12_p4) target bundleno = 1 (0x1), region = 74 }

</bundles_post_ra>
